<compile_context>
chip_gen: v6e
topology: v6e:2x2x1
jax: 0.10.0
libtpu: 0.0.40
codegen_flags: <defaults>
</compile_context>

<pallas_src>
import functools

import jax
import jax.numpy as jnp
from jax import lax
from jax.experimental import pallas as pl
from jax.experimental.pallas import tpu as pltpu


def _round_up(a, b):
    return ((a + b - 1) // b) * b


def _layer_norm(h, gamma, beta, eps=1e-5):
    mean = jnp.mean(h, axis=-1, keepdims=True)
    var = jnp.mean((h - mean) ** 2, axis=-1, keepdims=True)
    return (h - mean) * lax.rsqrt(var + eps) * gamma + beta


# ----------------------------------------------------------------------------
# Parameter packing: all weights -> w_pack, all bias/LN vectors -> v_pack.
# Row offsets are 8-aligned so every in-kernel ref slice starts on a sublane
# tile boundary. Encoder first-layer weights (node_in/edge_in rows, not
# 8-aligned) and the lane-padded decoder final layer stay separate inputs.
# ----------------------------------------------------------------------------
def pack_params(params):
    latent = int(params["enc_node"]["ws"][-1].shape[1])
    hidden = int(params["enc_node"]["ws"][0].shape[1])
    PW = max(latent, hidden)

    w_chunks, w_slots = [], []   # slot = (row_offset, nrows, ncols)
    v_chunks, v_slots = [], []   # slot = (row_offset, ncols)
    wrow = [0]

    def addw(w):
        r, c = int(w.shape[0]), int(w.shape[1])
        assert r % 8 == 0, "packed weight rows must be sublane aligned"
        w_chunks.append(jnp.pad(jnp.asarray(w, jnp.float32), ((0, 0), (0, PW - c))))
        w_slots.append((wrow[0], r, c))
        wrow[0] += r
        return len(w_slots) - 1

    def addv(v):
        v = jnp.asarray(v, jnp.float32).reshape(1, -1)
        c = int(v.shape[1])
        v_chunks.append(jnp.pad(v, ((0, 7), (0, PW - c))))   # own 8-row block
        off = 8 * len(v_slots)
        v_slots.append((off, c))
        return len(v_slots) - 1

    def pack_block(blk, skip_first_w=False, skip_last=False):
        ws, bs = blk["ws"], blk["bs"]
        if skip_last:
            ws, bs = ws[:-1], bs[:-1]
        entry = {
            "w": [None if (skip_first_w and i == 0) else addw(w)
                  for i, w in enumerate(ws)],
            "b": [addv(b) for b in bs],
            "ln": None,
        }
        if blk.get("ln") is not None:
            entry["ln"] = (addv(blk["ln"][0]), addv(blk["ln"][1]))
        return entry

    layout = {
        "enc_node": pack_block(params["enc_node"], skip_first_w=True),
        "enc_edge": pack_block(params["enc_edge"], skip_first_w=True),
        "proc": [{"edge": pack_block(st["edge"]), "node": pack_block(st["node"])}
                 for st in params["proc"]],
        "dec": pack_block(params["dec"], skip_last=True),
    }

    w_pack = jnp.concatenate(w_chunks, axis=0)
    v_pack = jnp.concatenate(v_chunks, axis=0)

    dec_w_last = jnp.asarray(params["dec"]["ws"][-1], jnp.float32)
    dec_b_last = jnp.asarray(params["dec"]["bs"][-1], jnp.float32)
    node_out = int(dec_w_last.shape[1])
    opad = _round_up(node_out, 128)   # lane-dense final store
    w_dec_last = jnp.pad(dec_w_last, ((0, 0), (0, opad - node_out)))
    b_dec_last = jnp.pad(dec_b_last.reshape(1, -1), ((0, 0), (0, opad - node_out)))

    packed = {
        "w_enc_node0": jnp.asarray(params["enc_node"]["ws"][0], jnp.float32),
        "w_enc_edge0": jnp.asarray(params["enc_edge"]["ws"][0], jnp.float32),
        "w_pack": w_pack,
        "v_pack": v_pack,
        "w_dec_last": w_dec_last,
        "b_dec_last": b_dec_last,
    }
    meta = {"layout": layout, "w_slots": tuple(w_slots), "v_slots": tuple(v_slots),
            "latent": latent, "hidden": hidden, "node_out": node_out, "opad": opad}
    return packed, meta


# ----------------------------------------------------------------------------
# Fused Encode-Process-Decode kernel (single grid step, everything in VMEM).
# ----------------------------------------------------------------------------
def _epd_kernel(meta, n_steps,
                send_col_ref, recv_col_ref, recv_row_ref, x_ref, e_ref,
                w_enc_node0_ref, w_enc_edge0_ref, w_pack_ref, v_pack_ref,
                w_dec_last_ref, b_dec_last_ref, out_ref):
    layout, w_slots, v_slots = meta["layout"], meta["w_slots"], meta["v_slots"]
    L = meta["latent"]

    def W(i):                      # full packed weight (static ref slice -> load)
        ro, nr, nc = w_slots[i]
        return w_pack_ref[ro:ro + nr, :nc]

    def Wpart(i, r0, r1):          # row sub-range of a packed weight
        ro, _nr, nc = w_slots[i]
        return w_pack_ref[ro + r0:ro + r1, :nc]

    def V(i):                      # (1, c) bias / LN vector
        ro, nc = v_slots[i]
        return v_pack_ref[ro:ro + 1, :nc]

    def block(entry, first_w=None):
        ws = [first_w if s is None else W(s) for s in entry["w"]]
        bs = [V(s) for s in entry["b"]]
        ln = None if entry["ln"] is None else (V(entry["ln"][0]), V(entry["ln"][1]))
        return ws, bs, ln

    def mlp(h, ws, bs, ln):
        for i, (w, b) in enumerate(zip(ws, bs)):
            h = jnp.dot(h, w, preferred_element_type=jnp.float32) + b
            if i < len(ws) - 1:
                h = jnp.maximum(h, 0.0)
        if ln is not None:
            h = _layer_norm(h, ln[0], ln[1])
        return h

    x = x_ref[...].astype(jnp.float32)          # (N, node_in)
    e = e_ref[...].astype(jnp.float32)          # (E, edge_in)
    N = x.shape[0]
    E = e.shape[0]

    # ---------------- Encoder: node / edge MLP + LayerNorm --------------------
    ws, bs, ln = block(layout["enc_node"], first_w=w_enc_node0_ref[...])
    xl = mlp(x, ws, bs, ln)                     # (N, L)
    ws, bs, ln = block(layout["enc_edge"], first_w=w_enc_edge0_ref[...])
    el = mlp(e, ws, bs, ln)                     # (E, L)

    # --------- one-hot gather / scatter matrices, built ONCE, reused ----------
    col_ids = lax.broadcasted_iota(jnp.int32, (E, N), 1)
    g_i = (col_ids == recv_col_ref[...]).astype(jnp.float32)   # x_i = x[receivers]
    g_j = (col_ids == send_col_ref[...]).astype(jnp.float32)   # x_j = x[senders]
    row_ids = lax.broadcasted_iota(jnp.int32, (N, E), 0)
    scat = (row_ids == recv_row_ref[...]).astype(jnp.float32)  # == g_i^T (scatter-add)

    # ---------------- Processor: message-passing steps, VMEM-resident ---------
    for s in range(n_steps):
        e_ent = layout["proc"][s]["edge"]
        n_ent = layout["proc"][s]["node"]

        # Edge MLP first Linear over cat([x_i, x_j, e]): hoist the O(N) node
        # projections, then gather with one MXU matmul per edge type (no concat,
        # no per-edge projection flops).
        p_i = jnp.dot(xl, Wpart(e_ent["w"][0], 0, L),
                      preferred_element_type=jnp.float32)            # (N, H)
        p_j = jnp.dot(xl, Wpart(e_ent["w"][0], L, 2 * L),
                      preferred_element_type=jnp.float32)            # (N, H)
        h = (jnp.dot(g_i, p_i, preferred_element_type=jnp.float32)
             + jnp.dot(g_j, p_j, preferred_element_type=jnp.float32)
             + jnp.dot(el, Wpart(e_ent["w"][0], 2 * L, 3 * L),
                       preferred_element_type=jnp.float32)
             + V(e_ent["b"][0]))
        for li in range(1, len(e_ent["w"])):
            h = jnp.maximum(h, 0.0)
            h = jnp.dot(h, W(e_ent["w"][li]),
                        preferred_element_type=jnp.float32) + V(e_ent["b"][li])
        msg = _layer_norm(h, V(e_ent["ln"][0]), V(e_ent["ln"][1]))   # (E, L)

        # Scatter-add messages onto receivers (reused one-hot transpose).
        agg = jnp.dot(scat, msg, preferred_element_type=jnp.float32)  # (N, L)

        # Node MLP first Linear over cat([agg, x]) via split weights.
        hn = (jnp.dot(agg, Wpart(n_ent["w"][0], 0, L),
                      preferred_element_type=jnp.float32)
              + jnp.dot(xl, Wpart(n_ent["w"][0], L, 2 * L),
                        preferred_element_type=jnp.float32)
              + V(n_ent["b"][0]))
        for li in range(1, len(n_ent["w"])):
            hn = jnp.maximum(hn, 0.0)
            hn = jnp.dot(hn, W(n_ent["w"][li]),
                         preferred_element_type=jnp.float32) + V(n_ent["b"][li])
        hn = _layer_norm(hn, V(n_ent["ln"][0]), V(n_ent["ln"][1]))

        xl = hn + xl        # node residual
        # PyG semantics: update() returns the ORIGINAL e_features, so the edge
        # residual simply doubles it each step. Kept as a VMEM-local value; it
        # only feeds the next step's edge MLP and is never written to HBM.
        el = el * 2.0

    # ---------------- Decoder (no LayerNorm), lane-dense padded store ---------
    d_ws, d_bs, _ = block(layout["dec"])
    h = xl
    for li in range(len(d_ws)):
        h = jnp.maximum(jnp.dot(h, d_ws[li], preferred_element_type=jnp.float32)
                        + d_bs[li], 0.0)
    out = (jnp.dot(h, w_dec_last_ref[...], preferred_element_type=jnp.float32)
           + b_dec_last_ref[...])
    out_ref[...] = out.astype(out_ref.dtype)


# ----------------------------------------------------------------------------
# Wrapper: pack params, build specs, single pallas_call.
# ----------------------------------------------------------------------------
def encode_process_decode(x, edge_index, e_features, params):
    N, node_in = x.shape
    E, edge_in = e_features.shape
    steps = len(params["proc"])
    layers = len(params["enc_node"]["ws"]) - 1

    packed, meta = pack_params(params)
    L, H = meta["latent"], meta["hidden"]
    node_out, opad = meta["node_out"], meta["opad"]

    send_col = edge_index[0].reshape(E, 1).astype(jnp.int32)   # x_j = x[senders]
    recv_col = edge_index[1].reshape(E, 1).astype(jnp.int32)   # x_i = x[receivers]
    recv_row = edge_index[1].reshape(1, E).astype(jnp.int32)   # scatter target

    args = [send_col, recv_col, recv_row,
            x.astype(jnp.float32), e_features.astype(jnp.float32),
            packed["w_enc_node0"], packed["w_enc_edge0"],
            packed["w_pack"], packed["v_pack"],
            packed["w_dec_last"], packed["b_dec_last"]]

    def full_spec(a):
        nd = a.ndim
        return pl.BlockSpec(a.shape, lambda i, _nd=nd: (0,) * _nd)

    in_specs = [full_spec(a) for a in args]

    # Advisory cost estimate.
    def mm(rows, dims):
        return 2 * rows * sum(dims[i] * dims[i + 1] for i in range(len(dims) - 1))

    enc_flops = (mm(N, [node_in] + [H] * layers + [L])
                 + mm(E, [edge_in] + [H] * layers + [L]))
    step_flops = (2 * N * (2 * L) * H                 # hoisted projections
                  + 2 * E * N * (2 * H + L)           # gathers + scatter (one-hot MXU)
                  + mm(E, [L] + [H] * layers + [L])   # e-path + remaining edge layers
                  + mm(N, [2 * L] + [H] * layers + [L]))
    dec_flops = mm(N, [L] + [H] * layers + [opad])
    cost = pl.CostEstimate(
        flops=int(enc_flops + steps * step_flops + dec_flops),
        transcendentals=int((steps + 1) * (N + E)),
        bytes_accessed=int(4 * (sum(int(a.size) for a in args) + N * opad)))

    kernel = functools.partial(_epd_kernel, meta, steps)
    out = pl.pallas_call(
        kernel,
        out_shape=jax.ShapeDtypeStruct((N, opad), jnp.float32),
        grid=(1,),
        in_specs=in_specs,
        out_specs=pl.BlockSpec((N, opad), lambda i: (0, 0)),
        compiler_params=pltpu.CompilerParams(
            dimension_semantics=("arbitrary",),
            # Explicit, modest budget: working set is ~2 MiB — safely within
            # v5e/v6e/v7x scoped limits.
            vmem_limit_bytes=32 * 1024 * 1024),
        cost_estimate=cost,
    )(*args)
    return out[:, :node_out]


# ----------------------------------------------------------------------------
# Parameter construction (deterministic, PyTorch-default-style init)
# ----------------------------------------------------------------------------
def _init_linear(key, fan_in, fan_out):
    k1, k2 = jax.random.split(key)
    bound = 1.0 / float(fan_in) ** 0.5
    w = jax.random.uniform(k1, (fan_in, fan_out), jnp.float32, -bound, bound)
    b = jax.random.uniform(k2, (fan_out,), jnp.float32, -bound, bound)
    return w, b


def _init_mlp(key, in_dim, hidden, num_layers, out_dim):
    sizes = [in_dim] + [hidden] * num_layers + [out_dim]
    ws, bs = [], []
    for i in range(len(sizes) - 1):
        key, sub = jax.random.split(key)
        w, b = _init_linear(sub, sizes[i], sizes[i + 1])
        ws.append(w)
        bs.append(b)
    return ws, bs


def init_params(key, node_in, edge_in, latent, node_out, hidden, layers, steps):
    def mlp_block(k, din, dout, with_ln):
        ws, bs = _init_mlp(k, din, hidden, layers, dout)
        ln = (jnp.ones((dout,), jnp.float32), jnp.zeros((dout,), jnp.float32)) if with_ln else None
        return {"ws": ws, "bs": bs, "ln": ln}

    keys = jax.random.split(key, 3 + 2 * steps)
    params = {
        "enc_node": mlp_block(keys[0], node_in, latent, True),
        "enc_edge": mlp_block(keys[1], edge_in, latent, True),
        "proc": [],
        "dec": mlp_block(keys[2], latent, node_out, False),
    }
    for s in range(steps):
        params["proc"].append({
            # edge_fn input: cat([x_i, x_j, e]) = 3 * latent
            "edge": mlp_block(keys[3 + 2 * s], 3 * latent, latent, True),
            # node_fn input: cat([aggregated, x]) = 2 * latent
            "node": mlp_block(keys[4 + 2 * s], 2 * latent, latent, True),
        })
    return params


# ----------------------------------------------------------------------------
# Pure-JAX reference (for correctness check)
# ----------------------------------------------------------------------------
def _mlp_ref(x, ws, bs, ln=None):
    h = x
    for i, (w, b) in enumerate(zip(ws, bs)):
        h = jnp.dot(h, w, precision=lax.Precision.HIGHEST) + b
        if i < len(ws) - 1:
            h = jnp.maximum(h, 0.0)
    if ln is not None:
        g, bt = ln
        m = jnp.mean(h, -1, keepdims=True)
        v = jnp.mean((h - m) ** 2, -1, keepdims=True)
        h = (h - m) / jnp.sqrt(v + 1e-5) * g + bt
    return h


def _forward_ref(x, edge_index, e_features, params):
    senders, receivers = edge_index[0], edge_index[1]
    n = x.shape[0]
    xl = _mlp_ref(x, params["enc_node"]["ws"], params["enc_node"]["bs"], params["enc_node"]["ln"])
    el = _mlp_ref(e_features, params["enc_edge"]["ws"], params["enc_edge"]["bs"], params["enc_edge"]["ln"])
    for step in params["proc"]:
        x_res, e_res = xl, el
        edge_inp = jnp.concatenate([xl[receivers], xl[senders], el], axis=-1)
        msg = _mlp_ref(edge_inp, step["edge"]["ws"], step["edge"]["bs"], step["edge"]["ln"])
        agg = jax.ops.segment_sum(msg, receivers, num_segments=n)
        node_inp = jnp.concatenate([agg, xl], axis=-1)
        x_new = _mlp_ref(node_inp, step["node"]["ws"], step["node"]["bs"], step["node"]["ln"])
        xl = x_new + x_res
        el = el + e_res   # PyG semantics: edge features simply double
    return _mlp_ref(xl, params["dec"]["ws"], params["dec"]["bs"], None)


if __name__ == "__main__":
    # Small shapes consistent with the module's forward.
    node_in, edge_in, latent_dim, node_out = 12, 4, 32, 3
    num_message_passing_steps, mlp_num_layers, mlp_hidden_dim = 2, 2, 32
    N, E = 128, 256

    key = jax.random.PRNGKey(0)
    kx, ke, ki, kp = jax.random.split(key, 4)
    x = jax.random.normal(kx, (N, node_in), jnp.float32)
    e_features = jax.random.normal(ke, (E, edge_in), jnp.float32)
    edge_index = jax.random.randint(ki, (2, E), 0, N, dtype=jnp.int32)

    params = init_params(kp, node_in, edge_in, latent_dim, node_out,
                         mlp_hidden_dim, mlp_num_layers, num_message_passing_steps)

    fwd = jax.jit(encode_process_decode)
    out = fwd(x, edge_index, e_features, params)
    out = jax.block_until_ready(out)
    assert out.shape == (N, node_out)

    ref = jax.block_until_ready(_forward_ref(x, edge_index, e_features, params))
    max_err = float(jnp.max(jnp.abs(out - ref)))
    assert max_err < 1e-2, f"mismatch vs reference: {max_err}"

    print("KERNEL_OK")
</pallas_src>

<mosaic_0001>
module attributes {stable_mosaic.version = 11 : i64} {
  func.func @_epd_kernel(%arg0: i32, %arg1: memref<256x1xi32, #tpu.memory_space<vmem>>, %arg2: memref<256x1xi32, #tpu.memory_space<vmem>>, %arg3: memref<1x256xi32, #tpu.memory_space<vmem>>, %arg4: memref<128x12xf32, #tpu.memory_space<vmem>>, %arg5: memref<256x4xf32, #tpu.memory_space<vmem>>, %arg6: memref<12x32xf32, #tpu.memory_space<vmem>>, %arg7: memref<4x32xf32, #tpu.memory_space<vmem>>, %arg8: memref<768x32xf32, #tpu.memory_space<vmem>>, %arg9: memref<256x32xf32, #tpu.memory_space<vmem>>, %arg10: memref<32x128xf32, #tpu.memory_space<vmem>>, %arg11: memref<1x128xf32, #tpu.memory_space<vmem>>, %arg12: memref<128x128xf32, #tpu.memory_space<vmem>>) attributes {dimension_semantics = [#tpu.dimension_semantics<arbitrary>], iteration_bounds = array<i64: 1>, scalar_prefetch = 0 : i64, scratch_operands = 0 : i64, tpu.core_type = #tpu.core_type<tc>, window_params = [{pipeline_mode = #tpu.pipeline_mode<synchronous>, transform_indices = @transform_0, window_bounds = array<i64: 256, 1>}, {pipeline_mode = #tpu.pipeline_mode<synchronous>, transform_indices = @transform_1, window_bounds = array<i64: 256, 1>}, {pipeline_mode = #tpu.pipeline_mode<synchronous>, transform_indices = @transform_2, window_bounds = array<i64: 1, 256>}, {pipeline_mode = #tpu.pipeline_mode<synchronous>, transform_indices = @transform_3, window_bounds = array<i64: 128, 12>}, {pipeline_mode = #tpu.pipeline_mode<synchronous>, transform_indices = @transform_4, window_bounds = array<i64: 256, 4>}, {pipeline_mode = #tpu.pipeline_mode<synchronous>, transform_indices = @transform_5, window_bounds = array<i64: 12, 32>}, {pipeline_mode = #tpu.pipeline_mode<synchronous>, transform_indices = @transform_6, window_bounds = array<i64: 4, 32>}, {pipeline_mode = #tpu.pipeline_mode<synchronous>, transform_indices = @transform_7, window_bounds = array<i64: 768, 32>}, {pipeline_mode = #tpu.pipeline_mode<synchronous>, transform_indices = @transform_8, window_bounds = array<i64: 256, 32>}, {pipeline_mode = #tpu.pipeline_mode<synchronous>, transform_indices = @transform_9, window_bounds = array<i64: 32, 128>}, {pipeline_mode = #tpu.pipeline_mode<synchronous>, transform_indices = @transform_10, window_bounds = array<i64: 1, 128>}, {pipeline_mode = #tpu.pipeline_mode<synchronous>, transform_indices = @transform_11, window_bounds = array<i64: 128, 128>}]} {
    %c0 = arith.constant 0 : index
    %c0_0 = arith.constant 0 : index
    %0 = vector.load %arg4[%c0, %c0_0] : memref<128x12xf32, #tpu.memory_space<vmem>>, vector<128x12xf32>
    %c0_1 = arith.constant 0 : index
    %c0_2 = arith.constant 0 : index
    %1 = vector.load %arg5[%c0_1, %c0_2] : memref<256x4xf32, #tpu.memory_space<vmem>>, vector<256x4xf32>
    %c0_3 = arith.constant 0 : index
    %c0_4 = arith.constant 0 : index
    %2 = vector.load %arg6[%c0_3, %c0_4] : memref<12x32xf32, #tpu.memory_space<vmem>>, vector<12x32xf32>
    %c0_5 = arith.constant 0 : index
    %c0_6 = arith.constant 0 : index
    %3 = vector.load %arg8[%c0_5, %c0_6] : memref<768x32xf32, #tpu.memory_space<vmem>>, vector<32x32xf32>
    %c32 = arith.constant 32 : index
    %c0_7 = arith.constant 0 : index
    %4 = vector.load %arg8[%c32, %c0_7] : memref<768x32xf32, #tpu.memory_space<vmem>>, vector<32x32xf32>
    %c0_8 = arith.constant 0 : index
    %c0_9 = arith.constant 0 : index
    %5 = vector.load %arg9[%c0_8, %c0_9] : memref<256x32xf32, #tpu.memory_space<vmem>>, vector<1x32xf32>
    %c8 = arith.constant 8 : index
    %c0_10 = arith.constant 0 : index
    %6 = vector.load %arg9[%c8, %c0_10] : memref<256x32xf32, #tpu.memory_space<vmem>>, vector<1x32xf32>
    %c16 = arith.constant 16 : index
    %c0_11 = arith.constant 0 : index
    %7 = vector.load %arg9[%c16, %c0_11] : memref<256x32xf32, #tpu.memory_space<vmem>>, vector<1x32xf32>
    %c24 = arith.constant 24 : index
    %c0_12 = arith.constant 0 : index
    %8 = vector.load %arg9[%c24, %c0_12] : memref<256x32xf32, #tpu.memory_space<vmem>>, vector<1x32xf32>
    %c32_13 = arith.constant 32 : index
    %c0_14 = arith.constant 0 : index
    %9 = vector.load %arg9[%c32_13, %c0_14] : memref<256x32xf32, #tpu.memory_space<vmem>>, vector<1x32xf32>
    %cst = arith.constant dense<0.000000e+00> : vector<128x32xf32>
    %10 = tpu.matmul %0, %2, %cst {dimension_numbers = #tpu.dot_dimension_numbers<[1], [0], [0], [1], [0, 0, 1, 1], [], []>} : vector<128x12xf32>, vector<12x32xf32>, vector<128x32xf32> -> vector<128x32xf32>
    %11 = vector.broadcast %5 : vector<1x32xf32> to vector<128x32xf32>
    %12 = arith.addf %10, %11 : vector<128x32xf32>
    %cst_15 = arith.constant 0.000000e+00 : f32
    %13 = vector.broadcast %cst_15 : f32 to vector<128x32xf32>
    %14 = arith.maximumf %12, %13 : vector<128x32xf32>
    %cst_16 = arith.constant dense<0.000000e+00> : vector<128x32xf32>
    %15 = tpu.matmul %14, %3, %cst_16 {dimension_numbers = #tpu.dot_dimension_numbers<[1], [0], [0], [1], [0, 0, 1, 1], [], []>} : vector<128x32xf32>, vector<32x32xf32>, vector<128x32xf32> -> vector<128x32xf32>
    %16 = vector.broadcast %6 : vector<1x32xf32> to vector<128x32xf32>
    %17 = arith.addf %15, %16 : vector<128x32xf32>
    %cst_17 = arith.constant 0.000000e+00 : f32
    %18 = vector.broadcast %cst_17 : f32 to vector<128x32xf32>
    %19 = arith.maximumf %17, %18 : vector<128x32xf32>
    %cst_18 = arith.constant dense<0.000000e+00> : vector<128x32xf32>
    %20 = tpu.matmul %19, %4, %cst_18 {dimension_numbers = #tpu.dot_dimension_numbers<[1], [0], [0], [1], [0, 0, 1, 1], [], []>} : vector<128x32xf32>, vector<32x32xf32>, vector<128x32xf32> -> vector<128x32xf32>
    %21 = vector.broadcast %7 : vector<1x32xf32> to vector<128x32xf32>
    %22 = arith.addf %20, %21 : vector<128x32xf32>
    %cst_19 = arith.constant dense<0.000000e+00> : vector<128xf32>
    %23 = vector.multi_reduction <add>, %22, %cst_19 [1] : vector<128x32xf32> to vector<128xf32>
    %24 = vector.shape_cast %23 : vector<128xf32> to vector<128x1xf32>
    %cst_20 = arith.constant 3.200000e+01 : f32
    %25 = vector.broadcast %cst_20 : f32 to vector<128x1xf32>
    %26 = arith.divf %24, %25 : vector<128x1xf32>
    %27 = vector.broadcast %26 : vector<128x1xf32> to vector<128x32xf32>
    %28 = arith.subf %22, %27 : vector<128x32xf32>
    %29 = arith.mulf %28, %28 : vector<128x32xf32>
    %cst_21 = arith.constant dense<0.000000e+00> : vector<128xf32>
    %30 = vector.multi_reduction <add>, %29, %cst_21 [1] : vector<128x32xf32> to vector<128xf32>
    %31 = vector.shape_cast %30 : vector<128xf32> to vector<128x1xf32>
    %cst_22 = arith.constant 3.200000e+01 : f32
    %32 = vector.broadcast %cst_22 : f32 to vector<128x1xf32>
    %33 = arith.divf %31, %32 : vector<128x1xf32>
    %34 = vector.broadcast %26 : vector<128x1xf32> to vector<128x32xf32>
    %35 = arith.subf %22, %34 : vector<128x32xf32>
    %cst_23 = arith.constant 9.99999974E-6 : f32
    %36 = vector.broadcast %cst_23 : f32 to vector<128x1xf32>
    %37 = arith.addf %33, %36 : vector<128x1xf32>
    %38 = math.rsqrt %37 : vector<128x1xf32>
    %39 = vector.broadcast %38 : vector<128x1xf32> to vector<128x32xf32>
    %40 = arith.mulf %35, %39 : vector<128x32xf32>
    %41 = vector.broadcast %8 : vector<1x32xf32> to vector<128x32xf32>
    %42 = arith.mulf %40, %41 : vector<128x32xf32>
    %43 = vector.broadcast %9 : vector<1x32xf32> to vector<128x32xf32>
    %44 = arith.addf %42, %43 : vector<128x32xf32>
    %c0_24 = arith.constant 0 : index
    %c0_25 = arith.constant 0 : index
    %45 = vector.load %arg7[%c0_24, %c0_25] : memref<4x32xf32, #tpu.memory_space<vmem>>, vector<4x32xf32>
    %c64 = arith.constant 64 : index
    %c0_26 = arith.constant 0 : index
    %46 = vector.load %arg8[%c64, %c0_26] : memref<768x32xf32, #tpu.memory_space<vmem>>, vector<32x32xf32>
    %c96 = arith.constant 96 : index
    %c0_27 = arith.constant 0 : index
    %47 = vector.load %arg8[%c96, %c0_27] : memref<768x32xf32, #tpu.memory_space<vmem>>, vector<32x32xf32>
    %c40 = arith.constant 40 : index
    %c0_28 = arith.constant 0 : index
    %48 = vector.load %arg9[%c40, %c0_28] : memref<256x32xf32, #tpu.memory_space<vmem>>, vector<1x32xf32>
    %c48 = arith.constant 48 : index
    %c0_29 = arith.constant 0 : index
    %49 = vector.load %arg9[%c48, %c0_29] : memref<256x32xf32, #tpu.memory_space<vmem>>, vector<1x32xf32>
    %c56 = arith.constant 56 : index
    %c0_30 = arith.constant 0 : index
    %50 = vector.load %arg9[%c56, %c0_30] : memref<256x32xf32, #tpu.memory_space<vmem>>, vector<1x32xf32>
    %c64_31 = arith.constant 64 : index
    %c0_32 = arith.constant 0 : index
    %51 = vector.load %arg9[%c64_31, %c0_32] : memref<256x32xf32, #tpu.memory_space<vmem>>, vector<1x32xf32>
    %c72 = arith.constant 72 : index
    %c0_33 = arith.constant 0 : index
    %52 = vector.load %arg9[%c72, %c0_33] : memref<256x32xf32, #tpu.memory_space<vmem>>, vector<1x32xf32>
    %cst_34 = arith.constant dense<0.000000e+00> : vector<256x32xf32>
    %53 = tpu.matmul %1, %45, %cst_34 {dimension_numbers = #tpu.dot_dimension_numbers<[1], [0], [0], [1], [0, 0, 1, 1], [], []>} : vector<256x4xf32>, vector<4x32xf32>, vector<256x32xf32> -> vector<256x32xf32>
    %54 = vector.broadcast %48 : vector<1x32xf32> to vector<256x32xf32>
    %55 = arith.addf %53, %54 : vector<256x32xf32>
    %cst_35 = arith.constant 0.000000e+00 : f32
    %56 = vector.broadcast %cst_35 : f32 to vector<256x32xf32>
    %57 = arith.maximumf %55, %56 : vector<256x32xf32>
    %cst_36 = arith.constant dense<0.000000e+00> : vector<256x32xf32>
    %58 = tpu.matmul %57, %46, %cst_36 {dimension_numbers = #tpu.dot_dimension_numbers<[1], [0], [0], [1], [0, 0, 1, 1], [], []>} : vector<256x32xf32>, vector<32x32xf32>, vector<256x32xf32> -> vector<256x32xf32>
    %59 = vector.broadcast %49 : vector<1x32xf32> to vector<256x32xf32>
    %60 = arith.addf %58, %59 : vector<256x32xf32>
    %cst_37 = arith.constant 0.000000e+00 : f32
    %61 = vector.broadcast %cst_37 : f32 to vector<256x32xf32>
    %62 = arith.maximumf %60, %61 : vector<256x32xf32>
    %cst_38 = arith.constant dense<0.000000e+00> : vector<256x32xf32>
    %63 = tpu.matmul %62, %47, %cst_38 {dimension_numbers = #tpu.dot_dimension_numbers<[1], [0], [0], [1], [0, 0, 1, 1], [], []>} : vector<256x32xf32>, vector<32x32xf32>, vector<256x32xf32> -> vector<256x32xf32>
    %64 = vector.broadcast %50 : vector<1x32xf32> to vector<256x32xf32>
    %65 = arith.addf %63, %64 : vector<256x32xf32>
    %cst_39 = arith.constant dense<0.000000e+00> : vector<256xf32>
    %66 = vector.multi_reduction <add>, %65, %cst_39 [1] : vector<256x32xf32> to vector<256xf32>
    %67 = vector.shape_cast %66 : vector<256xf32> to vector<256x1xf32>
    %cst_40 = arith.constant 3.200000e+01 : f32
    %68 = vector.broadcast %cst_40 : f32 to vector<256x1xf32>
    %69 = arith.divf %67, %68 : vector<256x1xf32>
    %70 = vector.broadcast %69 : vector<256x1xf32> to vector<256x32xf32>
    %71 = arith.subf %65, %70 : vector<256x32xf32>
    %72 = arith.mulf %71, %71 : vector<256x32xf32>
    %cst_41 = arith.constant dense<0.000000e+00> : vector<256xf32>
    %73 = vector.multi_reduction <add>, %72, %cst_41 [1] : vector<256x32xf32> to vector<256xf32>
    %74 = vector.shape_cast %73 : vector<256xf32> to vector<256x1xf32>
    %cst_42 = arith.constant 3.200000e+01 : f32
    %75 = vector.broadcast %cst_42 : f32 to vector<256x1xf32>
    %76 = arith.divf %74, %75 : vector<256x1xf32>
    %77 = vector.broadcast %69 : vector<256x1xf32> to vector<256x32xf32>
    %78 = arith.subf %65, %77 : vector<256x32xf32>
    %cst_43 = arith.constant 9.99999974E-6 : f32
    %79 = vector.broadcast %cst_43 : f32 to vector<256x1xf32>
    %80 = arith.addf %76, %79 : vector<256x1xf32>
    %81 = math.rsqrt %80 : vector<256x1xf32>
    %82 = vector.broadcast %81 : vector<256x1xf32> to vector<256x32xf32>
    %83 = arith.mulf %78, %82 : vector<256x32xf32>
    %84 = vector.broadcast %51 : vector<1x32xf32> to vector<256x32xf32>
    %85 = arith.mulf %83, %84 : vector<256x32xf32>
    %86 = vector.broadcast %52 : vector<1x32xf32> to vector<256x32xf32>
    %87 = arith.addf %85, %86 : vector<256x32xf32>
    %88 = tpu.iota {dimensions = array<i32: 1>} : vector<256x128xi32>
    %c0_44 = arith.constant 0 : index
    %c0_45 = arith.constant 0 : index
    %89 = vector.load %arg2[%c0_44, %c0_45] : memref<256x1xi32, #tpu.memory_space<vmem>>, vector<256x1xi32>
    %90 = vector.broadcast %89 : vector<256x1xi32> to vector<256x128xi32>
    %91 = arith.cmpi eq, %88, %90 : vector<256x128xi32>
    %92 = arith.extui %91 : vector<256x128xi1> to vector<256x128xi32>
    %93 = arith.sitofp %92 : vector<256x128xi32> to vector<256x128xf32>
    %c0_46 = arith.constant 0 : index
    %c0_47 = arith.constant 0 : index
    %94 = vector.load %arg1[%c0_46, %c0_47] : memref<256x1xi32, #tpu.memory_space<vmem>>, vector<256x1xi32>
    %95 = vector.broadcast %94 : vector<256x1xi32> to vector<256x128xi32>
    %96 = arith.cmpi eq, %88, %95 : vector<256x128xi32>
    %97 = arith.extui %96 : vector<256x128xi1> to vector<256x128xi32>
    %98 = arith.sitofp %97 : vector<256x128xi32> to vector<256x128xf32>
    %99 = tpu.iota {dimensions = array<i32: 0>} : vector<128x256xi32>
    %c0_48 = arith.constant 0 : index
    %c0_49 = arith.constant 0 : index
    %100 = vector.load %arg3[%c0_48, %c0_49] : memref<1x256xi32, #tpu.memory_space<vmem>>, vector<1x256xi32>
    %101 = vector.broadcast %100 : vector<1x256xi32> to vector<128x256xi32>
    %102 = arith.cmpi eq, %99, %101 : vector<128x256xi32>
    %103 = arith.extui %102 : vector<128x256xi1> to vector<128x256xi32>
    %104 = arith.sitofp %103 : vector<128x256xi32> to vector<128x256xf32>
    %c128 = arith.constant 128 : index
    %c0_50 = arith.constant 0 : index
    %105 = vector.load %arg8[%c128, %c0_50] : memref<768x32xf32, #tpu.memory_space<vmem>>, vector<32x32xf32>
    %cst_51 = arith.constant dense<0.000000e+00> : vector<128x32xf32>
    %106 = tpu.matmul %44, %105, %cst_51 {dimension_numbers = #tpu.dot_dimension_numbers<[1], [0], [0], [1], [0, 0, 1, 1], [], []>} : vector<128x32xf32>, vector<32x32xf32>, vector<128x32xf32> -> vector<128x32xf32>
    %c160 = arith.constant 160 : index
    %c0_52 = arith.constant 0 : index
    %107 = vector.load %arg8[%c160, %c0_52] : memref<768x32xf32, #tpu.memory_space<vmem>>, vector<32x32xf32>
    %cst_53 = arith.constant dense<0.000000e+00> : vector<128x32xf32>
    %108 = tpu.matmul %44, %107, %cst_53 {dimension_numbers = #tpu.dot_dimension_numbers<[1], [0], [0], [1], [0, 0, 1, 1], [], []>} : vector<128x32xf32>, vector<32x32xf32>, vector<128x32xf32> -> vector<128x32xf32>
    %cst_54 = arith.constant dense<0.000000e+00> : vector<256x32xf32>
    %109 = tpu.matmul %93, %106, %cst_54 {dimension_numbers = #tpu.dot_dimension_numbers<[1], [0], [0], [1], [0, 0, 1, 1], [], []>} : vector<256x128xf32>, vector<128x32xf32>, vector<256x32xf32> -> vector<256x32xf32>
    %cst_55 = arith.constant dense<0.000000e+00> : vector<256x32xf32>
    %110 = tpu.matmul %98, %108, %cst_55 {dimension_numbers = #tpu.dot_dimension_numbers<[1], [0], [0], [1], [0, 0, 1, 1], [], []>} : vector<256x128xf32>, vector<128x32xf32>, vector<256x32xf32> -> vector<256x32xf32>
    %111 = arith.addf %109, %110 : vector<256x32xf32>
    %c192 = arith.constant 192 : index
    %c0_56 = arith.constant 0 : index
    %112 = vector.load %arg8[%c192, %c0_56] : memref<768x32xf32, #tpu.memory_space<vmem>>, vector<32x32xf32>
    %cst_57 = arith.constant dense<0.000000e+00> : vector<256x32xf32>
    %113 = tpu.matmul %87, %112, %cst_57 {dimension_numbers = #tpu.dot_dimension_numbers<[1], [0], [0], [1], [0, 0, 1, 1], [], []>} : vector<256x32xf32>, vector<32x32xf32>, vector<256x32xf32> -> vector<256x32xf32>
    %114 = arith.addf %111, %113 : vector<256x32xf32>
    %c80 = arith.constant 80 : index
    %c0_58 = arith.constant 0 : index
    %115 = vector.load %arg9[%c80, %c0_58] : memref<256x32xf32, #tpu.memory_space<vmem>>, vector<1x32xf32>
    %116 = vector.broadcast %115 : vector<1x32xf32> to vector<256x32xf32>
    %117 = arith.addf %114, %116 : vector<256x32xf32>
    %cst_59 = arith.constant 0.000000e+00 : f32
    %118 = vector.broadcast %cst_59 : f32 to vector<256x32xf32>
    %119 = arith.maximumf %117, %118 : vector<256x32xf32>
    %c224 = arith.constant 224 : index
    %c0_60 = arith.constant 0 : index
    %120 = vector.load %arg8[%c224, %c0_60] : memref<768x32xf32, #tpu.memory_space<vmem>>, vector<32x32xf32>
    %cst_61 = arith.constant dense<0.000000e+00> : vector<256x32xf32>
    %121 = tpu.matmul %119, %120, %cst_61 {dimension_numbers = #tpu.dot_dimension_numbers<[1], [0], [0], [1], [0, 0, 1, 1], [], []>} : vector<256x32xf32>, vector<32x32xf32>, vector<256x32xf32> -> vector<256x32xf32>
    %c88 = arith.constant 88 : index
    %c0_62 = arith.constant 0 : index
    %122 = vector.load %arg9[%c88, %c0_62] : memref<256x32xf32, #tpu.memory_space<vmem>>, vector<1x32xf32>
    %123 = vector.broadcast %122 : vector<1x32xf32> to vector<256x32xf32>
    %124 = arith.addf %121, %123 : vector<256x32xf32>
    %cst_63 = arith.constant 0.000000e+00 : f32
    %125 = vector.broadcast %cst_63 : f32 to vector<256x32xf32>
    %126 = arith.maximumf %124, %125 : vector<256x32xf32>
    %c256 = arith.constant 256 : index
    %c0_64 = arith.constant 0 : index
    %127 = vector.load %arg8[%c256, %c0_64] : memref<768x32xf32, #tpu.memory_space<vmem>>, vector<32x32xf32>
    %cst_65 = arith.constant dense<0.000000e+00> : vector<256x32xf32>
    %128 = tpu.matmul %126, %127, %cst_65 {dimension_numbers = #tpu.dot_dimension_numbers<[1], [0], [0], [1], [0, 0, 1, 1], [], []>} : vector<256x32xf32>, vector<32x32xf32>, vector<256x32xf32> -> vector<256x32xf32>
    %c96_66 = arith.constant 96 : index
    %c0_67 = arith.constant 0 : index
    %129 = vector.load %arg9[%c96_66, %c0_67] : memref<256x32xf32, #tpu.memory_space<vmem>>, vector<1x32xf32>
    %130 = vector.broadcast %129 : vector<1x32xf32> to vector<256x32xf32>
    %131 = arith.addf %128, %130 : vector<256x32xf32>
    %c104 = arith.constant 104 : index
    %c0_68 = arith.constant 0 : index
    %132 = vector.load %arg9[%c104, %c0_68] : memref<256x32xf32, #tpu.memory_space<vmem>>, vector<1x32xf32>
    %c112 = arith.constant 112 : index
    %c0_69 = arith.constant 0 : index
    %133 = vector.load %arg9[%c112, %c0_69] : memref<256x32xf32, #tpu.memory_space<vmem>>, vector<1x32xf32>
    %cst_70 = arith.constant dense<0.000000e+00> : vector<256xf32>
    %134 = vector.multi_reduction <add>, %131, %cst_70 [1] : vector<256x32xf32> to vector<256xf32>
    %135 = vector.shape_cast %134 : vector<256xf32> to vector<256x1xf32>
    %cst_71 = arith.constant 3.200000e+01 : f32
    %136 = vector.broadcast %cst_71 : f32 to vector<256x1xf32>
    %137 = arith.divf %135, %136 : vector<256x1xf32>
    %138 = vector.broadcast %137 : vector<256x1xf32> to vector<256x32xf32>
    %139 = arith.subf %131, %138 : vector<256x32xf32>
    %140 = arith.mulf %139, %139 : vector<256x32xf32>
    %cst_72 = arith.constant dense<0.000000e+00> : vector<256xf32>
    %141 = vector.multi_reduction <add>, %140, %cst_72 [1] : vector<256x32xf32> to vector<256xf32>
    %142 = vector.shape_cast %141 : vector<256xf32> to vector<256x1xf32>
    %cst_73 = arith.constant 3.200000e+01 : f32
    %143 = vector.broadcast %cst_73 : f32 to vector<256x1xf32>
    %144 = arith.divf %142, %143 : vector<256x1xf32>
    %145 = vector.broadcast %137 : vector<256x1xf32> to vector<256x32xf32>
    %146 = arith.subf %131, %145 : vector<256x32xf32>
    %cst_74 = arith.constant 9.99999974E-6 : f32
    %147 = vector.broadcast %cst_74 : f32 to vector<256x1xf32>
    %148 = arith.addf %144, %147 : vector<256x1xf32>
    %149 = math.rsqrt %148 : vector<256x1xf32>
    %150 = vector.broadcast %149 : vector<256x1xf32> to vector<256x32xf32>
    %151 = arith.mulf %146, %150 : vector<256x32xf32>
    %152 = vector.broadcast %132 : vector<1x32xf32> to vector<256x32xf32>
    %153 = arith.mulf %151, %152 : vector<256x32xf32>
    %154 = vector.broadcast %133 : vector<1x32xf32> to vector<256x32xf32>
    %155 = arith.addf %153, %154 : vector<256x32xf32>
    %cst_75 = arith.constant dense<0.000000e+00> : vector<128x32xf32>
    %156 = tpu.matmul %104, %155, %cst_75 {dimension_numbers = #tpu.dot_dimension_numbers<[1], [0], [0], [1], [0, 0, 1, 1], [], []>} : vector<128x256xf32>, vector<256x32xf32>, vector<128x32xf32> -> vector<128x32xf32>
    %c288 = arith.constant 288 : index
    %c0_76 = arith.constant 0 : index
    %157 = vector.load %arg8[%c288, %c0_76] : memref<768x32xf32, #tpu.memory_space<vmem>>, vector<32x32xf32>
    %cst_77 = arith.constant dense<0.000000e+00> : vector<128x32xf32>
    %158 = tpu.matmul %156, %157, %cst_77 {dimension_numbers = #tpu.dot_dimension_numbers<[1], [0], [0], [1], [0, 0, 1, 1], [], []>} : vector<128x32xf32>, vector<32x32xf32>, vector<128x32xf32> -> vector<128x32xf32>
    %c320 = arith.constant 320 : index
    %c0_78 = arith.constant 0 : index
    %159 = vector.load %arg8[%c320, %c0_78] : memref<768x32xf32, #tpu.memory_space<vmem>>, vector<32x32xf32>
    %cst_79 = arith.constant dense<0.000000e+00> : vector<128x32xf32>
    %160 = tpu.matmul %44, %159, %cst_79 {dimension_numbers = #tpu.dot_dimension_numbers<[1], [0], [0], [1], [0, 0, 1, 1], [], []>} : vector<128x32xf32>, vector<32x32xf32>, vector<128x32xf32> -> vector<128x32xf32>
    %161 = arith.addf %158, %160 : vector<128x32xf32>
    %c120 = arith.constant 120 : index
    %c0_80 = arith.constant 0 : index
    %162 = vector.load %arg9[%c120, %c0_80] : memref<256x32xf32, #tpu.memory_space<vmem>>, vector<1x32xf32>
    %163 = vector.broadcast %162 : vector<1x32xf32> to vector<128x32xf32>
    %164 = arith.addf %161, %163 : vector<128x32xf32>
    %cst_81 = arith.constant 0.000000e+00 : f32
    %165 = vector.broadcast %cst_81 : f32 to vector<128x32xf32>
    %166 = arith.maximumf %164, %165 : vector<128x32xf32>
    %c352 = arith.constant 352 : index
    %c0_82 = arith.constant 0 : index
    %167 = vector.load %arg8[%c352, %c0_82] : memref<768x32xf32, #tpu.memory_space<vmem>>, vector<32x32xf32>
    %cst_83 = arith.constant dense<0.000000e+00> : vector<128x32xf32>
    %168 = tpu.matmul %166, %167, %cst_83 {dimension_numbers = #tpu.dot_dimension_numbers<[1], [0], [0], [1], [0, 0, 1, 1], [], []>} : vector<128x32xf32>, vector<32x32xf32>, vector<128x32xf32> -> vector<128x32xf32>
    %c128_84 = arith.constant 128 : index
    %c0_85 = arith.constant 0 : index
    %169 = vector.load %arg9[%c128_84, %c0_85] : memref<256x32xf32, #tpu.memory_space<vmem>>, vector<1x32xf32>
    %170 = vector.broadcast %169 : vector<1x32xf32> to vector<128x32xf32>
    %171 = arith.addf %168, %170 : vector<128x32xf32>
    %cst_86 = arith.constant 0.000000e+00 : f32
    %172 = vector.broadcast %cst_86 : f32 to vector<128x32xf32>
    %173 = arith.maximumf %171, %172 : vector<128x32xf32>
    %c384 = arith.constant 384 : index
    %c0_87 = arith.constant 0 : index
    %174 = vector.load %arg8[%c384, %c0_87] : memref<768x32xf32, #tpu.memory_space<vmem>>, vector<32x32xf32>
    %cst_88 = arith.constant dense<0.000000e+00> : vector<128x32xf32>
    %175 = tpu.matmul %173, %174, %cst_88 {dimension_numbers = #tpu.dot_dimension_numbers<[1], [0], [0], [1], [0, 0, 1, 1], [], []>} : vector<128x32xf32>, vector<32x32xf32>, vector<128x32xf32> -> vector<128x32xf32>
    %c136 = arith.constant 136 : index
    %c0_89 = arith.constant 0 : index
    %176 = vector.load %arg9[%c136, %c0_89] : memref<256x32xf32, #tpu.memory_space<vmem>>, vector<1x32xf32>
    %177 = vector.broadcast %176 : vector<1x32xf32> to vector<128x32xf32>
    %178 = arith.addf %175, %177 : vector<128x32xf32>
    %c144 = arith.constant 144 : index
    %c0_90 = arith.constant 0 : index
    %179 = vector.load %arg9[%c144, %c0_90] : memref<256x32xf32, #tpu.memory_space<vmem>>, vector<1x32xf32>
    %c152 = arith.constant 152 : index
    %c0_91 = arith.constant 0 : index
    %180 = vector.load %arg9[%c152, %c0_91] : memref<256x32xf32, #tpu.memory_space<vmem>>, vector<1x32xf32>
    %cst_92 = arith.constant dense<0.000000e+00> : vector<128xf32>
    %181 = vector.multi_reduction <add>, %178, %cst_92 [1] : vector<128x32xf32> to vector<128xf32>
    %182 = vector.shape_cast %181 : vector<128xf32> to vector<128x1xf32>
    %cst_93 = arith.constant 3.200000e+01 : f32
    %183 = vector.broadcast %cst_93 : f32 to vector<128x1xf32>
    %184 = arith.divf %182, %183 : vector<128x1xf32>
    %185 = vector.broadcast %184 : vector<128x1xf32> to vector<128x32xf32>
    %186 = arith.subf %178, %185 : vector<128x32xf32>
    %187 = arith.mulf %186, %186 : vector<128x32xf32>
    %cst_94 = arith.constant dense<0.000000e+00> : vector<128xf32>
    %188 = vector.multi_reduction <add>, %187, %cst_94 [1] : vector<128x32xf32> to vector<128xf32>
    %189 = vector.shape_cast %188 : vector<128xf32> to vector<128x1xf32>
    %cst_95 = arith.constant 3.200000e+01 : f32
    %190 = vector.broadcast %cst_95 : f32 to vector<128x1xf32>
    %191 = arith.divf %189, %190 : vector<128x1xf32>
    %192 = vector.broadcast %184 : vector<128x1xf32> to vector<128x32xf32>
    %193 = arith.subf %178, %192 : vector<128x32xf32>
    %cst_96 = arith.constant 9.99999974E-6 : f32
    %194 = vector.broadcast %cst_96 : f32 to vector<128x1xf32>
    %195 = arith.addf %191, %194 : vector<128x1xf32>
    %196 = math.rsqrt %195 : vector<128x1xf32>
    %197 = vector.broadcast %196 : vector<128x1xf32> to vector<128x32xf32>
    %198 = arith.mulf %193, %197 : vector<128x32xf32>
    %199 = vector.broadcast %179 : vector<1x32xf32> to vector<128x32xf32>
    %200 = arith.mulf %198, %199 : vector<128x32xf32>
    %201 = vector.broadcast %180 : vector<1x32xf32> to vector<128x32xf32>
    %202 = arith.addf %200, %201 : vector<128x32xf32>
    %203 = arith.addf %202, %44 : vector<128x32xf32>
    %cst_97 = arith.constant 2.000000e+00 : f32
    %204 = vector.broadcast %cst_97 : f32 to vector<256x32xf32>
    %205 = arith.mulf %87, %204 : vector<256x32xf32>
    %c416 = arith.constant 416 : index
    %c0_98 = arith.constant 0 : index
    %206 = vector.load %arg8[%c416, %c0_98] : memref<768x32xf32, #tpu.memory_space<vmem>>, vector<32x32xf32>
    %cst_99 = arith.constant dense<0.000000e+00> : vector<128x32xf32>
    %207 = tpu.matmul %203, %206, %cst_99 {dimension_numbers = #tpu.dot_dimension_numbers<[1], [0], [0], [1], [0, 0, 1, 1], [], []>} : vector<128x32xf32>, vector<32x32xf32>, vector<128x32xf32> -> vector<128x32xf32>
    %c448 = arith.constant 448 : index
    %c0_100 = arith.constant 0 : index
    %208 = vector.load %arg8[%c448, %c0_100] : memref<768x32xf32, #tpu.memory_space<vmem>>, vector<32x32xf32>
    %cst_101 = arith.constant dense<0.000000e+00> : vector<128x32xf32>
    %209 = tpu.matmul %203, %208, %cst_101 {dimension_numbers = #tpu.dot_dimension_numbers<[1], [0], [0], [1], [0, 0, 1, 1], [], []>} : vector<128x32xf32>, vector<32x32xf32>, vector<128x32xf32> -> vector<128x32xf32>
    %cst_102 = arith.constant dense<0.000000e+00> : vector<256x32xf32>
    %210 = tpu.matmul %93, %207, %cst_102 {dimension_numbers = #tpu.dot_dimension_numbers<[1], [0], [0], [1], [0, 0, 1, 1], [], []>} : vector<256x128xf32>, vector<128x32xf32>, vector<256x32xf32> -> vector<256x32xf32>
    %cst_103 = arith.constant dense<0.000000e+00> : vector<256x32xf32>
    %211 = tpu.matmul %98, %209, %cst_103 {dimension_numbers = #tpu.dot_dimension_numbers<[1], [0], [0], [1], [0, 0, 1, 1], [], []>} : vector<256x128xf32>, vector<128x32xf32>, vector<256x32xf32> -> vector<256x32xf32>
    %212 = arith.addf %210, %211 : vector<256x32xf32>
    %c480 = arith.constant 480 : index
    %c0_104 = arith.constant 0 : index
    %213 = vector.load %arg8[%c480, %c0_104] : memref<768x32xf32, #tpu.memory_space<vmem>>, vector<32x32xf32>
    %cst_105 = arith.constant dense<0.000000e+00> : vector<256x32xf32>
    %214 = tpu.matmul %205, %213, %cst_105 {dimension_numbers = #tpu.dot_dimension_numbers<[1], [0], [0], [1], [0, 0, 1, 1], [], []>} : vector<256x32xf32>, vector<32x32xf32>, vector<256x32xf32> -> vector<256x32xf32>
    %215 = arith.addf %212, %214 : vector<256x32xf32>
    %c160_106 = arith.constant 160 : index
    %c0_107 = arith.constant 0 : index
    %216 = vector.load %arg9[%c160_106, %c0_107] : memref<256x32xf32, #tpu.memory_space<vmem>>, vector<1x32xf32>
    %217 = vector.broadcast %216 : vector<1x32xf32> to vector<256x32xf32>
    %218 = arith.addf %215, %217 : vector<256x32xf32>
    %cst_108 = arith.constant 0.000000e+00 : f32
    %219 = vector.broadcast %cst_108 : f32 to vector<256x32xf32>
    %220 = arith.maximumf %218, %219 : vector<256x32xf32>
    %c512 = arith.constant 512 : index
    %c0_109 = arith.constant 0 : index
    %221 = vector.load %arg8[%c512, %c0_109] : memref<768x32xf32, #tpu.memory_space<vmem>>, vector<32x32xf32>
    %cst_110 = arith.constant dense<0.000000e+00> : vector<256x32xf32>
    %222 = tpu.matmul %220, %221, %cst_110 {dimension_numbers = #tpu.dot_dimension_numbers<[1], [0], [0], [1], [0, 0, 1, 1], [], []>} : vector<256x32xf32>, vector<32x32xf32>, vector<256x32xf32> -> vector<256x32xf32>
    %c168 = arith.constant 168 : index
    %c0_111 = arith.constant 0 : index
    %223 = vector.load %arg9[%c168, %c0_111] : memref<256x32xf32, #tpu.memory_space<vmem>>, vector<1x32xf32>
    %224 = vector.broadcast %223 : vector<1x32xf32> to vector<256x32xf32>
    %225 = arith.addf %222, %224 : vector<256x32xf32>
    %cst_112 = arith.constant 0.000000e+00 : f32
    %226 = vector.broadcast %cst_112 : f32 to vector<256x32xf32>
    %227 = arith.maximumf %225, %226 : vector<256x32xf32>
    %c544 = arith.constant 544 : index
    %c0_113 = arith.constant 0 : index
    %228 = vector.load %arg8[%c544, %c0_113] : memref<768x32xf32, #tpu.memory_space<vmem>>, vector<32x32xf32>
    %cst_114 = arith.constant dense<0.000000e+00> : vector<256x32xf32>
    %229 = tpu.matmul %227, %228, %cst_114 {dimension_numbers = #tpu.dot_dimension_numbers<[1], [0], [0], [1], [0, 0, 1, 1], [], []>} : vector<256x32xf32>, vector<32x32xf32>, vector<256x32xf32> -> vector<256x32xf32>
    %c176 = arith.constant 176 : index
    %c0_115 = arith.constant 0 : index
    %230 = vector.load %arg9[%c176, %c0_115] : memref<256x32xf32, #tpu.memory_space<vmem>>, vector<1x32xf32>
    %231 = vector.broadcast %230 : vector<1x32xf32> to vector<256x32xf32>
    %232 = arith.addf %229, %231 : vector<256x32xf32>
    %c184 = arith.constant 184 : index
    %c0_116 = arith.constant 0 : index
    %233 = vector.load %arg9[%c184, %c0_116] : memref<256x32xf32, #tpu.memory_space<vmem>>, vector<1x32xf32>
    %c192_117 = arith.constant 192 : index
    %c0_118 = arith.constant 0 : index
    %234 = vector.load %arg9[%c192_117, %c0_118] : memref<256x32xf32, #tpu.memory_space<vmem>>, vector<1x32xf32>
    %cst_119 = arith.constant dense<0.000000e+00> : vector<256xf32>
    %235 = vector.multi_reduction <add>, %232, %cst_119 [1] : vector<256x32xf32> to vector<256xf32>
    %236 = vector.shape_cast %235 : vector<256xf32> to vector<256x1xf32>
    %cst_120 = arith.constant 3.200000e+01 : f32
    %237 = vector.broadcast %cst_120 : f32 to vector<256x1xf32>
    %238 = arith.divf %236, %237 : vector<256x1xf32>
    %239 = vector.broadcast %238 : vector<256x1xf32> to vector<256x32xf32>
    %240 = arith.subf %232, %239 : vector<256x32xf32>
    %241 = arith.mulf %240, %240 : vector<256x32xf32>
    %cst_121 = arith.constant dense<0.000000e+00> : vector<256xf32>
    %242 = vector.multi_reduction <add>, %241, %cst_121 [1] : vector<256x32xf32> to vector<256xf32>
    %243 = vector.shape_cast %242 : vector<256xf32> to vector<256x1xf32>
    %cst_122 = arith.constant 3.200000e+01 : f32
    %244 = vector.broadcast %cst_122 : f32 to vector<256x1xf32>
    %245 = arith.divf %243, %244 : vector<256x1xf32>
    %246 = vector.broadcast %238 : vector<256x1xf32> to vector<256x32xf32>
    %247 = arith.subf %232, %246 : vector<256x32xf32>
    %cst_123 = arith.constant 9.99999974E-6 : f32
    %248 = vector.broadcast %cst_123 : f32 to vector<256x1xf32>
    %249 = arith.addf %245, %248 : vector<256x1xf32>
    %250 = math.rsqrt %249 : vector<256x1xf32>
    %251 = vector.broadcast %250 : vector<256x1xf32> to vector<256x32xf32>
    %252 = arith.mulf %247, %251 : vector<256x32xf32>
    %253 = vector.broadcast %233 : vector<1x32xf32> to vector<256x32xf32>
    %254 = arith.mulf %252, %253 : vector<256x32xf32>
    %255 = vector.broadcast %234 : vector<1x32xf32> to vector<256x32xf32>
    %256 = arith.addf %254, %255 : vector<256x32xf32>
    %cst_124 = arith.constant dense<0.000000e+00> : vector<128x32xf32>
    %257 = tpu.matmul %104, %256, %cst_124 {dimension_numbers = #tpu.dot_dimension_numbers<[1], [0], [0], [1], [0, 0, 1, 1], [], []>} : vector<128x256xf32>, vector<256x32xf32>, vector<128x32xf32> -> vector<128x32xf32>
    %c576 = arith.constant 576 : index
    %c0_125 = arith.constant 0 : index
    %258 = vector.load %arg8[%c576, %c0_125] : memref<768x32xf32, #tpu.memory_space<vmem>>, vector<32x32xf32>
    %cst_126 = arith.constant dense<0.000000e+00> : vector<128x32xf32>
    %259 = tpu.matmul %257, %258, %cst_126 {dimension_numbers = #tpu.dot_dimension_numbers<[1], [0], [0], [1], [0, 0, 1, 1], [], []>} : vector<128x32xf32>, vector<32x32xf32>, vector<128x32xf32> -> vector<128x32xf32>
    %c608 = arith.constant 608 : index
    %c0_127 = arith.constant 0 : index
    %260 = vector.load %arg8[%c608, %c0_127] : memref<768x32xf32, #tpu.memory_space<vmem>>, vector<32x32xf32>
    %cst_128 = arith.constant dense<0.000000e+00> : vector<128x32xf32>
    %261 = tpu.matmul %203, %260, %cst_128 {dimension_numbers = #tpu.dot_dimension_numbers<[1], [0], [0], [1], [0, 0, 1, 1], [], []>} : vector<128x32xf32>, vector<32x32xf32>, vector<128x32xf32> -> vector<128x32xf32>
    %262 = arith.addf %259, %261 : vector<128x32xf32>
    %c200 = arith.constant 200 : index
    %c0_129 = arith.constant 0 : index
    %263 = vector.load %arg9[%c200, %c0_129] : memref<256x32xf32, #tpu.memory_space<vmem>>, vector<1x32xf32>
    %264 = vector.broadcast %263 : vector<1x32xf32> to vector<128x32xf32>
    %265 = arith.addf %262, %264 : vector<128x32xf32>
    %cst_130 = arith.constant 0.000000e+00 : f32
    %266 = vector.broadcast %cst_130 : f32 to vector<128x32xf32>
    %267 = arith.maximumf %265, %266 : vector<128x32xf32>
    %c640 = arith.constant 640 : index
    %c0_131 = arith.constant 0 : index
    %268 = vector.load %arg8[%c640, %c0_131] : memref<768x32xf32, #tpu.memory_space<vmem>>, vector<32x32xf32>
    %cst_132 = arith.constant dense<0.000000e+00> : vector<128x32xf32>
    %269 = tpu.matmul %267, %268, %cst_132 {dimension_numbers = #tpu.dot_dimension_numbers<[1], [0], [0], [1], [0, 0, 1, 1], [], []>} : vector<128x32xf32>, vector<32x32xf32>, vector<128x32xf32> -> vector<128x32xf32>
    %c208 = arith.constant 208 : index
    %c0_133 = arith.constant 0 : index
    %270 = vector.load %arg9[%c208, %c0_133] : memref<256x32xf32, #tpu.memory_space<vmem>>, vector<1x32xf32>
    %271 = vector.broadcast %270 : vector<1x32xf32> to vector<128x32xf32>
    %272 = arith.addf %269, %271 : vector<128x32xf32>
    %cst_134 = arith.constant 0.000000e+00 : f32
    %273 = vector.broadcast %cst_134 : f32 to vector<128x32xf32>
    %274 = arith.maximumf %272, %273 : vector<128x32xf32>
    %c672 = arith.constant 672 : index
    %c0_135 = arith.constant 0 : index
    %275 = vector.load %arg8[%c672, %c0_135] : memref<768x32xf32, #tpu.memory_space<vmem>>, vector<32x32xf32>
    %cst_136 = arith.constant dense<0.000000e+00> : vector<128x32xf32>
    %276 = tpu.matmul %274, %275, %cst_136 {dimension_numbers = #tpu.dot_dimension_numbers<[1], [0], [0], [1], [0, 0, 1, 1], [], []>} : vector<128x32xf32>, vector<32x32xf32>, vector<128x32xf32> -> vector<128x32xf32>
    %c216 = arith.constant 216 : index
    %c0_137 = arith.constant 0 : index
    %277 = vector.load %arg9[%c216, %c0_137] : memref<256x32xf32, #tpu.memory_space<vmem>>, vector<1x32xf32>
    %278 = vector.broadcast %277 : vector<1x32xf32> to vector<128x32xf32>
    %279 = arith.addf %276, %278 : vector<128x32xf32>
    %c224_138 = arith.constant 224 : index
    %c0_139 = arith.constant 0 : index
    %280 = vector.load %arg9[%c224_138, %c0_139] : memref<256x32xf32, #tpu.memory_space<vmem>>, vector<1x32xf32>
    %c232 = arith.constant 232 : index
    %c0_140 = arith.constant 0 : index
    %281 = vector.load %arg9[%c232, %c0_140] : memref<256x32xf32, #tpu.memory_space<vmem>>, vector<1x32xf32>
    %cst_141 = arith.constant dense<0.000000e+00> : vector<128xf32>
    %282 = vector.multi_reduction <add>, %279, %cst_141 [1] : vector<128x32xf32> to vector<128xf32>
    %283 = vector.shape_cast %282 : vector<128xf32> to vector<128x1xf32>
    %cst_142 = arith.constant 3.200000e+01 : f32
    %284 = vector.broadcast %cst_142 : f32 to vector<128x1xf32>
    %285 = arith.divf %283, %284 : vector<128x1xf32>
    %286 = vector.broadcast %285 : vector<128x1xf32> to vector<128x32xf32>
    %287 = arith.subf %279, %286 : vector<128x32xf32>
    %288 = arith.mulf %287, %287 : vector<128x32xf32>
    %cst_143 = arith.constant dense<0.000000e+00> : vector<128xf32>
    %289 = vector.multi_reduction <add>, %288, %cst_143 [1] : vector<128x32xf32> to vector<128xf32>
    %290 = vector.shape_cast %289 : vector<128xf32> to vector<128x1xf32>
    %cst_144 = arith.constant 3.200000e+01 : f32
    %291 = vector.broadcast %cst_144 : f32 to vector<128x1xf32>
    %292 = arith.divf %290, %291 : vector<128x1xf32>
    %293 = vector.broadcast %285 : vector<128x1xf32> to vector<128x32xf32>
    %294 = arith.subf %279, %293 : vector<128x32xf32>
    %cst_145 = arith.constant 9.99999974E-6 : f32
    %295 = vector.broadcast %cst_145 : f32 to vector<128x1xf32>
    %296 = arith.addf %292, %295 : vector<128x1xf32>
    %297 = math.rsqrt %296 : vector<128x1xf32>
    %298 = vector.broadcast %297 : vector<128x1xf32> to vector<128x32xf32>
    %299 = arith.mulf %294, %298 : vector<128x32xf32>
    %300 = vector.broadcast %280 : vector<1x32xf32> to vector<128x32xf32>
    %301 = arith.mulf %299, %300 : vector<128x32xf32>
    %302 = vector.broadcast %281 : vector<1x32xf32> to vector<128x32xf32>
    %303 = arith.addf %301, %302 : vector<128x32xf32>
    %304 = arith.addf %303, %203 : vector<128x32xf32>
    %c704 = arith.constant 704 : index
    %c0_146 = arith.constant 0 : index
    %305 = vector.load %arg8[%c704, %c0_146] : memref<768x32xf32, #tpu.memory_space<vmem>>, vector<32x32xf32>
    %c736 = arith.constant 736 : index
    %c0_147 = arith.constant 0 : index
    %306 = vector.load %arg8[%c736, %c0_147] : memref<768x32xf32, #tpu.memory_space<vmem>>, vector<32x32xf32>
    %c240 = arith.constant 240 : index
    %c0_148 = arith.constant 0 : index
    %307 = vector.load %arg9[%c240, %c0_148] : memref<256x32xf32, #tpu.memory_space<vmem>>, vector<1x32xf32>
    %c248 = arith.constant 248 : index
    %c0_149 = arith.constant 0 : index
    %308 = vector.load %arg9[%c248, %c0_149] : memref<256x32xf32, #tpu.memory_space<vmem>>, vector<1x32xf32>
    %cst_150 = arith.constant dense<0.000000e+00> : vector<128x32xf32>
    %309 = tpu.matmul %304, %305, %cst_150 {dimension_numbers = #tpu.dot_dimension_numbers<[1], [0], [0], [1], [0, 0, 1, 1], [], []>} : vector<128x32xf32>, vector<32x32xf32>, vector<128x32xf32> -> vector<128x32xf32>
    %310 = vector.broadcast %307 : vector<1x32xf32> to vector<128x32xf32>
    %311 = arith.addf %309, %310 : vector<128x32xf32>
    %cst_151 = arith.constant 0.000000e+00 : f32
    %312 = vector.broadcast %cst_151 : f32 to vector<128x32xf32>
    %313 = arith.maximumf %311, %312 : vector<128x32xf32>
    %cst_152 = arith.constant dense<0.000000e+00> : vector<128x32xf32>
    %314 = tpu.matmul %313, %306, %cst_152 {dimension_numbers = #tpu.dot_dimension_numbers<[1], [0], [0], [1], [0, 0, 1, 1], [], []>} : vector<128x32xf32>, vector<32x32xf32>, vector<128x32xf32> -> vector<128x32xf32>
    %315 = vector.broadcast %308 : vector<1x32xf32> to vector<128x32xf32>
    %316 = arith.addf %314, %315 : vector<128x32xf32>
    %cst_153 = arith.constant 0.000000e+00 : f32
    %317 = vector.broadcast %cst_153 : f32 to vector<128x32xf32>
    %318 = arith.maximumf %316, %317 : vector<128x32xf32>
    %c0_154 = arith.constant 0 : index
    %c0_155 = arith.constant 0 : index
    %319 = vector.load %arg10[%c0_154, %c0_155] : memref<32x128xf32, #tpu.memory_space<vmem>>, vector<32x128xf32>
    %cst_156 = arith.constant dense<0.000000e+00> : vector<128x128xf32>
    %320 = tpu.matmul %318, %319, %cst_156 {dimension_numbers = #tpu.dot_dimension_numbers<[1], [0], [0], [1], [0, 0, 1, 1], [], []>} : vector<128x32xf32>, vector<32x128xf32>, vector<128x128xf32> -> vector<128x128xf32>
    %c0_157 = arith.constant 0 : index
    %c0_158 = arith.constant 0 : index
    %321 = vector.load %arg11[%c0_157, %c0_158] : memref<1x128xf32, #tpu.memory_space<vmem>>, vector<1x128xf32>
    %322 = vector.broadcast %321 : vector<1x128xf32> to vector<128x128xf32>
    %323 = arith.addf %320, %322 : vector<128x128xf32>
    %c0_159 = arith.constant 0 : index
    %c0_160 = arith.constant 0 : index
    %324 = vector.load %arg12[%c0_159, %c0_160] : memref<128x128xf32, #tpu.memory_space<vmem>>, vector<128x128xf32>
    tpu.vector_store %arg12[%c0_159, %c0_160], %323 {strides = array<i32>} : memref<128x128xf32, #tpu.memory_space<vmem>>, vector<128x128xf32>,
    return
  }
  func.func @transform_0(%arg0: i32) -> (i32, i32) {
    %c0_i32 = arith.constant 0 : i32
    %c0_i32_0 = arith.constant 0 : i32
    %c0_i32_1 = arith.constant 0 : i32
    return %c0_i32, %c0_i32_0 : i32, i32
  }
  func.func @transform_1(%arg0: i32) -> (i32, i32) {
    %c0_i32 = arith.constant 0 : i32
    %c0_i32_0 = arith.constant 0 : i32
    %c0_i32_1 = arith.constant 0 : i32
    return %c0_i32, %c0_i32_0 : i32, i32
  }
  func.func @transform_2(%arg0: i32) -> (i32, i32) {
    %c0_i32 = arith.constant 0 : i32
    %c0_i32_0 = arith.constant 0 : i32
    %c0_i32_1 = arith.constant 0 : i32
    return %c0_i32, %c0_i32_0 : i32, i32
  }
  func.func @transform_3(%arg0: i32) -> (i32, i32) {
    %c0_i32 = arith.constant 0 : i32
    %c0_i32_0 = arith.constant 0 : i32
    %c0_i32_1 = arith.constant 0 : i32
    return %c0_i32, %c0_i32_0 : i32, i32
  }
  func.func @transform_4(%arg0: i32) -> (i32, i32) {
    %c0_i32 = arith.constant 0 : i32
    %c0_i32_0 = arith.constant 0 : i32
    %c0_i32_1 = arith.constant 0 : i32
    return %c0_i32, %c0_i32_0 : i32, i32
  }
  func.func @transform_5(%arg0: i32) -> (i32, i32) {
    %c0_i32 = arith.constant 0 : i32
    %c0_i32_0 = arith.constant 0 : i32
    %c0_i32_1 = arith.constant 0 : i32
    return %c0_i32, %c0_i32_0 : i32, i32
  }
  func.func @transform_6(%arg0: i32) -> (i32, i32) {
    %c0_i32 = arith.constant 0 : i32
    %c0_i32_0 = arith.constant 0 : i32
    %c0_i32_1 = arith.constant 0 : i32
    return %c0_i32, %c0_i32_0 : i32, i32
  }
  func.func @transform_7(%arg0: i32) -> (i32, i32) {
    %c0_i32 = arith.constant 0 : i32
    %c0_i32_0 = arith.constant 0 : i32
    %c0_i32_1 = arith.constant 0 : i32
    return %c0_i32, %c0_i32_0 : i32, i32
  }
  func.func @transform_8(%arg0: i32) -> (i32, i32) {
    %c0_i32 = arith.constant 0 : i32
    %c0_i32_0 = arith.constant 0 : i32
    %c0_i32_1 = arith.constant 0 : i32
    return %c0_i32, %c0_i32_0 : i32, i32
  }
  func.func @transform_9(%arg0: i32) -> (i32, i32) {
    %c0_i32 = arith.constant 0 : i32
    %c0_i32_0 = arith.constant 0 : i32
    %c0_i32_1 = arith.constant 0 : i32
    return %c0_i32, %c0_i32_0 : i32, i32
  }
  func.func @transform_10(%arg0: i32) -> (i32, i32) {
    %c0_i32 = arith.constant 0 : i32
    %c0_i32_0 = arith.constant 0 : i32
    %c0_i32_1 = arith.constant 0 : i32
    return %c0_i32, %c0_i32_0 : i32, i32
  }
  func.func @transform_11(%arg0: i32) -> (i32, i32) {
    %c0_i32 = arith.constant 0 : i32
    %c0_i32_0 = arith.constant 0 : i32
    %c0_i32_1 = arith.constant 0 : i32
    return %c0_i32, %c0_i32_0 : i32, i32
  }
}

</mosaic_0001>

<bundles_post_ra>
// kernel: encode_process_decode.1
= control target key start
LH: loop header
LB: loop body
LE: loop exit
PB: predicated region body
PF: predicated region fallthrough
CT: control target
= control target key end

     0   :  { %vm154_vm0 = vcmask 1043456   ;;  %vm105_vm1 = vcmask 97280   ;;  %vm20584_vm2 = vcmask 261120   ;;  %vm997_vm3 = vcmask 31744   ;;  %s20326_s5 = inlined_call_operand.vmem [shape: f32[12,32], index: 5, kind: input, shape index: {}]   ;;  %s20327_s3 = inlined_call_operand.vmem [shape: f32[128,12], index: 3, kind: input, shape index: {}]   ;;  %s20328_s7 = inlined_call_operand.vmem [shape: f32[768,32], index: 7, kind: input, shape index: {}]   ;;  %s20329_s6 = inlined_call_operand.vmem [shape: f32[4,32], index: 6, kind: input, shape index: {}]   ;;  %s20330_s8 = inlined_call_operand.vmem [shape: f32[256,32], index: 8, kind: input, shape index: {}]   ;;  %s20331_s4 = inlined_call_operand.vmem [shape: f32[256,4], index: 4, kind: input, shape index: {}]   ;;  %s20332_s0 = inlined_call_operand.vmem [shape: s32[256,1], index: 0, kind: input, shape index: {}]   ;;  %s20333_s1 = inlined_call_operand.vmem [shape: s32[256,1], index: 1, kind: input, shape index: {}]   ;;  %s20334_s2 = inlined_call_operand.vmem [shape: s32[1,256], index: 2, kind: input, shape index: {}]   ;;  %s20335_s9 = inlined_call_operand.vmem [shape: f32[32,128], index: 9, kind: input, shape index: {}]   ;;  %s20336_s10 = inlined_call_operand.vmem [shape: f32[1,128], index: 10, kind: input, shape index: {}]   ;;  %s20337_s11 = inlined_call_operand.vmem [shape: f32[128,128], index: 11, kind: output, shape index: {}]  }
   0x1   :  { %v87_v0 = vld [vmem:[%s20326_s5 + $0x8] sm:$0xf]  ;;  %v86_v1 = vld [vmem:[%s20326_s5] sm:$0xff]  ;;  %v40_v4 = vld [vmem:[%s20327_s3 + $0x10] sm:$0xff] }
   0x2   :  { %v38_v2 = vld [vmem:[%s20327_s3] sm:$0xff]  ;;  %12954 = vmatprep.subr.msk.mxu0 %vm154_vm0, %v87_v0  ;;  %v39_v3 = vld [vmem:[%s20327_s3 + $0x8] sm:$0xff]  ;;  %v41_v5 = vld [vmem:[%s20327_s3 + $0x18] sm:$0xff] }
   0x3   :  { %12958 = vmatprep.mubr.msk.f32.mxu0 %vm105_vm1, %v38_v2  ;;  %12955 = vmatpush3.msk.msra.mxu0 %vm154_vm0, %v87_v0  ;;  %v42_v6 = vld [vmem:[%s20327_s3 + $0x20] sm:$0xff]  ;;  %v43_v7 = vld [vmem:[%s20327_s3 + $0x28] sm:$0xff]  ;;  %v44_v8 = vld [vmem:[%s20327_s3 + $0x30] sm:$0xff] }
   0x4   :  { %12956 = vmatprep.subr.mxu0 %v86_v1  ;;  %v45_v9 = vld [vmem:[%s20327_s3 + $0x38] sm:$0xff]  ;;  %v46_v10 = vld [vmem:[%s20327_s3 + $0x40] sm:$0xff]  ;;  %v47_v11 = vld [vmem:[%s20327_s3 + $0x48] sm:$0xff] }
   0x5   :  { %12957 = vmatpush3.msra.mxu0 %v86_v1  ;;  %v48_v12 = vld [vmem:[%s20327_s3 + $0x50] sm:$0xff]  ;;  %v49_v13 = vld [vmem:[%s20327_s3 + $0x58] sm:$0xff]  ;;  %v50_v14 = vld [vmem:[%s20327_s3 + $0x60] sm:$0xff] }
   0x6   :  { %12959 = vmatmul.mubr.msk.f32.vlgmr.msra.gmra.mxu0 %vm105_vm1, %v39_v3  ;;  %v51_v15 = vld [vmem:[%s20327_s3 + $0x68] sm:$0xff]  ;;  %v52_v16 = vld [vmem:[%s20327_s3 + $0x70] sm:$0xff]  ;;  %v53_v17 = vld [vmem:[%s20327_s3 + $0x78] sm:$0xff] }
   0x7   :  { %12961 = vmatprep.mubr.msk.f32.mxu0 %vm105_vm1, %v40_v4  ;;  %v91_v18 = vld [vmem:[%s20328_s7 + $0x18] sm:$0xff]  ;;  %v90_v19 = vld [vmem:[%s20328_s7 + $0x10] sm:$0xff]  ;;  %v89_v20 = vld [vmem:[%s20328_s7 + $0x8] sm:$0xff] }
   0x8   :  { %12982 = vmatprep.subr.mxu1 %v91_v18  ;;  %v88_v21 = vld [vmem:[%s20328_s7] sm:$0xff] }
   0x9   :  { %12983 = vmatpush3.msra.mxu1 %v91_v18  ;;  %v979_v22 = vld [vmem:[%s20329_s6] sm:$0xf]  ;;  %v64_v18 = vld [vmem:[%s20331_s4 + $0x50] sm:$0xff] }
   0xa   :  { %12962 = vmatmul.mubr.msk.f32.gmra.mxu0 %vm105_vm1, %v41_v5  ;;  %12984 = vmatprep.subr.mxu1 %v90_v19  ;;  %v11024_v23 = vld [vmem:[%s20330_s8] ss:$0 sm:$0xff] }
   0xb   :  { %12964 = vmatprep.mubr.msk.f32.mxu0 %vm105_vm1, %v42_v6  ;;  %12985 = vmatpush3.msra.mxu1 %v90_v19  ;;  %v65_v19 = vld [vmem:[%s20331_s4 + $0x58] sm:$0xff] }
   0xc   :  { %12986 = vmatprep.subr.mxu1 %v89_v20 }
   0xd   :  { %12987 = vmatpush3.msra.mxu1 %v89_v20  ;;  %v66_v20 = vld [vmem:[%s20331_s4 + $0x60] sm:$0xff] }
   0xe   :  { %12965 = vmatmul.mubr.msk.f32.gmra.mxu0 %vm105_vm1, %v43_v7  ;;  %12988 = vmatprep.subr.mxu1 %v88_v21 }
   0xf   :  { %12967 = vmatprep.mubr.msk.f32.mxu0 %vm105_vm1, %v44_v8  ;;  %12989 = vmatpush3.msra.mxu1 %v88_v21  ;;  %v54_v8 = vld [vmem:[%s20331_s4] sm:$0xff]  ;;  %v67_v21 = vld [vmem:[%s20331_s4 + $0x68] sm:$0xff] }
  0x10   :  { %13046 = vmatprep.subr.msk.mxu1 %vm154_vm0, %v979_v22 }
  0x12   :  { %12968 = vmatmul.mubr.msk.f32.gmra.mxu0 %vm105_vm1, %v45_v9  ;;  %v55_v9 = vld [vmem:[%s20331_s4 + $0x8] sm:$0xff] }
  0x13   :  { %12970 = vmatprep.mubr.msk.f32.mxu0 %vm105_vm1, %v46_v10  ;;  %v56_v10 = vld [vmem:[%s20331_s4 + $0x10] sm:$0xff] }
  0x16   :  { %12971 = vmatmul.mubr.msk.f32.gmra.mxu0 %vm105_vm1, %v47_v11  ;;  %v57_v11 = vld [vmem:[%s20331_s4 + $0x18] sm:$0xff] }
  0x17   :  { %12973 = vmatprep.mubr.msk.f32.mxu0 %vm105_vm1, %v48_v12  ;;  %v58_v12 = vld [vmem:[%s20331_s4 + $0x20] sm:$0xff] }
  0x1a   :  { %12974 = vmatmul.mubr.msk.f32.gmra.mxu0 %vm105_vm1, %v49_v13  ;;  %v59_v13 = vld [vmem:[%s20331_s4 + $0x28] sm:$0xff] }
  0x1b   :  { %12976 = vmatprep.mubr.msk.f32.mxu0 %vm105_vm1, %v50_v14  ;;  %v60_v14 = vld [vmem:[%s20331_s4 + $0x30] sm:$0xff] }
  0x1e   :  { %12977 = vmatmul.mubr.msk.f32.gmra.mxu0 %vm105_vm1, %v51_v15  ;;  %v61_v15 = vld [vmem:[%s20331_s4 + $0x38] sm:$0xff] }
  0x1f   :  { %12979 = vmatprep.mubr.msk.f32.mxu0 %vm105_vm1, %v52_v16  ;;  %v62_v16 = vld [vmem:[%s20331_s4 + $0x40] sm:$0xff] }
  0x22   :  { %12980 = vmatmul.mubr.msk.f32.gmra.mxu0 %vm105_vm1, %v53_v17  ;;  %v63_v17 = vld [vmem:[%s20331_s4 + $0x48] sm:$0xff] }
  0xc6   :  { %v12960_v24 = vpop.f32.mrf.mxu0 }
  0xc7   :  { %v230_v25 = vadd.f32 %v12960_v24, %v11024_v23  ;;  %v70_v24 = vld [vmem:[%s20331_s4 + $0x80] sm:$0xff] }
  0xc8   :  { %v224_v26 = vpop.f32.mrf.mxu0 }
  0xc9   :  { %v225_v27 = vadd.f32 %v11024_v23, %v224_v26  ;;  %v304_v30 = vmax.f32 %v230_v25, 0.0  ;;  %v71_v25 = vld [vmem:[%s20331_s4 + $0x88] sm:$0xff]  ;;  %v72_v26 = vld [vmem:[%s20331_s4 + $0x90] sm:$0xff] }
  0xca   :  { %v12963_v28 = vpop.f32.mrf.mxu0 }
  0xcb   :  { %v303_v29 = vmax.f32 %v225_v27, 0.0  ;;  %v240_v31 = vadd.f32 %v12963_v28, %v11024_v23  ;;  %v95_v27 = vld [vmem:[%s20328_s7 + $0x38] sm:$0xff] }
  0xcc   :  { %v234_v32 = vpop.f32.mrf.mxu0  ;;  %13014 = vmatprep.subr.mxu0 %v95_v27  ;;  %v73_v28 = vld [vmem:[%s20331_s4 + $0x98] sm:$0xff] }
  0xcd   :  { %v235_v33 = vadd.f32 %v11024_v23, %v234_v32  ;;  %12990 = vmatprep.mubr.msk.f32.mxu1 %vm20584_vm2, %v303_v29  ;;  %v306_v36 = vmax.f32 %v240_v31, 0.0  ;;  %13015 = vmatpush3.msra.mxu0 %v95_v27  ;;  %v94_v29 = vld [vmem:[%s20328_s7 + $0x30] sm:$0xff]  ;;  %v93_v31 = vld [vmem:[%s20328_s7 + $0x28] sm:$0xff] }
  0xce   :  { %v12966_v34 = vpop.f32.mrf.mxu0  ;;  %12991 = vmatmul.mubr.msk.f32.vlgmr.msra.gmra.mxu1 %vm20584_vm2, %v304_v30  ;;  %v74_v30 = vld [vmem:[%s20331_s4 + $0xa0] sm:$0xff]  ;;  %13016 = vmatprep.subr.mxu0 %v94_v29  ;;  %v75_v32 = vld [vmem:[%s20331_s4 + $0xa8] sm:$0xff] }
  0xcf   :  { %v305_v35 = vmax.f32 %v235_v33, 0.0  ;;  %13047 = vmatpush3.msk.msra.mxu1 %vm154_vm0, %v979_v22  ;;  %v250_v37 = vadd.f32 %v12966_v34, %v11024_v23  ;;  %v68_v22 = vld [vmem:[%s20331_s4 + $0x70] sm:$0xff]  ;;  %13017 = vmatpush3.msra.mxu0 %v94_v29  ;;  %v92_v33 = vld [vmem:[%s20328_s7 + $0x20] sm:$0xff] }
  0xd0   :  { %v244_v38 = vpop.f32.mrf.mxu0  ;;  %13018 = vmatprep.subr.mxu0 %v93_v31  ;;  %v76_v34 = vld [vmem:[%s20331_s4 + $0xb0] sm:$0xff] }
  0xd1   :  { %v245_v39 = vadd.f32 %v11024_v23, %v244_v38  ;;  %12993 = vmatprep.mubr.msk.f32.mxu1 %vm20584_vm2, %v305_v35  ;;  %v308_v42 = vmax.f32 %v250_v37, 0.0  ;;  %13019 = vmatpush3.msra.mxu0 %v93_v31  ;;  %v77_v35 = vld [vmem:[%s20331_s4 + $0xb8] sm:$0xff]  ;;  %v79_v37 = vld [vmem:[%s20331_s4 + $0xc8] sm:$0xff]  ;;  %v80_v38 = vld [vmem:[%s20331_s4 + $0xd0] sm:$0xff] }
  0xd2   :  { %v12969_v40 = vpop.f32.mrf.mxu0  ;;  %12994 = vmatmul.mubr.msk.f32.gmra.mxu1 %vm20584_vm2, %v306_v36  ;;  %13020 = vmatprep.subr.mxu0 %v92_v33  ;;  %v78_v36 = vld [vmem:[%s20331_s4 + $0xc0] sm:$0xff] }
  0xd3   :  { %v307_v41 = vmax.f32 %v245_v39, 0.0  ;;  %v260_v43 = vadd.f32 %v12969_v40, %v11024_v23  ;;  %13021 = vmatpush3.msra.mxu0 %v92_v33  ;;  %v81_v39 = vld [vmem:[%s20331_s4 + $0xd8] sm:$0xff]  ;;  %v82_v40 = vld [vmem:[%s20331_s4 + $0xe0] sm:$0xff] }
  0xd4   :  { %v254_v44 = vpop.f32.mrf.mxu0 }
  0xd5   :  { %v255_v45 = vadd.f32 %v11024_v23, %v254_v44  ;;  %12996 = vmatprep.mubr.msk.f32.mxu1 %vm20584_vm2, %v307_v41  ;;  %v310_v48 = vmax.f32 %v260_v43, 0.0  ;;  %v83_v41 = vld [vmem:[%s20331_s4 + $0xe8] sm:$0xff]  ;;  %v85_v43 = vld [vmem:[%s20331_s4 + $0xf8] sm:$0xff] }
  0xd6   :  { %v12972_v46 = vpop.f32.mrf.mxu0  ;;  %12997 = vmatmul.mubr.msk.f32.gmra.mxu1 %vm20584_vm2, %v308_v42  ;;  %v84_v42 = vld [vmem:[%s20331_s4 + $0xf0] sm:$0xff]  ;;  %v983_v44 = vld [vmem:[%s20328_s7 + $0x58] sm:$0xff] }
  0xd7   :  { %v309_v47 = vmax.f32 %v255_v45, 0.0  ;;  %v270_v49 = vadd.f32 %v12972_v46, %v11024_v23  ;;  %13096 = vmatprep.subr.mxu0 %v983_v44  ;;  %v14952_v45 = vld [vmem:[%s20330_s8 + $0x8] ss:$0 sm:$0xff] }
  0xd8   :  { %v264_v50 = vpop.f32.mrf.mxu0 }
  0xd9   :  { %v265_v51 = vadd.f32 %v11024_v23, %v264_v50  ;;  %12999 = vmatprep.mubr.msk.f32.mxu1 %vm20584_vm2, %v309_v47  ;;  %v312_v54 = vmax.f32 %v270_v49, 0.0 }
  0xda   :  { %v12975_v52 = vpop.f32.mrf.mxu0  ;;  %13000 = vmatmul.mubr.msk.f32.gmra.mxu1 %vm20584_vm2, %v310_v48 }
  0xdb   :  { %v311_v53 = vmax.f32 %v265_v51, 0.0  ;;  %v280_v55 = vadd.f32 %v12975_v52, %v11024_v23 }
  0xdc   :  { %v274_v56 = vpop.f32.mrf.mxu0 }
  0xdd   :  { %v275_v57 = vadd.f32 %v11024_v23, %v274_v56  ;;  %13002 = vmatprep.mubr.msk.f32.mxu1 %vm20584_vm2, %v311_v53  ;;  %v314_v60 = vmax.f32 %v280_v55, 0.0  ;;  %v982_v56 = vld [vmem:[%s20328_s7 + $0x50] sm:$0xff] }
  0xde   :  { %v12978_v58 = vpop.f32.mrf.mxu0  ;;  %13003 = vmatmul.mubr.msk.f32.gmra.mxu1 %vm20584_vm2, %v312_v54 }
  0xdf   :  { %v313_v59 = vmax.f32 %v275_v57, 0.0  ;;  %v290_v61 = vadd.f32 %v12978_v58, %v11024_v23 }
  0xe0   :  { %v284_v62 = vpop.f32.mrf.mxu0 }
  0xe1   :  { %v285_v63 = vadd.f32 %v11024_v23, %v284_v62  ;;  %13005 = vmatprep.mubr.msk.f32.mxu1 %vm20584_vm2, %v313_v59  ;;  %v316_v2 = vmax.f32 %v290_v61, 0.0  ;;  %v981_v59 = vld [vmem:[%s20328_s7 + $0x48] sm:$0xff] }
  0xe2   :  { %v12981_v0 = vpop.f32.mrf.mxu0  ;;  %13006 = vmatmul.mubr.msk.f32.gmra.mxu1 %vm20584_vm2, %v314_v60 }
  0xe3   :  { %v315_v1 = vmax.f32 %v285_v63, 0.0  ;;  %v300_v3 = vadd.f32 %v12981_v0, %v11024_v23  ;;  %v980_v0 = vld [vmem:[%s20328_s7 + $0x40] sm:$0xff] }
  0xe4   :  { %v294_v4 = vpop.f32.mrf.mxu0 }
  0xe5   :  { %v295_v5 = vadd.f32 %v11024_v23, %v294_v4  ;;  %13008 = vmatprep.mubr.msk.f32.mxu1 %vm20584_vm2, %v315_v1  ;;  %v318_v7 = vmax.f32 %v300_v3, 0.0  ;;  %v69_v23 = vld [vmem:[%s20331_s4 + $0x78] sm:$0xff] }
  0xe6   :  { %13009 = vmatmul.mubr.msk.f32.gmra.mxu1 %vm20584_vm2, %v316_v2 }
  0xe7   :  { %v317_v6 = vmax.f32 %v295_v5, 0.0 }
  0xe9   :  { %13011 = vmatprep.mubr.msk.f32.mxu1 %vm20584_vm2, %v317_v6 }
  0xea   :  { %13012 = vmatmul.mubr.msk.f32.gmra.mxu1 %vm20584_vm2, %v318_v7 }
  0xeb   :  { %13048 = vmatprep.mubr.msk.f32.mxu1 %vm997_vm3, %v54_v8 }
  0xee   :  { %13049 = vmatmul.mubr.msk.f32.vlgmr.msra.gmra.mxu1 %vm997_vm3, %v55_v9 }
  0xef   :  { %13051 = vmatprep.mubr.msk.f32.mxu1 %vm997_vm3, %v56_v10 }
  0xf2   :  { %13052 = vmatmul.mubr.msk.f32.gmra.mxu1 %vm997_vm3, %v57_v11 }
  0xf3   :  { %13054 = vmatprep.mubr.msk.f32.mxu1 %vm997_vm3, %v58_v12 }
  0xf6   :  { %13055 = vmatmul.mubr.msk.f32.gmra.mxu1 %vm997_vm3, %v59_v13 }
  0xf7   :  { %13057 = vmatprep.mubr.msk.f32.mxu1 %vm997_vm3, %v60_v14 }
  0xfa   :  { %13058 = vmatmul.mubr.msk.f32.gmra.mxu1 %vm997_vm3, %v61_v15 }
  0xfb   :  { %13060 = vmatprep.mubr.msk.f32.mxu1 %vm997_vm3, %v62_v16 }
  0xfe   :  { %13061 = vmatmul.mubr.msk.f32.gmra.mxu1 %vm997_vm3, %v63_v17 }
  0xff   :  { %13063 = vmatprep.mubr.msk.f32.mxu1 %vm997_vm3, %v64_v18 }
 0x102   :  { %13064 = vmatmul.mubr.msk.f32.gmra.mxu1 %vm997_vm3, %v65_v19 }
 0x103   :  { %13066 = vmatprep.mubr.msk.f32.mxu1 %vm997_vm3, %v66_v20 }
 0x106   :  { %13067 = vmatmul.mubr.msk.f32.gmra.mxu1 %vm997_vm3, %v67_v21 }
 0x107   :  { %13069 = vmatprep.mubr.msk.f32.mxu1 %vm997_vm3, %v68_v22 }
 0x10a   :  { %13070 = vmatmul.mubr.msk.f32.gmra.mxu1 %vm997_vm3, %v69_v23 }
 0x10b   :  { %13072 = vmatprep.mubr.msk.f32.mxu1 %vm997_vm3, %v70_v24 }
 0x10e   :  { %13073 = vmatmul.mubr.msk.f32.gmra.mxu1 %vm997_vm3, %v71_v25 }
 0x10f   :  { %13075 = vmatprep.mubr.msk.f32.mxu1 %vm997_vm3, %v72_v26 }
 0x112   :  { %13076 = vmatmul.mubr.msk.f32.gmra.mxu1 %vm997_vm3, %v73_v28 }
 0x113   :  { %13078 = vmatprep.mubr.msk.f32.mxu1 %vm997_vm3, %v74_v30  ;;  %v14993_v30 = vld [vmem:[%s20330_s8 + $0x28] ss:$0 sm:$0xff] }
 0x116   :  { %13079 = vmatmul.mubr.msk.f32.gmra.mxu1 %vm997_vm3, %v75_v32 }
 0x117   :  { %13081 = vmatprep.mubr.msk.f32.mxu1 %vm997_vm3, %v76_v34 }
 0x11a   :  { %13082 = vmatmul.mubr.msk.f32.gmra.mxu1 %vm997_vm3, %v77_v35 }
 0x11b   :  { %13084 = vmatprep.mubr.msk.f32.mxu1 %vm997_vm3, %v78_v36 }
 0x11e   :  { %13085 = vmatmul.mubr.msk.f32.gmra.mxu1 %vm997_vm3, %v79_v37 }
 0x11f   :  { %13087 = vmatprep.mubr.msk.f32.mxu1 %vm997_vm3, %v80_v38 }
 0x122   :  { %13088 = vmatmul.mubr.msk.f32.gmra.mxu1 %vm997_vm3, %v81_v39 }
 0x123   :  { %13090 = vmatprep.mubr.msk.f32.mxu1 %vm997_vm3, %v82_v40 }
 0x126   :  { %13091 = vmatmul.mubr.msk.f32.gmra.mxu1 %vm997_vm3, %v83_v41 }
 0x127   :  { %13093 = vmatprep.mubr.msk.f32.mxu1 %vm997_vm3, %v84_v42 }
 0x12a   :  { %13094 = vmatmul.mubr.msk.f32.gmra.mxu1 %vm997_vm3, %v85_v43 }
 0x18e   :  { %v12992_v46 = vpop.f32.mrf.mxu1 }
 0x18f   :  { %v444_v47 = vadd.f32 %v12992_v46, %v14952_v45 }
 0x190   :  { %v438_v48 = vpop.f32.mrf.mxu1 }
 0x191   :  { %v439_v49 = vadd.f32 %v14952_v45, %v438_v48  ;;  %v518_v52 = vmax.f32 %v444_v47, 0.0 }
 0x192   :  { %v12995_v50 = vpop.f32.mrf.mxu1 }
 0x193   :  { %v517_v51 = vmax.f32 %v439_v49, 0.0  ;;  %v454_v53 = vadd.f32 %v12995_v50, %v14952_v45 }
 0x194   :  { %v448_v54 = vpop.f32.mrf.mxu1 }
 0x195   :  { %v449_v55 = vadd.f32 %v14952_v45, %v448_v54  ;;  %13022 = vmatprep.mubr.msk.f32.mxu0 %vm20584_vm2, %v517_v51  ;;  %v520_v60 = vmax.f32 %v454_v53, 0.0 }
 0x196   :  { %v12998_v57 = vpop.f32.mrf.mxu1  ;;  %13023 = vmatmul.mubr.msk.f32.vlgmr.msra.gmra.mxu0 %vm20584_vm2, %v518_v52 }
 0x197   :  { %v519_v58 = vmax.f32 %v449_v55, 0.0  ;;  %13097 = vmatpush3.msra.mxu0 %v983_v44  ;;  %v464_v61 = vadd.f32 %v12998_v57, %v14952_v45 }
 0x198   :  { %v458_v62 = vpop.f32.mrf.mxu1  ;;  %13098 = vmatprep.subr.mxu0 %v982_v56 }
 0x199   :  { %v459_v63 = vadd.f32 %v14952_v45, %v458_v62  ;;  %13025 = vmatprep.mubr.msk.f32.mxu0 %vm20584_vm2, %v519_v58  ;;  %13099 = vmatpush3.msra.mxu0 %v982_v56  ;;  %v522_v3 = vmax.f32 %v464_v61, 0.0 }
 0x19a   :  { %v13001_v1 = vpop.f32.mrf.mxu1  ;;  %13026 = vmatmul.mubr.msk.f32.gmra.mxu0 %vm20584_vm2, %v520_v60  ;;  %13100 = vmatprep.subr.mxu0 %v981_v59 }
 0x19b   :  { %v521_v2 = vmax.f32 %v459_v63, 0.0  ;;  %13101 = vmatpush3.msra.mxu0 %v981_v59  ;;  %v474_v4 = vadd.f32 %v13001_v1, %v14952_v45 }
 0x19c   :  { %v468_v5 = vpop.f32.mrf.mxu1  ;;  %13102 = vmatprep.subr.mxu0 %v980_v0 }
 0x19d   :  { %v469_v6 = vadd.f32 %v14952_v45, %v468_v5  ;;  %13028 = vmatprep.mubr.msk.f32.mxu0 %vm20584_vm2, %v521_v2  ;;  %13103 = vmatpush3.msra.mxu0 %v980_v0  ;;  %v524_v9 = vmax.f32 %v474_v4, 0.0 }
 0x19e   :  { %v13004_v7 = vpop.f32.mrf.mxu1  ;;  %13029 = vmatmul.mubr.msk.f32.gmra.mxu0 %vm20584_vm2, %v522_v3 }
 0x19f   :  { %v523_v8 = vmax.f32 %v469_v6, 0.0  ;;  %v484_v10 = vadd.f32 %v13004_v7, %v14952_v45 }
 0x1a0   :  { %v478_v11 = vpop.f32.mrf.mxu1 }
 0x1a1   :  { %v479_v12 = vadd.f32 %v14952_v45, %v478_v11  ;;  %13031 = vmatprep.mubr.msk.f32.mxu0 %vm20584_vm2, %v523_v8  ;;  %v526_v15 = vmax.f32 %v484_v10, 0.0 }
 0x1a2   :  { %v13007_v13 = vpop.f32.mrf.mxu1  ;;  %13032 = vmatmul.mubr.msk.f32.gmra.mxu0 %vm20584_vm2, %v524_v9 }
 0x1a3   :  { %v525_v14 = vmax.f32 %v479_v12, 0.0  ;;  %v494_v16 = vadd.f32 %v13007_v13, %v14952_v45 }
 0x1a4   :  { %v488_v17 = vpop.f32.mrf.mxu1 }
 0x1a5   :  { %v489_v18 = vadd.f32 %v14952_v45, %v488_v17  ;;  %13034 = vmatprep.mubr.msk.f32.mxu0 %vm20584_vm2, %v525_v14  ;;  %v528_v21 = vmax.f32 %v494_v16, 0.0 }
 0x1a6   :  { %v13010_v19 = vpop.f32.mrf.mxu1  ;;  %13035 = vmatmul.mubr.msk.f32.gmra.mxu0 %vm20584_vm2, %v526_v15 }
 0x1a7   :  { %v527_v20 = vmax.f32 %v489_v18, 0.0  ;;  %v504_v22 = vadd.f32 %v13010_v19, %v14952_v45 }
 0x1a8   :  { %v498_v23 = vpop.f32.mrf.mxu1 }
 0x1a9   :  { %v499_v24 = vadd.f32 %v14952_v45, %v498_v23  ;;  %13037 = vmatprep.mubr.msk.f32.mxu0 %vm20584_vm2, %v527_v20  ;;  %v530_v27 = vmax.f32 %v504_v22, 0.0 }
 0x1aa   :  { %v13013_v25 = vpop.f32.mrf.mxu1  ;;  %13038 = vmatmul.mubr.msk.f32.gmra.mxu0 %vm20584_vm2, %v528_v21 }
 0x1ab   :  { %v529_v26 = vmax.f32 %v499_v24, 0.0  ;;  %v514_v28 = vadd.f32 %v13013_v25, %v14952_v45 }
 0x1ac   :  { %v508_v29 = vpop.f32.mrf.mxu1 }
 0x1ad   :  { %v509_v31 = vadd.f32 %v14952_v45, %v508_v29  ;;  %13040 = vmatprep.mubr.msk.f32.mxu0 %vm20584_vm2, %v529_v26  ;;  %v532_v35 = vmax.f32 %v514_v28, 0.0 }
 0x1ae   :  { %13041 = vmatmul.mubr.msk.f32.gmra.mxu0 %vm20584_vm2, %v530_v27  ;;  %v13050_v32 = vpop.f32.mrf.mxu1 }
 0x1af   :  { %v531_v33 = vmax.f32 %v509_v31, 0.0  ;;  %v1169_v34 = vadd.f32 %v13050_v32, %v14993_v30 }
 0x1b0   :  { %v1163_v36 = vpop.f32.mrf.mxu1 }
 0x1b1   :  { %13043 = vmatprep.mubr.msk.f32.mxu0 %vm20584_vm2, %v531_v33  ;;  %v1164_v37 = vadd.f32 %v14993_v30, %v1163_v36  ;;  %v1323_v38 = vmax.f32 %v1169_v34, 0.0 }
 0x1b2   :  { %13044 = vmatmul.mubr.msk.f32.gmra.mxu0 %vm20584_vm2, %v532_v35  ;;  %v13053_v39 = vpop.f32.mrf.mxu1 }
 0x1b3   :  { %v1322_v40 = vmax.f32 %v1164_v37, 0.0  ;;  %v1179_v41 = vadd.f32 %v13053_v39, %v14993_v30 }
 0x1b4   :  { %v1173_v42 = vpop.f32.mrf.mxu1 }
 0x1b5   :  { %v1174_v43 = vadd.f32 %v14993_v30, %v1173_v42  ;;  %13104 = vmatprep.mubr.msk.f32.mxu0 %vm20584_vm2, %v1322_v40  ;;  %v1325_v44 = vmax.f32 %v1179_v41, 0.0 }
 0x1b6   :  { %v13056_v45 = vpop.f32.mrf.mxu1  ;;  %13105 = vmatmul.mubr.msk.f32.vlgmr.msra.gmra.mxu0 %vm20584_vm2, %v1323_v38 }
 0x1b7   :  { %v1324_v46 = vmax.f32 %v1174_v43, 0.0  ;;  %v1189_v47 = vadd.f32 %v13056_v45, %v14993_v30 }
 0x1b8   :  { %v1183_v48 = vpop.f32.mrf.mxu1 }
 0x1b9   :  { %v1184_v49 = vadd.f32 %v14993_v30, %v1183_v48  ;;  %13107 = vmatprep.mubr.msk.f32.mxu0 %vm20584_vm2, %v1324_v46  ;;  %v1327_v50 = vmax.f32 %v1189_v47, 0.0 }
 0x1ba   :  { %v13059_v51 = vpop.f32.mrf.mxu1  ;;  %13108 = vmatmul.mubr.msk.f32.gmra.mxu0 %vm20584_vm2, %v1325_v44 }
 0x1bb   :  { %v1326_v52 = vmax.f32 %v1184_v49, 0.0  ;;  %v1199_v53 = vadd.f32 %v13059_v51, %v14993_v30 }
 0x1bc   :  { %v1193_v54 = vpop.f32.mrf.mxu1 }
 0x1bd   :  { %v1194_v55 = vadd.f32 %v14993_v30, %v1193_v54  ;;  %13110 = vmatprep.mubr.msk.f32.mxu0 %vm20584_vm2, %v1326_v52  ;;  %v1329_v56 = vmax.f32 %v1199_v53, 0.0 }
 0x1be   :  { %v13062_v57 = vpop.f32.mrf.mxu1  ;;  %13111 = vmatmul.mubr.msk.f32.gmra.mxu0 %vm20584_vm2, %v1327_v50 }
 0x1bf   :  { %v1328_v58 = vmax.f32 %v1194_v55, 0.0  ;;  %v1209_v59 = vadd.f32 %v13062_v57, %v14993_v30 }
 0x1c0   :  { %v1203_v60 = vpop.f32.mrf.mxu1 }
 0x1c1   :  { %v1204_v61 = vadd.f32 %v14993_v30, %v1203_v60  ;;  %13113 = vmatprep.mubr.msk.f32.mxu0 %vm20584_vm2, %v1328_v58  ;;  %v1331_v62 = vmax.f32 %v1209_v59, 0.0 }
 0x1c2   :  { %v13065_v63 = vpop.f32.mrf.mxu1  ;;  %13114 = vmatmul.mubr.msk.f32.gmra.mxu0 %vm20584_vm2, %v1329_v56 }
 0x1c3   :  { %v1330_v0 = vmax.f32 %v1204_v61, 0.0  ;;  %v1219_v1 = vadd.f32 %v13065_v63, %v14993_v30 }
 0x1c4   :  { %v1213_v2 = vpop.f32.mrf.mxu1 }
 0x1c5   :  { %v1214_v3 = vadd.f32 %v14993_v30, %v1213_v2  ;;  %13116 = vmatprep.mubr.msk.f32.mxu0 %vm20584_vm2, %v1330_v0  ;;  %v1333_v4 = vmax.f32 %v1219_v1, 0.0 }
 0x1c6   :  { %v13068_v5 = vpop.f32.mrf.mxu1  ;;  %13117 = vmatmul.mubr.msk.f32.gmra.mxu0 %vm20584_vm2, %v1331_v62 }
 0x1c7   :  { %v1332_v6 = vmax.f32 %v1214_v3, 0.0  ;;  %v1229_v7 = vadd.f32 %v13068_v5, %v14993_v30  ;;  %v987_v3 = vld [vmem:[%s20328_s7 + $0x78] sm:$0xff]  ;;  %v984_v5 = vld [vmem:[%s20328_s7 + $0x60] sm:$0xff] }
 0x1c8   :  { %v1223_v8 = vpop.f32.mrf.mxu1  ;;  %13152 = vmatprep.subr.mxu1 %v987_v3 }
 0x1c9   :  { %v1224_v9 = vadd.f32 %v14993_v30, %v1223_v8  ;;  %13119 = vmatprep.mubr.msk.f32.mxu0 %vm20584_vm2, %v1332_v6  ;;  %v1335_v10 = vmax.f32 %v1229_v7, 0.0  ;;  %13153 = vmatpush3.msra.mxu1 %v987_v3  ;;  %v11059_v7 = vld [vmem:[%s20330_s8 + $0x10] ss:$0 sm:$0xff] }
 0x1ca   :  { %v13071_v11 = vpop.f32.mrf.mxu1  ;;  %13120 = vmatmul.mubr.msk.f32.gmra.mxu0 %vm20584_vm2, %v1333_v4  ;;  %v986_v4 = vld [vmem:[%s20328_s7 + $0x70] sm:$0xff] }
 0x1cb   :  { %v1334_v12 = vmax.f32 %v1224_v9, 0.0  ;;  %v1239_v13 = vadd.f32 %v13071_v11, %v14993_v30  ;;  %13154 = vmatprep.subr.mxu1 %v986_v4 }
 0x1cc   :  { %v1233_v14 = vpop.f32.mrf.mxu1  ;;  %13155 = vmatpush3.msra.mxu1 %v986_v4 }
 0x1cd   :  { %v1234_v15 = vadd.f32 %v14993_v30, %v1233_v14  ;;  %13122 = vmatprep.mubr.msk.f32.mxu0 %vm20584_vm2, %v1334_v12  ;;  %v1337_v16 = vmax.f32 %v1239_v13, 0.0 }
 0x1ce   :  { %v13074_v17 = vpop.f32.mrf.mxu1  ;;  %13123 = vmatmul.mubr.msk.f32.gmra.mxu0 %vm20584_vm2, %v1335_v10 }
 0x1cf   :  { %v1336_v18 = vmax.f32 %v1234_v15, 0.0  ;;  %v1249_v19 = vadd.f32 %v13074_v17, %v14993_v30 }
 0x1d0   :  { %v1243_v20 = vpop.f32.mrf.mxu1 }
 0x1d1   :  { %v1244_v21 = vadd.f32 %v14993_v30, %v1243_v20  ;;  %13125 = vmatprep.mubr.msk.f32.mxu0 %vm20584_vm2, %v1336_v18  ;;  %v1339_v22 = vmax.f32 %v1249_v19, 0.0 }
 0x1d2   :  { %v13077_v23 = vpop.f32.mrf.mxu1  ;;  %13126 = vmatmul.mubr.msk.f32.gmra.mxu0 %vm20584_vm2, %v1337_v16 }
 0x1d3   :  { %v1338_v24 = vmax.f32 %v1244_v21, 0.0  ;;  %v1259_v25 = vadd.f32 %v13077_v23, %v14993_v30 }
 0x1d4   :  { %v1253_v26 = vpop.f32.mrf.mxu1 }
 0x1d5   :  { %v1254_v27 = vadd.f32 %v14993_v30, %v1253_v26  ;;  %13128 = vmatprep.mubr.msk.f32.mxu0 %vm20584_vm2, %v1338_v24  ;;  %v1341_v28 = vmax.f32 %v1259_v25, 0.0 }
 0x1d6   :  { %v13080_v29 = vpop.f32.mrf.mxu1  ;;  %13129 = vmatmul.mubr.msk.f32.gmra.mxu0 %vm20584_vm2, %v1339_v22 }
 0x1d7   :  { %v1340_v31 = vmax.f32 %v1254_v27, 0.0  ;;  %v1269_v32 = vadd.f32 %v13080_v29, %v14993_v30 }
 0x1d8   :  { %v1263_v33 = vpop.f32.mrf.mxu1 }
 0x1d9   :  { %v1264_v34 = vadd.f32 %v14993_v30, %v1263_v33  ;;  %13131 = vmatprep.mubr.msk.f32.mxu0 %vm20584_vm2, %v1340_v31  ;;  %v1343_v35 = vmax.f32 %v1269_v32, 0.0 }
 0x1da   :  { %v13083_v36 = vpop.f32.mrf.mxu1  ;;  %13132 = vmatmul.mubr.msk.f32.gmra.mxu0 %vm20584_vm2, %v1341_v28 }
 0x1db   :  { %v1342_v37 = vmax.f32 %v1264_v34, 0.0  ;;  %v1279_v38 = vadd.f32 %v13083_v36, %v14993_v30 }
 0x1dc   :  { %v1273_v39 = vpop.f32.mrf.mxu1 }
 0x1dd   :  { %v1274_v40 = vadd.f32 %v14993_v30, %v1273_v39  ;;  %13134 = vmatprep.mubr.msk.f32.mxu0 %vm20584_vm2, %v1342_v37  ;;  %v1345_v41 = vmax.f32 %v1279_v38, 0.0 }
 0x1de   :  { %13135 = vmatmul.mubr.msk.f32.gmra.mxu0 %vm20584_vm2, %v1343_v35  ;;  %v13086_v42 = vpop.f32.mrf.mxu1 }
 0x1df   :  { %v1344_v43 = vmax.f32 %v1274_v40, 0.0  ;;  %v1289_v44 = vadd.f32 %v13086_v42, %v14993_v30 }
 0x1e0   :  { %v1283_v45 = vpop.f32.mrf.mxu1 }
 0x1e1   :  { %13137 = vmatprep.mubr.msk.f32.mxu0 %vm20584_vm2, %v1344_v43  ;;  %v1284_v46 = vadd.f32 %v14993_v30, %v1283_v45  ;;  %v1347_v47 = vmax.f32 %v1289_v44, 0.0 }
 0x1e2   :  { %13138 = vmatmul.mubr.msk.f32.gmra.mxu0 %vm20584_vm2, %v1345_v41  ;;  %v13089_v48 = vpop.f32.mrf.mxu1 }
 0x1e3   :  { %v1346_v49 = vmax.f32 %v1284_v46, 0.0  ;;  %v1299_v50 = vadd.f32 %v13089_v48, %v14993_v30 }
 0x1e4   :  { %v1293_v51 = vpop.f32.mrf.mxu1 }
 0x1e5   :  { %v1294_v52 = vadd.f32 %v14993_v30, %v1293_v51  ;;  %13140 = vmatprep.mubr.msk.f32.mxu0 %vm20584_vm2, %v1346_v49  ;;  %v1349_v53 = vmax.f32 %v1299_v50, 0.0  ;;  %v15136_v51 = vld [vmem:[%s20330_s8 + $0x30] ss:$0 sm:$0xff] }
 0x1e6   :  { %v13092_v54 = vpop.f32.mrf.mxu1  ;;  %13141 = vmatmul.mubr.msk.f32.gmra.mxu0 %vm20584_vm2, %v1347_v47 }
 0x1e7   :  { %v1348_v55 = vmax.f32 %v1294_v52, 0.0  ;;  %v1309_v56 = vadd.f32 %v13092_v54, %v14993_v30 }
 0x1e8   :  { %v1303_v57 = vpop.f32.mrf.mxu1 }
 0x1e9   :  { %v1304_v58 = vadd.f32 %v14993_v30, %v1303_v57  ;;  %13143 = vmatprep.mubr.msk.f32.mxu0 %vm20584_vm2, %v1348_v55  ;;  %v1351_v59 = vmax.f32 %v1309_v56, 0.0 }
 0x1ea   :  { %v13095_v60 = vpop.f32.mrf.mxu1  ;;  %13144 = vmatmul.mubr.msk.f32.gmra.mxu0 %vm20584_vm2, %v1349_v53 }
 0x1eb   :  { %v1350_v61 = vmax.f32 %v1304_v58, 0.0  ;;  %v1319_v62 = vadd.f32 %v13095_v60, %v14993_v30 }
 0x1ec   :  { %v1313_v63 = vpop.f32.mrf.mxu1 }
 0x1ed   :  { %v1314_v0 = vadd.f32 %v14993_v30, %v1313_v63  ;;  %13146 = vmatprep.mubr.msk.f32.mxu0 %vm20584_vm2, %v1350_v61  ;;  %v1353_v1 = vmax.f32 %v1319_v62, 0.0  ;;  %v985_v30 = vld [vmem:[%s20328_s7 + $0x68] sm:$0xff] }
 0x1ee   :  { %13147 = vmatmul.mubr.msk.f32.gmra.mxu0 %vm20584_vm2, %v1351_v59  ;;  %13156 = vmatprep.subr.mxu1 %v985_v30 }
 0x1ef   :  { %v1352_v2 = vmax.f32 %v1314_v0, 0.0  ;;  %13157 = vmatpush3.msra.mxu1 %v985_v30 }
 0x1f0   :  { %13158 = vmatprep.subr.mxu1 %v984_v5 }
 0x1f1   :  { %13149 = vmatprep.mubr.msk.f32.mxu0 %vm20584_vm2, %v1352_v2  ;;  %13159 = vmatpush3.msra.mxu1 %v984_v5 }
 0x1f2   :  { %13150 = vmatmul.mubr.msk.f32.gmra.mxu0 %vm20584_vm2, %v1353_v1 }
 0x256   :  { %v13024_v6 = vpop.f32.mrf.mxu0 }
 0x257   :  { %v15081_v11 = vadd.f32 %v13024_v6, %v11059_v7 }
 0x258   :  { %v651_v8 = vpop.f32.mrf.mxu0 }
 0x259   :  { %v15079_v9 = vadd.f32 %v11059_v7, %v651_v8  ;;  %v733_v18 = vsel %vm20584_vm2, %v15081_v11, 0.0 }
 0x25a   :  { %v13027_v10 = vpop.f32.mrf.mxu0 }
 0x25b   :  { %v730_v12 = vsel %vm20584_vm2, %v15079_v9, 0.0  ;;  %v15087_v16 = vadd.f32 %v13027_v10, %v11059_v7 }
 0x25c   :  { %v661_v13 = vpop.f32.mrf.mxu0  ;;  %731 = vadd.xlane.f32.xlu0 %v730_v12 }
 0x25d   :  { %v15085_v14 = vadd.f32 %v11059_v7, %v661_v13  ;;  %v739_v23 = vsel %vm20584_vm2, %v15087_v16, 0.0 }
 0x25e   :  { %v13030_v15 = vpop.f32.mrf.mxu0 }
 0x25f   :  { %v736_v17 = vsel %vm20584_vm2, %v15085_v14, 0.0  ;;  %v15095_v22 = vadd.f32 %v13030_v15, %v11059_v7 }
 0x260   :  { %v671_v19 = vpop.f32.mrf.mxu0  ;;  %737 = vadd.xlane.f32.xlu1 %v736_v17  ;;  %734 = vadd.xlane.f32.xlu0 %v733_v18 }
 0x261   :  { %v15093_v20 = vadd.f32 %v11059_v7, %v671_v19  ;;  %v745_v29 = vsel %vm20584_vm2, %v15095_v22, 0.0 }
 0x262   :  { %v13033_v21 = vpop.f32.mrf.mxu0 }
 0x263   :  { %v742_v24 = vsel %vm20584_vm2, %v15093_v20, 0.0  ;;  %v15103_v28 = vadd.f32 %v13033_v21, %v11059_v7 }
 0x264   :  { %v681_v25 = vpop.f32.mrf.mxu0  ;;  %740 = vadd.xlane.f32.xlu1 %v739_v23  ;;  %743 = vadd.xlane.f32.xlu0 %v742_v24 }
 0x265   :  { %v15101_v26 = vadd.f32 %v11059_v7, %v681_v25  ;;  %v751_v36 = vsel %vm20584_vm2, %v15103_v28, 0.0 }
 0x266   :  { %v13036_v27 = vpop.f32.mrf.mxu0 }
 0x267   :  { %v748_v31 = vsel %vm20584_vm2, %v15101_v26, 0.0  ;;  %v15111_v35 = vadd.f32 %v13036_v27, %v11059_v7 }
 0x268   :  { %v691_v32 = vpop.f32.mrf.mxu0  ;;  %746 = vadd.xlane.f32.xlu1 %v745_v29  ;;  %749 = vadd.xlane.f32.xlu0 %v748_v31 }
 0x269   :  { %v15109_v33 = vadd.f32 %v11059_v7, %v691_v32  ;;  %v757_v42 = vsel %vm20584_vm2, %v15111_v35, 0.0 }
 0x26a   :  { %v13039_v34 = vpop.f32.mrf.mxu0 }
 0x26b   :  { %v754_v37 = vsel %vm20584_vm2, %v15109_v33, 0.0  ;;  %v15119_v41 = vadd.f32 %v13039_v34, %v11059_v7 }
 0x26c   :  { %v701_v38 = vpop.f32.mrf.mxu0  ;;  %752 = vadd.xlane.f32.xlu1 %v751_v36  ;;  %755 = vadd.xlane.f32.xlu0 %v754_v37 }
 0x26d   :  { %v15117_v39 = vadd.f32 %v11059_v7, %v701_v38  ;;  %v763_v48 = vsel %vm20584_vm2, %v15119_v41, 0.0 }
 0x26e   :  { %v13042_v40 = vpop.f32.mrf.mxu0 }
 0x26f   :  { %v760_v43 = vsel %vm20584_vm2, %v15117_v39, 0.0  ;;  %v15127_v47 = vadd.f32 %v13042_v40, %v11059_v7  ;;  %v14636_v40 = vmov 0  }
 0x270   :  { %v711_v44 = vpop.f32.mrf.mxu0  ;;  %758 = vadd.xlane.f32.xlu1 %v757_v42  ;;  %761 = vadd.xlane.f32.xlu0 %v760_v43 }
 0x271   :  { %v15125_v45 = vadd.f32 %v11059_v7, %v711_v44  ;;  %v769_v55 = vsel %vm20584_vm2, %v15127_v47, 0.0  ;;  %14347 = vset.pattern.permute.xlu1 %v14636_v40  ;;  %14346 = vset.pattern.permute.xlu0 %v14636_v40 }
 0x272   :  { %v13045_v46 = vpop.f32.mrf.mxu0 }
 0x273   :  { %v766_v49 = vsel %vm20584_vm2, %v15125_v45, 0.0  ;;  %v15140_v54 = vadd.f32 %v13045_v46, %v11059_v7 }
 0x274   :  { %v721_v50 = vpop.f32.mrf.mxu0  ;;  %764 = vadd.xlane.f32.xlu1 %v763_v48  ;;  %767 = vadd.xlane.f32.xlu0 %v766_v49 }
 0x275   :  { %v15138_v52 = vadd.f32 %v11059_v7, %v721_v50  ;;  %v775_v62 = vsel %vm20584_vm2, %v15140_v54, 0.0 }
 0x276   :  { %v13106_v53 = vpop.f32.mrf.mxu0 }
 0x277   :  { %v772_v56 = vsel %vm20584_vm2, %v15138_v52, 0.0  ;;  %v1526_v57 = vadd.f32 %v13106_v53, %v15136_v51 }
 0x278   :  { %770 = vadd.xlane.f32.xlu1 %v769_v55  ;;  %773 = vadd.xlane.f32.xlu0 %v772_v56  ;;  %v1520_v58 = vpop.f32.mrf.mxu0 }
 0x279   :  { %v1521_v59 = vadd.f32 %v15136_v51, %v1520_v58  ;;  %v1680_v60 = vmax.f32 %v1526_v57, 0.0 }
 0x27a   :  { %v13109_v61 = vpop.f32.mrf.mxu0 }
 0x27b   :  { %v1679_v63 = vmax.f32 %v1521_v59, 0.0  ;;  %v1536_v0 = vadd.f32 %v13109_v61, %v15136_v51 }
 0x27c   :  { %776 = vadd.xlane.f32.xlu1 %v775_v62  ;;  %v1530_v1 = vpop.f32.mrf.mxu0 }
 0x27d   :  { %v1531_v2 = vadd.f32 %v15136_v51, %v1530_v1  ;;  %13160 = vmatprep.mubr.msk.f32.mxu1 %vm20584_vm2, %v1679_v63  ;;  %v1682_v3 = vmax.f32 %v1536_v0, 0.0 }
 0x27e   :  { %v13112_v4 = vpop.f32.mrf.mxu0  ;;  %13161 = vmatmul.mubr.msk.f32.vlgmr.msra.gmra.mxu1 %vm20584_vm2, %v1680_v60 }
 0x27f   :  { %v1681_v30 = vmax.f32 %v1531_v2, 0.0  ;;  %v1546_v5 = vadd.f32 %v13112_v4, %v15136_v51 }
 0x280   :  { %v1540_v6 = vpop.f32.mrf.mxu0 }
 0x281   :  { %v1541_v7 = vadd.f32 %v15136_v51, %v1540_v6  ;;  %13163 = vmatprep.mubr.msk.f32.mxu1 %vm20584_vm2, %v1681_v30  ;;  %v1684_v8 = vmax.f32 %v1546_v5, 0.0 }
 0x282   :  { %v13115_v10 = vpop.f32.mrf.mxu0  ;;  %13164 = vmatmul.mubr.msk.f32.gmra.mxu1 %vm20584_vm2, %v1682_v3 }
 0x283   :  { %v1683_v12 = vmax.f32 %v1541_v7, 0.0  ;;  %v1556_v13 = vadd.f32 %v13115_v10, %v15136_v51 }
 0x284   :  { %v1550_v15 = vpop.f32.mrf.mxu0 }
 0x285   :  { %v1551_v17 = vadd.f32 %v15136_v51, %v1550_v15  ;;  %13166 = vmatprep.mubr.msk.f32.mxu1 %vm20584_vm2, %v1683_v12  ;;  %v1686_v18 = vmax.f32 %v1556_v13, 0.0 }
 0x286   :  { %v13118_v19 = vpop.f32.mrf.mxu0  ;;  %13167 = vmatmul.mubr.msk.f32.gmra.mxu1 %vm20584_vm2, %v1684_v8 }
 0x287   :  { %v1685_v21 = vmax.f32 %v1551_v17, 0.0  ;;  %v1566_v23 = vadd.f32 %v13118_v19, %v15136_v51 }
 0x288   :  { %v1560_v24 = vpop.f32.mrf.mxu0 }
 0x289   :  { %v1561_v25 = vadd.f32 %v15136_v51, %v1560_v24  ;;  %13169 = vmatprep.mubr.msk.f32.mxu1 %vm20584_vm2, %v1685_v21  ;;  %v1688_v27 = vmax.f32 %v1566_v23, 0.0 }
 0x28a   :  { %v13121_v29 = vpop.f32.mrf.mxu0  ;;  %13170 = vmatmul.mubr.msk.f32.gmra.mxu1 %vm20584_vm2, %v1686_v18 }
 0x28b   :  { %v1687_v31 = vmax.f32 %v1561_v25, 0.0  ;;  %v1576_v32 = vadd.f32 %v13121_v29, %v15136_v51 }
 0x28c   :  { %v1570_v34 = vpop.f32.mrf.mxu0 }
 0x28d   :  { %v1571_v36 = vadd.f32 %v15136_v51, %v1570_v34  ;;  %13172 = vmatprep.mubr.msk.f32.mxu1 %vm20584_vm2, %v1687_v31  ;;  %v1690_v37 = vmax.f32 %v1576_v32, 0.0 }
 0x28e   :  { %v13124_v38 = vpop.f32.mrf.mxu0  ;;  %13173 = vmatmul.mubr.msk.f32.gmra.mxu1 %vm20584_vm2, %v1688_v27 }
 0x28f   :  { %v1689_v42 = vmax.f32 %v1571_v36, 0.0  ;;  %v1586_v43 = vadd.f32 %v13124_v38, %v15136_v51 }
 0x290   :  { %v1580_v44 = vpop.f32.mrf.mxu0 }
 0x291   :  { %v1581_v46 = vadd.f32 %v15136_v51, %v1580_v44  ;;  %13175 = vmatprep.mubr.msk.f32.mxu1 %vm20584_vm2, %v1689_v42  ;;  %v1692_v48 = vmax.f32 %v1586_v43, 0.0 }
 0x292   :  { %v13127_v49 = vpop.f32.mrf.mxu0  ;;  %13176 = vmatmul.mubr.msk.f32.gmra.mxu1 %vm20584_vm2, %v1690_v37 }
 0x293   :  { %v1691_v50 = vmax.f32 %v1581_v46, 0.0  ;;  %v1596_v53 = vadd.f32 %v13127_v49, %v15136_v51 }
 0x294   :  { %v1590_v55 = vpop.f32.mrf.mxu0 }
 0x295   :  { %v1591_v56 = vadd.f32 %v15136_v51, %v1590_v55  ;;  %13178 = vmatprep.mubr.msk.f32.mxu1 %vm20584_vm2, %v1691_v50  ;;  %v1694_v57 = vmax.f32 %v1596_v53, 0.0 }
 0x296   :  { %v13130_v58 = vpop.f32.mrf.mxu0  ;;  %13179 = vmatmul.mubr.msk.f32.gmra.mxu1 %vm20584_vm2, %v1692_v48 }
 0x297   :  { %v1693_v59 = vmax.f32 %v1591_v56, 0.0  ;;  %v1606_v60 = vadd.f32 %v13130_v58, %v15136_v51 }
 0x298   :  { %v1600_v61 = vpop.f32.mrf.mxu0 }
 0x299   :  { %v1601_v62 = vadd.f32 %v15136_v51, %v1600_v61  ;;  %13181 = vmatprep.mubr.msk.f32.mxu1 %vm20584_vm2, %v1693_v59  ;;  %v1696_v63 = vmax.f32 %v1606_v60, 0.0 }
 0x29a   :  { %v13133_v0 = vpop.f32.mrf.mxu0  ;;  %13182 = vmatmul.mubr.msk.f32.gmra.mxu1 %vm20584_vm2, %v1694_v57 }
 0x29b   :  { %v1695_v1 = vmax.f32 %v1601_v62, 0.0  ;;  %v1616_v2 = vadd.f32 %v13133_v0, %v15136_v51 }
 0x29c   :  { %v1610_v3 = vpop.f32.mrf.mxu0 }
 0x29d   :  { %v1611_v4 = vadd.f32 %v15136_v51, %v1610_v3  ;;  %13184 = vmatprep.mubr.msk.f32.mxu1 %vm20584_vm2, %v1695_v1  ;;  %v1698_v30 = vmax.f32 %v1616_v2, 0.0 }
 0x29e   :  { %v13136_v5 = vpop.f32.mrf.mxu0  ;;  %13185 = vmatmul.mubr.msk.f32.gmra.mxu1 %vm20584_vm2, %v1696_v63 }
 0x29f   :  { %v1697_v6 = vmax.f32 %v1611_v4, 0.0  ;;  %v1626_v7 = vadd.f32 %v13136_v5, %v15136_v51 }
 0x2a0   :  { %v1620_v8 = vpop.f32.mrf.mxu0 }
 0x2a1   :  { %v1621_v10 = vadd.f32 %v15136_v51, %v1620_v8  ;;  %13187 = vmatprep.mubr.msk.f32.mxu1 %vm20584_vm2, %v1697_v6  ;;  %v1700_v12 = vmax.f32 %v1626_v7, 0.0 }
 0x2a2   :  { %v13139_v13 = vpop.f32.mrf.mxu0  ;;  %13188 = vmatmul.mubr.msk.f32.gmra.mxu1 %vm20584_vm2, %v1698_v30 }
 0x2a3   :  { %v1699_v15 = vmax.f32 %v1621_v10, 0.0  ;;  %v1636_v17 = vadd.f32 %v13139_v13, %v15136_v51 }
 0x2a4   :  { %v1630_v18 = vpop.f32.mrf.mxu0 }
 0x2a5   :  { %v1631_v19 = vadd.f32 %v15136_v51, %v1630_v18  ;;  %13190 = vmatprep.mubr.msk.f32.mxu1 %vm20584_vm2, %v1699_v15  ;;  %v1702_v21 = vmax.f32 %v1636_v17, 0.0 }
 0x2a6   :  { %13191 = vmatmul.mubr.msk.f32.gmra.mxu1 %vm20584_vm2, %v1700_v12  ;;  %v13142_v23 = vpop.f32.mrf.mxu0 }
 0x2a7   :  { %v1701_v24 = vmax.f32 %v1631_v19, 0.0  ;;  %v1646_v25 = vadd.f32 %v13142_v23, %v15136_v51 }
 0x2a8   :  { %v1640_v27 = vpop.f32.mrf.mxu0 }
 0x2a9   :  { %13193 = vmatprep.mubr.msk.f32.mxu1 %vm20584_vm2, %v1701_v24  ;;  %v1641_v29 = vadd.f32 %v15136_v51, %v1640_v27  ;;  %v1704_v31 = vmax.f32 %v1646_v25, 0.0 }
 0x2aa   :  { %13194 = vmatmul.mubr.msk.f32.gmra.mxu1 %vm20584_vm2, %v1702_v21  ;;  %v13145_v32 = vpop.f32.mrf.mxu0 }
 0x2ab   :  { %v1703_v34 = vmax.f32 %v1641_v29, 0.0  ;;  %v1656_v36 = vadd.f32 %v13145_v32, %v15136_v51 }
 0x2ac   :  { %v1650_v37 = vpop.f32.mrf.mxu0 }
 0x2ad   :  { %v1651_v38 = vadd.f32 %v15136_v51, %v1650_v37  ;;  %13196 = vmatprep.mubr.msk.f32.mxu1 %vm20584_vm2, %v1703_v34  ;;  %v1706_v40 = vmax.f32 %v1656_v36, 0.0 }
 0x2ae   :  { %v13148_v42 = vpop.f32.mrf.mxu0  ;;  %13197 = vmatmul.mubr.msk.f32.gmra.mxu1 %vm20584_vm2, %v1704_v31 }
 0x2af   :  { %v1705_v43 = vmax.f32 %v1651_v38, 0.0  ;;  %v1666_v44 = vadd.f32 %v13148_v42, %v15136_v51 }
 0x2b0   :  { %v1660_v46 = vpop.f32.mrf.mxu0 }
 0x2b1   :  { %v1661_v48 = vadd.f32 %v15136_v51, %v1660_v46  ;;  %13199 = vmatprep.mubr.msk.f32.mxu1 %vm20584_vm2, %v1705_v43  ;;  %v1708_v49 = vmax.f32 %v1666_v44, 0.0 }
 0x2b2   :  { %v13151_v50 = vpop.f32.mrf.mxu0  ;;  %13200 = vmatmul.mubr.msk.f32.gmra.mxu1 %vm20584_vm2, %v1706_v40 }
 0x2b3   :  { %v1707_v53 = vmax.f32 %v1661_v48, 0.0  ;;  %v1676_v55 = vadd.f32 %v13151_v50, %v15136_v51 }
 0x2b4   :  { %v1670_v56 = vpop.f32.mrf.mxu0 }
 0x2b5   :  { %v1671_v57 = vadd.f32 %v15136_v51, %v1670_v56  ;;  %13202 = vmatprep.mubr.msk.f32.mxu1 %vm20584_vm2, %v1707_v53  ;;  %v1710_v58 = vmax.f32 %v1676_v55, 0.0 }
 0x2b6   :  { %13203 = vmatmul.mubr.msk.f32.gmra.mxu1 %vm20584_vm2, %v1708_v49 }
 0x2b7   :  { %v1709_v59 = vmax.f32 %v1671_v57, 0.0 }
 0x2b9   :  { %13205 = vmatprep.mubr.msk.f32.mxu1 %vm20584_vm2, %v1709_v59 }
 0x2ba   :  { %13206 = vmatmul.mubr.msk.f32.gmra.mxu1 %vm20584_vm2, %v1710_v58 }
 0x2e5   :  { %v732_v60 = vpop.xlane.xlu0 %731 }
 0x2e6   :  { %v779_v61 = vmul.f32 0.03125, %v732_v60 }
 0x2e8   :  { %v15213_v62 = vsub.f32 %v15079_v9, %v779_v61 }
 0x2e9   :  { %v738_v63 = vpop.xlane.xlu1 %737  ;;  %v735_v0 = vpop.xlane.xlu0 %734 }
 0x2ea   :  { %v781_v1 = vmul.f32 0.03125, %v738_v63  ;;  %v780_v2 = vmul.f32 0.03125, %v735_v0  ;;  %v811_v51 = vmul.f32 %v15213_v62, %v15213_v62 }
 0x2ec   :  { %v15218_v3 = vsub.f32 %v15085_v14, %v781_v1  ;;  %v15221_v4 = vsub.f32 %v15081_v11, %v780_v2  ;;  %v827_v30 = vsel %vm20584_vm2, %v811_v51, 0.0 }
 0x2ed   :  { %v741_v5 = vpop.xlane.xlu1 %740  ;;  %828 = vadd.xlane.f32.xlu0 %v827_v30  ;;  %v744_v6 = vpop.xlane.xlu0 %743 }
 0x2ee   :  { %v782_v9 = vmul.f32 0.03125, %v741_v5  ;;  %v783_v7 = vmul.f32 0.03125, %v744_v6  ;;  %v813_v8 = vmul.f32 %v15218_v3, %v15218_v3  ;;  %v812_v10 = vmul.f32 %v15221_v4, %v15221_v4 }
 0x2f0   :  { %v15229_v12 = vsub.f32 %v15087_v16, %v782_v9  ;;  %v15232_v14 = vsub.f32 %v15093_v20, %v783_v7  ;;  %v833_v11 = vsel %vm20584_vm2, %v813_v8, 0.0  ;;  %v830_v13 = vsel %vm20584_vm2, %v812_v10, 0.0 }
 0x2f1   :  { %v747_v15 = vpop.xlane.xlu1 %746  ;;  %834 = vadd.xlane.f32.xlu0 %v833_v11  ;;  %831 = vadd.xlane.f32.xlu1 %v830_v13  ;;  %v750_v17 = vpop.xlane.xlu0 %749 }
 0x2f2   :  { %v784_v18 = vmul.f32 0.03125, %v747_v15  ;;  %v785_v19 = vmul.f32 0.03125, %v750_v17  ;;  %v814_v21 = vmul.f32 %v15229_v12, %v15229_v12  ;;  %v815_v16 = vmul.f32 %v15232_v14, %v15232_v14  ;;  %v3099_v15 = vld [vmem:[%s20328_s7 + $0x98] sm:$0xff] }
 0x2f3   :  { %13208 = vmatprep.subr.mxu0 %v3099_v15 }
 0x2f4   :  { %v15241_v23 = vsub.f32 %v15095_v22, %v784_v18  ;;  %v15244_v20 = vsub.f32 %v15101_v26, %v785_v19  ;;  %v836_v24 = vsel %vm20584_vm2, %v814_v21, 0.0  ;;  %v839_v25 = vsel %vm20584_vm2, %v815_v16, 0.0  ;;  %13209 = vmatpush3.msra.mxu0 %v3099_v15  ;;  %v3097_v18 = vld [vmem:[%s20328_s7 + $0x88] sm:$0xff]  ;;  %v3096_v19 = vld [vmem:[%s20328_s7 + $0x80] sm:$0xff] }
 0x2f5   :  { %v753_v27 = vpop.xlane.xlu1 %752  ;;  %837 = vadd.xlane.f32.xlu1 %v836_v24  ;;  %840 = vadd.xlane.f32.xlu0 %v839_v25  ;;  %v756_v29 = vpop.xlane.xlu0 %755  ;;  %v2751_v21 = vld [vmem:[%s20332_s0 + $0x8] sm:$0xff]  ;;  %v2750_v16 = vld [vmem:[%s20332_s0] sm:$0xff]  ;;  %v2753_v24 = vld [vmem:[%s20332_s0 + $0x18] sm:$0xff] }
 0x2f6   :  { %v786_v31 = vmul.f32 0.03125, %v753_v27  ;;  %v787_v32 = vmul.f32 0.03125, %v756_v29  ;;  %v816_v34 = vmul.f32 %v15241_v23, %v15241_v23  ;;  %v817_v22 = vmul.f32 %v15244_v20, %v15244_v20  ;;  %v2752_v25 = vld [vmem:[%s20332_s0 + $0x10] sm:$0xff]  ;;  %v2755_v27 = vld [vmem:[%s20332_s0 + $0x28] sm:$0xff]  ;;  %v2754_v29 = vld [vmem:[%s20332_s0 + $0x20] sm:$0xff] }
 0x2f7   :  { %v2778_v15 = vld [vmem:[%s20332_s0 + $0xe0] sm:$0xff] }
 0x2f8   :  { %v15253_v36 = vsub.f32 %v15103_v28, %v786_v31  ;;  %v15256_v26 = vsub.f32 %v15109_v33, %v787_v32  ;;  %v842_v37 = vsel %vm20584_vm2, %v816_v34, 0.0  ;;  %v845_v38 = vsel %vm20584_vm2, %v817_v22, 0.0  ;;  %v2757_v31 = vld [vmem:[%s20332_s0 + $0x38] sm:$0xff]  ;;  %v2756_v32 = vld [vmem:[%s20332_s0 + $0x30] sm:$0xff]  ;;  %v2759_v34 = vld [vmem:[%s20332_s0 + $0x48] sm:$0xff] }
 0x2f9   :  { %v759_v40 = vpop.xlane.xlu1 %758  ;;  %843 = vadd.xlane.f32.xlu1 %v842_v37  ;;  %846 = vadd.xlane.f32.xlu0 %v845_v38  ;;  %v762_v42 = vpop.xlane.xlu0 %761  ;;  %v15350_v22 = vld [vmem:[%s20328_s7 + $0xb8] sm:$0xff]  ;;  %v2758_v37 = vld [vmem:[%s20332_s0 + $0x40] sm:$0xff]  ;;  %v2764_v38 = vld [vmem:[%s20332_s0 + $0x70] sm:$0xff] }
 0x2fa   :  { %v788_v43 = vmul.f32 0.03125, %v759_v40  ;;  %v789_v44 = vmul.f32 0.03125, %v762_v42  ;;  %v818_v46 = vmul.f32 %v15253_v36, %v15253_v36  ;;  %v819_v28 = vmul.f32 %v15256_v26, %v15256_v26  ;;  %v2760_v40 = vld [vmem:[%s20332_s0 + $0x50] sm:$0xff]  ;;  %v2769_v42 = vld [vmem:[%s20332_s0 + $0x98] sm:$0xff] }
 0x2fc   :  { %v15265_v48 = vsub.f32 %v15111_v35, %v788_v43  ;;  %v15268_v33 = vsub.f32 %v15117_v39, %v789_v44  ;;  %v848_v49 = vsel %vm20584_vm2, %v818_v46, 0.0  ;;  %v851_v50 = vsel %vm20584_vm2, %v819_v28, 0.0  ;;  %v2761_v43 = vld [vmem:[%s20332_s0 + $0x58] sm:$0xff]  ;;  %v2771_v44 = vld [vmem:[%s20332_s0 + $0xa8] sm:$0xff]  ;;  %v2762_v46 = vld [vmem:[%s20332_s0 + $0x60] sm:$0xff] }
 0x2fd   :  { %v765_v53 = vpop.xlane.xlu1 %764  ;;  %849 = vadd.xlane.f32.xlu1 %v848_v49  ;;  %852 = vadd.xlane.f32.xlu0 %v851_v50  ;;  %v768_v55 = vpop.xlane.xlu0 %767  ;;  %v2773_v28 = vld [vmem:[%s20332_s0 + $0xb8] sm:$0xff]  ;;  %v2763_v49 = vld [vmem:[%s20332_s0 + $0x68] sm:$0xff] }
 0x2fe   :  { %v790_v56 = vmul.f32 0.03125, %v765_v53  ;;  %v791_v57 = vmul.f32 0.03125, %v768_v55  ;;  %v820_v58 = vmul.f32 %v15265_v48, %v15265_v48  ;;  %v821_v35 = vmul.f32 %v15268_v33, %v15268_v33  ;;  %v2775_v50 = vld [vmem:[%s20332_s0 + $0xc8] sm:$0xff]  ;;  %v2765_v53 = vld [vmem:[%s20332_s0 + $0x78] sm:$0xff] }
 0x2ff   :  { %v2777_v55 = vld [vmem:[%s20332_s0 + $0xd8] sm:$0xff] }
 0x300   :  { %v15277_v59 = vsub.f32 %v15119_v41, %v790_v56  ;;  %v15280_v39 = vsub.f32 %v15125_v45, %v791_v57  ;;  %v854_v60 = vsel %vm20584_vm2, %v820_v58, 0.0  ;;  %v857_v61 = vsel %vm20584_vm2, %v821_v35, 0.0  ;;  %v2766_v57 = vld [vmem:[%s20332_s0 + $0x80] sm:$0xff]  ;;  %v2779_v58 = vld [vmem:[%s20332_s0 + $0xe8] sm:$0xff] }
 0x301   :  { %v771_v63 = vpop.xlane.xlu1 %770  ;;  %855 = vadd.xlane.f32.xlu1 %v854_v60  ;;  %858 = vadd.xlane.f32.xlu0 %v857_v61  ;;  %v774_v0 = vpop.xlane.xlu0 %773  ;;  %v2767_v60 = vld [vmem:[%s20332_s0 + $0x88] sm:$0xff]  ;;  %v2781_v61 = vld [vmem:[%s20332_s0 + $0xf8] sm:$0xff] }
 0x302   :  { %v792_v1 = vmul.f32 0.03125, %v771_v63  ;;  %v793_v2 = vmul.f32 0.03125, %v774_v0  ;;  %v822_v51 = vmul.f32 %v15277_v59, %v15277_v59  ;;  %v823_v41 = vmul.f32 %v15280_v39, %v15280_v39  ;;  %v2768_v0 = vld [vmem:[%s20332_s0 + $0x90] sm:$0xff] }
 0x304   :  { %v15289_v30 = vsub.f32 %v15127_v47, %v792_v1  ;;  %v15292_v45 = vsub.f32 %v15138_v52, %v793_v2  ;;  %v860_v5 = vsel %vm20584_vm2, %v822_v51, 0.0  ;;  %v863_v6 = vsel %vm20584_vm2, %v823_v41, 0.0  ;;  %v2526_v1 = vld [vmem:[%s20333_s1] sm:$0xff]  ;;  %v2528_v41 = vld [vmem:[%s20333_s1 + $0x10] sm:$0xff] }
 0x305   :  { %v777_v9 = vpop.xlane.xlu1 %776  ;;  %861 = vadd.xlane.f32.xlu1 %v860_v5  ;;  %864 = vadd.xlane.f32.xlu0 %v863_v6  ;;  %v2770_v51 = vld [vmem:[%s20332_s0 + $0xa0] sm:$0xff]  ;;  %v2772_v6 = vld [vmem:[%s20332_s0 + $0xb0] sm:$0xff] }
 0x306   :  { %v794_v7 = vmul.f32 0.03125, %v777_v9  ;;  %v824_v8 = vmul.f32 %v15289_v30, %v15289_v30  ;;  %v825_v10 = vmul.f32 %v15292_v45, %v15292_v45  ;;  %v2529_v9 = vld [vmem:[%s20333_s1 + $0x18] sm:$0xff] }
 0x308   :  { %v15301_v47 = vsub.f32 %v15140_v54, %v794_v7  ;;  %v866_v52 = vsel %vm20584_vm2, %v824_v8, 0.0  ;;  %v869_v11 = vsel %vm20584_vm2, %v825_v10, 0.0  ;;  %v3098_v54 = vld [vmem:[%s20328_s7 + $0x90] sm:$0xff]  ;;  %v2774_v8 = vld [vmem:[%s20332_s0 + $0xc0] sm:$0xff] }
 0x309   :  { %867 = vadd.xlane.f32.xlu1 %v866_v52  ;;  %870 = vadd.xlane.f32.xlu0 %v869_v11  ;;  %v2544_v10 = vld [vmem:[%s20333_s1 + $0x90] sm:$0xff] }
 0x30a   :  { %v826_v13 = vmul.f32 %v15301_v47, %v15301_v47  ;;  %13210 = vmatprep.subr.mxu0 %v3098_v54  ;;  %v2776_v11 = vld [vmem:[%s20332_s0 + $0xd0] sm:$0xff] }
 0x30b   :  { %13211 = vmatpush3.msra.mxu0 %v3098_v54  ;;  %v2780_v54 = vld [vmem:[%s20332_s0 + $0xf0] sm:$0xff] }
 0x30c   :  { %v872_v17 = vsel %vm20584_vm2, %v826_v13, 0.0  ;;  %13212 = vmatprep.subr.mxu0 %v3097_v18 }
 0x30d   :  { %873 = vadd.xlane.f32.xlu1 %v872_v17  ;;  %13213 = vmatpush3.msra.mxu0 %v3097_v18 }
 0x30e   :  { %13214 = vmatprep.subr.mxu0 %v3096_v19 }
 0x30f   :  { %13215 = vmatpush3.msra.mxu0 %v3096_v19  ;;  %v2527_v19 = vld [vmem:[%s20333_s1 + $0x8] sm:$0xff] }
 0x310   :  { %13240 = vmatprep.subr.mxu0 %v15350_v22 }
 0x31e   :  { %2786 = vperm.xlu1 %14347, %v2751_v21  }
 0x31f   :  { %2783 = vperm.xlu0 %14346, %v2750_v16   ;;  %v2530_v16 = vld [vmem:[%s20333_s1 + $0x20] sm:$0xff] }
 0x322   :  { %2792 = vperm.xlu1 %14347, %v2753_v24  }
 0x323   :  { %2789 = vperm.xlu0 %14346, %v2752_v25   ;;  %v2531_v25 = vld [vmem:[%s20333_s1 + $0x28] sm:$0xff] }
 0x326   :  { %2798 = vperm.xlu1 %14347, %v2755_v27  }
 0x327   :  { %2795 = vperm.xlu0 %14346, %v2754_v29   ;;  %v2532_v29 = vld [vmem:[%s20333_s1 + $0x30] sm:$0xff] }
 0x32a   :  { %2804 = vperm.xlu1 %14347, %v2757_v31  }
 0x32b   :  { %2801 = vperm.xlu0 %14346, %v2756_v32  }
 0x32e   :  { %2810 = vperm.xlu1 %14347, %v2759_v34  }
 0x32f   :  { %2807 = vperm.xlu0 %14346, %v2758_v37   ;;  %v2533_v37 = vld [vmem:[%s20333_s1 + $0x38] sm:$0xff] }
 0x332   :  { %2825 = vperm.xlu1 %14347, %v2764_v38   ;;  %v15478_v38 = vld [vmem:[%s20330_s8 + $0x38] ss:$0 sm:$0xff] }
 0x333   :  { %2813 = vperm.xlu0 %14346, %v2760_v40  }
 0x336   :  { %2840 = vperm.xlu1 %14347, %v2769_v42  }
 0x337   :  { %2816 = vperm.xlu0 %14346, %v2761_v43  }
 0x33a   :  { %2846 = vperm.xlu1 %14347, %v2771_v44  }
 0x33b   :  { %2819 = vperm.xlu0 %14346, %v2762_v46  }
 0x33e   :  { %2852 = vperm.xlu1 %14347, %v2773_v28   ;;  %v15389_v56 = vpop.f32.mrf.mxu1 }
 0x33f   :  { %2822 = vperm.xlu0 %14346, %v2763_v49   ;;  %v15482_v28 = vadd.f32 %v15389_v56, %v15478_v38 }
 0x340   :  { %v15397_v35 = vpop.f32.mrf.mxu1 }
 0x341   :  { %v2039_v56 = vsel %vm20584_vm2, %v15482_v28, 0.0 }
 0x342   :  { %2858 = vperm.xlu1 %14347, %v2775_v50   ;;  %v13165_v63 = vpop.f32.mrf.mxu1  ;;  %v2534_v50 = vld [vmem:[%s20333_s1 + $0x40] sm:$0xff] }
 0x343   :  { %2828 = vperm.xlu0 %14346, %v2765_v53  }
 0x344   :  { %v15411_v2 = vpop.f32.mrf.mxu1 }
 0x346   :  { %2864 = vperm.xlu1 %14347, %v2777_v55   ;;  %v15419_v5 = vpop.f32.mrf.mxu1 }
 0x347   :  { %2831 = vperm.xlu0 %14346, %v2766_v57  }
 0x348   :  { %v15427_v7 = vpop.f32.mrf.mxu1 }
 0x34a   :  { %2870 = vperm.xlu1 %14347, %v2779_v58   ;;  %v15435_v52 = vpop.f32.mrf.mxu1 }
 0x34b   :  { %2834 = vperm.xlu0 %14346, %v2767_v60   ;;  %v15490_v60 = vadd.f32 %v13165_v63, %v15478_v38 }
 0x34c   :  { %v15440_v13 = vpop.f32.mrf.mxu1 }
 0x34d   :  { %v2045_v63 = vsel %vm20584_vm2, %v15490_v60, 0.0 }
 0x34e   :  { %2876 = vperm.xlu1 %14347, %v2781_v61   ;;  %v15445_v17 = vpop.f32.mrf.mxu1 }
 0x34f   :  { %2837 = vperm.xlu0 %14346, %v2768_v0  }
 0x350   :  { %v15450_v18 = vpop.f32.mrf.mxu1 }
 0x352   :  { %2559 = vperm.xlu1 %14347, %v2526_v1   ;;  %v15455_v21 = vpop.f32.mrf.mxu1 }
 0x353   :  { %2843 = vperm.xlu0 %14346, %v2770_v51   ;;  %v2535_v51 = vld [vmem:[%s20333_s1 + $0x48] sm:$0xff] }
 0x354   :  { %v15460_v24 = vpop.f32.mrf.mxu1 }
 0x356   :  { %2565 = vperm.xlu1 %14347, %v2528_v41   ;;  %v15465_v27 = vpop.f32.mrf.mxu1 }
 0x357   :  { %2849 = vperm.xlu0 %14346, %v2772_v6  }
 0x358   :  { %v15470_v34 = vpop.f32.mrf.mxu1 }
 0x35a   :  { %2568 = vperm.xlu1 %14347, %v2529_v9   ;;  %v15484_v49 = vpop.f32.mrf.mxu1 }
 0x35b   :  { %2855 = vperm.xlu0 %14346, %v2774_v8  }
 0x35c   :  { %v15494_v1 = vpop.f32.mrf.mxu1 }
 0x35e   :  { %2613 = vperm.xlu1 %14347, %v2544_v10  }
 0x35f   :  { %2861 = vperm.xlu0 %14346, %v2776_v11  }
 0x363   :  { %2867 = vperm.xlu0 %14346, %v2778_v15   ;;  %v15503_v15 = vadd.f32 %v15419_v5, %v15478_v38 }
 0x367   :  { %2873 = vperm.xlu0 %14346, %v2780_v54   ;;  %v15505_v54 = vpop.f32.mrf.mxu1 }
 0x36b   :  { %2562 = vperm.xlu0 %14346, %v2527_v19   ;;  %v2536_v19 = vld [vmem:[%s20333_s1 + $0x50] sm:$0xff] }
 0x36f   :  { %2571 = vperm.xlu0 %14346, %v2530_v16  }
 0x373   :  { %2574 = vperm.xlu0 %14346, %v2531_v25  }
 0x376   :  { %v829_v31 = vpop.xlane.xlu0 %828 }
 0x377   :  { %v875_v32 = vmul.f32 0.03125, %v829_v31  ;;  %2577 = vperm.xlu0 %14346, %v2532_v29  }
 0x379   :  { %v891_v40 = vadd.f32 1e-05, %v875_v32  ;;  %v15512_v32 = vadd.f32 %v15435_v52, %v15478_v38  ;;  %v2537_v52 = vld [vmem:[%s20333_s1 + $0x58] sm:$0xff] }
 0x37a   :  { %v832_v42 = vpop.xlane.xlu1 %831  ;;  %v835_v43 = vpop.xlane.xlu0 %834 }
 0x37b   :  { %14348 = vrsqrt.f32 %v891_v40  ;;  %v876_v44 = vmul.f32 0.03125, %v832_v42  ;;  %v877_v46 = vmul.f32 0.03125, %v835_v43  ;;  %2580 = vperm.xlu0 %14346, %v2533_v37   ;;  %v2051_v40 = vsel %vm20584_vm2, %v15503_v15, 0.0  ;;  %v15516_v42 = vpop.f32.mrf.mxu1 }
 0x37d   :  { %v892_v53 = vadd.f32 1e-05, %v876_v44  ;;  %v893_v55 = vadd.f32 1e-05, %v877_v46  ;;  %v15521_v44 = vld [vmem:[%s20330_s8 + $0x18] ss:$0 sm:$0xff] }
 0x37e   :  { %v838_v57 = vpop.xlane.xlu1 %837  ;;  %v841_v58 = vpop.xlane.xlu0 %840 }
 0x37f   :  { %14350 = vrsqrt.f32 %v892_v53  ;;  %v878_v61 = vmul.f32 0.03125, %v838_v57  ;;  %v879_v0 = vmul.f32 0.03125, %v841_v58  ;;  %2583 = vperm.xlu0 %14346, %v2534_v50   ;;  %v15529_v58 = vadd.f32 %v15445_v17, %v15478_v38  ;;  %v2538_v17 = vld [vmem:[%s20333_s1 + $0x60] sm:$0xff] }
 0x380   :  { %14352 = vrsqrt.f32 %v893_v55 }
 0x381   :  { %v894_v41 = vadd.f32 1e-05, %v878_v61  ;;  %v895_v6 = vadd.f32 1e-05, %v879_v0  ;;  %v2057_v61 = vsel %vm20584_vm2, %v15512_v32, 0.0 }
 0x382   :  { %v844_v9 = vpop.xlane.xlu1 %843  ;;  %v847_v8 = vpop.xlane.xlu0 %846  ;;  %2040 = vadd.xlane.f32.xlu1 %v2039_v56  ;;  %v15536_v0 = vld [vmem:[%s20330_s8 + $0x20] ss:$0 sm:$0xff] }
 0x383   :  { %14354 = vrsqrt.f32 %v894_v41  ;;  %v880_v10 = vmul.f32 0.03125, %v844_v9  ;;  %v881_v11 = vmul.f32 0.03125, %v847_v8  ;;  %2586 = vperm.xlu0 %14346, %v2535_v51   ;;  %v15539_v41 = vpop.f32.mrf.mxu1 }
 0x384   :  { %14356 = vrsqrt.f32 %v895_v6 }
 0x385   :  { %v896_v16 = vadd.f32 1e-05, %v880_v10  ;;  %v897_v25 = vadd.f32 1e-05, %v881_v11 }
 0x386   :  { %v850_v29 = vpop.xlane.xlu1 %849  ;;  %v853_v31 = vpop.xlane.xlu0 %852  ;;  %2046 = vadd.xlane.f32.xlu1 %v2045_v63 }
 0x387   :  { %14358 = vrsqrt.f32 %v896_v16  ;;  %v882_v37 = vmul.f32 0.03125, %v850_v29  ;;  %v883_v5 = vmul.f32 0.03125, %v853_v31  ;;  %2589 = vperm.xlu0 %14346, %v2536_v19   ;;  %v2063_v29 = vsel %vm20584_vm2, %v15529_v58, 0.0 }
 0x388   :  { %v14349_v43 = vpop.eup %14348  ;;  %14360 = vrsqrt.f32 %v897_v25  ;;  %v15550_v25 = vadd.f32 %v15455_v21, %v15478_v38  ;;  %v2539_v21 = vld [vmem:[%s20333_s1 + $0x68] sm:$0xff] }
 0x389   :  { %v898_v46 = vadd.f32 1e-05, %v882_v37  ;;  %v899_v50 = vadd.f32 1e-05, %v883_v5  ;;  %v923_v53 = vmul.f32 %v14349_v43, %v15213_v62 }
 0x38a   :  { %v856_v55 = vpop.xlane.xlu1 %855  ;;  %v859_v57 = vpop.xlane.xlu0 %858  ;;  %2052 = vadd.xlane.f32.xlu1 %v2051_v40 }
 0x38b   :  { %14362 = vrsqrt.f32 %v898_v46  ;;  %v884_v56 = vmul.f32 0.03125, %v856_v55  ;;  %v885_v51 = vmul.f32 0.03125, %v859_v57  ;;  %2592 = vperm.xlu0 %14346, %v2537_v52   ;;  %v943_v62 = vmul.f32 %v15521_v44, %v923_v53  ;;  %v15558_v40 = vpop.f32.mrf.mxu1 }
 0x38c   :  { %v14351_v6 = vpop.eup %14350  ;;  %14364 = vrsqrt.f32 %v899_v50 }
 0x38d   :  { %v14353_v9 = vpop.eup %14352  ;;  %v924_v8 = vmul.f32 %v14351_v6, %v15221_v4  ;;  %v900_v63 = vadd.f32 1e-05, %v884_v56  ;;  %v901_v10 = vadd.f32 1e-05, %v885_v51  ;;  %v15546_v11 = vadd.f32 %v15536_v0, %v943_v62 }
 0x38e   :  { %v862_v19 = vpop.xlane.xlu1 %861  ;;  %v865_v16 = vpop.xlane.xlu0 %864  ;;  %2058 = vadd.xlane.f32.xlu1 %v2057_v61  ;;  %v925_v31 = vmul.f32 %v14353_v9, %v15218_v3  ;;  %v20338_v3 = vlaneseq  ;;  %v15573_v62 = vadd.f32 %v15465_v27, %v15478_v38  ;;  %v2069_v6 = vsel %vm20584_vm2, %v15550_v25, 0.0  ;;  %v3295_v9 = vld [vmem:[%s20328_s7 + $0xb0] sm:$0xff] }
 0x38f   :  { %20682 = vst [vmem:[#allocation2_spill] sm:$0xff] %v15546_v11  ;;  %v944_v37 = vmul.f32 %v15521_v44, %v924_v8  ;;  %14366 = vrsqrt.f32 %v900_v63  ;;  %v886_v4 = vmul.f32 0.03125, %v862_v19  ;;  %v887_v5 = vmul.f32 0.03125, %v865_v16  ;;  %13216 = vmatprep.mubr.msk.f32.mxu0 %vm20584_vm2, %v15546_v11  ;;  %2595 = vperm.xlu0 %14346, %v2538_v17   ;;  %v15584_v27 = vpop.f32.mrf.mxu1 }
 0x390   :  { %v14355_v43 = vpop.eup %14354  ;;  %14368 = vrsqrt.f32 %v901_v10  ;;  %v945_v52 = vmul.f32 %v15521_v44, %v925_v31 }
 0x391   :  { %v14357_v46 = vpop.eup %14356  ;;  %v902_v50 = vadd.f32 1e-05, %v886_v4  ;;  %v903_v53 = vadd.f32 1e-05, %v887_v5  ;;  %v15565_v55 = vadd.f32 %v15536_v0, %v944_v37  ;;  %v926_v57 = vmul.f32 %v14355_v43, %v15229_v12  ;;  %v3294_v5 = vld [vmem:[%s20328_s7 + $0xa8] sm:$0xff] }
 0x392   :  { %v868_v61 = vpop.xlane.xlu1 %867  ;;  %v871_v56 = vpop.xlane.xlu0 %870  ;;  %2064 = vadd.xlane.f32.xlu1 %v2063_v29  ;;  %v15569_v51 = vadd.f32 %v15536_v0, %v945_v52  ;;  %v927_v17 = vmul.f32 %v14357_v46, %v15232_v14  ;;  %v2540_v14 = vld [vmem:[%s20333_s1 + $0x70] sm:$0xff]  ;;  %v15608_v52 = vand.u32 127, %v20338_v3 }
 0x393   :  { %20683 = vst [vmem:[#allocation3_spill] sm:$0xff] %v15565_v55  ;;  %14370 = vrsqrt.f32 %v902_v50  ;;  %v888_v12 = vmul.f32 0.03125, %v868_v61  ;;  %v889_v8 = vmul.f32 0.03125, %v871_v56  ;;  %13217 = vmatmul.mubr.msk.f32.vlgmr.msra.gmra.mxu0 %vm20584_vm2, %v15565_v55  ;;  %2598 = vperm.xlu0 %14346, %v2539_v21   ;;  %v946_v63 = vmul.f32 %v15521_v44, %v926_v57  ;;  %v15616_v57 = vpop.f32.mrf.mxu1 }
 0x394   :  { %20684 = vst [vmem:[#allocation4_spill] sm:$0xff] %v15569_v51  ;;  %v14359_v10 = vpop.eup %14358  ;;  %14372 = vrsqrt.f32 %v903_v53  ;;  %13219 = vmatprep.mubr.msk.f32.mxu0 %vm20584_vm2, %v15569_v51  ;;  %v947_v19 = vmul.f32 %v15521_v44, %v927_v17  ;;  %13241 = vmatpush3.msra.mxu0 %v15350_v22  ;;  %v15605_v22 = vadd.f32 %v15484_v49, %v15478_v38  ;;  %20687 = vst [vmem:[#allocation7_spill] sm:$0xff] %v15608_v52  ;;  %v3293_v49 = vld [vmem:[%s20328_s7 + $0xa0] sm:$0xff] }
 0x395   :  { %v14361_v16 = vpop.eup %14360  ;;  %v904_v29 = vadd.f32 1e-05, %v888_v12  ;;  %v905_v31 = vadd.f32 1e-05, %v889_v8  ;;  %v15594_v37 = vadd.f32 %v15536_v0, %v946_v63  ;;  %v928_v4 = vmul.f32 %v14359_v10, %v15241_v23  ;;  %13242 = vmatprep.subr.mxu0 %v3295_v9 }
 0x396   :  { %v874_v43 = vpop.xlane.xlu1 %873  ;;  %2070 = vadd.xlane.f32.xlu1 %v2069_v6  ;;  %v15601_v21 = vadd.f32 %v15536_v0, %v947_v19  ;;  %v929_v46 = vmul.f32 %v14361_v16, %v15244_v20  ;;  %13243 = vmatpush3.msra.mxu0 %v3295_v9  ;;  %v2075_v50 = vsel %vm20584_vm2, %v15573_v62, 0.0  ;;  %v2541_v20 = vld [vmem:[%s20333_s1 + $0x78] sm:$0xff] }
 0x397   :  { %20685 = vst [vmem:[#allocation5_spill] sm:$0xff] %v15594_v37  ;;  %14374 = vrsqrt.f32 %v904_v29  ;;  %v890_v23 = vmul.f32 0.03125, %v874_v43  ;;  %13220 = vmatmul.mubr.msk.f32.gmra.mxu0 %vm20584_vm2, %v15594_v37  ;;  %2601 = vperm.xlu0 %14346, %v2540_v14   ;;  %v948_v53 = vmul.f32 %v15521_v44, %v928_v4  ;;  %v2081_v14 = vsel %vm20584_vm2, %v15605_v22, 0.0  ;;  %v13195_v29 = vpop.f32.mrf.mxu1  ;;  %v2542_v4 = vld [vmem:[%s20333_s1 + $0x80] sm:$0xff] }
 0x398   :  { %20686 = vst [vmem:[#allocation6_spill] sm:$0xff] %v15601_v21  ;;  %v14363_v61 = vpop.eup %14362  ;;  %14376 = vrsqrt.f32 %v905_v31  ;;  %13222 = vmatprep.mubr.msk.f32.mxu0 %vm20584_vm2, %v15601_v21  ;;  %v949_v56 = vmul.f32 %v15521_v44, %v929_v46  ;;  %13244 = vmatprep.subr.mxu0 %v3294_v5 }
 0x399   :  { %v14365_v6 = vpop.eup %14364  ;;  %v906_v17 = vadd.f32 1e-05, %v890_v23  ;;  %v15628_v9 = vadd.f32 %v15536_v0, %v948_v53  ;;  %v930_v12 = vmul.f32 %v14363_v61, %v15253_v36  ;;  %13245 = vmatpush3.msra.mxu0 %v3294_v5  ;;  %v15647_v36 = vadd.f32 %v15505_v54, %v15478_v38  ;;  %v1987_v23 = vpop.f32.mrf.mxu1 }
 0x39a   :  { %2076 = vadd.xlane.f32.xlu1 %v2075_v50  ;;  %v15631_v8 = vpop.permute.xlu1 %2786  ;;  %v15633_v63 = vpop.permute.xlu0 %2783  ;;  %v15636_v10 = vadd.f32 %v15536_v0, %v949_v56  ;;  %v931_v19 = vmul.f32 %v14365_v6, %v15256_v26  ;;  %13246 = vmatprep.subr.mxu0 %v3293_v49  ;;  %v20339_v26 = vmov 1.0   ;;  %v15676_v56 = vadd.f32 %v15539_v41, %v15478_v38 }
 0x39b   :  { %20688 = vst [vmem:[#allocation8_spill] sm:$0xff] %v15628_v9  ;;  %20689 = vst [vmem:[#allocation9_spill] sm:$0xff] %v15631_v8  ;;  %14378 = vrsqrt.f32 %v906_v17  ;;  %vm20583_vm4 = vcmp.eq.s32.totalorder %v15608_v52, %v15633_v63  ;;  %13223 = vmatmul.mubr.msk.f32.gmra.mxu0 %vm20584_vm2, %v15628_v9  ;;  %2604 = vperm.xlu0 %14346, %v2541_v20   ;;  %v950_v16 = vmul.f32 %v15521_v44, %v930_v12  ;;  %v13198_v12 = vpop.f32.mrf.mxu1 }
 0x39c   :  { %20690 = vst [vmem:[#allocation10_spill] sm:$0xff] %v15633_v63  ;;  %20691 = vst [vmem:[#allocation11_spill] sm:$0xff] %v15636_v10  ;;  %v14367_v31 = vpop.eup %14366  ;;  %13225 = vmatprep.mubr.msk.f32.mxu0 %vm20584_vm2, %v15636_v10  ;;  %13304 = vmatprep.mubr.msk.f32.mxu1 %vm20583_vm4, %v20339_v26  ;;  %v951_v54 = vmul.f32 %v15521_v44, %v931_v19 }
 0x39d   :  { %v14369_v5 = vpop.eup %14368  ;;  %v15661_v43 = vadd.f32 %v15536_v0, %v950_v16  ;;  %v932_v46 = vmul.f32 %v14367_v31, %v15265_v48  ;;  %13247 = vmatpush3.msra.mxu0 %v3293_v49  ;;  %v2087_v48 = vsel %vm20584_vm2, %v15647_v36, 0.0 }
 0x39e   :  { %2082 = vadd.xlane.f32.xlu1 %v2081_v14  ;;  %v15664_v50 = vpop.permute.xlu1 %2792  ;;  %v15666_v53 = vpop.permute.xlu0 %2789  ;;  %v15669_v61 = vadd.f32 %v15536_v0, %v951_v54  ;;  %v933_v20 = vmul.f32 %v14369_v5, %v15268_v33  ;;  %v2543_v33 = vld [vmem:[%s20333_s1 + $0x88] sm:$0xff]  ;;  %v15703_v5 = vadd.f32 %v15584_v27, %v15478_v38 }
 0x39f   :  { %20692 = vst [vmem:[#allocation12_spill] sm:$0xff] %v15661_v43  ;;  %20693 = vst [vmem:[#allocation13_spill] sm:$0xff] %v15664_v50  ;;  %13226 = vmatmul.mubr.msk.f32.gmra.mxu0 %vm20584_vm2, %v15661_v43  ;;  %2607 = vperm.xlu0 %14346, %v2542_v4   ;;  %v952_v49 = vmul.f32 %v15521_v44, %v932_v46 }
 0x3a0   :  { %20694 = vst [vmem:[#allocation14_spill] sm:$0xff] %v15666_v53  ;;  %20695 = vst [vmem:[#allocation15_spill] sm:$0xff] %v15669_v61  ;;  %v14371_v6 = vpop.eup %14370  ;;  %13228 = vmatprep.mubr.msk.f32.mxu0 %vm20584_vm2, %v15669_v61  ;;  %v953_v17 = vmul.f32 %v15521_v44, %v933_v20 }
 0x3a1   :  { %v14373_v14 = vpop.eup %14372  ;;  %v15688_v41 = vadd.f32 %v15536_v0, %v952_v49  ;;  %v934_v19 = vmul.f32 %v14371_v6, %v15277_v59  ;;  %v2093_v59 = vsel %vm20584_vm2, %v15676_v56, 0.0 }
 0x3a2   :  { %2088 = vadd.xlane.f32.xlu1 %v2087_v48  ;;  %v15691_v16 = vpop.permute.xlu1 %2798  ;;  %v15693_v31 = vpop.permute.xlu0 %2795  ;;  %v15696_v4 = vadd.f32 %v15536_v0, %v953_v17  ;;  %v935_v54 = vmul.f32 %v14373_v14, %v15280_v39 }
 0x3a3   :  { %20696 = vst [vmem:[#allocation16_spill] sm:$0xff] %v15688_v41  ;;  %20697 = vst [vmem:[#allocation17_spill] sm:$0xff] %v15691_v16  ;;  %13229 = vmatmul.mubr.msk.f32.gmra.mxu0 %vm20584_vm2, %v15688_v41  ;;  %2610 = vperm.xlu0 %14346, %v2543_v33   ;;  %v954_v46 = vmul.f32 %v15521_v44, %v934_v19  ;;  %v15711_v39 = vpop.f32.mrf.mxu1 }
 0x3a4   :  { %20698 = vst [vmem:[#allocation18_spill] sm:$0xff] %v15693_v31  ;;  %20699 = vst [vmem:[#allocation19_spill] sm:$0xff] %v15696_v4  ;;  %v14375_v20 = vpop.eup %14374  ;;  %13231 = vmatprep.mubr.msk.f32.mxu0 %vm20584_vm2, %v15696_v4  ;;  %v955_v48 = vmul.f32 %v15521_v44, %v935_v54  ;;  %v15728_v54 = vadd.f32 %v13195_v29, %v15478_v38 }
 0x3a5   :  { %v14377_v49 = vpop.eup %14376  ;;  %v15714_v6 = vadd.f32 %v15536_v0, %v954_v46  ;;  %v936_v27 = vmul.f32 %v14375_v20, %v15289_v30  ;;  %v2099_v46 = vsel %vm20584_vm2, %v15703_v5, 0.0 }
 0x3a6   :  { %2094 = vadd.xlane.f32.xlu1 %v2093_v59  ;;  %v15717_v33 = vpop.permute.xlu1 %2804  ;;  %v15719_v17 = vpop.permute.xlu0 %2801  ;;  %v15722_v14 = vadd.f32 %v15536_v0, %v955_v48  ;;  %v937_v19 = vmul.f32 %v14377_v49, %v15292_v45 }
 0x3a7   :  { %20700 = vst [vmem:[#allocation20_spill] sm:$0xff] %v15714_v6  ;;  %20701 = vst [vmem:[#allocation21_spill] sm:$0xff] %v15717_v33  ;;  %13232 = vmatmul.mubr.msk.f32.gmra.mxu0 %vm20584_vm2, %v15714_v6  ;;  %v956_v30 = vmul.f32 %v15521_v44, %v936_v27  ;;  %v13201_v48 = vpop.f32.mrf.mxu1  ;;  %v15750_v27 = vadd.f32 %v15478_v38, %v1987_v23  ;;  %v15769_v23 = vadd.f32 %v13198_v12, %v15478_v38 }
 0x3a8   :  { %20702 = vst [vmem:[#allocation22_spill] sm:$0xff] %v15719_v17  ;;  %20703 = vst [vmem:[#allocation23_spill] sm:$0xff] %v15722_v14  ;;  %v14379_v59 = vpop.eup %14378  ;;  %13234 = vmatprep.mubr.msk.f32.mxu0 %vm20584_vm2, %v15722_v14  ;;  %v957_v20 = vmul.f32 %v15521_v44, %v937_v19  ;;  %v2105_v19 = vsel %vm20584_vm2, %v15728_v54, 0.0 }
 0x3a9   :  { %v15737_v45 = vadd.f32 %v15536_v0, %v956_v30  ;;  %v938_v49 = vmul.f32 %v14379_v59, %v15301_v47  ;;  %v15757_v47 = vpop.f32.mrf.mxu1  ;;  %v2111_v12 = vsel %vm20584_vm2, %v15769_v23, 0.0 }
 0x3aa   :  { %2100 = vadd.xlane.f32.xlu1 %v2099_v46  ;;  %v15740_v29 = vpop.permute.xlu1 %2810  ;;  %v15742_v3 = vpop.permute.xlu0 %2807  ;;  %v15745_v26 = vadd.f32 %v15536_v0, %v957_v20 }
 0x3ab   :  { %20704 = vst [vmem:[#allocation24_spill] sm:$0xff] %v15737_v45  ;;  %20705 = vst [vmem:[#allocation25_spill] sm:$0xff] %v15740_v29  ;;  %13235 = vmatmul.mubr.msk.f32.gmra.mxu0 %vm20584_vm2, %v15737_v45  ;;  %v958_v30 = vmul.f32 %v15521_v44, %v938_v49  ;;  %v2102_v44 = vsel %vm20584_vm2, %v15750_v27, 0.0  ;;  %v13204_v49 = vpop.f32.mrf.mxu1 }
 0x3ac   :  { %20706 = vst [vmem:[#allocation26_spill] sm:$0xff] %v15742_v3  ;;  %20707 = vst [vmem:[#allocation27_spill] sm:$0xff] %v15745_v26  ;;  %13237 = vmatprep.mubr.msk.f32.mxu0 %vm20584_vm2, %v15745_v26 }
 0x3ad   :  { %v15760_v46 = vadd.f32 %v15536_v0, %v958_v30  ;;  %v15782_v30 = vadd.f32 %v13201_v48, %v15478_v38  ;;  %v15788_v63 = vpop.f32.mrf.mxu1 }
 0x3ae   :  { %2106 = vadd.xlane.f32.xlu1 %v2105_v19  ;;  %v15762_v59 = vpop.permute.xlu1 %2825  ;;  %v15764_v20 = vpop.permute.xlu0 %2813 }
 0x3af   :  { %20708 = vst [vmem:[#allocation28_spill] sm:$0xff] %v15760_v46  ;;  %20709 = vst [vmem:[#allocation29_spill] sm:$0xff] %v15762_v59  ;;  %13238 = vmatmul.mubr.msk.f32.gmra.mxu0 %vm20584_vm2, %v15760_v46  ;;  %v2117_v48 = vsel %vm20584_vm2, %v15782_v30, 0.0 }
 0x3b0   :  { %20710 = vst [vmem:[#allocation30_spill] sm:$0xff] %v15764_v20  ;;  %13248 = vmatprep.mubr.msk.f32.mxu0 %vm20584_vm2, %v15546_v11 }
 0x3b2   :  { %2103 = vadd.xlane.f32.xlu1 %v2102_v44  ;;  %v15775_v0 = vpop.permute.xlu1 %2840  ;;  %v15777_v19 = vpop.permute.xlu0 %2816 }
 0x3b3   :  { %20711 = vst [vmem:[#allocation31_spill] sm:$0xff] %v15775_v0  ;;  %20712 = vst [vmem:[#allocation32_spill] sm:$0xff] %v15777_v19  ;;  %13249 = vmatmul.mubr.msk.f32.vlgmr.msra.gmra.mxu0 %vm20584_vm2, %v15565_v55  ;;  %v15797_v55 = vadd.f32 %v13204_v49, %v15478_v38 }
 0x3b4   :  { %13251 = vmatprep.mubr.msk.f32.mxu0 %vm20584_vm2, %v15569_v51  ;;  %v13207_v51 = vpop.f32.mrf.mxu1 }
 0x3b5   :  { %v2123_v49 = vsel %vm20584_vm2, %v15797_v55, 0.0 }
 0x3b6   :  { %2112 = vadd.xlane.f32.xlu1 %v2111_v12  ;;  %v15790_v44 = vpop.permute.xlu1 %2846  ;;  %v15792_v11 = vpop.permute.xlu0 %2819 }
 0x3b7   :  { %20713 = vst [vmem:[#allocation33_spill] sm:$0xff] %v15790_v44  ;;  %20714 = vst [vmem:[#allocation34_spill] sm:$0xff] %v15792_v11  ;;  %13252 = vmatmul.mubr.msk.f32.gmra.mxu0 %vm20584_vm2, %v15594_v37  ;;  %v15810_v37 = vadd.f32 %v13207_v51, %v15478_v38 }
 0x3b8   :  { %13254 = vmatprep.mubr.msk.f32.mxu0 %vm20584_vm2, %v15601_v21  ;;  %v15818_v21 = vadd.f32 %v15478_v38, %v15397_v35 }
 0x3b9   :  { %v2129_v51 = vsel %vm20584_vm2, %v15810_v37, 0.0 }
 0x3ba   :  { %2118 = vadd.xlane.f32.xlu1 %v2117_v48  ;;  %v15803_v0 = vpop.permute.xlu1 %2852  ;;  %v15805_v12 = vpop.permute.xlu0 %2822  ;;  %v2036_v35 = vsel %vm20584_vm2, %v15818_v21, 0.0 }
 0x3bb   :  { %20715 = vst [vmem:[#allocation35_spill] sm:$0xff] %v15803_v0  ;;  %20716 = vst [vmem:[#allocation36_spill] sm:$0xff] %v15805_v12  ;;  %13255 = vmatmul.mubr.msk.f32.gmra.mxu0 %vm20584_vm2, %v15628_v9 }
 0x3bc   :  { %13257 = vmatprep.mubr.msk.f32.mxu0 %vm20584_vm2, %v15636_v10  ;;  %v15832_v10 = vadd.f32 %v15478_v38, %v15411_v2 }
 0x3be   :  { %2124 = vadd.xlane.f32.xlu1 %v2123_v49  ;;  %v15820_v48 = vpop.permute.xlu1 %2858  ;;  %v15822_v0 = vpop.permute.xlu0 %2828  ;;  %v2042_v2 = vsel %vm20584_vm2, %v15832_v10, 0.0 }
 0x3bf   :  { %20717 = vst [vmem:[#allocation37_spill] sm:$0xff] %v15820_v48  ;;  %20718 = vst [vmem:[#allocation38_spill] sm:$0xff] %v15822_v0  ;;  %13258 = vmatmul.mubr.msk.f32.gmra.mxu0 %vm20584_vm2, %v15661_v43 }
 0x3c0   :  { %13260 = vmatprep.mubr.msk.f32.mxu0 %vm20584_vm2, %v15669_v61  ;;  %v15846_v61 = vadd.f32 %v15478_v38, %v15427_v7 }
 0x3c2   :  { %2130 = vadd.xlane.f32.xlu1 %v2129_v51  ;;  %v15836_v49 = vpop.permute.xlu1 %2864  ;;  %2037 = vadd.xlane.f32.xlu0 %v2036_v35  ;;  %v15838_v9 = vpop.permute.xlu0 %2831  ;;  %v15860_v35 = vadd.f32 %v15478_v38, %v15440_v13  ;;  %v2048_v7 = vsel %vm20584_vm2, %v15846_v61, 0.0 }
 0x3c3   :  { %20719 = vst [vmem:[#allocation39_spill] sm:$0xff] %v15836_v49  ;;  %20720 = vst [vmem:[#allocation40_spill] sm:$0xff] %v15838_v9  ;;  %13261 = vmatmul.mubr.msk.f32.gmra.mxu0 %vm20584_vm2, %v15688_v41 }
 0x3c4   :  { %13263 = vmatprep.mubr.msk.f32.mxu0 %vm20584_vm2, %v15696_v4  ;;  %v2054_v13 = vsel %vm20584_vm2, %v15860_v35, 0.0 }
 0x3c6   :  { %v15850_v43 = vpop.permute.xlu1 %2870  ;;  %2043 = vadd.xlane.f32.xlu0 %v2042_v2  ;;  %v15852_v51 = vpop.permute.xlu0 %2834  ;;  %v15874_v2 = vadd.f32 %v15478_v38, %v15450_v18  ;;  %v15892_v18 = vadd.f32 %v15478_v38, %v15460_v24 }
 0x3c7   :  { %20721 = vst [vmem:[#allocation41_spill] sm:$0xff] %v15850_v43  ;;  %20722 = vst [vmem:[#allocation42_spill] sm:$0xff] %v15852_v51  ;;  %13264 = vmatmul.mubr.msk.f32.gmra.mxu0 %vm20584_vm2, %v15714_v6 }
 0x3c8   :  { %13266 = vmatprep.mubr.msk.f32.mxu0 %vm20584_vm2, %v15722_v14 }
 0x3ca   :  { %v15864_v4 = vpop.permute.xlu1 %2876  ;;  %2049 = vadd.xlane.f32.xlu0 %v2048_v7  ;;  %v15866_v41 = vpop.permute.xlu0 %2837 }
 0x3cb   :  { %20723 = vst [vmem:[#allocation43_spill] sm:$0xff] %v15864_v4  ;;  %20724 = vst [vmem:[#allocation44_spill] sm:$0xff] %v15866_v41  ;;  %13267 = vmatmul.mubr.msk.f32.gmra.mxu0 %vm20584_vm2, %v15737_v45  ;;  %v20727_v45 = vmov 1.0  }
 0x3cc   :  { %13269 = vmatprep.mubr.msk.f32.mxu0 %vm20584_vm2, %v15745_v26  ;;  %v15898_v26 = vadd.f32 %v15478_v38, %v15470_v34 }
 0x3ce   :  { %v15878_v14 = vpop.permute.xlu1 %2559  ;;  %2055 = vadd.xlane.f32.xlu0 %v2054_v13  ;;  %v15882_v7 = vpop.permute.xlu0 %2843  ;;  %v2060_v13 = vsel %vm20584_vm2, %v15874_v2, 0.0  ;;  %v2072_v24 = vsel %vm20584_vm2, %v15898_v26, 0.0 }
 0x3cf   :  { %20725 = vst [vmem:[#allocation45_spill] sm:$0xff] %v15878_v14  ;;  %vm20582_vm5 = vcmp.eq.s32.totalorder %v15608_v52, %v15878_v14  ;;  %20726 = vst [vmem:[#allocation46_spill] sm:$0xff] %v15882_v7  ;;  %13270 = vmatmul.mubr.msk.f32.gmra.mxu0 %vm20584_vm2, %v15760_v46  ;;  %v2066_v46 = vsel %vm20584_vm2, %v15892_v18, 0.0  ;;  %v15906_v14 = vadd.f32 %v15478_v38, %v15494_v1 }
 0x3d0   :  { %13384 = vmatprep.mubr.msk.f32.mxu0 %vm20582_vm5, %v20727_v45 }
 0x3d1   :  { %v2078_v4 = vsel %vm20584_vm2, %v15906_v14, 0.0 }
 0x3d2   :  { %2061 = vadd.xlane.f32.xlu0 %v2060_v13  ;;  %v15900_v6 = vpop.permute.xlu0 %2849  ;;  %v15912_v13 = vadd.f32 %v15478_v38, %v15516_v42  ;;  %v15928_v42 = vadd.f32 %v15478_v38, %v15616_v57 }
 0x3d3   :  { %20728 = vst [vmem:[#allocation47_spill] sm:$0xff] %v15900_v6 }
 0x3d4   :  { %v2084_v1 = vsel %vm20584_vm2, %v15912_v13, 0.0  ;;  %v2096_v49 = vsel %vm20584_vm2, %v15928_v42, 0.0 }
 0x3d6   :  { %2067 = vadd.xlane.f32.xlu0 %v2066_v46  ;;  %v15914_v34 = vpop.permute.xlu0 %2855  ;;  %v15920_v46 = vadd.f32 %v15478_v38, %v15558_v40 }
 0x3d7   :  { %20729 = vst [vmem:[#allocation48_spill] sm:$0xff] %v15914_v34 }
 0x3da   :  { %2073 = vadd.xlane.f32.xlu0 %v2072_v24  ;;  %v15924_v43 = vpop.permute.xlu0 %2861  ;;  %v2090_v24 = vsel %vm20584_vm2, %v15920_v46, 0.0 }
 0x3db   :  { %20730 = vst [vmem:[#allocation49_spill] sm:$0xff] %v15924_v43 }
 0x3de   :  { %2079 = vadd.xlane.f32.xlu0 %v2078_v4  ;;  %v15934_v4 = vadd.f32 %v15478_v38, %v15711_v39  ;;  %v15936_v40 = vpop.permute.xlu0 %2867  ;;  %v15950_v39 = vadd.f32 %v15478_v38, %v15788_v63  ;;  %v15965_v63 = vpop.permute.xlu1 %2565 }
 0x3df   :  { %20731 = vst [vmem:[#allocation50_spill] sm:$0xff] %v15936_v40  ;;  %v2027_v40 = vpop.f32.mrf.mxu1  ;;  %20735 = vst [vmem:[#allocation54_spill] sm:$0xff] %v15965_v63  ;;  %vm20578_vm7 = vcmp.eq.s32.totalorder %v15608_v52, %v15965_v63 }
 0x3e0   :  { %v2108_v57 = vsel %vm20584_vm2, %v15934_v4, 0.0  ;;  %v2120_v48 = vsel %vm20584_vm2, %v15950_v39, 0.0 }
 0x3e2   :  { %2085 = vadd.xlane.f32.xlu0 %v2084_v1  ;;  %v15942_v1 = vadd.f32 %v15478_v38, %v15757_v47  ;;  %v15946_v43 = vpop.permute.xlu0 %2873  ;;  %v15957_v47 = vadd.f32 %v15478_v38, %v2027_v40 }
 0x3e3   :  { %20732 = vst [vmem:[#allocation51_spill] sm:$0xff] %v15946_v43 }
 0x3e6   :  { %2091 = vadd.xlane.f32.xlu0 %v2090_v24  ;;  %v2114_v24 = vsel %vm20584_vm2, %v15942_v1, 0.0 }
 0x3ea   :  { %2097 = vadd.xlane.f32.xlu0 %v2096_v49  ;;  %v15954_v49 = vpop.permute.xlu0 %2562 }
 0x3eb   :  { %20733 = vst [vmem:[#allocation52_spill] sm:$0xff] %v15954_v49  ;;  %vm20580_vm6 = vcmp.eq.s32.totalorder %v15608_v52, %v15954_v49 }
 0x3ee   :  { %2109 = vadd.xlane.f32.xlu0 %v2108_v57  ;;  %v2126_v57 = vsel %vm20584_vm2, %v15957_v47, 0.0  ;;  %v15963_v43 = vpop.permute.xlu0 %2571 }
 0x3ef   :  { %20734 = vst [vmem:[#allocation53_spill] sm:$0xff] %v15963_v43  ;;  %vm20574_vm9 = vcmp.eq.s32.totalorder %v15608_v52, %v15963_v43 }
 0x3f2   :  { %2115 = vadd.xlane.f32.xlu0 %v2114_v24  ;;  %v15967_v34 = vpop.permute.xlu0 %2574  ;;  %v15969_v24 = vpop.permute.xlu1 %2568 }
 0x3f3   :  { %20736 = vst [vmem:[#allocation55_spill] sm:$0xff] %v15967_v34  ;;  %20737 = vst [vmem:[#allocation56_spill] sm:$0xff] %v15969_v24  ;;  %vm20576_vm8 = vcmp.eq.s32.totalorder %v15608_v52, %v15969_v24  ;;  %vm20437_vm10 = vcmp.eq.s32.totalorder %v15608_v52, %v15967_v34 }
 0x3f6   :  { %2121 = vadd.xlane.f32.xlu0 %v2120_v48  ;;  %v15971_v6 = vpop.permute.xlu0 %2577  ;;  %v15973_v38 = vpop.permute.xlu1 %2613 }
 0x3f7   :  { %20738 = vst [vmem:[#allocation57_spill] sm:$0xff] %v15971_v6  ;;  %20739 = vst [vmem:[#allocation58_spill] sm:$0xff] %v15973_v38  ;;  %vm20435_vm11 = vcmp.eq.s32.totalorder %v15608_v52, %v15971_v6 }
 0x3fa   :  { %2127 = vadd.xlane.f32.xlu0 %v2126_v57  ;;  %v15975_v40 = vpop.permute.xlu0 %2580 }
 0x3fb   :  { %20740 = vst [vmem:[#allocation59_spill] sm:$0xff] %v15975_v40  ;;  %vm20434_vm12 = vcmp.eq.s32.totalorder %v15608_v52, %v15975_v40 }
 0x3fe   :  { %v15982_v9 = vpop.permute.xlu0 %2583 }
 0x3ff   :  { %20742 = vst [vmem:[#allocation61_spill] sm:$0xff] %v15982_v9  ;;  %vm20433_vm13 = vcmp.eq.s32.totalorder %v15608_v52, %v15982_v9 }
 0x40b   :  { %v2041_v44 = vpop.xlane.xlu1 %2040 }
 0x40c   :  { %v2133_v48 = vmul.f32 0.03125, %v2041_v44 }
 0x40e   :  { %v15978_v7 = vsub.f32 %v15482_v28, %v2133_v48  ;;  %v15994_v48 = vpop.permute.xlu0 %2586 }
 0x40f   :  { %v2047_v41 = vpop.xlane.xlu1 %2046  ;;  %20745 = vst [vmem:[#allocation64_spill] sm:$0xff] %v15994_v48  ;;  %vm20430_vm14 = vcmp.eq.s32.totalorder %v15608_v52, %v15994_v48 }
 0x410   :  { %20741 = vst [vmem:[#allocation60_spill] sm:$0xff] %v15978_v7  ;;  %v2135_v51 = vmul.f32 0.03125, %v2047_v41  ;;  %v2197_v57 = vmul.f32 %v15978_v7, %v15978_v7 }
 0x412   :  { %v15985_v0 = vsub.f32 %v15490_v60, %v2135_v51  ;;  %v2231_v59 = vsel %vm20584_vm2, %v2197_v57, 0.0 }
 0x413   :  { %2232 = vadd.xlane.f32.xlu1 %v2231_v59  ;;  %v2053_v12 = vpop.xlane.xlu1 %2052 }
 0x414   :  { %20743 = vst [vmem:[#allocation62_spill] sm:$0xff] %v15985_v0  ;;  %v2137_v11 = vmul.f32 0.03125, %v2053_v12  ;;  %v2199_v44 = vmul.f32 %v15985_v0, %v15985_v0 }
 0x416   :  { %v15991_v28 = vsub.f32 %v15503_v15, %v2137_v11  ;;  %v2237_v41 = vsel %vm20584_vm2, %v2199_v44, 0.0  ;;  %v16004_v11 = vpop.permute.xlu0 %2589 }
 0x417   :  { %2238 = vadd.xlane.f32.xlu1 %v2237_v41  ;;  %v2059_v7 = vpop.xlane.xlu1 %2058  ;;  %20747 = vst [vmem:[#allocation66_spill] sm:$0xff] %v16004_v11  ;;  %vm20427_vm15 = vcmp.eq.s32.totalorder %v15608_v52, %v16004_v11 }
 0x418   :  { %20744 = vst [vmem:[#allocation63_spill] sm:$0xff] %v15991_v28  ;;  %v2139_v19 = vmul.f32 0.03125, %v2059_v7  ;;  %v2201_v60 = vmul.f32 %v15991_v28, %v15991_v28 }
 0x41a   :  { %v15999_v59 = vsub.f32 %v15512_v32, %v2139_v19  ;;  %v2243_v12 = vsel %vm20584_vm2, %v2201_v60, 0.0 }
 0x41b   :  { %2244 = vadd.xlane.f32.xlu1 %v2243_v12  ;;  %v2065_v51 = vpop.xlane.xlu1 %2064  ;;  %v16016_v12 = vpop.permute.xlu0 %2592 }
 0x41c   :  { %20746 = vst [vmem:[#allocation65_spill] sm:$0xff] %v15999_v59  ;;  %v2141_v57 = vmul.f32 0.03125, %v2065_v51  ;;  %v2203_v15 = vmul.f32 %v15999_v59, %v15999_v59  ;;  %20750 = vst [vmem:[#allocation69_spill] sm:$0xff] %v16016_v12  ;;  %vm20423_vm0 = vcmp.eq.s32.totalorder %v15608_v52, %v16016_v12 }
 0x41e   :  { %v16007_v44 = vsub.f32 %v15529_v58, %v2141_v57  ;;  %v2249_v7 = vsel %vm20584_vm2, %v2203_v15, 0.0 }
 0x41f   :  { %2250 = vadd.xlane.f32.xlu1 %v2249_v7  ;;  %v2071_v41 = vpop.xlane.xlu1 %2070 }
 0x420   :  { %20748 = vst [vmem:[#allocation67_spill] sm:$0xff] %v16007_v44  ;;  %v2143_v28 = vmul.f32 0.03125, %v2071_v41  ;;  %v2205_v32 = vmul.f32 %v16007_v44, %v16007_v44 }
 0x422   :  { %v16013_v19 = vsub.f32 %v15550_v25, %v2143_v28  ;;  %v2255_v60 = vsel %vm20584_vm2, %v2205_v32, 0.0  ;;  %v16026_v28 = vpop.permute.xlu0 %2595 }
 0x423   :  { %2256 = vadd.xlane.f32.xlu1 %v2255_v60  ;;  %v2077_v51 = vpop.xlane.xlu1 %2076  ;;  %20752 = vst [vmem:[#allocation71_spill] sm:$0xff] %v16026_v28  ;;  %vm20424_vm1 = vcmp.eq.s32.totalorder %v15608_v52, %v16026_v28 }
 0x424   :  { %20749 = vst [vmem:[#allocation68_spill] sm:$0xff] %v16013_v19  ;;  %v2145_v59 = vmul.f32 0.03125, %v2077_v51  ;;  %v2207_v58 = vmul.f32 %v16013_v19, %v16013_v19 }
 0x426   :  { %v16021_v57 = vsub.f32 %v15573_v62, %v2145_v59  ;;  %v2261_v15 = vsel %vm20584_vm2, %v2207_v58, 0.0  ;;  %v16035_v51 = vpop.permute.xlu0 %2598 }
 0x427   :  { %2262 = vadd.xlane.f32.xlu1 %v2261_v15  ;;  %v2083_v7 = vpop.xlane.xlu1 %2082  ;;  %20754 = vst [vmem:[#allocation73_spill] sm:$0xff] %v16035_v51  ;;  %vm20425_vm3 = vcmp.eq.s32.totalorder %v15608_v52, %v16035_v51  ;;  %v20803_v51 = vld [vmem:[#allocation62_spill] sm:$0xff] }
 0x428   :  { %20751 = vst [vmem:[#allocation70_spill] sm:$0xff] %v16021_v57  ;;  %v2147_v41 = vmul.f32 0.03125, %v2083_v7  ;;  %v2209_v25 = vmul.f32 %v16021_v57, %v16021_v57 }
 0x42a   :  { %v16029_v32 = vsub.f32 %v15605_v22, %v2147_v41  ;;  %v2267_v60 = vsel %vm20584_vm2, %v2209_v25, 0.0  ;;  %v16037_v58 = vpop.permute.xlu0 %2601  ;;  %v2549_v22 = vld [vmem:[%s20333_s1 + $0xb8] sm:$0xff]  ;;  %v2551_v41 = vld [vmem:[%s20333_s1 + $0xc8] sm:$0xff] }
 0x42b   :  { %2268 = vadd.xlane.f32.xlu1 %v2267_v60  ;;  %20755 = vst [vmem:[#allocation74_spill] sm:$0xff] %v16037_v58  ;;  %v2553_v25 = vld [vmem:[%s20333_s1 + $0xd8] sm:$0xff] }
 0x42c   :  { %20753 = vst [vmem:[#allocation72_spill] sm:$0xff] %v16029_v32  ;;  %v2211_v62 = vmul.f32 %v16029_v32, %v16029_v32 }
 0x42e   :  { %v2273_v59 = vsel %vm20584_vm2, %v2211_v62, 0.0  ;;  %v16039_v15 = vpop.permute.xlu0 %2604  ;;  %v2555_v62 = vld [vmem:[%s20333_s1 + $0xe8] sm:$0xff] }
 0x42f   :  { %2274 = vadd.xlane.f32.xlu1 %v2273_v59  ;;  %20756 = vst [vmem:[#allocation75_spill] sm:$0xff] %v16039_v15 }
 0x432   :  { %v16044_v7 = vpop.permute.xlu0 %2607 }
 0x433   :  { %20757 = vst [vmem:[#allocation76_spill] sm:$0xff] %v16044_v7 }
 0x436   :  { %v16052_v60 = vpop.permute.xlu0 %2610 }
 0x437   :  { %20758 = vst [vmem:[#allocation77_spill] sm:$0xff] %v16052_v60 }
 0x440   :  { %2628 = vperm.xlu1 %14347, %v2549_v22  }
 0x444   :  { %2634 = vperm.xlu1 %14347, %v2551_v41  }
 0x448   :  { %2640 = vperm.xlu1 %14347, %v2553_v25  }
 0x44b   :  { %v2038_v59 = vpop.xlane.xlu0 %2037 }
 0x44c   :  { %v2132_v22 = vmul.f32 0.03125, %v2038_v59  ;;  %2646 = vperm.xlu1 %14347, %v2555_v62  }
 0x44e   :  { %v16058_v32 = vsub.f32 %v15818_v21, %v2132_v22 }
 0x44f   :  { %v2044_v57 = vpop.xlane.xlu0 %2043 }
 0x450   :  { %20759 = vst [vmem:[#allocation78_spill] sm:$0xff] %v16058_v32  ;;  %v2134_v19 = vmul.f32 0.03125, %v2044_v57  ;;  %v2196_v41 = vmul.f32 %v16058_v32, %v16058_v32 }
 0x452   :  { %v16063_v44 = vsub.f32 %v15832_v10, %v2134_v19  ;;  %v2228_v25 = vsel %vm20584_vm2, %v2196_v41, 0.0 }
 0x453   :  { %v16066_v0 = vpop.f32.mrf.mxu0  ;;  %2229 = vadd.xlane.f32.xlu0 %v2228_v25  ;;  %v2050_v20 = vpop.xlane.xlu0 %2049 }
 0x454   :  { %20760 = vst [vmem:[#allocation79_spill] sm:$0xff] %v16063_v44  ;;  %v2136_v29 = vmul.f32 0.03125, %v2050_v20  ;;  %v2198_v62 = vmul.f32 %v16063_v44, %v16063_v44 }
 0x455   :  { %v16070_v21 = vpop.f32.mrf.mxu0 }
 0x456   :  { %v16073_v57 = vsub.f32 %v15846_v61, %v2136_v29  ;;  %v2234_v59 = vsel %vm20584_vm2, %v2198_v62, 0.0 }
 0x457   :  { %v16076_v22 = vpop.f32.mrf.mxu0  ;;  %2235 = vadd.xlane.f32.xlu0 %v2234_v59  ;;  %v2056_v10 = vpop.xlane.xlu0 %2055 }
 0x458   :  { %20761 = vst [vmem:[#allocation80_spill] sm:$0xff] %v16073_v57  ;;  %v2138_v19 = vmul.f32 0.03125, %v2056_v10  ;;  %v2200_v41 = vmul.f32 %v16073_v57, %v16073_v57 }
 0x459   :  { %v16080_v25 = vpop.f32.mrf.mxu0 }
 0x45a   :  { %v16083_v20 = vsub.f32 %v15860_v35, %v2138_v19  ;;  %v2240_v44 = vsel %vm20584_vm2, %v2200_v41, 0.0  ;;  %v16098_v19 = vpop.xlane.xlu1 %2088 }
 0x45b   :  { %v16086_v32 = vpop.f32.mrf.mxu0  ;;  %2241 = vadd.xlane.f32.xlu0 %v2240_v44  ;;  %v2062_v61 = vpop.xlane.xlu0 %2061 }
 0x45c   :  { %20762 = vst [vmem:[#allocation81_spill] sm:$0xff] %v16083_v20  ;;  %v2140_v29 = vmul.f32 0.03125, %v2062_v61  ;;  %v2202_v62 = vmul.f32 %v16083_v20, %v16083_v20 }
 0x45d   :  { %v16090_v59 = vpop.f32.mrf.mxu0 }
 0x45e   :  { %v16093_v10 = vsub.f32 %v15874_v2, %v2140_v29  ;;  %v2246_v57 = vsel %vm20584_vm2, %v2202_v62, 0.0 }
 0x45f   :  { %v16096_v3 = vpop.f32.mrf.mxu0  ;;  %2247 = vadd.xlane.f32.xlu0 %v2246_v57  ;;  %v2068_v35 = vpop.xlane.xlu0 %2067 }
 0x460   :  { %20763 = vst [vmem:[#allocation82_spill] sm:$0xff] %v16093_v10  ;;  %v2142_v41 = vmul.f32 0.03125, %v2068_v35  ;;  %v2204_v44 = vmul.f32 %v16093_v10, %v16093_v10  ;;  %v2095_v35 = vpop.xlane.xlu1 %2094 }
 0x461   :  { %v16102_v61 = vpop.f32.mrf.mxu0 }
 0x462   :  { %v16105_v20 = vsub.f32 %v15892_v18, %v2142_v41  ;;  %v2252_v2 = vsel %vm20584_vm2, %v2204_v44, 0.0 }
 0x463   :  { %v16108_v29 = vpop.f32.mrf.mxu0  ;;  %2253 = vadd.xlane.f32.xlu0 %v2252_v2  ;;  %v2074_v62 = vpop.xlane.xlu0 %2073 }
 0x464   :  { %20764 = vst [vmem:[#allocation83_spill] sm:$0xff] %v16105_v20  ;;  %v2144_v33 = vmul.f32 0.03125, %v2074_v62  ;;  %v2206_v57 = vmul.f32 %v16105_v20, %v16105_v20  ;;  %v2151_v62 = vmul.f32 0.03125, %v2095_v35 }
 0x465   :  { %v16112_v17 = vpop.f32.mrf.mxu0 }
 0x466   :  { %v16115_v10 = vsub.f32 %v15898_v26, %v2144_v33  ;;  %v2258_v16 = vsel %vm20584_vm2, %v2206_v57, 0.0  ;;  %v2101_v33 = vpop.xlane.xlu1 %2100 }
 0x467   :  { %v13233_v18 = vpop.f32.mrf.mxu0  ;;  %2259 = vadd.xlane.f32.xlu0 %v2258_v16  ;;  %v2080_v41 = vpop.xlane.xlu0 %2079 }
 0x468   :  { %20765 = vst [vmem:[#allocation84_spill] sm:$0xff] %v16115_v10  ;;  %v2146_v44 = vmul.f32 0.03125, %v2080_v41  ;;  %v2208_v2 = vmul.f32 %v16115_v10, %v16115_v10  ;;  %v16127_v41 = vsub.f32 %v15676_v56, %v2151_v62 }
 0x469   :  { %v3264_v31 = vpop.f32.mrf.mxu0 }
 0x46a   :  { %v16121_v50 = vsub.f32 %v15906_v14, %v2146_v44  ;;  %v2264_v20 = vsel %vm20584_vm2, %v2208_v2, 0.0  ;;  %v2107_v60 = vpop.xlane.xlu1 %2106 }
 0x46b   :  { %v13236_v38 = vpop.f32.mrf.mxu0  ;;  %2265 = vadd.xlane.f32.xlu0 %v2264_v20  ;;  %v2086_v26 = vpop.xlane.xlu0 %2085 }
 0x46c   :  { %20766 = vst [vmem:[#allocation85_spill] sm:$0xff] %v16121_v50  ;;  %v2148_v53 = vmul.f32 0.03125, %v2086_v26  ;;  %v2210_v16 = vmul.f32 %v16121_v50, %v16121_v50  ;;  %v2153_v50 = vmul.f32 0.03125, %v2101_v33 }
 0x46d   :  { %v3274_v57 = vpop.f32.mrf.mxu0 }
 0x46e   :  { %v16130_v10 = vsub.f32 %v15912_v13, %v2148_v53  ;;  %v2270_v14 = vsel %vm20584_vm2, %v2210_v16, 0.0  ;;  %v2215_v13 = vmul.f32 %v16127_v41, %v16127_v41  ;;  %v16146_v33 = vsub.f32 %v15703_v5, %v2153_v50 }
 0x46f   :  { %v13239_v35 = vpop.f32.mrf.mxu0  ;;  %2271 = vadd.xlane.f32.xlu0 %v2270_v14  ;;  %v2092_v44 = vpop.xlane.xlu0 %2091 }
 0x470   :  { %v2150_v2 = vmul.f32 0.03125, %v2092_v44  ;;  %13352 = vmatprep.subr.mxu0 %v13239_v35  ;;  %v2212_v20 = vmul.f32 %v16130_v10, %v16130_v10 }
 0x471   :  { %v3284_v26 = vpop.f32.mrf.mxu0  ;;  %13353 = vmatpush3.msra.mxu0 %v13239_v35  ;;  %v2285_v35 = vsel %vm20584_vm2, %v2215_v13, 0.0 }
 0x472   :  { %v16136_v56 = vsub.f32 %v15920_v46, %v2150_v2  ;;  %13354 = vmatprep.subr.mxu0 %v3284_v26  ;;  %v2276_v53 = vsel %vm20584_vm2, %v2212_v20, 0.0  ;;  %v2104_v20 = vpop.xlane.xlu1 %2103 }
 0x473   :  { %v16141_v62 = vpop.f32.mrf.mxu0  ;;  %13355 = vmatpush3.msra.mxu0 %v3284_v26  ;;  %2277 = vadd.xlane.f32.xlu1 %v2276_v53  ;;  %v2098_v16 = vpop.xlane.xlu0 %2097  ;;  %v2217_v53 = vmul.f32 %v16146_v33, %v16146_v33 }
 0x474   :  { %13356 = vmatprep.subr.mxu0 %v13236_v38  ;;  %v2152_v46 = vmul.f32 0.03125, %v2098_v16  ;;  %v2214_v44 = vmul.f32 %v16136_v56, %v16136_v56 }
 0x475   :  { %v16143_v14 = vpop.f32.mrf.mxu0  ;;  %13357 = vmatpush3.msra.mxu0 %v13236_v38  ;;  %v2155_v38 = vmul.f32 0.03125, %v2107_v60 }
 0x476   :  { %13358 = vmatprep.subr.mxu0 %v3274_v57  ;;  %v16156_v50 = vsub.f32 %v15928_v42, %v2152_v46  ;;  %v2282_v5 = vsel %vm20584_vm2, %v2214_v44, 0.0  ;;  %v2154_v42 = vmul.f32 0.03125, %v2104_v20  ;;  %v2113_v46 = vpop.xlane.xlu1 %2112  ;;  %v2545_v20 = vld [vmem:[%s20333_s1 + $0x98] sm:$0xff] }
 0x477   :  { %v16151_v2 = vpop.f32.mrf.mxu0  ;;  %13359 = vmatpush3.msra.mxu0 %v3274_v57  ;;  %2286 = vadd.xlane.f32.xlu1 %v2285_v35  ;;  %v16168_v60 = vsub.f32 %v15728_v54, %v2155_v38  ;;  %v2157_v35 = vmul.f32 0.03125, %v2113_v46  ;;  %v2110_v38 = vpop.xlane.xlu0 %2109 }
 0x478   :  { %13360 = vmatprep.subr.mxu0 %v13233_v18  ;;  %v2216_v16 = vmul.f32 %v16156_v50, %v16156_v50  ;;  %v16182_v54 = vsub.f32 %v15750_v27, %v2154_v42 }
 0x479   :  { %v16153_v26 = vpop.f32.mrf.mxu0  ;;  %13361 = vmatpush3.msra.mxu0 %v13233_v18  ;;  %v2291_v18 = vsel %vm20584_vm2, %v2217_v53, 0.0  ;;  %v16199_v27 = vsub.f32 %v15769_v23, %v2157_v35  ;;  %v2156_v53 = vmul.f32 0.03125, %v2110_v38 }
 0x47a   :  { %13362 = vmatprep.subr.mxu0 %v3264_v31  ;;  %v2288_v44 = vsel %vm20584_vm2, %v2216_v16, 0.0 }
 0x47b   :  { %v16161_v13 = vpop.f32.mrf.mxu0  ;;  %13363 = vmatpush3.msra.mxu0 %v3264_v31  ;;  %2283 = vadd.xlane.f32.xlu1 %v2282_v5  ;;  %v16211_v46 = vsub.f32 %v15934_v4, %v2156_v53 }
 0x47c   :  { %13364 = vmatprep.subr.mxu0 %v16108_v29 }
 0x47d   :  { %v16164_v57 = vpop.f32.mrf.mxu0  ;;  %13365 = vmatpush3.msra.mxu0 %v16108_v29  ;;  %v2220_v53 = vmul.f32 %v16211_v46, %v16211_v46 }
 0x47e   :  { %13366 = vmatprep.subr.mxu0 %v16112_v17 }
 0x47f   :  { %v16174_v31 = vpop.f32.mrf.mxu0  ;;  %13367 = vmatpush3.msra.mxu0 %v16112_v17  ;;  %2292 = vadd.xlane.f32.xlu1 %v2291_v18  ;;  %v2219_v17 = vmul.f32 %v16168_v60, %v16168_v60  ;;  %v2218_v18 = vmul.f32 %v16182_v54, %v16182_v54 }
 0x480   :  { %13368 = vmatprep.subr.mxu0 %v16096_v3 }
 0x481   :  { %v16178_v29 = vpop.f32.mrf.mxu0  ;;  %13369 = vmatpush3.msra.mxu0 %v16096_v3  ;;  %v2297_v42 = vsel %vm20584_vm2, %v2219_v17, 0.0  ;;  %v2294_v35 = vsel %vm20584_vm2, %v2218_v18, 0.0  ;;  %v2300_v18 = vsel %vm20584_vm2, %v2220_v53, 0.0 }
 0x482   :  { %13370 = vmatprep.subr.mxu0 %v16102_v61 }
 0x483   :  { %v16191_v5 = vpop.f32.mrf.mxu0  ;;  %13371 = vmatpush3.msra.mxu0 %v16102_v61  ;;  %2289 = vadd.xlane.f32.xlu1 %v2288_v44  ;;  %v2119_v61 = vpop.xlane.xlu1 %2118  ;;  %v2221_v44 = vmul.f32 %v16199_v27, %v16199_v27 }
 0x484   :  { %13372 = vmatprep.subr.mxu0 %v16086_v32  ;;  %v2159_v23 = vmul.f32 0.03125, %v2119_v61 }
 0x485   :  { %v16195_v3 = vpop.f32.mrf.mxu0  ;;  %13373 = vmatpush3.msra.mxu0 %v16086_v32  ;;  %2616 = vperm.xlu0 %14346, %v2545_v20   ;;  %v2116_v20 = vpop.xlane.xlu0 %2115  ;;  %v2303_v38 = vsel %vm20584_vm2, %v2221_v44, 0.0 }
 0x486   :  { %13374 = vmatprep.subr.mxu0 %v16090_v59  ;;  %v16221_v4 = vsub.f32 %v15782_v30, %v2159_v23 }
 0x487   :  { %v13265_v16 = vpop.f32.mrf.mxu0  ;;  %13375 = vmatpush3.msra.mxu0 %v16090_v59  ;;  %2298 = vadd.xlane.f32.xlu1 %v2297_v42 }
 0x488   :  { %13376 = vmatprep.subr.mxu0 %v16076_v22  ;;  %v2223_v61 = vmul.f32 %v16221_v4, %v16221_v4 }
 0x489   :  { %v16207_v32 = vpop.f32.mrf.mxu0  ;;  %13377 = vmatpush3.msra.mxu0 %v16076_v22  ;;  %v2158_v22 = vmul.f32 0.03125, %v2116_v20  ;;  %v2122_v23 = vpop.xlane.xlu0 %2121 }
 0x48a   :  { %13378 = vmatprep.subr.mxu0 %v16080_v25  ;;  %v2309_v44 = vsel %vm20584_vm2, %v2223_v61, 0.0  ;;  %v3892_v61 = vld [vmem:[%s20328_s7 + $0xc0] sm:$0xff] }
 0x48b   :  { %v13268_v59 = vpop.f32.mrf.mxu0  ;;  %13379 = vmatpush3.msra.mxu0 %v16080_v25  ;;  %2295 = vadd.xlane.f32.xlu1 %v2294_v35  ;;  %v2125_v25 = vpop.xlane.xlu1 %2124  ;;  %v2160_v35 = vmul.f32 0.03125, %v2122_v23 }
 0x48c   :  { %13380 = vmatprep.subr.mxu0 %v16066_v0  ;;  %v2161_v30 = vmul.f32 0.03125, %v2125_v25 }
 0x48d   :  { %v3423_v17 = vpop.f32.mrf.mxu0  ;;  %13381 = vmatpush3.msra.mxu0 %v16066_v0 }
 0x48e   :  { %13382 = vmatprep.subr.mxu0 %v16070_v21 }
 0x48f   :  { %v13271_v42 = vpop.f32.mrf.mxu0  ;;  %13383 = vmatpush3.msra.mxu0 %v16070_v21  ;;  %2304 = vadd.xlane.f32.xlu1 %v2303_v38  ;;  %v16241_v21 = vsub.f32 %v15942_v1, %v2158_v22  ;;  %v16259_v1 = vsub.f32 %v15797_v55, %v2161_v30  ;;  %v2131_v22 = vpop.xlane.xlu1 %2130  ;;  %v3893_v30 = vld [vmem:[%s20328_s7 + $0xc8] sm:$0xff] }
 0x490   :  { %13272 = vmatprep.subr.mxu1 %v13271_v42  ;;  %13385 = vmatmul.mubr.msk.f32.vlgmr.msra.gmra.mxu0 %vm20580_vm6, %v20727_v45  ;;  %v2163_v55 = vmul.f32 0.03125, %v2131_v22  ;;  %v2557_v22 = vld [vmem:[%s20333_s1 + $0xf8] sm:$0xff] }
 0x491   :  { %v3433_v0 = vpop.f32.mrf.mxu0  ;;  %13273 = vmatpush3.msra.mxu1 %v13271_v42  ;;  %13387 = vmatprep.mubr.msk.f32.mxu0 %vm20578_vm7, %v20727_v45  ;;  %v2222_v20 = vmul.f32 %v16241_v21, %v16241_v21  ;;  %v2225_v38 = vmul.f32 %v16259_v1, %v16259_v1 }
 0x492   :  { %13274 = vmatprep.subr.mxu1 %v3433_v0 }
 0x493   :  { %13275 = vmatpush3.msra.mxu1 %v3433_v0  ;;  %2301 = vadd.xlane.f32.xlu1 %v2300_v18  ;;  %v20770_v0 = vld [vmem:[#allocation13_spill] sm:$0xff]  ;;  %v20771_v18 = vld [vmem:[#allocation18_spill] sm:$0xff] }
 0x494   :  { %13276 = vmatprep.subr.mxu1 %v13268_v59  ;;  %13388 = vmatmul.mubr.msk.f32.gmra.mxu0 %vm20576_vm8, %v20727_v45 }
 0x495   :  { %13277 = vmatpush3.msra.mxu1 %v13268_v59  ;;  %13390 = vmatprep.mubr.msk.f32.mxu0 %vm20574_vm9, %v20727_v45  ;;  %v2149_v59 = vmul.f32 0.03125, %v16098_v19  ;;  %v2306_v19 = vsel %vm20584_vm2, %v2222_v20, 0.0  ;;  %v2546_v20 = vld [vmem:[%s20333_s1 + $0xa0] sm:$0xff] }
 0x496   :  { %13278 = vmatprep.subr.mxu1 %v3423_v17 }
 0x497   :  { %13279 = vmatpush3.msra.mxu1 %v3423_v17  ;;  %2310 = vadd.xlane.f32.xlu1 %v2309_v44  ;;  %v16278_v17 = vsub.f32 %v15950_v39, %v2160_v35  ;;  %v16290_v39 = vsub.f32 %v15647_v36, %v2149_v59  ;;  %v2315_v36 = vsel %vm20584_vm2, %v2225_v38, 0.0  ;;  %v20772_v35 = vld [vmem:[#allocation17_spill] sm:$0xff]  ;;  %v20773_v44 = vld [vmem:[#allocation22_spill] sm:$0xff]  ;;  %v2547_v38 = vld [vmem:[%s20333_s1 + $0xa8] sm:$0xff] }
 0x498   :  { %13280 = vmatprep.subr.mxu1 %v13265_v16  ;;  %13391 = vmatmul.mubr.msk.f32.gmra.mxu0 %vm20437_vm10, %v20727_v45  ;;  %v20774_v59 = vld [vmem:[#allocation21_spill] sm:$0xff] }
 0x499   :  { %13281 = vmatpush3.msra.mxu1 %v13265_v16  ;;  %13393 = vmatprep.mubr.msk.f32.mxu0 %vm20435_vm11, %v20727_v45  ;;  %v2128_v16 = vpop.xlane.xlu0 %2127  ;;  %v2224_v25 = vmul.f32 %v16278_v17, %v16278_v17 }
 0x49a   :  { %13282 = vmatprep.subr.mxu1 %v16207_v32  ;;  %v2162_v53 = vmul.f32 0.03125, %v2128_v16  ;;  %v20776_v16 = vld [vmem:[#allocation25_spill] sm:$0xff] }
 0x49b   :  { %13283 = vmatpush3.msra.mxu1 %v16207_v32  ;;  %2307 = vadd.xlane.f32.xlu1 %v2306_v19  ;;  %v16303_v32 = vsub.f32 %v15810_v37, %v2163_v55  ;;  %v2213_v37 = vmul.f32 %v16290_v39, %v16290_v39  ;;  %v20775_v55 = vld [vmem:[#allocation26_spill] sm:$0xff] }
 0x49c   :  { %13284 = vmatprep.subr.mxu1 %v16191_v5  ;;  %13394 = vmatmul.mubr.msk.f32.gmra.mxu0 %vm20434_vm12, %v20727_v45  ;;  %v2233_v23 = vpop.xlane.xlu1 %2232  ;;  %vm20439_vm12 = vcmp.eq.s32.totalorder %v15608_v52, %v20774_v59  ;;  %vm20438_vm11 = vcmp.eq.s32.totalorder %v15608_v52, %v20775_v55 }
 0x49d   :  { %13285 = vmatpush3.msra.mxu1 %v16191_v5  ;;  %13396 = vmatprep.mubr.msk.f32.mxu0 %vm20433_vm13, %v20727_v45  ;;  %v16327_v5 = vsub.f32 %v15957_v47, %v2162_v53  ;;  %v2227_v42 = vmul.f32 %v16303_v32, %v16303_v32  ;;  %v2279_v47 = vsel %vm20584_vm2, %v2213_v37, 0.0  ;;  %vm20436_vm13 = vcmp.eq.s32.totalorder %v15608_v52, %v20773_v44  ;;  %v20777_v53 = vld [vmem:[#allocation30_spill] sm:$0xff]  ;;  %v20778_v37 = vld [vmem:[#allocation32_spill] sm:$0xff] }
 0x49e   :  { %13286 = vmatprep.subr.mxu1 %v16195_v3  ;;  %vm20440_vm10 = vcmp.eq.s32.totalorder %v15608_v52, %v20777_v53 }
 0x49f   :  { %13287 = vmatpush3.msra.mxu1 %v16195_v3  ;;  %2316 = vadd.xlane.f32.xlu1 %v2315_v36  ;;  %v2312_v3 = vsel %vm20584_vm2, %v2224_v25, 0.0  ;;  %v2548_v36 = vld [vmem:[%s20333_s1 + $0xb0] sm:$0xff] }
 0x4a0   :  { %13288 = vmatprep.subr.mxu1 %v16174_v31  ;;  %13397 = vmatmul.mubr.msk.f32.gmra.mxu0 %vm20430_vm14, %v20727_v45  ;;  %vm20577_vm14 = vcmp.eq.s32.totalorder %v15608_v52, %v20770_v0  ;;  %v2239_v19 = vpop.xlane.xlu1 %2238 }
 0x4a1   :  { %13289 = vmatpush3.msra.mxu1 %v16174_v31  ;;  %13399 = vmatprep.mubr.msk.f32.mxu0 %vm20427_vm15, %v20727_v45  ;;  %v2321_v31 = vsel %vm20584_vm2, %v2227_v42, 0.0  ;;  %v2550_v42 = vld [vmem:[%s20333_s1 + $0xc0] sm:$0xff] }
 0x4a2   :  { %13290 = vmatprep.subr.mxu1 %v16178_v29 }
 0x4a3   :  { %13291 = vmatpush3.msra.mxu1 %v16178_v29  ;;  %2313 = vadd.xlane.f32.xlu1 %v2312_v3  ;;  %v2226_v29 = vmul.f32 %v16327_v5, %v16327_v5  ;;  %v20779_v3 = vld [vmem:[#allocation34_spill] sm:$0xff] }
 0x4a4   :  { %13292 = vmatprep.subr.mxu1 %v16161_v13  ;;  %13400 = vmatmul.mubr.msk.f32.gmra.mxu0 %vm20423_vm0, %v20727_v45  ;;  %vm20426_vm0 = vcmp.eq.s32.totalorder %v15608_v52, %v16037_v58  ;;  %v2245_v25 = vpop.xlane.xlu1 %2244  ;;  %v20802_v58 = vld [vmem:[#allocation78_spill] sm:$0xff] }
 0x4a5   :  { %2280 = vadd.xlane.f32.xlu0 %v2279_v47  ;;  %13293 = vmatpush3.msra.mxu1 %v16161_v13  ;;  %v2318_v13 = vsel %vm20584_vm2, %v2226_v29, 0.0  ;;  %v20780_v47 = vld [vmem:[#allocation36_spill] sm:$0xff] }
 0x4a6   :  { %13402 = vmatprep.mubr.msk.f32.mxu0 %vm20424_vm1, %v20727_v45  ;;  %13294 = vmatprep.subr.mxu1 %v16164_v57  ;;  %vm20428_vm1 = vcmp.eq.s32.totalorder %v15608_v52, %v16039_v15 }
 0x4a7   :  { %13295 = vmatpush3.msra.mxu1 %v16164_v57  ;;  %2322 = vadd.xlane.f32.xlu1 %v2321_v31  ;;  %v20769_v57 = vld [vmem:[#allocation58_spill] sm:$0xff]  ;;  %v20781_v31 = vld [vmem:[#allocation29_spill] sm:$0xff] }
 0x4a8   :  { %13296 = vmatprep.subr.mxu1 %v16151_v2  ;;  %13403 = vmatmul.mubr.msk.f32.gmra.mxu0 %vm20425_vm3, %v20727_v45  ;;  %vm20429_vm3 = vcmp.eq.s32.totalorder %v15608_v52, %v16044_v7  ;;  %v2251_v29 = vpop.xlane.xlu1 %2250  ;;  %v20793_v7 = vld [vmem:[#allocation49_spill] sm:$0xff] }
 0x4a9   :  { %13297 = vmatpush3.msra.mxu1 %v16151_v2  ;;  %13405 = vmatprep.mubr.msk.f32.mxu0 %vm20426_vm0, %v20727_v45  ;;  %vm20581_vm0 = vcmp.eq.s32.totalorder %v15608_v52, %v15631_v8  ;;  %v20767_v2 = vld [vmem:[#allocation77_spill] sm:$0xff] }
 0x4aa   :  { %13298 = vmatprep.subr.mxu1 %v16153_v26  ;;  %vm20431_vm15 = vcmp.eq.s32.totalorder %v15608_v52, %v20767_v2 }
 0x4ab   :  { %13299 = vmatpush3.msra.mxu1 %v16153_v26  ;;  %2319 = vadd.xlane.f32.xlu1 %v2318_v13  ;;  %v3895_v26 = vld [vmem:[%s20328_s7 + $0xd8] sm:$0xff]  ;;  %v2552_v13 = vld [vmem:[%s20333_s1 + $0xd0] sm:$0xff] }
 0x4ac   :  { %13300 = vmatprep.subr.mxu1 %v16141_v62  ;;  %13406 = vmatmul.mubr.msk.f32.gmra.mxu0 %vm20428_vm1, %v20727_v45 }
 0x4ad   :  { %13301 = vmatpush3.msra.mxu1 %v16141_v62  ;;  %13408 = vmatprep.mubr.msk.f32.mxu0 %vm20429_vm3, %v20727_v45  ;;  %v20768_v62 = vld [vmem:[#allocation14_spill] sm:$0xff]  ;;  %vm20432_vm3 = vcmp.eq.s32.totalorder %v15608_v52, %v20769_v57  ;;  %v20788_v57 = vld [vmem:[#allocation33_spill] sm:$0xff] }
 0x4ae   :  { %13302 = vmatprep.subr.mxu1 %v16143_v14  ;;  %vm20579_vm1 = vcmp.eq.s32.totalorder %v15608_v52, %v20768_v62 }
 0x4af   :  { %13303 = vmatpush3.msra.mxu1 %v16143_v14  ;;  %v3894_v14 = vld [vmem:[%s20328_s7 + $0xd0] sm:$0xff] }
 0x4b0   :  { %13305 = vmatmul.mubr.msk.f32.vlgmr.msra.gmra.mxu1 %vm20581_vm0, %v20727_v45  ;;  %13409 = vmatmul.mubr.msk.f32.gmra.mxu0 %vm20431_vm15, %v20727_v45  ;;  %vm20575_vm15 = vcmp.eq.s32.totalorder %v15608_v52, %v20771_v18 }
 0x4b1   :  { %13307 = vmatprep.mubr.msk.f32.mxu1 %vm20579_vm1, %v20727_v45  ;;  %13411 = vmatprep.mubr.msk.f32.mxu0 %vm20432_vm3, %v20727_v45  ;;  %vm20572_vm3 = vcmp.eq.s32.totalorder %v15608_v52, %v20772_v35 }
 0x4b2   :  { %13432 = vmatprep.subr.mxu1 %v3895_v26 }
 0x4b3   :  { %13433 = vmatpush3.msra.mxu1 %v3895_v26  ;;  %v20782_v26 = vld [vmem:[#allocation38_spill] sm:$0xff] }
 0x4b4   :  { %13308 = vmatmul.mubr.msk.f32.gmra.mxu1 %vm20577_vm14, %v20727_v45  ;;  %13434 = vmatprep.subr.mxu1 %v3894_v14 }
 0x4b5   :  { %13310 = vmatprep.mubr.msk.f32.mxu1 %vm20575_vm15, %v20727_v45  ;;  %13435 = vmatpush3.msra.mxu1 %v3894_v14  ;;  %v20783_v14 = vld [vmem:[#allocation40_spill] sm:$0xff] }
 0x4b6   :  { %13436 = vmatprep.subr.mxu1 %v3893_v30 }
 0x4b7   :  { %13437 = vmatpush3.msra.mxu1 %v3893_v30  ;;  %v2554_v30 = vld [vmem:[%s20333_s1 + $0xe0] sm:$0xff] }
 0x4b8   :  { %13311 = vmatmul.mubr.msk.f32.gmra.mxu1 %vm20572_vm3, %v20727_v45  ;;  %13438 = vmatprep.subr.mxu1 %v3892_v61 }
 0x4b9   :  { %13313 = vmatprep.mubr.msk.f32.mxu1 %vm20436_vm13, %v20727_v45  ;;  %13439 = vmatpush3.msra.mxu1 %v3892_v61  ;;  %vm20441_vm13 = vcmp.eq.s32.totalorder %v15608_v52, %v20776_v16  ;;  %v2257_v61 = vpop.xlane.xlu1 %2256 }
 0x4bb   :  { %2619 = vperm.xlu0 %14346, %v2546_v20   ;;  %v20784_v20 = vld [vmem:[#allocation42_spill] sm:$0xff] }
 0x4bc   :  { %13314 = vmatmul.mubr.msk.f32.gmra.mxu1 %vm20439_vm12, %v20727_v45  ;;  %2652 = vperm.xlu1 %14347, %v2557_v22   ;;  %vm20442_vm12 = vcmp.eq.s32.totalorder %v15608_v52, %v20779_v3  ;;  %v20785_v22 = vld [vmem:[#allocation44_spill] sm:$0xff] }
 0x4bd   :  { %13316 = vmatprep.mubr.msk.f32.mxu1 %vm20438_vm11, %v20727_v45  ;;  %vm20443_vm11 = vcmp.eq.s32.totalorder %v15608_v52, %v20778_v37 }
 0x4bf   :  { %2622 = vperm.xlu0 %14346, %v2547_v38   ;;  %v2556_v38 = vld [vmem:[%s20333_s1 + $0xf0] sm:$0xff] }
 0x4c0   :  { %13317 = vmatmul.mubr.msk.f32.gmra.mxu1 %vm20441_vm13, %v20727_v45  ;;  %vm20444_vm13 = vcmp.eq.s32.totalorder %v15608_v52, %v20781_v31 }
 0x4c1   :  { %13319 = vmatprep.mubr.msk.f32.mxu1 %vm20440_vm10, %v20727_v45  ;;  %vm20445_vm10 = vcmp.eq.s32.totalorder %v15608_v52, %v20780_v47 }
 0x4c3   :  { %2625 = vperm.xlu0 %14346, %v2548_v36   ;;  %v20786_v36 = vld [vmem:[#allocation31_spill] sm:$0xff] }
 0x4c4   :  { %13320 = vmatmul.mubr.msk.f32.gmra.mxu1 %vm20443_vm11, %v20727_v45  ;;  %vm20446_vm11 = vcmp.eq.s32.totalorder %v15608_v52, %v20783_v14 }
 0x4c5   :  { %13322 = vmatprep.mubr.msk.f32.mxu1 %vm20442_vm12, %v20727_v45  ;;  %vm20447_vm12 = vcmp.eq.s32.totalorder %v15608_v52, %v20782_v26 }
 0x4c7   :  { %2631 = vperm.xlu0 %14346, %v2550_v42   ;;  %v2325_v42 = vmul.f32 0.03125, %v2233_v23  ;;  %v20789_v23 = vld [vmem:[#allocation47_spill] sm:$0xff] }
 0x4c8   :  { %13323 = vmatmul.mubr.msk.f32.gmra.mxu1 %vm20445_vm10, %v20727_v45  ;;  %vm20449_vm10 = vcmp.eq.s32.totalorder %v15608_v52, %v20785_v22 }
 0x4c9   :  { %13325 = vmatprep.mubr.msk.f32.mxu1 %vm20444_vm13, %v20727_v45  ;;  %vm20451_vm13 = vcmp.eq.s32.totalorder %v15608_v52, %v20784_v20  ;;  %v2357_v22 = vadd.f32 1e-05, %v2325_v42  ;;  %v20791_v42 = vld [vmem:[#allocation48_spill] sm:$0xff] }
 0x4cb   :  { %2637 = vperm.xlu0 %14346, %v2552_v13   ;;  %v20787_v13 = vld [vmem:[#allocation46_spill] sm:$0xff]  ;;  %14380 = vrsqrt.f32 %v2357_v22 }
 0x4cc   :  { %13326 = vmatmul.mubr.msk.f32.gmra.mxu1 %vm20447_vm12, %v20727_v45  ;;  %vm20454_vm12 = vcmp.eq.s32.totalorder %v15608_v52, %v20787_v13 }
 0x4cd   :  { %13328 = vmatprep.mubr.msk.f32.mxu1 %vm20446_vm11, %v20727_v45  ;;  %vm20455_vm11 = vcmp.eq.s32.totalorder %v15608_v52, %v20786_v36  ;;  %v20790_v36 = vld [vmem:[#allocation35_spill] sm:$0xff] }
 0x4cf   :  { %2643 = vperm.xlu0 %14346, %v2554_v30   ;;  %v2263_v30 = vpop.xlane.xlu1 %2262 }
 0x4d0   :  { %13329 = vmatmul.mubr.msk.f32.gmra.mxu1 %vm20451_vm13, %v20727_v45  ;;  %vm20460_vm13 = vcmp.eq.s32.totalorder %v15608_v52, %v20789_v23  ;;  %v20792_v23 = vld [vmem:[#allocation37_spill] sm:$0xff] }
 0x4d1   :  { %13331 = vmatprep.mubr.msk.f32.mxu1 %vm20449_vm10, %v20727_v45  ;;  %vm20462_vm10 = vcmp.eq.s32.totalorder %v15608_v52, %v20788_v57 }
 0x4d3   :  { %2649 = vperm.xlu0 %14346, %v2556_v38   ;;  %v2327_v38 = vmul.f32 0.03125, %v2239_v19  ;;  %v2269_v13 = vpop.xlane.xlu1 %2268  ;;  %v2329_v19 = vmul.f32 0.03125, %v2245_v25 }
 0x4d4   :  { %13332 = vmatmul.mubr.msk.f32.gmra.mxu1 %vm20455_vm11, %v20727_v45  ;;  %vm20465_vm11 = vcmp.eq.s32.totalorder %v15608_v52, %v20791_v42 }
 0x4d5   :  { %13334 = vmatprep.mubr.msk.f32.mxu1 %vm20454_vm12, %v20727_v45  ;;  %vm20466_vm12 = vcmp.eq.s32.totalorder %v15608_v52, %v20790_v36  ;;  %v2359_v2 = vadd.f32 1e-05, %v2327_v38  ;;  %v2361_v25 = vadd.f32 1e-05, %v2329_v19  ;;  %v2331_v38 = vmul.f32 0.03125, %v2251_v29  ;;  %v20795_v19 = vld [vmem:[#allocation50_spill] sm:$0xff] }
 0x4d6   :  { %v2333_v36 = vmul.f32 0.03125, %v2257_v61 }
 0x4d7   :  { %14382 = vrsqrt.f32 %v2359_v2  ;;  %v2275_v14 = vpop.xlane.xlu1 %2274  ;;  %v2363_v29 = vadd.f32 1e-05, %v2331_v38  ;;  %v20798_v38 = vld [vmem:[#allocation51_spill] sm:$0xff] }
 0x4d8   :  { %13335 = vmatmul.mubr.msk.f32.gmra.mxu1 %vm20462_vm10, %v20727_v45  ;;  %vm20469_vm10 = vcmp.eq.s32.totalorder %v15608_v52, %v20793_v7  ;;  %v20797_v7 = vld [vmem:[#allocation41_spill] sm:$0xff]  ;;  %v14381_v61 = vpop.eup %14380 }
 0x4d9   :  { %13337 = vmatprep.mubr.msk.f32.mxu1 %vm20460_vm13, %v20727_v45  ;;  %vm20470_vm13 = vcmp.eq.s32.totalorder %v15608_v52, %v20792_v23  ;;  %v2335_v23 = vmul.f32 0.03125, %v2263_v30  ;;  %v16623_v30 = vld [vmem:[%s20330_s8 + $0x40] ss:$0 sm:$0xff] }
 0x4dc   :  { %13338 = vmatmul.mubr.msk.f32.gmra.mxu1 %vm20466_vm12, %v20727_v45  ;;  %v2230_v57 = vpop.xlane.xlu0 %2229  ;;  %vm20473_vm12 = vcmp.eq.s32.totalorder %v15608_v52, %v20795_v19  ;;  %v20800_v19 = vld [vmem:[#allocation60_spill] sm:$0xff] }
 0x4dd   :  { %v2324_v20 = vmul.f32 0.03125, %v2230_v57  ;;  %13340 = vmatprep.mubr.msk.f32.mxu1 %vm20465_vm11, %v20727_v45 }
 0x4df   :  { %v2356_v22 = vadd.f32 1e-05, %v2324_v20  ;;  %v20794_v20 = vld [vmem:[#allocation39_spill] sm:$0xff] }
 0x4e0   :  { %13341 = vmatmul.mubr.msk.f32.gmra.mxu1 %vm20470_vm13, %v20727_v45  ;;  %v2236_v57 = vpop.xlane.xlu0 %2235  ;;  %vm20515_vm11 = vcmp.eq.s32.totalorder %v15608_v52, %v20794_v20  ;;  %vm20513_vm13 = vcmp.eq.s32.totalorder %v15608_v52, %v20798_v38  ;;  %v2365_v20 = vadd.f32 1e-05, %v2333_v36 }
 0x4e1   :  { %14384 = vrsqrt.f32 %v2356_v22  ;;  %v2326_v42 = vmul.f32 0.03125, %v2236_v57  ;;  %13343 = vmatprep.mubr.msk.f32.mxu1 %vm20469_vm10, %v20727_v45  ;;  %vm20514_vm10 = vcmp.eq.s32.totalorder %v15608_v52, %v20797_v7  ;;  %v2367_v7 = vadd.f32 1e-05, %v2335_v23 }
 0x4e2   :  { %14386 = vrsqrt.f32 %v2361_v25 }
 0x4e3   :  { %v2358_v2 = vadd.f32 1e-05, %v2326_v42  ;;  %v16603_v42 = vpop.permute.xlu1 %2628 }
 0x4e4   :  { %13344 = vmatmul.mubr.msk.f32.gmra.mxu1 %vm20515_vm11, %v20727_v45  ;;  %v2242_v22 = vpop.xlane.xlu0 %2241  ;;  %20796 = vst [vmem:[#allocation86_spill] sm:$0xff] %v16603_v42  ;;  %v14383_v15 = vpop.eup %14382 }
 0x4e5   :  { %14388 = vrsqrt.f32 %v2358_v2  ;;  %v2328_v57 = vmul.f32 0.03125, %v2242_v22  ;;  %13346 = vmatprep.mubr.msk.f32.mxu1 %vm20473_vm12, %v20727_v45  ;;  %v2423_v47 = vmul.f32 %v14383_v15, %v20803_v51 }
 0x4e6   :  { %14390 = vrsqrt.f32 %v2363_v29  ;;  %v2421_v29 = vmul.f32 %v14381_v61, %v20800_v19 }
 0x4e7   :  { %v2360_v25 = vadd.f32 1e-05, %v2328_v57  ;;  %v20799_v57 = vld [vmem:[#allocation43_spill] sm:$0xff]  ;;  %v2459_v15 = vmul.f32 %v16623_v30, %v2423_v47 }
 0x4e8   :  { %13347 = vmatmul.mubr.msk.f32.gmra.mxu1 %vm20514_vm10, %v20727_v45  ;;  %v2248_v2 = vpop.xlane.xlu0 %2247  ;;  %vm20491_vm12 = vcmp.eq.s32.totalorder %v15608_v52, %v20799_v57 }
 0x4e9   :  { %14392 = vrsqrt.f32 %v2360_v25  ;;  %v2330_v22 = vmul.f32 0.03125, %v2248_v2  ;;  %13349 = vmatprep.mubr.msk.f32.mxu1 %vm20513_vm13, %v20727_v45  ;;  %v2337_v25 = vmul.f32 0.03125, %v2269_v13  ;;  %v16625_v2 = vpop.permute.xlu1 %2634  ;;  %v16636_v13 = vld [vmem:[%s20330_s8 + $0x48] ss:$0 sm:$0xff] }
 0x4ea   :  { %14394 = vrsqrt.f32 %v2365_v20  ;;  %20801 = vst [vmem:[#allocation60_spill] sm:$0xff] %v16625_v2  ;;  %v2339_v20 = vmul.f32 0.03125, %v2275_v14 }
 0x4eb   :  { %v2362_v36 = vadd.f32 1e-05, %v2330_v22  ;;  %v2457_v22 = vmul.f32 %v16623_v30, %v2421_v29  ;;  %v2369_v23 = vadd.f32 1e-05, %v2337_v25 }
 0x4ec   :  { %13350 = vmatmul.mubr.msk.f32.gmra.mxu1 %vm20491_vm12, %v20727_v45  ;;  %v2254_v38 = vpop.xlane.xlu0 %2253  ;;  %v2371_v25 = vadd.f32 1e-05, %v2339_v20  ;;  %v20810_v20 = vld [vmem:[#allocation80_spill] sm:$0xff] }
 0x4ed   :  { %14396 = vrsqrt.f32 %v2362_v36  ;;  %v2332_v19 = vmul.f32 0.03125, %v2254_v38 }
 0x4ee   :  { %v14385_v61 = vpop.eup %14384  ;;  %14398 = vrsqrt.f32 %v2367_v7  ;;  %v20807_v7 = vld [vmem:[#allocation79_spill] sm:$0xff] }
 0x4ef   :  { %v2364_v26 = vadd.f32 1e-05, %v2332_v19  ;;  %v2420_v31 = vmul.f32 %v14385_v61, %v20802_v58  ;;  %v14387_v28 = vpop.eup %14386  ;;  %v16640_v19 = vpop.permute.xlu1 %2640  ;;  %v16643_v58 = vadd.f32 %v16636_v13, %v2457_v22 }
 0x4f0   :  { %v2260_v57 = vpop.xlane.xlu0 %2259  ;;  %20804 = vst [vmem:[#allocation78_spill] sm:$0xff] %v16640_v19 }
 0x4f1   :  { %14400 = vrsqrt.f32 %v2364_v26  ;;  %v2334_v38 = vmul.f32 0.03125, %v2260_v57  ;;  %v2456_v36 = vmul.f32 %v16623_v30, %v2420_v31  ;;  %20805 = vst [vmem:[#allocation62_spill] sm:$0xff] %v16643_v58  ;;  %v20808_v26 = vld [vmem:[#allocation63_spill] sm:$0xff] }
 0x4f2   :  { %v14389_v29 = vpop.eup %14388  ;;  %14402 = vrsqrt.f32 %v2369_v23  ;;  %v2425_v57 = vmul.f32 %v14387_v28, %v20808_v26 }
 0x4f3   :  { %v2366_v61 = vadd.f32 1e-05, %v2334_v38  ;;  %v16646_v3 = vadd.f32 %v16636_v13, %v2456_v36  ;;  %v2422_v14 = vmul.f32 %v14389_v29, %v20807_v7  ;;  %v14391_v31 = vpop.eup %14390  ;;  %v16660_v28 = vpop.permute.xlu1 %2646 }
 0x4f4   :  { %v2266_v51 = vpop.xlane.xlu0 %2265  ;;  %20811 = vst [vmem:[#allocation63_spill] sm:$0xff] %v16660_v28  ;;  %v2461_v7 = vmul.f32 %v16623_v30, %v2425_v57 }
 0x4f5   :  { %20806 = vst [vmem:[#allocation87_spill] sm:$0xff] %v16646_v3  ;;  %14404 = vrsqrt.f32 %v2366_v61  ;;  %v2336_v12 = vmul.f32 0.03125, %v2266_v51  ;;  %13440 = vmatprep.mubr.msk.f32.mxu1 %vm20584_vm2, %v16646_v3  ;;  %v2458_v22 = vmul.f32 %v16623_v30, %v2422_v14  ;;  %v16663_v61 = vadd.f32 %v16636_v13, %v2459_v15  ;;  %v20813_v14 = vld [vmem:[#allocation65_spill] sm:$0xff] }
 0x4f6   :  { %v14393_v38 = vpop.eup %14392  ;;  %13441 = vmatmul.mubr.msk.f32.vlgmr.msra.gmra.mxu1 %vm20584_vm2, %v16643_v58  ;;  %14406 = vrsqrt.f32 %v2371_v25  ;;  %v2427_v51 = vmul.f32 %v14391_v31, %v20813_v14  ;;  %v16677_v31 = vadd.f32 %v16636_v13, %v2461_v7 }
 0x4f7   :  { %v2368_v36 = vadd.f32 1e-05, %v2336_v12  ;;  %v16657_v23 = vadd.f32 %v16636_v13, %v2458_v22  ;;  %v2424_v47 = vmul.f32 %v14393_v38, %v20810_v20  ;;  %20812 = vst [vmem:[#allocation80_spill] sm:$0xff] %v16663_v61  ;;  %v14395_v26 = vpop.eup %14394  ;;  %v20815_v38 = vld [vmem:[#allocation81_spill] sm:$0xff] }
 0x4f8   :  { %v2272_v29 = vpop.xlane.xlu0 %2271  ;;  %20816 = vst [vmem:[#allocation81_spill] sm:$0xff] %v16677_v31 }
 0x4f9   :  { %20809 = vst [vmem:[#allocation79_spill] sm:$0xff] %v16657_v23  ;;  %14408 = vrsqrt.f32 %v2368_v36  ;;  %v2338_v58 = vmul.f32 0.03125, %v2272_v29  ;;  %13443 = vmatprep.mubr.msk.f32.mxu1 %vm20584_vm2, %v16657_v23  ;;  %v2460_v12 = vmul.f32 %v16623_v30, %v2424_v47  ;;  %v2463_v36 = vmul.f32 %v16623_v30, %v2427_v51  ;;  %v20817_v29 = vld [vmem:[#allocation67_spill] sm:$0xff] }
 0x4fa   :  { %v14397_v22 = vpop.eup %14396  ;;  %13444 = vmatmul.mubr.msk.f32.gmra.mxu1 %vm20584_vm2, %v16663_v61  ;;  %v2429_v14 = vmul.f32 %v14395_v26, %v20817_v29  ;;  %v20822_v29 = vld [vmem:[#allocation68_spill] sm:$0xff] }
 0x4fb   :  { %v2370_v25 = vadd.f32 1e-05, %v2338_v58  ;;  %v16673_v15 = vadd.f32 %v16636_v13, %v2460_v12  ;;  %v2426_v57 = vmul.f32 %v14397_v22, %v20815_v38  ;;  %v14399_v23 = vpop.eup %14398  ;;  %v20819_v38 = vld [vmem:[#allocation82_spill] sm:$0xff] }
 0x4fc   :  { %v2278_v20 = vpop.xlane.xlu1 %2277 }
 0x4fd   :  { %20814 = vst [vmem:[#allocation65_spill] sm:$0xff] %v16673_v15  ;;  %14410 = vrsqrt.f32 %v2370_v25  ;;  %v2340_v47 = vmul.f32 0.03125, %v2278_v20  ;;  %13446 = vmatprep.mubr.msk.f32.mxu1 %vm20584_vm2, %v16673_v15  ;;  %v2462_v58 = vmul.f32 %v16623_v30, %v2426_v57  ;;  %v16693_v25 = vadd.f32 %v16636_v13, %v2463_v36  ;;  %v20824_v36 = vld [vmem:[#allocation83_spill] sm:$0xff] }
 0x4fe   :  { %v14401_v12 = vpop.eup %14400  ;;  %13447 = vmatmul.mubr.msk.f32.gmra.mxu1 %vm20584_vm2, %v16677_v31  ;;  %v2465_v20 = vmul.f32 %v16623_v30, %v2429_v14  ;;  %v2431_v57 = vmul.f32 %v14399_v23, %v20822_v29 }
 0x4ff   :  { %v2372_v22 = vadd.f32 1e-05, %v2340_v47  ;;  %v16687_v7 = vadd.f32 %v16636_v13, %v2462_v58  ;;  %v2428_v51 = vmul.f32 %v14401_v12, %v20819_v38  ;;  %20821 = vst [vmem:[#allocation88_spill] sm:$0xff] %v16693_v25  ;;  %v14403_v15 = vpop.eup %14402 }
 0x500   :  { %v2287_v61 = vpop.xlane.xlu1 %2286  ;;  %v16690_v26 = vpop.permute.xlu0 %2616  ;;  %v2467_v38 = vmul.f32 %v16623_v30, %v2431_v57 }
 0x501   :  { %20818 = vst [vmem:[#allocation67_spill] sm:$0xff] %v16687_v7  ;;  %20820 = vst [vmem:[#allocation82_spill] sm:$0xff] %v16690_v26  ;;  %14412 = vrsqrt.f32 %v2372_v22  ;;  %vm20571_vm12 = vcmp.eq.s32.totalorder %v15608_v52, %v16690_v26  ;;  %13449 = vmatprep.mubr.msk.f32.mxu1 %vm20584_vm2, %v16687_v7  ;;  %v2464_v47 = vmul.f32 %v16623_v30, %v2428_v51  ;;  %v20826_v51 = vld [vmem:[#allocation70_spill] sm:$0xff] }
 0x502   :  { %v14405_v58 = vpop.eup %14404  ;;  %13412 = vmatmul.mubr.msk.f32.gmra.mxu0 %vm20571_vm12, %v20727_v45  ;;  %13450 = vmatmul.mubr.msk.f32.gmra.mxu1 %vm20584_vm2, %v16693_v25  ;;  %v16713_v22 = vadd.f32 %v16636_v13, %v2465_v20  ;;  %v2433_v29 = vmul.f32 %v14403_v15, %v20826_v51  ;;  %v16727_v57 = vadd.f32 %v16636_v13, %v2467_v38  ;;  %v20830_v51 = vld [vmem:[#allocation72_spill] sm:$0xff] }
 0x503   :  { %v16709_v23 = vadd.f32 %v16636_v13, %v2464_v47  ;;  %v2430_v14 = vmul.f32 %v14405_v58, %v20824_v36  ;;  %v14407_v7 = vpop.eup %14406  ;;  %v20828_v58 = vld [vmem:[#allocation84_spill] sm:$0xff] }
 0x504   :  { %v2284_v12 = vpop.xlane.xlu1 %2283  ;;  %20825 = vst [vmem:[#allocation83_spill] sm:$0xff] %v16713_v22  ;;  %20829 = vst [vmem:[#allocation84_spill] sm:$0xff] %v16727_v57  ;;  %v2469_v15 = vmul.f32 %v16623_v30, %v2433_v29  ;;  %v2435_v3 = vmul.f32 %v14407_v7, %v20830_v51 }
 0x505   :  { %20823 = vst [vmem:[#allocation68_spill] sm:$0xff] %v16709_v23  ;;  %13452 = vmatprep.mubr.msk.f32.mxu1 %vm20584_vm2, %v16709_v23  ;;  %v2466_v31 = vmul.f32 %v16623_v30, %v2430_v14 }
 0x506   :  { %v14409_v25 = vpop.eup %14408  ;;  %13453 = vmatmul.mubr.msk.f32.gmra.mxu1 %vm20584_vm2, %v16713_v22  ;;  %v16741_v22 = vadd.f32 %v16636_v13, %v2469_v15  ;;  %v2471_v7 = vmul.f32 %v16623_v30, %v2435_v3 }
 0x507   :  { %v16723_v47 = vadd.f32 %v16636_v13, %v2466_v31  ;;  %v2432_v20 = vmul.f32 %v14409_v25, %v20828_v58  ;;  %v20832_v25 = vld [vmem:[#allocation85_spill] sm:$0xff] }
 0x508   :  { %v2293_v36 = vpop.xlane.xlu1 %2292  ;;  %20833 = vst [vmem:[#allocation85_spill] sm:$0xff] %v16741_v22  ;;  %v16754_v15 = vadd.f32 %v16636_v13, %v2471_v7 }
 0x509   :  { %20827 = vst [vmem:[#allocation70_spill] sm:$0xff] %v16723_v47  ;;  %13455 = vmatprep.mubr.msk.f32.mxu1 %vm20584_vm2, %v16723_v47  ;;  %v2468_v14 = vmul.f32 %v16623_v30, %v2432_v20  ;;  %v2345_v26 = vmul.f32 0.03125, %v2293_v36 }
 0x50a   :  { %v14411_v23 = vpop.eup %14410  ;;  %13456 = vmatmul.mubr.msk.f32.gmra.mxu1 %vm20584_vm2, %v16727_v57  ;;  %20835 = vst [vmem:[#allocation90_spill] sm:$0xff] %v16754_v15 }
 0x50b   :  { %v16737_v31 = vadd.f32 %v16636_v13, %v2468_v14  ;;  %v2434_v58 = vmul.f32 %v14411_v23, %v20832_v25  ;;  %v2377_v48 = vadd.f32 1e-05, %v2345_v26  ;;  %v4320_v26 = vld [vmem:[%s20328_s7 + $0xf0] sm:$0xff] }
 0x50c   :  { %v2290_v38 = vpop.xlane.xlu1 %2289 }
 0x50d   :  { %20831 = vst [vmem:[#allocation72_spill] sm:$0xff] %v16737_v31  ;;  %13458 = vmatprep.mubr.msk.f32.mxu1 %vm20584_vm2, %v16737_v31  ;;  %v2470_v29 = vmul.f32 %v16623_v30, %v2434_v58  ;;  %v2343_v31 = vmul.f32 0.03125, %v2287_v61  ;;  %v2344_v47 = vmul.f32 0.03125, %v2290_v38 }
 0x50e   :  { %v14413_v20 = vpop.eup %14412  ;;  %13459 = vmatmul.mubr.msk.f32.gmra.mxu1 %vm20584_vm2, %v16741_v22  ;;  %v2342_v22 = vmul.f32 0.03125, %v2284_v12 }
 0x50f   :  { %v16750_v51 = vadd.f32 %v16636_v13, %v2470_v29  ;;  %v2436_v23 = vmul.f32 %v14413_v20, %v16130_v10 }
 0x510   :  { %v2299_v14 = vpop.xlane.xlu1 %2298 }
 0x511   :  { %20834 = vst [vmem:[#allocation89_spill] sm:$0xff] %v16750_v51  ;;  %13461 = vmatprep.mubr.msk.f32.mxu1 %vm20584_vm2, %v16750_v51  ;;  %v2472_v3 = vmul.f32 %v16623_v30, %v2436_v23  ;;  %v2374_v51 = vadd.f32 1e-05, %v2342_v22  ;;  %v2375_v23 = vadd.f32 1e-05, %v2343_v31 }
 0x512   :  { %13462 = vmatmul.mubr.msk.f32.gmra.mxu1 %vm20584_vm2, %v16754_v15  ;;  %v2376_v15 = vadd.f32 1e-05, %v2344_v47 }
 0x513   :  { %v16762_v25 = vadd.f32 %v16636_v13, %v2472_v3  ;;  %14414 = vrsqrt.f32 %v2374_v51 }
 0x514   :  { %v2296_v58 = vpop.xlane.xlu1 %2295  ;;  %14416 = vrsqrt.f32 %v2375_v23 }
 0x515   :  { %20836 = vst [vmem:[#allocation91_spill] sm:$0xff] %v16762_v25  ;;  %13464 = vmatprep.mubr.msk.f32.mxu1 %vm20584_vm2, %v16762_v25  ;;  %v2346_v37 = vmul.f32 0.03125, %v2296_v58  ;;  %v2347_v25 = vmul.f32 0.03125, %v2299_v14  ;;  %14418 = vrsqrt.f32 %v2376_v15 }
 0x517   :  { %v2378_v9 = vadd.f32 1e-05, %v2346_v37  ;;  %v2379_v61 = vadd.f32 1e-05, %v2347_v25 }
 0x518   :  { %v2305_v10 = vpop.xlane.xlu1 %2304 }
 0x519   :  { %v2349_v12 = vmul.f32 0.03125, %v2305_v10 }
 0x51c   :  { %v2302_v29 = vpop.xlane.xlu1 %2301 }
 0x51d   :  { %v2348_v55 = vmul.f32 0.03125, %v2302_v29 }
 0x51f   :  { %v2380_v36 = vadd.f32 1e-05, %v2348_v55 }
 0x520   :  { %v2311_v20 = vpop.xlane.xlu1 %2310  ;;  %v14415_v38 = vpop.eup %14414 }
 0x521   :  { %v14417_v14 = vpop.eup %14416 }
 0x522   :  { %v14419_v23 = vpop.eup %14418 }
 0x524   :  { %v2308_v7 = vpop.xlane.xlu1 %2307 }
 0x525   :  { %v2350_v31 = vmul.f32 0.03125, %v2308_v7  ;;  %v4318_v7 = vld [vmem:[%s20328_s7 + $0xe0] sm:$0xff] }
 0x528   :  { %v2317_v57 = vpop.xlane.xlu1 %2316 }
 0x529   :  { %v2353_v25 = vmul.f32 0.03125, %v2317_v57 }
 0x52b   :  { %v2385_v57 = vadd.f32 1e-05, %v2353_v25 }
 0x52c   :  { %v2314_v11 = vpop.xlane.xlu1 %2313 }
 0x52d   :  { %v2352_v55 = vmul.f32 0.03125, %v2314_v11  ;;  %v4319_v11 = vld [vmem:[%s20328_s7 + $0xe8] sm:$0xff] }
 0x52e   :  { %v2281_v3 = vpop.xlane.xlu0 %2280 }
 0x52f   :  { %v2341_v53 = vmul.f32 0.03125, %v2281_v3  ;;  %v2384_v58 = vadd.f32 1e-05, %v2352_v55 }
 0x530   :  { %v2323_v22 = vpop.xlane.xlu1 %2322 }
 0x531   :  { %v2373_v16 = vadd.f32 1e-05, %v2341_v53  ;;  %v2351_v53 = vmul.f32 0.03125, %v2311_v20  ;;  %v2438_v20 = vmul.f32 %v14415_v38, %v16136_v56  ;;  %v2439_v56 = vmul.f32 %v14417_v14, %v16127_v41 }
 0x532   :  { %v2440_v41 = vmul.f32 %v14419_v23, %v16156_v50 }
 0x533   :  { %14420 = vrsqrt.f32 %v2373_v16  ;;  %v2381_v16 = vadd.f32 1e-05, %v2349_v12  ;;  %v2383_v15 = vadd.f32 1e-05, %v2351_v53 }
 0x534   :  { %14422 = vrsqrt.f32 %v2377_v48  ;;  %v4321_v48 = vld [vmem:[%s20328_s7 + $0xf8] sm:$0xff]  ;;  %v2320_v51 = vpop.xlane.xlu1 %2319 }
 0x535   :  { %14424 = vrsqrt.f32 %v2378_v9  ;;  %13488 = vmatprep.subr.mxu0 %v4321_v48  ;;  %v2382_v9 = vadd.f32 1e-05, %v2350_v31  ;;  %v2354_v10 = vmul.f32 0.03125, %v2320_v51 }
 0x536   :  { %v16766_v47 = vpop.permute.xlu0 %2619  ;;  %14426 = vrsqrt.f32 %v2379_v61  ;;  %13489 = vmatpush3.msra.mxu0 %v4321_v48  ;;  %v2355_v61 = vmul.f32 0.03125, %v2323_v22 }
 0x537   :  { %20837 = vst [vmem:[#allocation92_spill] sm:$0xff] %v16766_v47  ;;  %vm20570_vm13 = vcmp.eq.s32.totalorder %v15608_v52, %v16766_v47  ;;  %14428 = vrsqrt.f32 %v2380_v36  ;;  %13490 = vmatprep.subr.mxu0 %v4320_v26  ;;  %v2386_v31 = vadd.f32 1e-05, %v2354_v10 }
 0x538   :  { %13414 = vmatprep.mubr.msk.f32.mxu0 %vm20570_vm13, %v20727_v45  ;;  %14430 = vrsqrt.f32 %v2381_v16  ;;  %13491 = vmatpush3.msra.mxu0 %v4320_v26  ;;  %v2474_v16 = vmul.f32 %v16623_v30, %v2438_v20 }
 0x539   :  { %14432 = vrsqrt.f32 %v2382_v9  ;;  %13492 = vmatprep.subr.mxu0 %v4319_v11  ;;  %v2387_v9 = vadd.f32 1e-05, %v2355_v61 }
 0x53a   :  { %v16777_v37 = vpop.permute.xlu0 %2622  ;;  %13493 = vmatpush3.msra.mxu0 %v4319_v11  ;;  %14434 = vrsqrt.f32 %v2383_v15  ;;  %v16836_v51 = vadd.f32 %v16636_v13, %v2474_v16  ;;  %v2476_v11 = vmul.f32 %v16623_v30, %v2440_v41 }
 0x53b   :  { %20838 = vst [vmem:[#allocation93_spill] sm:$0xff] %v16777_v37  ;;  %vm20516_vm10 = vcmp.eq.s32.totalorder %v15608_v52, %v16777_v37  ;;  %13494 = vmatprep.subr.mxu0 %v4318_v7  ;;  %14436 = vrsqrt.f32 %v2384_v58 }
 0x53c   :  { %13415 = vmatmul.mubr.msk.f32.gmra.mxu0 %vm20516_vm10, %v20727_v45  ;;  %vm20518_vm10 = vcmp.eq.s32.totalorder %v15608_v52, %v16603_v42  ;;  %14438 = vrsqrt.f32 %v2385_v57  ;;  %20843 = vst [vmem:[#allocation98_spill] sm:$0xff] %v16836_v51  ;;  %v16864_v20 = vadd.f32 %v16636_v13, %v2476_v11 }
 0x53d   :  { %13495 = vmatpush3.msra.mxu0 %v4318_v7  ;;  %14440 = vrsqrt.f32 %v2386_v31 }
 0x53e   :  { %v16791_v29 = vpop.permute.xlu0 %2625  ;;  %14442 = vrsqrt.f32 %v2387_v9  ;;  %20846 = vst [vmem:[#allocation101_spill] sm:$0xff] %v16864_v20 }
 0x53f   :  { %20839 = vst [vmem:[#allocation94_spill] sm:$0xff] %v16791_v29  ;;  %vm20517_vm11 = vcmp.eq.s32.totalorder %v15608_v52, %v16791_v29  ;;  %v17026_v29 = vld [vmem:[%s20330_s8 + $0x50] ss:$0 sm:$0xff] }
 0x540   :  { %v14421_v3 = vpop.eup %14420  ;;  %13417 = vmatprep.mubr.msk.f32.mxu0 %vm20517_vm11, %v20727_v45 }
 0x541   :  { %13418 = vmatmul.mubr.msk.f32.gmra.mxu0 %vm20518_vm10, %v20727_v45  ;;  %v2437_v12 = vmul.f32 %v14421_v3, %v16290_v39  ;;  %v14423_v36 = vpop.eup %14422  ;;  %vm20519_vm10 = vcmp.eq.s32.totalorder %v15608_v52, %v16625_v2  ;;  %v2475_v39 = vmul.f32 %v16623_v30, %v2439_v56 }
 0x542   :  { %v16811_v48 = vpop.permute.xlu0 %2631  ;;  %v14425_v53 = vpop.eup %14424  ;;  %v2441_v55 = vmul.f32 %v14423_v36, %v16146_v33 }
 0x543   :  { %20840 = vst [vmem:[#allocation95_spill] sm:$0xff] %v16811_v48  ;;  %vm20520_vm11 = vcmp.eq.s32.totalorder %v15608_v52, %v16811_v48  ;;  %v2473_v22 = vmul.f32 %v16623_v30, %v2437_v12  ;;  %v14427_v26 = vpop.eup %14426  ;;  %v2442_v14 = vmul.f32 %v14425_v53, %v16182_v54  ;;  %v16857_v33 = vadd.f32 %v16636_v13, %v2475_v39 }
 0x544   :  { %13420 = vmatprep.mubr.msk.f32.mxu0 %vm20520_vm11, %v20727_v45  ;;  %v14429_v15 = vpop.eup %14428  ;;  %vm20521_vm11 = vcmp.eq.s32.totalorder %v15608_v52, %v16640_v19  ;;  %v2477_v54 = vmul.f32 %v16623_v30, %v2441_v55  ;;  %v2443_v25 = vmul.f32 %v14427_v26, %v16168_v60  ;;  %v16880_v60 = vpop.permute.xlu1 %2652 }
 0x545   :  { %13421 = vmatmul.mubr.msk.f32.gmra.mxu0 %vm20519_vm10, %v20727_v45  ;;  %v16830_v50 = vadd.f32 %v16636_v13, %v2473_v22  ;;  %20844 = vst [vmem:[#allocation99_spill] sm:$0xff] %v16857_v33  ;;  %v14431_v58 = vpop.eup %14430  ;;  %v2478_v7 = vmul.f32 %v16623_v30, %v2442_v14  ;;  %v2444_v23 = vmul.f32 %v14429_v15, %v16211_v46  ;;  %20847 = vst [vmem:[#allocation102_spill] sm:$0xff] %v16880_v60 }
 0x546   :  { %v16833_v38 = vpop.permute.xlu0 %2637  ;;  %v14433_v3 = vpop.eup %14432  ;;  %v16887_v46 = vadd.f32 %v16636_v13, %v2477_v54  ;;  %v2479_v56 = vmul.f32 %v16623_v30, %v2443_v25  ;;  %v2445_v57 = vmul.f32 %v14431_v58, %v16199_v27 }
 0x547   :  { %20841 = vst [vmem:[#allocation96_spill] sm:$0xff] %v16830_v50  ;;  %20842 = vst [vmem:[#allocation97_spill] sm:$0xff] %v16833_v38  ;;  %vm20522_vm10 = vcmp.eq.s32.totalorder %v15608_v52, %v16833_v38  ;;  %13465 = vmatmul.mubr.msk.f32.gmra.mxu1 %vm20584_vm2, %v16830_v50  ;;  %v14435_v61 = vpop.eup %14434  ;;  %v16894_v36 = vadd.f32 %v16636_v13, %v2478_v7  ;;  %v2480_v31 = vmul.f32 %v16623_v30, %v2444_v23 }
 0x548   :  { %13423 = vmatprep.mubr.msk.f32.mxu0 %vm20522_vm10, %v20727_v45  ;;  %13467 = vmatprep.mubr.msk.f32.mxu1 %vm20584_vm2, %v16836_v51  ;;  %vm20523_vm10 = vcmp.eq.s32.totalorder %v15608_v52, %v16660_v28  ;;  %20848 = vst [vmem:[#allocation103_spill] sm:$0xff] %v16887_v46  ;;  %v2446_v16 = vmul.f32 %v14433_v3, %v16241_v21  ;;  %v14437_v41 = vpop.eup %14436 }
 0x549   :  { %13424 = vmatmul.mubr.msk.f32.gmra.mxu0 %vm20521_vm11, %v20727_v45  ;;  %20850 = vst [vmem:[#allocation105_spill] sm:$0xff] %v16894_v36  ;;  %v16915_v27 = vadd.f32 %v16636_v13, %v2479_v56  ;;  %v2481_v21 = vmul.f32 %v16623_v30, %v2445_v57  ;;  %v2447_v53 = vmul.f32 %v14435_v61, %v16221_v4  ;;  %v14439_v22 = vpop.eup %14438 }
 0x54a   :  { %v16861_v10 = vpop.permute.xlu0 %2643  ;;  %v16920_v39 = vadd.f32 %v16636_v13, %v2480_v31  ;;  %v2482_v9 = vmul.f32 %v16623_v30, %v2446_v16  ;;  %v2448_v55 = vmul.f32 %v14437_v41, %v16278_v17  ;;  %v14441_v26 = vpop.eup %14440  ;;  %v2449_v14 = vmul.f32 %v14439_v22, %v16259_v1 }
 0x54b   :  { %20845 = vst [vmem:[#allocation100_spill] sm:$0xff] %v16861_v10  ;;  %vm20524_vm11 = vcmp.eq.s32.totalorder %v15608_v52, %v16861_v10  ;;  %13468 = vmatmul.mubr.msk.f32.gmra.mxu1 %vm20584_vm2, %v16857_v33  ;;  %20851 = vst [vmem:[#allocation106_spill] sm:$0xff] %v16915_v27  ;;  %v16929_v11 = vadd.f32 %v16636_v13, %v2481_v21  ;;  %v2483_v4 = vmul.f32 %v16623_v30, %v2447_v53  ;;  %v14443_v15 = vpop.eup %14442 }
 0x54c   :  { %13426 = vmatprep.mubr.msk.f32.mxu0 %vm20524_vm11, %v20727_v45  ;;  %13470 = vmatprep.mubr.msk.f32.mxu1 %vm20584_vm2, %v16864_v20  ;;  %vm20568_vm11 = vcmp.eq.s32.totalorder %v15608_v52, %v16880_v60  ;;  %20852 = vst [vmem:[#allocation107_spill] sm:$0xff] %v16920_v39  ;;  %v16934_v54 = vadd.f32 %v16636_v13, %v2482_v9 }
 0x54d   :  { %13427 = vmatmul.mubr.msk.f32.gmra.mxu0 %vm20523_vm10, %v20727_v45  ;;  %20853 = vst [vmem:[#allocation108_spill] sm:$0xff] %v16929_v11  ;;  %v2484_v17 = vmul.f32 %v16623_v30, %v2448_v55  ;;  %v2450_v25 = vmul.f32 %v14441_v26, %v16327_v5  ;;  %v16943_v58 = vadd.f32 %v16636_v13, %v2483_v4 }
 0x54e   :  { %v16891_v12 = vpop.permute.xlu0 %2649  ;;  %20854 = vst [vmem:[#allocation109_spill] sm:$0xff] %v16934_v54  ;;  %v2485_v7 = vmul.f32 %v16623_v30, %v2449_v14  ;;  %v2451_v1 = vmul.f32 %v14443_v15, %v16303_v32 }
 0x54f   :  { %20849 = vst [vmem:[#allocation104_spill] sm:$0xff] %v16891_v12  ;;  %vm20569_vm10 = vcmp.eq.s32.totalorder %v15608_v52, %v16891_v12  ;;  %13471 = vmatmul.mubr.msk.f32.gmra.mxu1 %vm20584_vm2, %v16887_v46  ;;  %20855 = vst [vmem:[#allocation110_spill] sm:$0xff] %v16943_v58  ;;  %v16948_v23 = vadd.f32 %v16636_v13, %v2484_v17  ;;  %v2486_v3 = vmul.f32 %v16623_v30, %v2450_v25 }
 0x550   :  { %13429 = vmatprep.mubr.msk.f32.mxu0 %vm20569_vm10, %v20727_v45  ;;  %13473 = vmatprep.mubr.msk.f32.mxu1 %vm20584_vm2, %v16894_v36  ;;  %v16956_v5 = vadd.f32 %v16636_v13, %v2485_v7  ;;  %v2487_v56 = vmul.f32 %v16623_v30, %v2451_v1 }
 0x551   :  { %13430 = vmatmul.mubr.msk.f32.gmra.mxu0 %vm20568_vm11, %v20727_v45  ;;  %20856 = vst [vmem:[#allocation111_spill] sm:$0xff] %v16948_v23  ;;  %v16960_v57 = vadd.f32 %v16636_v13, %v2486_v3  ;;  %v13386_v3 = vpop.f32.mrf.mxu0 }
 0x552   :  { %20857 = vst [vmem:[#allocation112_spill] sm:$0xff] %v16956_v5  ;;  %v16967_v32 = vadd.f32 %v16636_v13, %v2487_v56 }
 0x553   :  { %13474 = vmatmul.mubr.msk.f32.gmra.mxu1 %vm20584_vm2, %v16915_v27  ;;  %20858 = vst [vmem:[#allocation113_spill] sm:$0xff] %v16960_v57 }
 0x554   :  { %13476 = vmatprep.mubr.msk.f32.mxu1 %vm20584_vm2, %v16920_v39  ;;  %20859 = vst [vmem:[#allocation114_spill] sm:$0xff] %v16967_v32 }
 0x557   :  { %13477 = vmatmul.mubr.msk.f32.gmra.mxu1 %vm20584_vm2, %v16929_v11 }
 0x558   :  { %13479 = vmatprep.mubr.msk.f32.mxu1 %vm20584_vm2, %v16934_v54 }
 0x55b   :  { %13480 = vmatmul.mubr.msk.f32.gmra.mxu1 %vm20584_vm2, %v16943_v58 }
 0x55c   :  { %13482 = vmatprep.mubr.msk.f32.mxu1 %vm20584_vm2, %v16948_v23 }
 0x55f   :  { %13483 = vmatmul.mubr.msk.f32.gmra.mxu1 %vm20584_vm2, %v16956_v5 }
 0x560   :  { %13485 = vmatprep.mubr.msk.f32.mxu1 %vm20584_vm2, %v16960_v57  ;;  %v3733_v57 = vpop.f32.mrf.mxu0 }
 0x562   :  { %v13389_v58 = vpop.f32.mrf.mxu0 }
 0x563   :  { %13486 = vmatmul.mubr.msk.f32.gmra.mxu1 %vm20584_vm2, %v16967_v32 }
 0x564   :  { %v3743_v39 = vpop.f32.mrf.mxu0 }
 0x566   :  { %v13392_v46 = vpop.f32.mrf.mxu0 }
 0x568   :  { %v3753_v51 = vpop.f32.mrf.mxu0 }
 0x56a   :  { %v13395_v60 = vpop.f32.mrf.mxu0 }
 0x56c   :  { %v3763_v28 = vpop.f32.mrf.mxu0 }
 0x56e   :  { %v13398_v38 = vpop.f32.mrf.mxu0 }
 0x570   :  { %v13306_v61 = vpop.f32.mrf.mxu1  ;;  %v3773_v59 = vpop.f32.mrf.mxu0 }
 0x571   :  { %v3739_v19 = vadd.f32 %v13386_v3, %v13306_v61 }
 0x572   :  { %v3508_v31 = vpop.f32.mrf.mxu1 }
 0x573   :  { %v3734_v48 = vadd.f32 %v3733_v57, %v3508_v31 }
 0x574   :  { %v13309_v16 = vpop.f32.mrf.mxu1 }
 0x575   :  { %v3749_v47 = vadd.f32 %v13389_v58, %v13309_v16 }
 0x576   :  { %v3518_v41 = vpop.f32.mrf.mxu1 }
 0x577   :  { %v3744_v34 = vadd.f32 %v3743_v39, %v3518_v41 }
 0x578   :  { %v13312_v30 = vpop.f32.mrf.mxu1 }
 0x579   :  { %v3759_v43 = vadd.f32 %v13392_v46, %v13312_v30 }
 0x57a   :  { %v3528_v21 = vpop.f32.mrf.mxu1 }
 0x57b   :  { %v3754_v0 = vadd.f32 %v3753_v51, %v3528_v21 }
 0x57c   :  { %v16971_v53 = vpop.f32.mrf.mxu1 }
 0x57e   :  { %v16973_v22 = vpop.f32.mrf.mxu1 }
 0x57f   :  { %v3764_v39 = vadd.f32 %v3763_v28, %v16973_v22 }
 0x580   :  { %v16975_v9 = vpop.f32.mrf.mxu1 }
 0x582   :  { %v16977_v55 = vpop.f32.mrf.mxu1 }
 0x583   :  { %v3774_v21 = vadd.f32 %v3773_v59, %v16977_v55 }
 0x584   :  { %v16979_v26 = vpop.f32.mrf.mxu1 }
 0x586   :  { %v16981_v13 = vpop.f32.mrf.mxu1 }
 0x588   :  { %v16983_v4 = vpop.f32.mrf.mxu1 }
 0x58a   :  { %v16985_v14 = vpop.f32.mrf.mxu1 }
 0x58c   :  { %v16987_v15 = vpop.f32.mrf.mxu1 }
 0x58e   :  { %v16989_v17 = vpop.f32.mrf.mxu1 }
 0x590   :  { %v16991_v25 = vpop.f32.mrf.mxu1 }
 0x592   :  { %v16993_v7 = vpop.f32.mrf.mxu1 }
 0x594   :  { %v16995_v1 = vpop.f32.mrf.mxu1 }
 0x596   :  { %v16997_v56 = vpop.f32.mrf.mxu1 }
 0x598   :  { %v16999_v32 = vpop.f32.mrf.mxu1 }
 0x59a   :  { %v17001_v5 = vpop.f32.mrf.mxu1 }
 0x59c   :  { %v17003_v23 = vpop.f32.mrf.mxu1 }
 0x59e   :  { %v17005_v54 = vpop.f32.mrf.mxu1 }
 0x5a0   :  { %v17007_v11 = vpop.f32.mrf.mxu1 }
 0x5a2   :  { %v17009_v27 = vpop.f32.mrf.mxu1 }
 0x5a4   :  { %v17011_v36 = vpop.f32.mrf.mxu1 }
 0x5a6   :  { %v17013_v20 = vpop.f32.mrf.mxu1 }
 0x5a8   :  { %v17015_v33 = vpop.f32.mrf.mxu1 }
 0x5aa   :  { %v17017_v50 = vpop.f32.mrf.mxu1 }
 0x5ac   :  { %v17019_v12 = vpop.f32.mrf.mxu1 }
 0x5ae   :  { %v17021_v10 = vpop.f32.mrf.mxu1 }
 0x5b6   :  { %v13442_v2 = vpop.f32.mrf.mxu1 }
 0x5b7   :  { %v4218_v42 = vadd.f32 %v13442_v2, %v3739_v19  ;;  %v13401_v19 = vpop.f32.mrf.mxu0 }
 0x5b8   :  { %v4058_v37 = vpop.f32.mrf.mxu1 }
 0x5b9   :  { %v4217_v40 = vadd.f32 %v4058_v37, %v3734_v48  ;;  %v4255_v6 = vadd.f32 %v17026_v29, %v4218_v42 }
 0x5ba   :  { %v13445_v44 = vpop.f32.mrf.mxu1 }
 0x5bb   :  { %v4254_v35 = vadd.f32 %v17026_v29, %v4217_v40  ;;  %v4220_v61 = vadd.f32 %v13445_v44, %v3749_v47  ;;  %v4287_v31 = vmax.f32 %v4255_v6, 0.0  ;;  %v3769_v40 = vadd.f32 %v13395_v60, %v16971_v53 }
 0x5bc   :  { %v4068_v3 = vpop.f32.mrf.mxu1 }
 0x5bd   :  { %v4286_v57 = vmax.f32 %v4254_v35, 0.0  ;;  %v4219_v2 = vadd.f32 %v4068_v3, %v3744_v34  ;;  %v4257_v18 = vadd.f32 %v17026_v29, %v4220_v61  ;;  %v3783_v35 = vpop.f32.mrf.mxu0  ;;  %v3789_v61 = vadd.f32 %v13401_v19, %v16979_v26 }
 0x5be   :  { %v13448_v24 = vpop.f32.mrf.mxu1 }
 0x5bf   :  { %v4256_v37 = vadd.f32 %v17026_v29, %v4219_v2  ;;  %v4222_v48 = vadd.f32 %v13448_v24, %v3759_v43  ;;  %13496 = vmatprep.mubr.msk.f32.mxu0 %vm20584_vm2, %v4286_v57  ;;  %v4289_v34 = vmax.f32 %v4257_v18, 0.0  ;;  %v3779_v24 = vadd.f32 %v13398_v38, %v16975_v9 }
 0x5c0   :  { %v4078_v42 = vpop.f32.mrf.mxu1  ;;  %13497 = vmatmul.mubr.msk.f32.vlgmr.msra.gmra.mxu0 %vm20584_vm2, %v4287_v31 }
 0x5c1   :  { %v4288_v44 = vmax.f32 %v4256_v37, 0.0  ;;  %v4221_v47 = vadd.f32 %v4078_v42, %v3754_v0  ;;  %v4259_v6 = vadd.f32 %v17026_v29, %v4222_v48  ;;  %v13404_v0 = vpop.f32.mrf.mxu0  ;;  %v3784_v37 = vadd.f32 %v3783_v35, %v16981_v13 }
 0x5c2   :  { %v13451_v46 = vpop.f32.mrf.mxu1  ;;  %v3799_v42 = vadd.f32 %v13404_v0, %v16983_v4 }
 0x5c3   :  { %v4258_v51 = vadd.f32 %v17026_v29, %v4221_v47  ;;  %v4224_v58 = vadd.f32 %v13451_v46, %v3769_v40  ;;  %13499 = vmatprep.mubr.msk.f32.mxu0 %vm20584_vm2, %v4288_v44  ;;  %v4291_v41 = vmax.f32 %v4259_v6, 0.0  ;;  %v3793_v3 = vpop.f32.mrf.mxu0 }
 0x5c4   :  { %v4088_v43 = vpop.f32.mrf.mxu1  ;;  %13500 = vmatmul.mubr.msk.f32.gmra.mxu0 %vm20584_vm2, %v4289_v34  ;;  %v3794_v6 = vadd.f32 %v3793_v3, %v16985_v14 }
 0x5c5   :  { %v4290_v60 = vmax.f32 %v4258_v51, 0.0  ;;  %v4223_v16 = vadd.f32 %v4088_v43, %v3764_v39  ;;  %v4261_v18 = vadd.f32 %v17026_v29, %v4224_v58  ;;  %v13407_v40 = vpop.f32.mrf.mxu0 }
 0x5c6   :  { %v13454_v30 = vpop.f32.mrf.mxu1  ;;  %v3809_v39 = vadd.f32 %v13407_v40, %v16987_v15 }
 0x5c7   :  { %v4260_v28 = vadd.f32 %v17026_v29, %v4223_v16  ;;  %v4226_v53 = vadd.f32 %v13454_v30, %v3779_v24  ;;  %13502 = vmatprep.mubr.msk.f32.mxu0 %vm20584_vm2, %v4290_v60  ;;  %v4293_v57 = vmax.f32 %v4261_v18, 0.0  ;;  %v3803_v58 = vpop.f32.mrf.mxu0 }
 0x5c8   :  { %v4098_v22 = vpop.f32.mrf.mxu1  ;;  %13503 = vmatmul.mubr.msk.f32.gmra.mxu0 %vm20584_vm2, %v4291_v41  ;;  %v3804_v16 = vadd.f32 %v3803_v58, %v16989_v17 }
 0x5c9   :  { %v4292_v38 = vmax.f32 %v4260_v28, 0.0  ;;  %v4225_v9 = vadd.f32 %v4098_v22, %v3774_v21  ;;  %v4263_v2 = vadd.f32 %v17026_v29, %v4226_v53  ;;  %v13410_v22 = vpop.f32.mrf.mxu0 }
 0x5ca   :  { %v13457_v31 = vpop.f32.mrf.mxu1 }
 0x5cb   :  { %v4262_v59 = vadd.f32 %v17026_v29, %v4225_v9  ;;  %v4228_v55 = vadd.f32 %v13457_v31, %v3789_v61  ;;  %13505 = vmatprep.mubr.msk.f32.mxu0 %vm20584_vm2, %v4292_v38  ;;  %v4295_v44 = vmax.f32 %v4263_v2, 0.0  ;;  %v3813_v61 = vpop.f32.mrf.mxu0  ;;  %v4683_v2 = vld [vmem:[%s20328_s7 + $0x118] sm:$0xff] }
 0x5cc   :  { %v4108_v48 = vpop.f32.mrf.mxu1  ;;  %13506 = vmatmul.mubr.msk.f32.gmra.mxu0 %vm20584_vm2, %v4293_v57  ;;  %13544 = vmatprep.subr.mxu1 %v4683_v2  ;;  %v3814_v40 = vadd.f32 %v3813_v61, %v16993_v7 }
 0x5cd   :  { %v4294_v26 = vmax.f32 %v4262_v59, 0.0  ;;  %v4227_v19 = vadd.f32 %v4108_v48, %v3784_v37  ;;  %v4265_v47 = vadd.f32 %v17026_v29, %v4228_v55  ;;  %v13413_v38 = vpop.f32.mrf.mxu0  ;;  %13545 = vmatpush3.msra.mxu1 %v4683_v2  ;;  %v4682_v37 = vld [vmem:[%s20328_s7 + $0x110] sm:$0xff]  ;;  %v4681_v55 = vld [vmem:[%s20328_s7 + $0x108] sm:$0xff] }
 0x5ce   :  { %v13460_v34 = vpop.f32.mrf.mxu1  ;;  %13546 = vmatprep.subr.mxu1 %v4682_v37 }
 0x5cf   :  { %v4264_v13 = vadd.f32 %v17026_v29, %v4227_v19  ;;  %v4230_v35 = vadd.f32 %v13460_v34, %v3799_v42  ;;  %13508 = vmatprep.mubr.msk.f32.mxu0 %vm20584_vm2, %v4294_v26  ;;  %v4297_v43 = vmax.f32 %v4265_v47, 0.0  ;;  %v3823_v9 = vpop.f32.mrf.mxu0  ;;  %13547 = vmatpush3.msra.mxu1 %v4682_v37  ;;  %v3819_v42 = vadd.f32 %v13410_v22, %v16991_v25  ;;  %v4680_v26 = vld [vmem:[%s20328_s7 + $0x100] sm:$0xff] }
 0x5d0   :  { %v4118_v46 = vpop.f32.mrf.mxu1  ;;  %13509 = vmatmul.mubr.msk.f32.gmra.mxu0 %vm20584_vm2, %v4295_v44  ;;  %13548 = vmatprep.subr.mxu1 %v4681_v55  ;;  %v3824_v25 = vadd.f32 %v3823_v9, %v16997_v56 }
 0x5d1   :  { %v4296_v4 = vmax.f32 %v4264_v13, 0.0  ;;  %v4229_v51 = vadd.f32 %v4118_v46, %v3794_v6  ;;  %v4267_v24 = vadd.f32 %v17026_v29, %v4230_v35  ;;  %13549 = vmatpush3.msra.mxu1 %v4681_v55  ;;  %v3829_v6 = vadd.f32 %v13413_v38, %v16995_v1 }
 0x5d2   :  { %v13463_v60 = vpop.f32.mrf.mxu1  ;;  %13550 = vmatprep.subr.mxu1 %v4680_v26 }
 0x5d3   :  { %v4266_v14 = vadd.f32 %v17026_v29, %v4229_v51  ;;  %v4232_v0 = vadd.f32 %v13463_v60, %v3809_v39  ;;  %13511 = vmatprep.mubr.msk.f32.mxu0 %vm20584_vm2, %v4296_v4  ;;  %v4299_v15 = vmax.f32 %v4267_v24, 0.0  ;;  %13551 = vmatpush3.msra.mxu1 %v4680_v26 }
 0x5d4   :  { %v4128_v41 = vpop.f32.mrf.mxu1  ;;  %13512 = vmatmul.mubr.msk.f32.gmra.mxu0 %vm20584_vm2, %v4297_v43 }
 0x5d5   :  { %v4298_v18 = vmax.f32 %v4266_v14, 0.0  ;;  %v4231_v30 = vadd.f32 %v4128_v41, %v3804_v16  ;;  %v4269_v21 = vadd.f32 %v17026_v29, %v4232_v0 }
 0x5d7   :  { %v4268_v28 = vadd.f32 %v17026_v29, %v4231_v30  ;;  %13514 = vmatprep.mubr.msk.f32.mxu0 %vm20584_vm2, %v4298_v18  ;;  %v4301_v53 = vmax.f32 %v4269_v21, 0.0 }
 0x5d8   :  { %13515 = vmatmul.mubr.msk.f32.gmra.mxu0 %vm20584_vm2, %v4299_v15 }
 0x5d9   :  { %v4300_v17 = vmax.f32 %v4268_v28, 0.0 }
 0x5db   :  { %13517 = vmatprep.mubr.msk.f32.mxu0 %vm20584_vm2, %v4300_v17 }
 0x5dc   :  { %13518 = vmatmul.mubr.msk.f32.gmra.mxu0 %vm20584_vm2, %v4301_v53 }
 0x5fc   :  { %v13416_v3 = vpop.f32.mrf.mxu0 }
 0x5fd   :  { %v3839_v43 = vadd.f32 %v13416_v3, %v16999_v32 }
 0x5fe   :  { %v3833_v57 = vpop.f32.mrf.mxu0 }
 0x5ff   :  { %v3834_v1 = vadd.f32 %v3833_v57, %v17001_v5 }
 0x601   :  { %v13419_v31 = vpop.f32.mrf.mxu0 }
 0x602   :  { %v3849_v30 = vadd.f32 %v13419_v31, %v17003_v23 }
 0x603   :  { %v3843_v59 = vpop.f32.mrf.mxu0 }
 0x604   :  { %v3844_v53 = vadd.f32 %v3843_v59, %v17005_v54 }
 0x605   :  { %v13422_v48 = vpop.f32.mrf.mxu0 }
 0x606   :  { %v3859_v9 = vadd.f32 %v13422_v48, %v17007_v11 }
 0x607   :  { %v13466_v19 = vpop.f32.mrf.mxu1  ;;  %v3853_v47 = vpop.f32.mrf.mxu0 }
 0x608   :  { %v4234_v44 = vadd.f32 %v13466_v19, %v3819_v42  ;;  %v3854_v37 = vadd.f32 %v3853_v47, %v17009_v27 }
 0x609   :  { %v4138_v34 = vpop.f32.mrf.mxu1  ;;  %v13425_v51 = vpop.f32.mrf.mxu0 }
 0x60a   :  { %v4233_v13 = vadd.f32 %v4138_v34, %v3814_v40  ;;  %v4271_v35 = vadd.f32 %v17026_v29, %v4234_v44  ;;  %v3869_v26 = vadd.f32 %v13425_v51, %v17011_v36 }
 0x60b   :  { %v13469_v46 = vpop.f32.mrf.mxu1  ;;  %v3863_v56 = vpop.f32.mrf.mxu0 }
 0x60c   :  { %v4270_v39 = vadd.f32 %v17026_v29, %v4233_v13  ;;  %v4236_v4 = vadd.f32 %v13469_v46, %v3829_v6  ;;  %v4303_v60 = vmax.f32 %v4271_v35, 0.0  ;;  %v3864_v34 = vadd.f32 %v3863_v56, %v17013_v20 }
 0x60d   :  { %v4148_v58 = vpop.f32.mrf.mxu1  ;;  %v13428_v61 = vpop.f32.mrf.mxu0 }
 0x60e   :  { %v4302_v7 = vmax.f32 %v4270_v39, 0.0  ;;  %v4235_v24 = vadd.f32 %v4148_v58, %v3824_v25  ;;  %v4273_v16 = vadd.f32 %v17026_v29, %v4236_v4  ;;  %v3879_v35 = vadd.f32 %v13428_v61, %v17015_v33 }
 0x60f   :  { %v13472_v14 = vpop.f32.mrf.mxu1  ;;  %v3873_v55 = vpop.f32.mrf.mxu0 }
 0x610   :  { %v4272_v0 = vadd.f32 %v17026_v29, %v4235_v24  ;;  %v4238_v41 = vadd.f32 %v13472_v14, %v3839_v43  ;;  %13520 = vmatprep.mubr.msk.f32.mxu0 %vm20584_vm2, %v4302_v7  ;;  %v4305_v21 = vmax.f32 %v4273_v16, 0.0  ;;  %v3874_v51 = vadd.f32 %v3873_v55, %v17017_v50 }
 0x611   :  { %v4158_v18 = vpop.f32.mrf.mxu1  ;;  %13521 = vmatmul.mubr.msk.f32.gmra.mxu0 %vm20584_vm2, %v4303_v60  ;;  %v13431_v6 = vpop.f32.mrf.mxu0 }
 0x612   :  { %v4304_v32 = vmax.f32 %v4272_v0, 0.0  ;;  %v4237_v15 = vadd.f32 %v4158_v18, %v3834_v1  ;;  %v4275_v28 = vadd.f32 %v17026_v29, %v4238_v41  ;;  %v3889_v24 = vadd.f32 %v13431_v6, %v17019_v12 }
 0x613   :  { %v13475_v17 = vpop.f32.mrf.mxu1  ;;  %v3883_v43 = vpop.f32.mrf.mxu0 }
 0x614   :  { %v4274_v5 = vadd.f32 %v17026_v29, %v4237_v15  ;;  %v4240_v22 = vadd.f32 %v13475_v17, %v3849_v30  ;;  %13523 = vmatprep.mubr.msk.f32.mxu0 %vm20584_vm2, %v4304_v32  ;;  %v4307_v57 = vmax.f32 %v4275_v28, 0.0  ;;  %v3884_v0 = vadd.f32 %v3883_v43, %v17021_v10  ;;  %v5652_v28 = vld [vmem:[%s20328_s7 + $0x158] sm:$0xff] }
 0x615   :  { %v4168_v38 = vpop.f32.mrf.mxu1  ;;  %13524 = vmatmul.mubr.msk.f32.gmra.mxu0 %vm20584_vm2, %v4305_v21  ;;  %13600 = vmatprep.subr.mxu1 %v5652_v28  ;;  %v17136_v17 = vld [vmem:[%s20330_s8 + $0x58] ss:$0 sm:$0xff] }
 0x616   :  { %v4306_v23 = vmax.f32 %v4274_v5, 0.0  ;;  %v4239_v3 = vadd.f32 %v4168_v38, %v3844_v53  ;;  %v4277_v2 = vadd.f32 %v17026_v29, %v4240_v22 }
 0x617   :  { %v13478_v31 = vpop.f32.mrf.mxu1 }
 0x618   :  { %v4276_v54 = vadd.f32 %v17026_v29, %v4239_v3  ;;  %v4242_v59 = vadd.f32 %v13478_v31, %v3859_v9  ;;  %13526 = vmatprep.mubr.msk.f32.mxu0 %vm20584_vm2, %v4306_v23  ;;  %v4309_v19 = vmax.f32 %v4277_v2, 0.0  ;;  %v5651_v2 = vld [vmem:[%s20328_s7 + $0x150] sm:$0xff] }
 0x619   :  { %v4178_v42 = vpop.f32.mrf.mxu1  ;;  %13527 = vmatmul.mubr.msk.f32.gmra.mxu0 %vm20584_vm2, %v4307_v57 }
 0x61a   :  { %v4308_v11 = vmax.f32 %v4276_v54, 0.0  ;;  %v4241_v48 = vadd.f32 %v4178_v42, %v3854_v37  ;;  %v4279_v40 = vadd.f32 %v17026_v29, %v4242_v59  ;;  %v5650_v54 = vld [vmem:[%s20328_s7 + $0x148] sm:$0xff] }
 0x61b   :  { %v13481_v44 = vpop.f32.mrf.mxu1 }
 0x61c   :  { %v4278_v27 = vadd.f32 %v17026_v29, %v4241_v48  ;;  %v4244_v47 = vadd.f32 %v13481_v44, %v3869_v26  ;;  %13529 = vmatprep.mubr.msk.f32.mxu0 %vm20584_vm2, %v4308_v11  ;;  %v4311_v25 = vmax.f32 %v4279_v40, 0.0  ;;  %v5649_v11 = vld [vmem:[%s20328_s7 + $0x140] sm:$0xff] }
 0x61d   :  { %v4188_v13 = vpop.f32.mrf.mxu1  ;;  %13530 = vmatmul.mubr.msk.f32.gmra.mxu0 %vm20584_vm2, %v4309_v19 }
 0x61e   :  { %v4310_v36 = vmax.f32 %v4278_v27, 0.0  ;;  %v4243_v46 = vadd.f32 %v4188_v13, %v3864_v34  ;;  %v4281_v39 = vadd.f32 %v17026_v29, %v4244_v47 }
 0x61f   :  { %v13484_v4 = vpop.f32.mrf.mxu1 }
 0x620   :  { %v4280_v20 = vadd.f32 %v17026_v29, %v4243_v46  ;;  %v4246_v58 = vadd.f32 %v13484_v4, %v3879_v35  ;;  %13532 = vmatprep.mubr.msk.f32.mxu0 %vm20584_vm2, %v4310_v36  ;;  %v4313_v16 = vmax.f32 %v4281_v39, 0.0 }
 0x621   :  { %v4198_v7 = vpop.f32.mrf.mxu1  ;;  %13533 = vmatmul.mubr.msk.f32.gmra.mxu0 %vm20584_vm2, %v4311_v25 }
 0x622   :  { %v4312_v33 = vmax.f32 %v4280_v20, 0.0  ;;  %v4245_v60 = vadd.f32 %v4198_v7, %v3874_v51  ;;  %v4283_v14 = vadd.f32 %v17026_v29, %v4246_v58 }
 0x623   :  { %v13487_v1 = vpop.f32.mrf.mxu1 }
 0x624   :  { %v4282_v50 = vadd.f32 %v17026_v29, %v4245_v60  ;;  %v4248_v41 = vadd.f32 %v13487_v1, %v3889_v24  ;;  %13535 = vmatprep.mubr.msk.f32.mxu0 %vm20584_vm2, %v4312_v33  ;;  %v4315_v32 = vmax.f32 %v4283_v14, 0.0 }
 0x625   :  { %v4208_v56 = vpop.f32.mrf.mxu1  ;;  %13536 = vmatmul.mubr.msk.f32.gmra.mxu0 %vm20584_vm2, %v4313_v16 }
 0x626   :  { %v4314_v18 = vmax.f32 %v4282_v50, 0.0  ;;  %v4247_v30 = vadd.f32 %v4208_v56, %v3884_v0  ;;  %v4285_v12 = vadd.f32 %v17026_v29, %v4248_v41 }
 0x628   :  { %v4284_v15 = vadd.f32 %v17026_v29, %v4247_v30  ;;  %13538 = vmatprep.mubr.msk.f32.mxu0 %vm20584_vm2, %v4314_v18  ;;  %v4317_v21 = vmax.f32 %v4285_v12, 0.0 }
 0x629   :  { %13539 = vmatmul.mubr.msk.f32.gmra.mxu0 %vm20584_vm2, %v4315_v32 }
 0x62a   :  { %v4316_v10 = vmax.f32 %v4284_v15, 0.0 }
 0x62c   :  { %13541 = vmatprep.mubr.msk.f32.mxu0 %vm20584_vm2, %v4316_v10 }
 0x62d   :  { %13542 = vmatmul.mubr.msk.f32.gmra.mxu0 %vm20584_vm2, %v4317_v21 }
 0x680   :  { %v13498_v29 = vpop.f32.mrf.mxu0 }
 0x681   :  { %v4495_v53 = vadd.f32 %v13498_v29, %v17136_v17 }
 0x682   :  { %v4489_v5 = vpop.f32.mrf.mxu0 }
 0x683   :  { %v4490_v22 = vadd.f32 %v17136_v17, %v4489_v5  ;;  %v4649_v9 = vmax.f32 %v4495_v53, 0.0 }
 0x684   :  { %v13501_v61 = vpop.f32.mrf.mxu0 }
 0x685   :  { %v4648_v38 = vmax.f32 %v4490_v22, 0.0  ;;  %v4505_v23 = vadd.f32 %v13501_v61, %v17136_v17 }
 0x686   :  { %v4499_v3 = vpop.f32.mrf.mxu0 }
 0x687   :  { %v4500_v57 = vadd.f32 %v17136_v17, %v4499_v3  ;;  %13552 = vmatprep.mubr.msk.f32.mxu1 %vm20584_vm2, %v4648_v38  ;;  %v4651_v59 = vmax.f32 %v4505_v23, 0.0 }
 0x688   :  { %v13504_v31 = vpop.f32.mrf.mxu0  ;;  %13553 = vmatmul.mubr.msk.f32.vlgmr.msra.gmra.mxu1 %vm20584_vm2, %v4649_v9 }
 0x689   :  { %v4650_v37 = vmax.f32 %v4500_v57, 0.0  ;;  %13601 = vmatpush3.msra.mxu1 %v5652_v28  ;;  %v4515_v55 = vadd.f32 %v13504_v31, %v17136_v17 }
 0x68a   :  { %v4509_v42 = vpop.f32.mrf.mxu0  ;;  %13602 = vmatprep.subr.mxu1 %v5651_v2 }
 0x68b   :  { %v4510_v26 = vadd.f32 %v17136_v17, %v4509_v42  ;;  %13555 = vmatprep.mubr.msk.f32.mxu1 %vm20584_vm2, %v4650_v37  ;;  %13603 = vmatpush3.msra.mxu1 %v5651_v2  ;;  %v4653_v40 = vmax.f32 %v4515_v55, 0.0 }
 0x68c   :  { %v13507_v48 = vpop.f32.mrf.mxu0  ;;  %13556 = vmatmul.mubr.msk.f32.gmra.mxu1 %vm20584_vm2, %v4651_v59  ;;  %13604 = vmatprep.subr.mxu1 %v5650_v54 }
 0x68d   :  { %v4652_v19 = vmax.f32 %v4510_v26, 0.0  ;;  %13605 = vmatpush3.msra.mxu1 %v5650_v54  ;;  %v4525_v44 = vadd.f32 %v13507_v48, %v17136_v17 }
 0x68e   :  { %v4519_v34 = vpop.f32.mrf.mxu0  ;;  %13606 = vmatprep.subr.mxu1 %v5649_v11 }
 0x68f   :  { %v4520_v27 = vadd.f32 %v17136_v17, %v4519_v34  ;;  %13558 = vmatprep.mubr.msk.f32.mxu1 %vm20584_vm2, %v4652_v19  ;;  %13607 = vmatpush3.msra.mxu1 %v5649_v11  ;;  %v4655_v13 = vmax.f32 %v4525_v44, 0.0 }
 0x690   :  { %v13510_v47 = vpop.f32.mrf.mxu0  ;;  %13559 = vmatmul.mubr.msk.f32.gmra.mxu1 %vm20584_vm2, %v4653_v40 }
 0x691   :  { %v4654_v6 = vmax.f32 %v4520_v27, 0.0  ;;  %v4535_v35 = vadd.f32 %v13510_v47, %v17136_v17 }
 0x692   :  { %v4529_v36 = vpop.f32.mrf.mxu0 }
 0x693   :  { %v4530_v46 = vadd.f32 %v17136_v17, %v4529_v36  ;;  %13561 = vmatprep.mubr.msk.f32.mxu1 %vm20584_vm2, %v4654_v6  ;;  %v4657_v4 = vmax.f32 %v4535_v35, 0.0 }
 0x694   :  { %v13513_v25 = vpop.f32.mrf.mxu0  ;;  %13562 = vmatmul.mubr.msk.f32.gmra.mxu1 %vm20584_vm2, %v4655_v13 }
 0x695   :  { %v4656_v39 = vmax.f32 %v4530_v46, 0.0  ;;  %v4545_v51 = vadd.f32 %v13513_v25, %v17136_v17 }
 0x696   :  { %v4539_v20 = vpop.f32.mrf.mxu0 }
 0x697   :  { %v4540_v58 = vadd.f32 %v17136_v17, %v4539_v20  ;;  %13564 = vmatprep.mubr.msk.f32.mxu1 %vm20584_vm2, %v4656_v39  ;;  %v4659_v24 = vmax.f32 %v4545_v51, 0.0 }
 0x698   :  { %v13516_v43 = vpop.f32.mrf.mxu0  ;;  %13565 = vmatmul.mubr.msk.f32.gmra.mxu1 %vm20584_vm2, %v4657_v4 }
 0x699   :  { %v4658_v7 = vmax.f32 %v4540_v58, 0.0  ;;  %v4555_v33 = vadd.f32 %v13516_v43, %v17136_v17 }
 0x69a   :  { %v4549_v60 = vpop.f32.mrf.mxu0 }
 0x69b   :  { %v4550_v16 = vadd.f32 %v17136_v17, %v4549_v60  ;;  %13567 = vmatprep.mubr.msk.f32.mxu1 %vm20584_vm2, %v4658_v7  ;;  %v4661_v0 = vmax.f32 %v4555_v33, 0.0 }
 0x69c   :  { %v13519_v14 = vpop.f32.mrf.mxu0  ;;  %13568 = vmatmul.mubr.msk.f32.gmra.mxu1 %vm20584_vm2, %v4659_v24 }
 0x69d   :  { %v4660_v1 = vmax.f32 %v4550_v16, 0.0  ;;  %v4565_v50 = vadd.f32 %v13519_v14, %v17136_v17  ;;  %v20860_v16 = vld [vmem:[#allocation2_spill] sm:$0xff]  ;;  %v20861_v14 = vld [vmem:[#allocation3_spill] sm:$0xff] }
 0x69e   :  { %v4559_v41 = vpop.f32.mrf.mxu0 }
 0x69f   :  { %v4560_v56 = vadd.f32 %v17136_v17, %v4559_v41  ;;  %13570 = vmatprep.mubr.msk.f32.mxu1 %vm20584_vm2, %v4660_v1  ;;  %v4663_v30 = vmax.f32 %v4565_v50, 0.0  ;;  %v20862_v1 = vld [vmem:[#allocation4_spill] sm:$0xff]  ;;  %v20866_v41 = vld [vmem:[#allocation11_spill] sm:$0xff] }
 0x6a0   :  { %13571 = vmatmul.mubr.msk.f32.gmra.mxu1 %vm20584_vm2, %v4661_v0  ;;  %v20864_v0 = vld [vmem:[#allocation6_spill] sm:$0xff]  ;;  %v20865_v50 = vld [vmem:[#allocation8_spill] sm:$0xff] }
 0x6a1   :  { %v4662_v18 = vmax.f32 %v4560_v56, 0.0  ;;  %v20867_v56 = vld [vmem:[#allocation12_spill] sm:$0xff] }
 0x6a3   :  { %13573 = vmatprep.mubr.msk.f32.mxu1 %vm20584_vm2, %v4662_v18  ;;  %v20868_v18 = vld [vmem:[#allocation15_spill] sm:$0xff] }
 0x6a4   :  { %13574 = vmatmul.mubr.msk.f32.gmra.mxu1 %vm20584_vm2, %v4663_v30  ;;  %v20869_v30 = vld [vmem:[#allocation16_spill] sm:$0xff] }
 0x6d1   :  { %v13522_v32 = vpop.f32.mrf.mxu0 }
 0x6d2   :  { %v4575_v12 = vadd.f32 %v13522_v32, %v17136_v17  ;;  %v20870_v32 = vld [vmem:[#allocation19_spill] sm:$0xff] }
 0x6d3   :  { %v4569_v15 = vpop.f32.mrf.mxu0 }
 0x6d4   :  { %v4570_v10 = vadd.f32 %v17136_v17, %v4569_v15  ;;  %v4665_v29 = vmax.f32 %v4575_v12, 0.0  ;;  %v20871_v12 = vld [vmem:[#allocation20_spill] sm:$0xff]  ;;  %v20872_v15 = vld [vmem:[#allocation23_spill] sm:$0xff] }
 0x6d5   :  { %v13525_v21 = vpop.f32.mrf.mxu0 }
 0x6d6   :  { %v4664_v28 = vmax.f32 %v4570_v10, 0.0  ;;  %v4585_v53 = vadd.f32 %v13525_v21, %v17136_v17  ;;  %v20873_v10 = vld [vmem:[#allocation24_spill] sm:$0xff]  ;;  %v20874_v21 = vld [vmem:[#allocation27_spill] sm:$0xff] }
 0x6d7   :  { %v4579_v5 = vpop.f32.mrf.mxu0 }
 0x6d8   :  { %v4580_v22 = vadd.f32 %v17136_v17, %v4579_v5  ;;  %13576 = vmatprep.mubr.msk.f32.mxu1 %vm20584_vm2, %v4664_v28  ;;  %v4667_v9 = vmax.f32 %v4585_v53, 0.0  ;;  %v20875_v28 = vld [vmem:[#allocation28_spill] sm:$0xff] }
 0x6d9   :  { %v13528_v61 = vpop.f32.mrf.mxu0  ;;  %13577 = vmatmul.mubr.msk.f32.gmra.mxu1 %vm20584_vm2, %v4665_v29 }
 0x6da   :  { %v4666_v38 = vmax.f32 %v4580_v22, 0.0  ;;  %v4595_v23 = vadd.f32 %v13528_v61, %v17136_v17 }
 0x6db   :  { %v4589_v3 = vpop.f32.mrf.mxu0 }
 0x6dc   :  { %v4590_v57 = vadd.f32 %v17136_v17, %v4589_v3  ;;  %13579 = vmatprep.mubr.msk.f32.mxu1 %vm20584_vm2, %v4666_v38  ;;  %v4669_v37 = vmax.f32 %v4595_v23, 0.0  ;;  %v17262_v3 = vld [vmem:[%s20330_s8 + $0x60] ss:$0 sm:$0xff] }
 0x6dd   :  { %v13531_v2 = vpop.f32.mrf.mxu0  ;;  %13580 = vmatmul.mubr.msk.f32.gmra.mxu1 %vm20584_vm2, %v4667_v9 }
 0x6de   :  { %v4668_v31 = vmax.f32 %v4590_v57, 0.0  ;;  %v4605_v54 = vadd.f32 %v13531_v2, %v17136_v17 }
 0x6df   :  { %v4599_v59 = vpop.f32.mrf.mxu0 }
 0x6e0   :  { %v4600_v55 = vadd.f32 %v17136_v17, %v4599_v59  ;;  %13582 = vmatprep.mubr.msk.f32.mxu1 %vm20584_vm2, %v4668_v31  ;;  %v4671_v11 = vmax.f32 %v4605_v54, 0.0 }
 0x6e1   :  { %v13534_v42 = vpop.f32.mrf.mxu0  ;;  %13583 = vmatmul.mubr.msk.f32.gmra.mxu1 %vm20584_vm2, %v4669_v37 }
 0x6e2   :  { %v4670_v26 = vmax.f32 %v4600_v55, 0.0  ;;  %v4615_v48 = vadd.f32 %v13534_v42, %v17136_v17 }
 0x6e3   :  { %v4609_v19 = vpop.f32.mrf.mxu0 }
 0x6e4   :  { %v4610_v40 = vadd.f32 %v17136_v17, %v4609_v19  ;;  %13585 = vmatprep.mubr.msk.f32.mxu1 %vm20584_vm2, %v4670_v26  ;;  %v4673_v27 = vmax.f32 %v4615_v48, 0.0 }
 0x6e5   :  { %v13537_v44 = vpop.f32.mrf.mxu0  ;;  %13586 = vmatmul.mubr.msk.f32.gmra.mxu1 %vm20584_vm2, %v4671_v11 }
 0x6e6   :  { %v4672_v34 = vmax.f32 %v4610_v40, 0.0  ;;  %v4625_v47 = vadd.f32 %v13537_v44, %v17136_v17 }
 0x6e7   :  { %v4619_v6 = vpop.f32.mrf.mxu0 }
 0x6e8   :  { %v4620_v13 = vadd.f32 %v17136_v17, %v4619_v6  ;;  %13588 = vmatprep.mubr.msk.f32.mxu1 %vm20584_vm2, %v4672_v34  ;;  %v4675_v46 = vmax.f32 %v4625_v47, 0.0 }
 0x6e9   :  { %v13540_v35 = vpop.f32.mrf.mxu0  ;;  %13589 = vmatmul.mubr.msk.f32.gmra.mxu1 %vm20584_vm2, %v4673_v27 }
 0x6ea   :  { %v4674_v36 = vmax.f32 %v4620_v13, 0.0  ;;  %v4635_v25 = vadd.f32 %v13540_v35, %v17136_v17 }
 0x6eb   :  { %v4629_v39 = vpop.f32.mrf.mxu0 }
 0x6ec   :  { %v4630_v4 = vadd.f32 %v17136_v17, %v4629_v39  ;;  %13591 = vmatprep.mubr.msk.f32.mxu1 %vm20584_vm2, %v4674_v36  ;;  %v4677_v58 = vmax.f32 %v4635_v25, 0.0 }
 0x6ed   :  { %v13543_v51 = vpop.f32.mrf.mxu0  ;;  %13592 = vmatmul.mubr.msk.f32.gmra.mxu1 %vm20584_vm2, %v4675_v46 }
 0x6ee   :  { %v4676_v20 = vmax.f32 %v4630_v4, 0.0  ;;  %v4645_v43 = vadd.f32 %v13543_v51, %v17136_v17 }
 0x6ef   :  { %v4639_v7 = vpop.f32.mrf.mxu0 }
 0x6f0   :  { %v4640_v24 = vadd.f32 %v17136_v17, %v4639_v7  ;;  %13594 = vmatprep.mubr.msk.f32.mxu1 %vm20584_vm2, %v4676_v20  ;;  %v4679_v60 = vmax.f32 %v4645_v43, 0.0  ;;  %v20863_v17 = vld [vmem:[#allocation5_spill] sm:$0xff] }
 0x6f1   :  { %13595 = vmatmul.mubr.msk.f32.gmra.mxu1 %vm20584_vm2, %v4677_v58 }
 0x6f2   :  { %v4678_v33 = vmax.f32 %v4640_v24, 0.0 }
 0x6f4   :  { %13597 = vmatprep.mubr.msk.f32.mxu1 %vm20584_vm2, %v4678_v33 }
 0x6f5   :  { %13598 = vmatmul.mubr.msk.f32.gmra.mxu1 %vm20584_vm2, %v4679_v60 }
 0x6f6   :  { %13608 = vmatprep.mubr.msk.f32.mxu1 %vm20584_vm2, %v20860_v16 }
 0x6f9   :  { %13609 = vmatmul.mubr.msk.f32.vlgmr.msra.gmra.mxu1 %vm20584_vm2, %v20861_v14 }
 0x6fa   :  { %13611 = vmatprep.mubr.msk.f32.mxu1 %vm20584_vm2, %v20862_v1 }
 0x6fd   :  { %13612 = vmatmul.mubr.msk.f32.gmra.mxu1 %vm20584_vm2, %v20863_v17 }
 0x6fe   :  { %13614 = vmatprep.mubr.msk.f32.mxu1 %vm20584_vm2, %v20864_v0 }
 0x701   :  { %13615 = vmatmul.mubr.msk.f32.gmra.mxu1 %vm20584_vm2, %v20865_v50 }
 0x702   :  { %13617 = vmatprep.mubr.msk.f32.mxu1 %vm20584_vm2, %v20866_v41 }
 0x705   :  { %13618 = vmatmul.mubr.msk.f32.gmra.mxu1 %vm20584_vm2, %v20867_v56 }
 0x706   :  { %13620 = vmatprep.mubr.msk.f32.mxu1 %vm20584_vm2, %v20868_v18 }
 0x709   :  { %13621 = vmatmul.mubr.msk.f32.gmra.mxu1 %vm20584_vm2, %v20869_v30 }
 0x70a   :  { %13623 = vmatprep.mubr.msk.f32.mxu1 %vm20584_vm2, %v20870_v32 }
 0x70d   :  { %13624 = vmatmul.mubr.msk.f32.gmra.mxu1 %vm20584_vm2, %v20871_v12 }
 0x70e   :  { %13626 = vmatprep.mubr.msk.f32.mxu1 %vm20584_vm2, %v20872_v15 }
 0x711   :  { %13627 = vmatmul.mubr.msk.f32.gmra.mxu1 %vm20584_vm2, %v20873_v10 }
 0x712   :  { %13629 = vmatprep.mubr.msk.f32.mxu1 %vm20584_vm2, %v20874_v21 }
 0x715   :  { %13630 = vmatmul.mubr.msk.f32.gmra.mxu1 %vm20584_vm2, %v20875_v28 }
 0x748   :  { %v17243_v29 = vpop.f32.mrf.mxu1 }
 0x74a   :  { %v17245_v53 = vpop.f32.mrf.mxu1 }
 0x74c   :  { %v17247_v5 = vpop.f32.mrf.mxu1 }
 0x74e   :  { %v17249_v22 = vpop.f32.mrf.mxu1 }
 0x750   :  { %v17251_v61 = vpop.f32.mrf.mxu1 }
 0x752   :  { %v17253_v38 = vpop.f32.mrf.mxu1 }
 0x754   :  { %v17255_v9 = vpop.f32.mrf.mxu1 }
 0x756   :  { %v17257_v23 = vpop.f32.mrf.mxu1 }
 0x758   :  { %v13566_v57 = vpop.f32.mrf.mxu1 }
 0x759   :  { %v17265_v2 = vadd.f32 %v13566_v57, %v17262_v3 }
 0x75a   :  { %v4891_v31 = vpop.f32.mrf.mxu1 }
 0x75b   :  { %v17268_v37 = vadd.f32 %v17262_v3, %v4891_v31  ;;  %v5039_v54 = vsel %vm20584_vm2, %v17265_v2, 0.0 }
 0x75c   :  { %5040 = vadd.xlane.f32.xlu0 %v5039_v54  ;;  %v13569_v59 = vpop.f32.mrf.mxu1 }
 0x75d   :  { %v17273_v42 = vadd.f32 %v13569_v59, %v17262_v3  ;;  %v5036_v26 = vsel %vm20584_vm2, %v17268_v37, 0.0 }
 0x75e   :  { %v4901_v55 = vpop.f32.mrf.mxu1 }
 0x75f   :  { %v17278_v19 = vadd.f32 %v17262_v3, %v4901_v55  ;;  %v5045_v40 = vsel %vm20584_vm2, %v17273_v42, 0.0 }
 0x760   :  { %v13572_v11 = vpop.f32.mrf.mxu1  ;;  %5037 = vadd.xlane.f32.xlu0 %v5036_v26 }
 0x761   :  { %v17286_v27 = vadd.f32 %v13572_v11, %v17262_v3  ;;  %v5042_v6 = vsel %vm20584_vm2, %v17278_v19, 0.0 }
 0x762   :  { %v4911_v48 = vpop.f32.mrf.mxu1 }
 0x763   :  { %v17293_v13 = vadd.f32 %v17262_v3, %v4911_v48  ;;  %v5051_v35 = vsel %vm20584_vm2, %v17286_v27, 0.0 }
 0x764   :  { %v13575_v44 = vpop.f32.mrf.mxu1  ;;  %5046 = vadd.xlane.f32.xlu0 %v5045_v40 }
 0x765   :  { %v17283_v34 = vadd.f32 %v13575_v44, %v17262_v3  ;;  %v5048_v25 = vsel %vm20584_vm2, %v17293_v13, 0.0 }
 0x766   :  { %v4921_v36 = vpop.f32.mrf.mxu1 }
 0x767   :  { %v5057_v47 = vsel %vm20584_vm2, %v17283_v34, 0.0  ;;  %v17298_v46 = vadd.f32 %v17262_v3, %v4921_v36 }
 0x768   :  { %5058 = vadd.xlane.f32.xlu1 %v5057_v47  ;;  %5043 = vadd.xlane.f32.xlu0 %v5042_v6 }
 0x769   :  { %v5054_v39 = vsel %vm20584_vm2, %v17298_v46, 0.0 }
 0x76c   :  { %5052 = vadd.xlane.f32.xlu0 %v5051_v35 }
 0x770   :  { %5049 = vadd.xlane.f32.xlu0 %v5048_v25 }
 0x774   :  { %5055 = vadd.xlane.f32.xlu0 %v5054_v39 }
 0x799   :  { %v17304_v4 = vpop.f32.mrf.mxu1 }
 0x79b   :  { %v17306_v51 = vpop.f32.mrf.mxu1 }
 0x79d   :  { %v13581_v20 = vpop.f32.mrf.mxu1 }
 0x79f   :  { %v17308_v58 = vpop.f32.mrf.mxu1 }
 0x7a1   :  { %v13584_v43 = vpop.f32.mrf.mxu1 }
 0x7a3   :  { %v4951_v7 = vpop.f32.mrf.mxu1 }
 0x7a5   :  { %v13587_v24 = vpop.f32.mrf.mxu1 }
 0x7a6   :  { %v17311_v33 = vadd.f32 %v13587_v24, %v17262_v3 }
 0x7a7   :  { %v4961_v60 = vpop.f32.mrf.mxu1 }
 0x7a8   :  { %v5081_v57 = vsel %vm20584_vm2, %v17311_v33, 0.0 }
 0x7a9   :  { %5082 = vadd.xlane.f32.xlu1 %v5081_v57  ;;  %v13590_v31 = vpop.f32.mrf.mxu1 }
 0x7aa   :  { %v17316_v54 = vadd.f32 %v13590_v31, %v17262_v3 }
 0x7ab   :  { %v4971_v59 = vpop.f32.mrf.mxu1 }
 0x7ac   :  { %v17319_v55 = vadd.f32 %v17262_v3, %v4971_v59  ;;  %v5087_v26 = vsel %vm20584_vm2, %v17316_v54, 0.0 }
 0x7ad   :  { %5088 = vadd.xlane.f32.xlu1 %v5087_v26  ;;  %v13593_v11 = vpop.f32.mrf.mxu1 }
 0x7ae   :  { %v17324_v40 = vadd.f32 %v13593_v11, %v17262_v3  ;;  %v5084_v44 = vsel %vm20584_vm2, %v17319_v55, 0.0  ;;  %v17348_v11 = vadd.f32 %v17255_v9, %v17262_v3 }
 0x7af   :  { %v4981_v48 = vpop.f32.mrf.mxu1 }
 0x7b0   :  { %v17329_v35 = vadd.f32 %v17262_v3, %v4981_v48  ;;  %v5093_v36 = vsel %vm20584_vm2, %v17324_v40, 0.0 }
 0x7b1   :  { %v13596_v47 = vpop.f32.mrf.mxu1  ;;  %5085 = vadd.xlane.f32.xlu1 %v5084_v44 }
 0x7b2   :  { %v17337_v57 = vadd.f32 %v13596_v47, %v17262_v3  ;;  %v5090_v59 = vsel %vm20584_vm2, %v17329_v35, 0.0 }
 0x7b3   :  { %v4991_v6 = vpop.f32.mrf.mxu1 }
 0x7b4   :  { %v17351_v48 = vadd.f32 %v17262_v3, %v4991_v6  ;;  %v5099_v44 = vsel %vm20584_vm2, %v17337_v57, 0.0  ;;  %v5033_v6 = vsel %vm20584_vm2, %v17348_v11, 0.0 }
 0x7b5   :  { %5094 = vadd.xlane.f32.xlu1 %v5093_v36  ;;  %v13599_v25 = vpop.f32.mrf.mxu1  ;;  %v17359_v36 = vadd.f32 %v17262_v3, %v17257_v23 }
 0x7b6   :  { %v17334_v39 = vadd.f32 %v13599_v25, %v17262_v3  ;;  %v17362_v25 = vadd.f32 %v17262_v3, %v4961_v60  ;;  %v5096_v9 = vsel %vm20584_vm2, %v17351_v48, 0.0 }
 0x7b7   :  { %v5001_v24 = vpop.f32.mrf.mxu1  ;;  %v5030_v60 = vsel %vm20584_vm2, %v17359_v36, 0.0 }
 0x7b8   :  { %v17340_v31 = vadd.f32 %v17262_v3, %v5001_v24  ;;  %v5105_v26 = vsel %vm20584_vm2, %v17334_v39, 0.0  ;;  %v17370_v24 = vadd.f32 %v17251_v61, %v17262_v3  ;;  %v5078_v23 = vsel %vm20584_vm2, %v17362_v25, 0.0 }
 0x7b9   :  { %5091 = vadd.xlane.f32.xlu1 %v5090_v59  ;;  %5106 = vadd.xlane.f32.xlu0 %v5105_v26  ;;  %v17373_v59 = vadd.f32 %v13584_v43, %v17262_v3  ;;  %v17381_v26 = vadd.f32 %v17262_v3, %v17253_v38 }
 0x7ba   :  { %v5102_v47 = vsel %vm20584_vm2, %v17340_v31, 0.0  ;;  %v5027_v43 = vsel %vm20584_vm2, %v17370_v24, 0.0 }
 0x7bb   :  { %v5075_v61 = vsel %vm20584_vm2, %v17373_v59, 0.0 }
 0x7bd   :  { %5100 = vadd.xlane.f32.xlu1 %v5099_v44  ;;  %5103 = vadd.xlane.f32.xlu0 %v5102_v47  ;;  %v17384_v44 = vadd.f32 %v17262_v3, %v4951_v7  ;;  %v17392_v47 = vadd.f32 %v17247_v5, %v17262_v3  ;;  %v5024_v7 = vsel %vm20584_vm2, %v17381_v26, 0.0 }
 0x7bf   :  { %v5072_v38 = vsel %vm20584_vm2, %v17384_v44, 0.0 }
 0x7c1   :  { %5097 = vadd.xlane.f32.xlu1 %v5096_v9  ;;  %5034 = vadd.xlane.f32.xlu0 %v5033_v6  ;;  %v17395_v9 = vadd.f32 %v13581_v20, %v17262_v3  ;;  %v17403_v6 = vadd.f32 %v17262_v3, %v17249_v22  ;;  %v5021_v20 = vsel %vm20584_vm2, %v17392_v47, 0.0  ;;  %v17419_v22 = vadd.f32 %v17304_v4, %v17262_v3 }
 0x7c3   :  { %v5069_v5 = vsel %vm20584_vm2, %v17395_v9, 0.0  ;;  %v5063_v4 = vsel %vm20584_vm2, %v17419_v22, 0.0 }
 0x7c5   :  { %5079 = vadd.xlane.f32.xlu1 %v5078_v23  ;;  %5031 = vadd.xlane.f32.xlu0 %v5030_v60  ;;  %v17407_v23 = vadd.f32 %v17262_v3, %v17308_v58  ;;  %v17415_v60 = vadd.f32 %v17243_v29, %v17262_v3  ;;  %v17431_v29 = vadd.f32 %v17262_v3, %v17306_v51 }
 0x7c7   :  { %v5066_v58 = vsel %vm20584_vm2, %v17407_v23, 0.0 }
 0x7c9   :  { %5076 = vadd.xlane.f32.xlu1 %v5075_v61  ;;  %5028 = vadd.xlane.f32.xlu0 %v5027_v43  ;;  %v5018_v61 = vsel %vm20584_vm2, %v17403_v6, 0.0  ;;  %v17427_v43 = vadd.f32 %v17262_v3, %v17245_v53 }
 0x7cd   :  { %5073 = vadd.xlane.f32.xlu1 %v5072_v38  ;;  %5025 = vadd.xlane.f32.xlu0 %v5024_v7  ;;  %v5015_v38 = vsel %vm20584_vm2, %v17415_v60, 0.0  ;;  %v5060_v7 = vsel %vm20584_vm2, %v17431_v29, 0.0 }
 0x7d1   :  { %5070 = vadd.xlane.f32.xlu1 %v5069_v5  ;;  %5022 = vadd.xlane.f32.xlu0 %v5021_v20  ;;  %v5012_v5 = vsel %vm20584_vm2, %v17427_v43, 0.0 }
 0x7d5   :  { %5067 = vadd.xlane.f32.xlu1 %v5066_v58  ;;  %5019 = vadd.xlane.f32.xlu0 %v5018_v61 }
 0x7d9   :  { %5064 = vadd.xlane.f32.xlu1 %v5063_v4  ;;  %5016 = vadd.xlane.f32.xlu0 %v5015_v38 }
 0x7dd   :  { %5061 = vadd.xlane.f32.xlu1 %v5060_v7  ;;  %5013 = vadd.xlane.f32.xlu0 %v5012_v5 }
 0x7e5   :  { %v5041_v53 = vpop.xlane.xlu0 %5040 }
 0x7e9   :  { %v5038_v20 = vpop.xlane.xlu0 %5037 }
 0x7ed   :  { %v5047_v3 = vpop.xlane.xlu0 %5046 }
 0x7f1   :  { %v17441_v51 = vpop.xlane.xlu0 %5043  ;;  %v17443_v58 = vpop.xlane.xlu1 %5058 }
 0x7f5   :  { %v17445_v61 = vpop.xlane.xlu0 %5052 }
 0x7f9   :  { %v17452_v5 = vpop.xlane.xlu0 %5049 }
 0x832   :  { %v5083_v63 = vpop.xlane.xlu1 %5082 }
 0x833   :  { %v5131_v4 = vmul.f32 0.03125, %v5083_v63 }
 0x835   :  { %v17448_v38 = vsub.f32 %v17311_v33, %v5131_v4  ;;  %v17464_v4 = vpop.xlane.xlu0 %5055 }
 0x836   :  { %v5089_v62 = vpop.xlane.xlu1 %5088 }
 0x837   :  { %v5133_v49 = vmul.f32 0.03125, %v5089_v62  ;;  %v5195_v7 = vmul.f32 %v17448_v38, %v17448_v38 }
 0x839   :  { %v17455_v8 = vsub.f32 %v17316_v54, %v5133_v49  ;;  %v5273_v52 = vsel %vm20584_vm2, %v5195_v7, 0.0 }
 0x83a   :  { %v5086_v28 = vpop.xlane.xlu1 %5085  ;;  %5274 = vadd.xlane.f32.xlu1 %v5273_v52 }
 0x83b   :  { %v5132_v21 = vmul.f32 0.03125, %v5086_v28  ;;  %v5197_v63 = vmul.f32 %v17455_v8, %v17455_v8 }
 0x83d   :  { %v17461_v33 = vsub.f32 %v17319_v55, %v5132_v21  ;;  %v5279_v62 = vsel %vm20584_vm2, %v5197_v63, 0.0 }
 0x83e   :  { %v5095_v10 = vpop.xlane.xlu1 %5094  ;;  %5280 = vadd.xlane.f32.xlu1 %v5279_v62 }
 0x83f   :  { %v5135_v15 = vmul.f32 0.03125, %v5095_v10  ;;  %v5196_v49 = vmul.f32 %v17461_v33, %v17461_v33 }
 0x841   :  { %v17469_v54 = vsub.f32 %v17324_v40, %v5135_v15  ;;  %v5276_v52 = vsel %vm20584_vm2, %v5196_v49, 0.0  ;;  %v5117_v40 = vmul.f32 0.03125, %v5041_v53 }
 0x842   :  { %v5092_v28 = vpop.xlane.xlu1 %5091  ;;  %5277 = vadd.xlane.f32.xlu1 %v5276_v52  ;;  %v5107_v7 = vpop.xlane.xlu0 %5106 }
 0x843   :  { %v5134_v21 = vmul.f32 0.03125, %v5092_v28  ;;  %v5199_v55 = vmul.f32 %v17469_v54, %v17469_v54  ;;  %v5139_v49 = vmul.f32 0.03125, %v5107_v7 }
 0x845   :  { %v17475_v63 = vsub.f32 %v17329_v35, %v5134_v21  ;;  %v5285_v10 = vsel %vm20584_vm2, %v5199_v55, 0.0  ;;  %v17490_v53 = vsub.f32 %v17334_v39, %v5139_v49 }
 0x846   :  { %v5101_v62 = vpop.xlane.xlu1 %5100  ;;  %5286 = vadd.xlane.f32.xlu1 %v5285_v10  ;;  %v5104_v12 = vpop.xlane.xlu0 %5103  ;;  %v17487_v10 = vsub.f32 %v17265_v2, %v5117_v40 }
 0x847   :  { %v5137_v32 = vmul.f32 0.03125, %v5101_v62  ;;  %v5198_v15 = vmul.f32 %v17475_v63, %v17475_v63  ;;  %v5116_v62 = vmul.f32 0.03125, %v5038_v20  ;;  %v5138_v7 = vmul.f32 0.03125, %v5104_v12 }
 0x848   :  { %v5119_v12 = vmul.f32 0.03125, %v5047_v3  ;;  %v5118_v3 = vmul.f32 0.03125, %v17441_v51  ;;  %v5121_v51 = vmul.f32 0.03125, %v17445_v61  ;;  %v5120_v61 = vmul.f32 0.03125, %v17452_v5 }
 0x849   :  { %v17481_v52 = vsub.f32 %v17337_v57, %v5137_v32  ;;  %v5282_v28 = vsel %vm20584_vm2, %v5198_v15, 0.0  ;;  %v17504_v39 = vsub.f32 %v17268_v37, %v5116_v62 }
 0x84a   :  { %v5098_v30 = vpop.xlane.xlu1 %5097  ;;  %5283 = vadd.xlane.f32.xlu1 %v5282_v28  ;;  %v5035_v35 = vpop.xlane.xlu0 %5034  ;;  %v17516_v37 = vsub.f32 %v17273_v42, %v5119_v12  ;;  %v17529_v42 = vsub.f32 %v17278_v19, %v5118_v3  ;;  %v17542_v19 = vsub.f32 %v17286_v27, %v5121_v51  ;;  %v5123_v27 = vmul.f32 0.03125, %v17443_v58 }
 0x84b   :  { %v5136_v21 = vmul.f32 0.03125, %v5098_v30  ;;  %v5115_v18 = vmul.f32 0.03125, %v5035_v35  ;;  %v5201_v55 = vmul.f32 %v17481_v52, %v17481_v52  ;;  %v17556_v5 = vsub.f32 %v17293_v13, %v5120_v61 }
 0x84c   :  { %v17568_v13 = vsub.f32 %v17283_v34, %v5123_v27  ;;  %v5122_v58 = vmul.f32 0.03125, %v17464_v4 }
 0x84d   :  { %v17493_v32 = vsub.f32 %v17351_v48, %v5136_v21  ;;  %v17496_v57 = vsub.f32 %v17348_v11, %v5115_v18  ;;  %v5291_v30 = vsel %vm20584_vm2, %v5201_v55, 0.0  ;;  %v5203_v48 = vmul.f32 %v17490_v53, %v17490_v53 }
 0x84e   :  { %v5080_v15 = vpop.xlane.xlu1 %5079  ;;  %5292 = vadd.xlane.f32.xlu1 %v5291_v30  ;;  %v5181_v18 = vmul.f32 %v17487_v10, %v17487_v10  ;;  %v17511_v11 = vsub.f32 %v17340_v31, %v5138_v7  ;;  %v5180_v55 = vmul.f32 %v17504_v39, %v17504_v39  ;;  %v17581_v34 = vsub.f32 %v17298_v46, %v5122_v58 }
 0x84f   :  { %v5200_v28 = vmul.f32 %v17493_v32, %v17493_v32  ;;  %v5179_v2 = vmul.f32 %v17496_v57, %v17496_v57  ;;  %v5130_v20 = vmul.f32 0.03125, %v5080_v15  ;;  %v5297_v7 = vsel %vm20584_vm2, %v5203_v48, 0.0 }
 0x850   :  { %v5231_v21 = vsel %vm20584_vm2, %v5181_v18, 0.0  ;;  %v5202_v30 = vmul.f32 %v17511_v11, %v17511_v11 }
 0x851   :  { %v5288_v40 = vsel %vm20584_vm2, %v5200_v28, 0.0  ;;  %v5225_v49 = vsel %vm20584_vm2, %v5179_v2, 0.0  ;;  %v17523_v31 = vsub.f32 %v17362_v25, %v5130_v20  ;;  %v5228_v28 = vsel %vm20584_vm2, %v5180_v55, 0.0  ;;  %v5032_v20 = vpop.xlane.xlu0 %5031 }
 0x852   :  { %v5077_v35 = vpop.xlane.xlu1 %5076  ;;  %5289 = vadd.xlane.f32.xlu1 %v5288_v40  ;;  %5226 = vadd.xlane.f32.xlu0 %v5225_v49  ;;  %v5183_v25 = vmul.f32 %v17516_v37, %v17516_v37  ;;  %v5294_v48 = vsel %vm20584_vm2, %v5202_v30, 0.0  ;;  %v5114_v4 = vmul.f32 0.03125, %v5032_v20 }
 0x853   :  { %v5129_v62 = vmul.f32 0.03125, %v5077_v35  ;;  %v5194_v18 = vmul.f32 %v17523_v31, %v17523_v31 }
 0x854   :  { %v5237_v49 = vsel %vm20584_vm2, %v5183_v25, 0.0  ;;  %v17593_v46 = vsub.f32 %v17359_v36, %v5114_v4 }
 0x855   :  { %v17536_v2 = vsub.f32 %v17373_v59, %v5129_v62  ;;  %v5182_v59 = vmul.f32 %v17529_v42, %v17529_v42 }
 0x856   :  { %v5074_v15 = vpop.xlane.xlu1 %5073  ;;  %5298 = vadd.xlane.f32.xlu1 %v5297_v7  ;;  %5232 = vadd.xlane.f32.xlu0 %v5231_v21  ;;  %v5270_v21 = vsel %vm20584_vm2, %v5194_v18, 0.0  ;;  %v5029_v7 = vpop.xlane.xlu0 %5028  ;;  %v5178_v58 = vmul.f32 %v17593_v46, %v17593_v46 }
 0x857   :  { %v5128_v12 = vmul.f32 0.03125, %v5074_v15  ;;  %v5193_v55 = vmul.f32 %v17536_v2, %v17536_v2  ;;  %v5234_v30 = vsel %vm20584_vm2, %v5182_v59, 0.0 }
 0x859   :  { %v17549_v35 = vsub.f32 %v17384_v44, %v5128_v12  ;;  %v5185_v44 = vmul.f32 %v17542_v19, %v17542_v19 }
 0x85a   :  { %v5071_v40 = vpop.xlane.xlu1 %5070  ;;  %5295 = vadd.xlane.f32.xlu1 %v5294_v48  ;;  %5229 = vadd.xlane.f32.xlu0 %v5228_v28  ;;  %v5267_v28 = vsel %vm20584_vm2, %v5193_v55, 0.0  ;;  %v5026_v59 = vpop.xlane.xlu0 %5025 }
 0x85b   :  { %v5127_v3 = vmul.f32 0.03125, %v5071_v40  ;;  %v5192_v25 = vmul.f32 %v17549_v35, %v17549_v35  ;;  %v5243_v48 = vsel %vm20584_vm2, %v5185_v44, 0.0 }
 0x85d   :  { %v17562_v15 = vsub.f32 %v17395_v9, %v5127_v3  ;;  %v5184_v9 = vmul.f32 %v17556_v5, %v17556_v5  ;;  %v5264_v61 = vsel %vm20584_vm2, %v5192_v25, 0.0 }
 0x85e   :  { %v5068_v62 = vpop.xlane.xlu1 %5067  ;;  %5271 = vadd.xlane.f32.xlu1 %v5270_v21  ;;  %5238 = vadd.xlane.f32.xlu0 %v5237_v49  ;;  %v5023_v20 = vpop.xlane.xlu0 %5022 }
 0x85f   :  { %v5126_v51 = vmul.f32 0.03125, %v5068_v62  ;;  %v5191_v49 = vmul.f32 %v17562_v15, %v17562_v15  ;;  %v5240_v21 = vsel %vm20584_vm2, %v5184_v9, 0.0  ;;  %v5112_v9 = vmul.f32 0.03125, %v5026_v59 }
 0x861   :  { %v17575_v18 = vsub.f32 %v17407_v23, %v5126_v51  ;;  %v5187_v23 = vmul.f32 %v17568_v13, %v17568_v13  ;;  %v5261_v27 = vsel %vm20584_vm2, %v5191_v49, 0.0  ;;  %v5186_v51 = vmul.f32 %v17581_v34, %v17581_v34 }
 0x862   :  { %v5065_v12 = vpop.xlane.xlu1 %5064  ;;  %5268 = vadd.xlane.f32.xlu1 %v5267_v28  ;;  %5235 = vadd.xlane.f32.xlu0 %v5234_v30  ;;  %v5113_v28 = vmul.f32 0.03125, %v5029_v7  ;;  %v17615_v49 = vsub.f32 %v17381_v26, %v5112_v9 }
 0x863   :  { %v5125_v40 = vmul.f32 0.03125, %v5065_v12  ;;  %v5190_v30 = vmul.f32 %v17575_v18, %v17575_v18  ;;  %v5249_v44 = vsel %vm20584_vm2, %v5187_v23, 0.0  ;;  %v5246_v36 = vsel %vm20584_vm2, %v5186_v51, 0.0 }
 0x865   :  { %v17587_v55 = vsub.f32 %v17419_v22, %v5125_v40  ;;  %v5258_v25 = vsel %vm20584_vm2, %v5190_v30, 0.0  ;;  %v5020_v40 = vpop.xlane.xlu0 %5019 }
 0x866   :  { %v5062_v3 = vpop.xlane.xlu1 %5061  ;;  %5265 = vadd.xlane.f32.xlu1 %v5264_v61  ;;  %5244 = vadd.xlane.f32.xlu0 %v5243_v48  ;;  %v17608_v48 = vsub.f32 %v17370_v24, %v5113_v28  ;;  %v5222_v61 = vsel %vm20584_vm2, %v5178_v58, 0.0  ;;  %v5110_v23 = vmul.f32 0.03125, %v5020_v40 }
 0x867   :  { %v5124_v62 = vmul.f32 0.03125, %v5062_v3  ;;  %v5189_v12 = vmul.f32 %v17587_v55, %v17587_v55  ;;  %v5111_v3 = vmul.f32 0.03125, %v5023_v20 }
 0x868   :  { %v5177_v24 = vmul.f32 %v17608_v48, %v17608_v48  ;;  %v17627_v26 = vsub.f32 %v17403_v6, %v5110_v23 }
 0x869   :  { %v17599_v22 = vsub.f32 %v17431_v29, %v5124_v62  ;;  %v5255_v7 = vsel %vm20584_vm2, %v5189_v12, 0.0  ;;  %v5017_v59 = vpop.xlane.xlu0 %5016 }
 0x86a   :  { %5262 = vadd.xlane.f32.xlu1 %v5261_v27  ;;  %5241 = vadd.xlane.f32.xlu0 %v5240_v21  ;;  %v17621_v21 = vsub.f32 %v17392_v47, %v5111_v3  ;;  %v5219_v62 = vsel %vm20584_vm2, %v5177_v24, 0.0  ;;  %v5176_v27 = vmul.f32 %v17615_v49, %v17615_v49  ;;  %v5109_v30 = vmul.f32 0.03125, %v5017_v59 }
 0x86b   :  { %v5188_v29 = vmul.f32 %v17599_v22, %v17599_v22  ;;  %v5174_v12 = vmul.f32 %v17627_v26, %v17627_v26 }
 0x86c   :  { %v5216_v20 = vsel %vm20584_vm2, %v5176_v27, 0.0  ;;  %v17633_v47 = vsub.f32 %v17415_v60, %v5109_v30 }
 0x86d   :  { %v5252_v4 = vsel %vm20584_vm2, %v5188_v29, 0.0  ;;  %v5014_v51 = vpop.xlane.xlu0 %5013  ;;  %v20876_v29 = vlaneseq }
 0x86e   :  { %5259 = vadd.xlane.f32.xlu1 %v5258_v25  ;;  %5250 = vadd.xlane.f32.xlu0 %v5249_v44  ;;  %v5175_v44 = vmul.f32 %v17621_v21, %v17621_v21  ;;  %v5108_v28 = vmul.f32 0.03125, %v5014_v51  ;;  %v5173_v58 = vmul.f32 %v17633_v47, %v17633_v47 }
 0x86f   :  { %v17649_v40 = vshrl.u32 %v20876_v29, 7 }
 0x870   :  { %v5213_v25 = vsel %vm20584_vm2, %v5175_v44, 0.0  ;;  %v17639_v6 = vsub.f32 %v17427_v43, %v5108_v28  ;;  %v5207_v9 = vsel %vm20584_vm2, %v5173_v58, 0.0 }
 0x871   :  { %20877 = vst [vmem:[#allocation115_spill] sm:$0xff] %v17649_v40  ;;  %v2998_v43 = vsub.s32 1, %v17649_v40  ;;  %v2994_v3 = vsub.s32 0, %v17649_v40  ;;  %v17669_v59 = vadd.s32 8, %v17649_v40  ;;  %v17676_v23 = vadd.s32 16, %v17649_v40 }
 0x872   :  { %5256 = vadd.xlane.f32.xlu1 %v5255_v7  ;;  %5247 = vadd.xlane.f32.xlu0 %v5246_v36  ;;  %v5210_v36 = vsel %vm20584_vm2, %v5174_v12, 0.0  ;;  %v5172_v60 = vmul.f32 %v17639_v6, %v17639_v6  ;;  %v17690_v27 = vadd.s32 32, %v17649_v40  ;;  %v17697_v30 = vadd.s32 40, %v17649_v40 }
 0x873   :  { %20880 = vst [vmem:[#allocation118_spill] sm:$0xff] %v17669_v59  ;;  %20881 = vst [vmem:[#allocation119_spill] sm:$0xff] %v17676_v23  ;;  %v17706_v44 = vadd.s32 48, %v17649_v40  ;;  %v17713_v28 = vadd.s32 56, %v17649_v40  ;;  %v17722_v12 = vadd.s32 64, %v17649_v40  ;;  %v17729_v58 = vadd.s32 72, %v17649_v40 }
 0x874   :  { %v5204_v7 = vsel %vm20584_vm2, %v5172_v60, 0.0  ;;  %20883 = vst [vmem:[#allocation121_spill] sm:$0xff] %v17690_v27  ;;  %20884 = vst [vmem:[#allocation122_spill] sm:$0xff] %v17697_v30  ;;  %v17736_v60 = vadd.s32 80, %v17649_v40  ;;  %v17743_v29 = vadd.s32 88, %v17649_v40  ;;  %v17754_v41 = vadd.s32 96, %v17649_v40 }
 0x875   :  { %20885 = vst [vmem:[#allocation123_spill] sm:$0xff] %v17706_v44  ;;  %20886 = vst [vmem:[#allocation124_spill] sm:$0xff] %v17713_v28  ;;  %v17763_v14 = vadd.s32 104, %v17649_v40 }
 0x876   :  { %5253 = vadd.xlane.f32.xlu1 %v5252_v4  ;;  %5223 = vadd.xlane.f32.xlu0 %v5222_v61  ;;  %v2991_v61 = vld [vmem:[%s20334_s2] sm:$0x3]  ;;  %20887 = vst [vmem:[#allocation125_spill] sm:$0xff] %v17722_v12  ;;  %20888 = vst [vmem:[#allocation126_spill] sm:$0xff] %v17729_v58 }
 0x877   :  { %v17656_v4 = vrot.slane %v2991_v61, %v2998_v43  ;;  %v17658_v24 = vrot.slane %v2991_v61, %v2994_v3  ;;  %20889 = vst [vmem:[#allocation127_spill] sm:$0xff] %v17736_v60  ;;  %20890 = vst [vmem:[#allocation128_spill] sm:$0xff] %v17743_v29  ;;  %v17772_v29 = vadd.s32 112, %v17649_v40 }
 0x878   :  { %20891 = vst [vmem:[#allocation129_spill] sm:$0xff] %v17754_v41  ;;  %20892 = vst [vmem:[#allocation130_spill] sm:$0xff] %v17763_v14 }
 0x879   :  { %20878 = vst [vmem:[#allocation116_spill] sm:$0xff] %v17656_v4  ;;  %20879 = vst [vmem:[#allocation117_spill] sm:$0xff] %v17658_v24  ;;  %vm20573_vm11 = vcmp.eq.s32.totalorder %v17649_v40, %v17656_v4  ;;  %vm3000_vm10 = vcmp.eq.s32.totalorder %v17649_v40, %v17658_v24  ;;  %vm3003_vm13 = vcmp.eq.s32.totalorder %v17669_v59, %v17656_v4 }
 0x87a   :  { %5220 = vadd.xlane.f32.xlu0 %v5219_v62  ;;  %11473 = vmatprep.mubr.msk.f32.mxu0 %vm20573_vm11, %v20727_v45  ;;  %vm3002_vm12 = vcmp.eq.s32.totalorder %v17669_v59, %v17658_v24  ;;  %vm3005_vm3 = vcmp.eq.s32.totalorder %v17676_v23, %v17656_v4  ;;  %vm3004_vm11 = vcmp.eq.s32.totalorder %v17676_v23, %v17658_v24  ;;  %v17683_v62 = vadd.s32 24, %v17649_v40 }
 0x87b   :  { %vm20622_vm8 = vcmp.eq.s32.totalorder %v17690_v27, %v17656_v4  ;;  %vm20623_vm14 = vcmp.eq.s32.totalorder %v17690_v27, %v17658_v24  ;;  %vm20624_vm7 = vcmp.eq.s32.totalorder %v17697_v30, %v17656_v4  ;;  %vm20625_vm1 = vcmp.eq.s32.totalorder %v17697_v30, %v17658_v24  ;;  %20893 = vst [vmem:[#allocation131_spill] sm:$0xff] %v17772_v29 }
 0x87c   :  { %20882 = vst [vmem:[#allocation120_spill] sm:$0xff] %v17683_v62  ;;  %vm3007_vm9 = vcmp.eq.s32.totalorder %v17683_v62, %v17656_v4  ;;  %vm3006_vm15 = vcmp.eq.s32.totalorder %v17683_v62, %v17658_v24  ;;  %vm20626_vm6 = vcmp.eq.s32.totalorder %v17706_v44, %v17656_v4  ;;  %vm3029_vm2 = vcmp.eq.s32.totalorder %v17772_v29, %v17656_v4 }
 0x87d   :  { %vm20679_vm0 = vcmp.eq.s32.totalorder %v17772_v29, %v17658_v24 }
 0x87e   :  { %5217 = vadd.xlane.f32.xlu0 %v5216_v20 }
 0x882   :  { %5214 = vadd.xlane.f32.xlu0 %v5213_v25 }
 0x886   :  { %5211 = vadd.xlane.f32.xlu0 %v5210_v36 }
 0x88a   :  { %5208 = vadd.xlane.f32.xlu0 %v5207_v9 }
 0x88e   :  { %5205 = vadd.xlane.f32.xlu0 %v5204_v7 }
 0x8c3   :  { %v17699_v20 = vpop.xlane.xlu1 %5274 }
 0x8c7   :  { %v5281_v51 = vpop.xlane.xlu1 %5280 }
 0x8c8   :  { %v5325_v14 = vmul.f32 0.03125, %v5281_v51 }
 0x8ca   :  { %v5357_v30 = vadd.f32 1e-05, %v5325_v14  ;;  %v17799_v14 = vld [vmem:[%s20330_s8 + $0x70] ss:$0 sm:$0xff] }
 0x8cb   :  { %v17715_v25 = vpop.xlane.xlu1 %5277 }
 0x8cf   :  { %v5287_v36 = vpop.xlane.xlu1 %5286 }
 0x8d0   :  { %v5327_v60 = vmul.f32 0.03125, %v5287_v36 }
 0x8d2   :  { %v5359_v62 = vadd.f32 1e-05, %v5327_v60 }
 0x8d3   :  { %v5284_v9 = vpop.xlane.xlu1 %5283 }
 0x8d4   :  { %v5326_v44 = vmul.f32 0.03125, %v5284_v9 }
 0x8d7   :  { %v5293_v7 = vpop.xlane.xlu1 %5292 }
 0x8d8   :  { %v5329_v29 = vmul.f32 0.03125, %v5293_v7 }
 0x8db   :  { %v5290_v43 = vpop.xlane.xlu1 %5289  ;;  %v17745_v61 = vpop.xlane.xlu0 %5226 }
 0x8dc   :  { %v5328_v23 = vmul.f32 0.03125, %v5290_v43 }
 0x8de   :  { %v5360_v9 = vadd.f32 1e-05, %v5328_v23 }
 0x8df   :  { %v5299_v3 = vpop.xlane.xlu1 %5298  ;;  %v17751_v56 = vpop.xlane.xlu0 %5232 }
 0x8e0   :  { %v5331_v50 = vmul.f32 0.03125, %v5299_v3 }
 0x8e2   :  { %v5363_v0 = vadd.f32 1e-05, %v5331_v50 }
 0x8e3   :  { %v5296_v17 = vpop.xlane.xlu1 %5295  ;;  %v17760_v1 = vpop.xlane.xlu0 %5229 }
 0x8e4   :  { %14444 = vrsqrt.f32 %v5363_v0  ;;  %v17779_v0 = vadd.s32 120, %v17649_v40  ;;  %v5330_v12 = vmul.f32 0.03125, %v5296_v17 }
 0x8e5   :  { %14446 = vrsqrt.f32 %v5357_v30 }
 0x8e6   :  { %20894 = vst [vmem:[#allocation132_spill] sm:$0xff] %v17779_v0  ;;  %vm20678_vm5 = vcmp.eq.s32.totalorder %v17779_v0, %v17656_v4  ;;  %vm20627_vm4 = vcmp.eq.s32.totalorder %v17779_v0, %v17658_v24  ;;  %v17793_v4 = vld [vmem:[%s20330_s8 + $0x68] ss:$0 sm:$0xff]  ;;  %v5362_v51 = vadd.f32 1e-05, %v5330_v12  ;;  %14448 = vrsqrt.f32 %v5359_v62 }
 0x8e7   :  { %v17769_v3 = vpop.xlane.xlu1 %5271  ;;  %v5239_v16 = vpop.xlane.xlu0 %5238  ;;  %v5358_v0 = vadd.f32 1e-05, %v5326_v44  ;;  %v5323_v44 = vmul.f32 0.03125, %v17699_v20  ;;  %v5324_v62 = vmul.f32 0.03125, %v17715_v25  ;;  %v5308_v20 = vmul.f32 0.03125, %v17760_v1 }
 0x8e8   :  { %14450 = vrsqrt.f32 %v5362_v51  ;;  %v5311_v43 = vmul.f32 0.03125, %v5239_v16  ;;  %v5309_v16 = vmul.f32 0.03125, %v17751_v56 }
 0x8e9   :  { %14452 = vrsqrt.f32 %v5358_v0  ;;  %v5355_v51 = vadd.f32 1e-05, %v5323_v44  ;;  %v5307_v0 = vmul.f32 0.03125, %v17745_v61 }
 0x8ea   :  { %v5343_v23 = vadd.f32 1e-05, %v5311_v43 }
 0x8eb   :  { %v5236_v50 = vpop.xlane.xlu0 %5235  ;;  %v17781_v41 = vpop.xlane.xlu1 %5268  ;;  %v5339_v25 = vadd.f32 1e-05, %v5307_v0 }
 0x8ec   :  { %v5310_v30 = vmul.f32 0.03125, %v5236_v50  ;;  %v5321_v1 = vmul.f32 0.03125, %v17781_v41 }
 0x8ef   :  { %v5245_v58 = vpop.xlane.xlu0 %5244  ;;  %v17788_v59 = vpop.xlane.xlu1 %5265 }
 0x8f0   :  { %v5313_v36 = vmul.f32 0.03125, %v5245_v58 }
 0x8f1   :  { %v14445_v28 = vpop.eup %14444 }
 0x8f2   :  { %v5427_v27 = vmul.f32 %v14445_v28, %v17490_v53  ;;  %v5361_v53 = vadd.f32 1e-05, %v5329_v29  ;;  %v5345_v12 = vadd.f32 1e-05, %v5313_v36  ;;  %v14447_v56 = vpop.eup %14446 }
 0x8f3   :  { %v5242_v40 = vpop.xlane.xlu0 %5241 }
 0x8f4   :  { %v5463_v17 = vmul.f32 %v17793_v4, %v5427_v27  ;;  %v5312_v60 = vmul.f32 0.03125, %v5242_v40  ;;  %v5263_v27 = vpop.xlane.xlu1 %5262  ;;  %14454 = vrsqrt.f32 %v5361_v53 }
 0x8f5   :  { %14456 = vrsqrt.f32 %v5360_v9  ;;  %v5341_v9 = vadd.f32 1e-05, %v5309_v16  ;;  %v5319_v0 = vmul.f32 0.03125, %v5263_v27 }
 0x8f6   :  { %v5499_v28 = vadd.f32 %v17799_v14, %v5463_v17  ;;  %v5344_v29 = vadd.f32 1e-05, %v5312_v60  ;;  %14458 = vrsqrt.f32 %v5345_v12  ;;  %v5342_v17 = vadd.f32 1e-05, %v5310_v30 }
 0x8f7   :  { %v5251_v7 = vpop.xlane.xlu0 %5250 }
 0x8f8   :  { %v5315_v58 = vmul.f32 0.03125, %v5251_v7  ;;  %12330 = vmatprep.subr.mxu0 %v5499_v28  ;;  %v5260_v53 = vpop.xlane.xlu1 %5259  ;;  %v5356_v28 = vadd.f32 1e-05, %v5324_v62  ;;  %v14449_v7 = vpop.eup %14448 }
 0x8f9   :  { %v14451_v43 = vpop.eup %14450 }
 0x8fa   :  { %v5347_v24 = vadd.f32 1e-05, %v5315_v58  ;;  %v14453_v44 = vpop.eup %14452 }
 0x8fb   :  { %v5248_v45 = vpop.xlane.xlu0 %5247 }
 0x8fc   :  { %v5314_v40 = vmul.f32 0.03125, %v5248_v45  ;;  %14460 = vrsqrt.f32 %v5347_v24  ;;  %v5322_v45 = vmul.f32 0.03125, %v17769_v3  ;;  %v5340_v24 = vadd.f32 1e-05, %v5308_v20  ;;  %v5257_v12 = vpop.xlane.xlu1 %5256 }
 0x8fd   :  { %14462 = vrsqrt.f32 %v5344_v29  ;;  %v5320_v29 = vmul.f32 0.03125, %v17788_v59  ;;  %v17816_v59 = vmul.f32 %v14453_v44, %v17475_v63 }
 0x8fe   :  { %v5346_v36 = vadd.f32 1e-05, %v5314_v40  ;;  %14464 = vrsqrt.f32 %v5343_v23  ;;  %v5354_v30 = vadd.f32 1e-05, %v5322_v45  ;;  %v17811_v40 = vmul.f32 %v14447_v56, %v17455_v8 }
 0x8ff   :  { %v5224_v50 = vpop.xlane.xlu0 %5223  ;;  %v5317_v45 = vmul.f32 0.03125, %v5257_v12 }
 0x900   :  { %14466 = vrsqrt.f32 %v5346_v36  ;;  %v5306_v60 = vmul.f32 0.03125, %v5224_v50  ;;  %v5426_v36 = vmul.f32 %v14451_v43, %v17511_v11  ;;  %v5254_v56 = vpop.xlane.xlu1 %5253 }
 0x901   :  { %14468 = vrsqrt.f32 %v5355_v51  ;;  %v14455_v62 = vpop.eup %14454  ;;  %v5353_v51 = vadd.f32 1e-05, %v5321_v1  ;;  %v5316_v44 = vmul.f32 0.03125, %v5254_v56 }
 0x902   :  { %14470 = vrsqrt.f32 %v5342_v17  ;;  %v5338_v3 = vadd.f32 1e-05, %v5306_v60  ;;  %v14457_v16 = vpop.eup %14456  ;;  %v5318_v17 = vmul.f32 0.03125, %v5260_v53  ;;  %v5425_v8 = vmul.f32 %v14455_v62, %v17481_v52 }
 0x903   :  { %v5221_v61 = vpop.xlane.xlu0 %5220  ;;  %14472 = vrsqrt.f32 %v5356_v28  ;;  %v14459_v20 = vpop.eup %14458  ;;  %v5423_v28 = vmul.f32 %v14449_v7, %v17469_v54  ;;  %v5424_v53 = vmul.f32 %v14457_v16, %v17493_v32  ;;  %v5351_v54 = vadd.f32 1e-05, %v5319_v0 }
 0x904   :  { %14474 = vrsqrt.f32 %v5341_v9  ;;  %v5305_v58 = vmul.f32 0.03125, %v5221_v61  ;;  %v5462_v63 = vmul.f32 %v17793_v4, %v5426_v36  ;;  %v5350_v1 = vadd.f32 1e-05, %v5318_v17 }
 0x905   :  { %14476 = vrsqrt.f32 %v5339_v25  ;;  %v5352_v25 = vadd.f32 1e-05, %v5320_v29  ;;  %v5409_v52 = vmul.f32 %v14459_v20, %v17542_v19  ;;  %v5461_v19 = vmul.f32 %v17793_v4, %v5425_v8 }
 0x906   :  { %14478 = vrsqrt.f32 %v5340_v24  ;;  %v5337_v50 = vadd.f32 1e-05, %v5305_v58  ;;  %v5349_v58 = vadd.f32 1e-05, %v5317_v45 }
 0x907   :  { %v5218_v23 = vpop.xlane.xlu0 %5217  ;;  %14480 = vrsqrt.f32 %v5354_v30  ;;  %v5445_v36 = vmul.f32 %v17793_v4, %v5409_v52 }
 0x908   :  { %v5304_v41 = vmul.f32 0.03125, %v5218_v23  ;;  %14482 = vrsqrt.f32 %v5338_v3 }
 0x909   :  { %v14461_v9 = vpop.eup %14460  ;;  %14484 = vrsqrt.f32 %v5353_v51  ;;  %v5498_v51 = vadd.f32 %v17799_v14, %v5462_v63 }
 0x90a   :  { %v5336_v27 = vadd.f32 1e-05, %v5304_v41  ;;  %v5411_v11 = vmul.f32 %v14461_v9, %v17568_v13  ;;  %v14463_v60 = vpop.eup %14462  ;;  %14486 = vrsqrt.f32 %v5337_v50  ;;  %v5460_v50 = vmul.f32 %v17793_v4, %v5424_v53 }
 0x90b   :  { %v5215_v24 = vpop.xlane.xlu0 %5214  ;;  %v14465_v7 = vpop.eup %14464  ;;  %14488 = vrsqrt.f32 %v5352_v25  ;;  %v5408_v3 = vmul.f32 %v14463_v60, %v17556_v5  ;;  %v5481_v60 = vadd.f32 %v17799_v14, %v5445_v36 }
 0x90c   :  { %v5303_v61 = vmul.f32 0.03125, %v5215_v24  ;;  %v5447_v43 = vmul.f32 %v17793_v4, %v5411_v11  ;;  %14490 = vrsqrt.f32 %v5336_v27  ;;  %v5407_v20 = vmul.f32 %v14465_v7, %v17516_v37 }
 0x90d   :  { %v14467_v12 = vpop.eup %14466  ;;  %14492 = vrsqrt.f32 %v5351_v54  ;;  %v5444_v8 = vmul.f32 %v17793_v4, %v5408_v3  ;;  %v5497_v37 = vadd.f32 %v17799_v14, %v5461_v19  ;;  %v5459_v11 = vmul.f32 %v17793_v4, %v5423_v28 }
 0x90e   :  { %v5335_v13 = vadd.f32 1e-05, %v5303_v61  ;;  %v14469_v30 = vpop.eup %14468  ;;  %v5483_v29 = vadd.f32 %v17799_v14, %v5447_v43  ;;  %v5410_v62 = vmul.f32 %v14467_v12, %v17581_v34  ;;  %v5348_v34 = vadd.f32 1e-05, %v5316_v44 }
 0x90f   :  { %v5212_v32 = vpop.xlane.xlu0 %5211  ;;  %v14471_v23 = vpop.eup %14470  ;;  %v5443_v53 = vmul.f32 %v17793_v4, %v5407_v20  ;;  %v5458_v7 = vmul.f32 %v17793_v4, %v17816_v59  ;;  %v5480_v43 = vadd.f32 %v17799_v14, %v5444_v8  ;;  %v5495_v44 = vadd.f32 %v17799_v14, %v5459_v11 }
 0x910   :  { %v5302_v16 = vmul.f32 0.03125, %v5212_v32  ;;  %v14473_v0 = vpop.eup %14472  ;;  %14494 = vrsqrt.f32 %v5335_v13  ;;  %12331 = vmatpush3.msra.mxu0 %v5483_v29  ;;  %v5446_v41 = vmul.f32 %v17793_v4, %v5410_v62  ;;  %v5406_v56 = vmul.f32 %v14471_v23, %v17529_v42 }
 0x911   :  { %v14475_v17 = vpop.eup %14474  ;;  %14496 = vrsqrt.f32 %v5350_v1  ;;  %12332 = vmatprep.subr.mxu0 %v5498_v51  ;;  %v5420_v61 = vmul.f32 %v14473_v0, %v17461_v33  ;;  %v5496_v42 = vadd.f32 %v17799_v14, %v5460_v50  ;;  %v5457_v59 = vmul.f32 %v17793_v4, %v17811_v40 }
 0x912   :  { %v5334_v5 = vadd.f32 1e-05, %v5302_v16  ;;  %v14477_v9 = vpop.eup %14476  ;;  %14498 = vrsqrt.f32 %v5349_v58  ;;  %v5482_v45 = vadd.f32 %v17799_v14, %v5446_v41  ;;  %v5405_v54 = vmul.f32 %v14475_v17, %v17487_v10 }
 0x913   :  { %v5209_v25 = vpop.xlane.xlu0 %5208  ;;  %v14479_v27 = vpop.eup %14478  ;;  %v5442_v52 = vmul.f32 %v17793_v4, %v5406_v56  ;;  %v5419_v10 = vmul.f32 %v14469_v30, %v17448_v38  ;;  %v5479_v32 = vadd.f32 %v17799_v14, %v5443_v53  ;;  %v5403_v62 = vmul.f32 %v14477_v9, %v17496_v57 }
 0x914   :  { %14500 = vrsqrt.f32 %v5334_v5  ;;  %v5301_v24 = vmul.f32 0.03125, %v5209_v25  ;;  %12333 = vmatpush3.msra.mxu0 %v5482_v45  ;;  %v14481_v1 = vpop.eup %14480  ;;  %v5404_v12 = vmul.f32 %v14479_v27, %v17504_v39  ;;  %v5441_v29 = vmul.f32 %v17793_v4, %v5405_v54 }
 0x915   :  { %14502 = vrsqrt.f32 %v5348_v34  ;;  %12334 = vmatprep.subr.mxu0 %v5497_v37  ;;  %v14483_v33 = vpop.eup %14482  ;;  %v5494_v38 = vadd.f32 %v17799_v14, %v5458_v7  ;;  %v5456_v30 = vmul.f32 %v17793_v4, %v5420_v61  ;;  %v5418_v23 = vmul.f32 %v14481_v1, %v17523_v31 }
 0x916   :  { %v5333_v63 = vadd.f32 1e-05, %v5301_v24  ;;  %12335 = vmatpush3.msra.mxu0 %v5481_v60  ;;  %v14485_v13 = vpop.eup %14484  ;;  %v5478_v40 = vadd.f32 %v17799_v14, %v5442_v52  ;;  %v5440_v51 = vmul.f32 %v17793_v4, %v5404_v12  ;;  %v5402_v19 = vmul.f32 %v14483_v33, %v17593_v46 }
 0x917   :  { %v5206_v28 = vpop.xlane.xlu0 %5205  ;;  %12336 = vmatprep.subr.mxu0 %v5496_v42  ;;  %v14487_v39 = vpop.eup %14486  ;;  %v5493_v57 = vadd.f32 %v17799_v14, %v5457_v59  ;;  %v5455_v41 = vmul.f32 %v17793_v4, %v5419_v10  ;;  %v5417_v36 = vmul.f32 %v14485_v13, %v17536_v2  ;;  %v5477_v31 = vadd.f32 %v17799_v14, %v5441_v29 }
 0x918   :  { %14504 = vrsqrt.f32 %v5333_v63  ;;  %v5300_v58 = vmul.f32 0.03125, %v5206_v28  ;;  %12337 = vmatpush3.msra.mxu0 %v5480_v43  ;;  %v14489_v16 = vpop.eup %14488  ;;  %v5439_v17 = vmul.f32 %v17793_v4, %v5403_v62  ;;  %v5401_v34 = vmul.f32 %v14487_v39, %v17608_v48 }
 0x919   :  { %12338 = vmatprep.subr.mxu0 %v5495_v44  ;;  %v14491_v0 = vpop.eup %14490  ;;  %v5492_v46 = vadd.f32 %v17799_v14, %v5456_v30  ;;  %v5454_v50 = vmul.f32 %v17793_v4, %v5418_v23  ;;  %v5416_v9 = vmul.f32 %v14489_v16, %v17549_v35  ;;  %v5476_v2 = vadd.f32 %v17799_v14, %v5440_v51 }
 0x91a   :  { %v5332_v3 = vadd.f32 1e-05, %v5300_v58  ;;  %12339 = vmatpush3.msra.mxu0 %v5479_v32  ;;  %v14493_v20 = vpop.eup %14492  ;;  %v5438_v45 = vmul.f32 %v17793_v4, %v5402_v19  ;;  %v5400_v8 = vmul.f32 %v14491_v0, %v17615_v49  ;;  %v5491_v48 = vadd.f32 %v17799_v14, %v5455_v41  ;;  %v20899_v19 = vld [vmem:[#allocation116_spill] sm:$0xff]  ;;  %v20904_v41 = vld [vmem:[#allocation123_spill] sm:$0xff] }
 0x91b   :  { %12340 = vmatprep.subr.mxu0 %v5494_v38  ;;  %v5453_v27 = vmul.f32 %v17793_v4, %v5417_v36  ;;  %v5415_v24 = vmul.f32 %v14493_v20, %v17562_v15  ;;  %v5475_v35 = vadd.f32 %v17799_v14, %v5439_v17  ;;  %v5437_v11 = vmul.f32 %v17793_v4, %v5401_v34  ;;  %v20906_v36 = vld [vmem:[#allocation124_spill] sm:$0xff]  ;;  %v20909_v20 = vld [vmem:[#allocation125_spill] sm:$0xff]  ;;  %v20915_v17 = vld [vmem:[#allocation127_spill] sm:$0xff] }
 0x91c   :  { %14506 = vrsqrt.f32 %v5332_v3  ;;  %12341 = vmatpush3.msra.mxu0 %v5478_v40  ;;  %v5490_v53 = vadd.f32 %v17799_v14, %v5454_v50  ;;  %v5452_v49 = vmul.f32 %v17793_v4, %v5416_v9  ;;  %v5474_v63 = vadd.f32 %v17799_v14, %v5438_v45  ;;  %v20897_v40 = vld [vmem:[#allocation117_spill] sm:$0xff]  ;;  %v20918_v34 = vld [vmem:[#allocation128_spill] sm:$0xff]  ;;  %v5646_v45 = vld [vmem:[%s20328_s7 + $0x128] sm:$0xff] }
 0x91d   :  { %v14495_v5 = vpop.eup %14494  ;;  %12342 = vmatprep.subr.mxu0 %v5493_v57  ;;  %v5436_v15 = vmul.f32 %v17793_v4, %v5400_v8  ;;  %v5489_v7 = vadd.f32 %v17799_v14, %v5453_v27  ;;  %v5473_v43 = vadd.f32 %v17799_v14, %v5437_v11  ;;  %v5645_v8 = vld [vmem:[%s20328_s7 + $0x120] sm:$0xff] }
 0x91e   :  { %v14497_v25 = vpop.eup %14496  ;;  %12343 = vmatpush3.msra.mxu0 %v5477_v31  ;;  %v5399_v60 = vmul.f32 %v14495_v5, %v17621_v21  ;;  %v5451_v21 = vmul.f32 %v17793_v4, %v5415_v24  ;;  %v5488_v52 = vadd.f32 %v17799_v14, %v5452_v49  ;;  %v20912_v31 = vld [vmem:[#allocation126_spill] sm:$0xff]  ;;  %v20921_v5 = vld [vmem:[#allocation129_spill] sm:$0xff] }
 0x91f   :  { %v14499_v56 = vpop.eup %14498  ;;  %12344 = vmatprep.subr.mxu0 %v5492_v46  ;;  %v5414_v54 = vmul.f32 %v14497_v25, %v17575_v18  ;;  %v5472_v33 = vadd.f32 %v17799_v14, %v5436_v15  ;;  %v20924_v46 = vld [vmem:[#allocation130_spill] sm:$0xff]  ;;  %v5648_v25 = vld [vmem:[%s20328_s7 + $0x138] sm:$0xff] }
 0x920   :  { %12345 = vmatpush3.msra.mxu0 %v5476_v2  ;;  %v5413_v1 = vmul.f32 %v14499_v56, %v17587_v55  ;;  %v5435_v18 = vmul.f32 %v17793_v4, %v5399_v60  ;;  %v5487_v58 = vadd.f32 %v17799_v14, %v5451_v21  ;;  %v5647_v2 = vld [vmem:[%s20328_s7 + $0x130] sm:$0xff] }
 0x921   :  { %v14501_v37 = vpop.eup %14500  ;;  %12346 = vmatprep.subr.mxu0 %v5491_v48  ;;  %v5450_v12 = vmul.f32 %v17793_v4, %v5414_v54 }
 0x922   :  { %v14503_v61 = vpop.eup %14502  ;;  %12347 = vmatpush3.msra.mxu0 %v5475_v35  ;;  %v5398_v42 = vmul.f32 %v14501_v37, %v17627_v26  ;;  %v5449_v44 = vmul.f32 %v17793_v4, %v5413_v1  ;;  %v5471_v13 = vadd.f32 %v17799_v14, %v5435_v18 }
 0x923   :  { %12348 = vmatprep.subr.mxu0 %v5490_v53  ;;  %v5412_v10 = vmul.f32 %v14503_v61, %v17599_v22 }
 0x924   :  { %12349 = vmatpush3.msra.mxu0 %v5474_v63  ;;  %v5434_v55 = vmul.f32 %v17793_v4, %v5398_v42  ;;  %v5485_v39 = vadd.f32 %v17799_v14, %v5449_v44 }
 0x925   :  { %v14505_v28 = vpop.eup %14504  ;;  %12350 = vmatprep.subr.mxu0 %v5489_v7  ;;  %v5448_v22 = vmul.f32 %v17793_v4, %v5412_v10 }
 0x926   :  { %v5397_v26 = vmul.f32 %v14505_v28, %v17633_v47  ;;  %12351 = vmatpush3.msra.mxu0 %v5473_v43  ;;  %v5486_v47 = vadd.f32 %v17799_v14, %v5450_v12  ;;  %v5470_v62 = vadd.f32 %v17799_v14, %v5434_v55 }
 0x927   :  { %12352 = vmatprep.subr.mxu0 %v5488_v52  ;;  %v5484_v30 = vadd.f32 %v17799_v14, %v5448_v22 }
 0x928   :  { %12353 = vmatpush3.msra.mxu0 %v5472_v33  ;;  %v5433_v32 = vmul.f32 %v17793_v4, %v5397_v26 }
 0x929   :  { %v14507_v59 = vpop.eup %14506  ;;  %12354 = vmatprep.subr.mxu0 %v5487_v58 }
 0x92a   :  { %v5396_v29 = vmul.f32 %v14507_v59, %v17639_v6  ;;  %12355 = vmatpush3.msra.mxu0 %v5471_v13  ;;  %v5469_v38 = vadd.f32 %v17799_v14, %v5433_v32  ;;  %v20895_v6 = vmov 1.0  }
 0x92b   :  { %12356 = vmatprep.subr.mxu0 %v5486_v47 }
 0x92c   :  { %v5432_v3 = vmul.f32 %v17793_v4, %v5396_v29  ;;  %12357 = vmatpush3.msra.mxu0 %v5470_v62 }
 0x92d   :  { %12358 = vmatprep.subr.mxu0 %v5485_v39 }
 0x92e   :  { %v5468_v23 = vadd.f32 %v17799_v14, %v5432_v3  ;;  %12359 = vmatpush3.msra.mxu0 %v5469_v38 }
 0x92f   :  { %12360 = vmatprep.subr.mxu0 %v5484_v30 }
 0x930   :  { %12361 = vmatpush3.msra.mxu0 %v5468_v23 }
 0x931   :  { %11474 = vmatmul.mubr.msk.f32.vlgmr.msra.gmra.mxu0 %vm3000_vm10, %v20895_v6  ;;  %13632 = vmatprep.subr.mxu0 %v5648_v25 }
 0x932   :  { %11475 = vmatprep.mubr.msk.f32.mxu0 %vm3003_vm13, %v20895_v6  ;;  %13633 = vmatpush3.msra.mxu0 %v5648_v25 }
 0x933   :  { %13634 = vmatprep.subr.mxu0 %v5647_v2 }
 0x934   :  { %13635 = vmatpush3.msra.mxu0 %v5647_v2 }
 0x935   :  { %11476 = vmatmul.mubr.msk.f32.gmra.mxu0 %vm3002_vm12, %v20895_v6  ;;  %13636 = vmatprep.subr.mxu0 %v5646_v45 }
 0x936   :  { %11477 = vmatprep.mubr.msk.f32.mxu0 %vm3005_vm3, %v20895_v6  ;;  %13637 = vmatpush3.msra.mxu0 %v5646_v45 }
 0x937   :  { %13638 = vmatprep.subr.mxu0 %v5645_v8 }
 0x938   :  { %13639 = vmatpush3.msra.mxu0 %v5645_v8 }
 0x939   :  { %11478 = vmatmul.mubr.msk.f32.gmra.mxu0 %vm3004_vm11, %v20895_v6 }
 0x93a   :  { %11479 = vmatprep.mubr.msk.f32.mxu0 %vm3007_vm9, %v20895_v6 }
 0x93d   :  { %11480 = vmatmul.mubr.msk.f32.gmra.mxu0 %vm3006_vm15, %v20895_v6 }
 0x93e   :  { %11481 = vmatprep.mubr.msk.f32.mxu0 %vm20622_vm8, %v20895_v6  ;;  %vm20905_vm8 = vcmp.eq.s32.totalorder %v20904_v41, %v20897_v40 }
 0x941   :  { %11482 = vmatmul.mubr.msk.f32.gmra.mxu0 %vm20623_vm14, %v20895_v6  ;;  %vm20907_vm14 = vcmp.eq.s32.totalorder %v20906_v36, %v20899_v19 }
 0x942   :  { %11483 = vmatprep.mubr.msk.f32.mxu0 %vm20624_vm7, %v20895_v6  ;;  %vm20908_vm7 = vcmp.eq.s32.totalorder %v20906_v36, %v20897_v40 }
 0x945   :  { %11484 = vmatmul.mubr.msk.f32.gmra.mxu0 %vm20625_vm1, %v20895_v6  ;;  %vm20910_vm1 = vcmp.eq.s32.totalorder %v20909_v20, %v20899_v19 }
 0x946   :  { %11485 = vmatprep.mubr.msk.f32.mxu0 %vm20626_vm6, %v20895_v6  ;;  %vm20911_vm6 = vcmp.eq.s32.totalorder %v20909_v20, %v20897_v40 }
 0x949   :  { %11486 = vmatmul.mubr.msk.f32.gmra.mxu0 %vm20905_vm8, %v20895_v6  ;;  %vm20913_vm8 = vcmp.eq.s32.totalorder %v20912_v31, %v20899_v19 }
 0x94a   :  { %11487 = vmatprep.mubr.msk.f32.mxu0 %vm20907_vm14, %v20895_v6  ;;  %vm20914_vm14 = vcmp.eq.s32.totalorder %v20912_v31, %v20897_v40 }
 0x94d   :  { %11488 = vmatmul.mubr.msk.f32.gmra.mxu0 %vm20908_vm7, %v20895_v6  ;;  %vm20916_vm7 = vcmp.eq.s32.totalorder %v20915_v17, %v20899_v19 }
 0x94e   :  { %11489 = vmatprep.mubr.msk.f32.mxu0 %vm20910_vm1, %v20895_v6  ;;  %vm20917_vm1 = vcmp.eq.s32.totalorder %v20915_v17, %v20897_v40 }
 0x951   :  { %11490 = vmatmul.mubr.msk.f32.gmra.mxu0 %vm20911_vm6, %v20895_v6  ;;  %vm20919_vm6 = vcmp.eq.s32.totalorder %v20918_v34, %v20899_v19 }
 0x952   :  { %11491 = vmatprep.mubr.msk.f32.mxu0 %vm20913_vm8, %v20895_v6  ;;  %vm20920_vm8 = vcmp.eq.s32.totalorder %v20918_v34, %v20897_v40 }
 0x955   :  { %11492 = vmatmul.mubr.msk.f32.gmra.mxu0 %vm20914_vm14, %v20895_v6  ;;  %vm20922_vm14 = vcmp.eq.s32.totalorder %v20921_v5, %v20899_v19 }
 0x956   :  { %11493 = vmatprep.mubr.msk.f32.mxu0 %vm20916_vm7, %v20895_v6  ;;  %vm20923_vm7 = vcmp.eq.s32.totalorder %v20921_v5, %v20897_v40 }
 0x959   :  { %11494 = vmatmul.mubr.msk.f32.gmra.mxu0 %vm20917_vm1, %v20895_v6  ;;  %vm20925_vm1 = vcmp.eq.s32.totalorder %v20924_v46, %v20899_v19 }
 0x95a   :  { %11495 = vmatprep.mubr.msk.f32.mxu0 %vm20919_vm6, %v20895_v6  ;;  %vm20926_vm6 = vcmp.eq.s32.totalorder %v20924_v46, %v20897_v40 }
 0x95d   :  { %11496 = vmatmul.mubr.msk.f32.gmra.mxu0 %vm20920_vm8, %v20895_v6  ;;  %vm20929_vm8 = vcmask 261120  }
 0x95e   :  { %11497 = vmatprep.mubr.msk.f32.mxu0 %vm20922_vm14, %v20895_v6  ;;  %vm20930_vm14 = vmmov %vm20929_vm8 }
 0x961   :  { %11498 = vmatmul.mubr.msk.f32.gmra.mxu0 %vm20923_vm7, %v20895_v6  ;;  %vm20931_vm7 = vmmov %vm20929_vm8 }
 0x962   :  { %11499 = vmatprep.mubr.msk.f32.mxu0 %vm20925_vm1, %v20895_v6  ;;  %vm20932_vm1 = vmmov %vm20931_vm7 }
 0x965   :  { %11500 = vmatmul.mubr.msk.f32.gmra.mxu0 %vm20926_vm6, %v20895_v6  ;;  %vm20933_vm6 = vmmov %vm20932_vm1 }
 0x966   :  { %11501 = vmatprep.mubr.msk.f32.mxu0 %vm3029_vm2, %v20895_v6 }
 0x969   :  { %11502 = vmatmul.mubr.msk.f32.gmra.mxu0 %vm20679_vm0, %v20895_v6 }
 0x96a   :  { %11503 = vmatprep.mubr.msk.f32.mxu0 %vm20678_vm5, %v20895_v6 }
 0x96d   :  { %11504 = vmatmul.mubr.msk.f32.gmra.mxu0 %vm20627_vm4, %v20895_v6 }
 0x9f1   :  { %v12362_v56 = vpop.f32.mrf.mxu0 }
 0x9f3   :  { %v12363_v48 = vpop.f32.mrf.mxu0 }
 0x9f4   :  { %v12364_v27 = vadd.f32 %v12363_v48, %v12362_v56 }
 0x9f5   :  { %v12365_v24 = vpop.f32.mrf.mxu0 }
 0x9f6   :  { %13640 = vmatprep.mubr.msk.f32.mxu0 %vm20929_vm8, %v12364_v27  ;;  %vm20934_vm8 = vmmov %vm20932_vm1 }
 0x9f7   :  { %v12366_v37 = vpop.f32.mrf.mxu0 }
 0x9f8   :  { %v12367_v35 = vadd.f32 %v12366_v37, %v12365_v24  ;;  %v6031_v24 = vld [vmem:[%s20328_s7 + $0x178] sm:$0xff]  ;;  %v6030_v37 = vld [vmem:[%s20328_s7 + $0x170] sm:$0xff] }
 0x9f9   :  { %v12368_v11 = vpop.f32.mrf.mxu0  ;;  %13664 = vmatprep.subr.mxu1 %v6031_v24 }
 0x9fa   :  { %13641 = vmatmul.mubr.msk.f32.vlgmr.msra.gmra.mxu0 %vm20930_vm14, %v12367_v35  ;;  %vm20935_vm14 = vmmov %vm20932_vm1  ;;  %13665 = vmatpush3.msra.mxu1 %v6031_v24  ;;  %v6029_v35 = vld [vmem:[%s20328_s7 + $0x168] sm:$0xff] }
 0x9fb   :  { %v12369_v60 = vpop.f32.mrf.mxu0  ;;  %13666 = vmatprep.subr.mxu1 %v6030_v37 }
 0x9fc   :  { %v12370_v53 = vadd.f32 %v12369_v60, %v12368_v11  ;;  %13667 = vmatpush3.msra.mxu1 %v6030_v37  ;;  %v6028_v11 = vld [vmem:[%s20328_s7 + $0x160] sm:$0xff]  ;;  %v13610_v60 = vpop.f32.mrf.mxu1 }
 0x9fd   :  { %v12371_v49 = vpop.f32.mrf.mxu0  ;;  %13668 = vmatprep.subr.mxu1 %v6029_v35 }
 0x9fe   :  { %13643 = vmatprep.mubr.msk.f32.mxu0 %vm20931_vm7, %v12370_v53  ;;  %vm20936_vm7 = vmmov %vm20932_vm1  ;;  %13669 = vmatpush3.msra.mxu1 %v6029_v35 }
 0x9ff   :  { %v12372_v54 = vpop.f32.mrf.mxu0  ;;  %13670 = vmatprep.subr.mxu1 %v6028_v11 }
 0xa00   :  { %v12373_v61 = vadd.f32 %v12372_v54, %v12371_v49  ;;  %13671 = vmatpush3.msra.mxu1 %v6028_v11  ;;  %v18076_v54 = vld [vmem:[%s20330_s8 + $0x78] ss:$0 sm:$0xff] }
 0xa01   :  { %v12374_v63 = vpop.f32.mrf.mxu0 }
 0xa02   :  { %13644 = vmatmul.mubr.msk.f32.gmra.mxu0 %vm20932_vm1, %v12373_v61  ;;  %v5719_v61 = vpop.f32.mrf.mxu1 }
 0xa03   :  { %v12375_v15 = vpop.f32.mrf.mxu0 }
 0xa04   :  { %v12376_v42 = vadd.f32 %v12375_v15, %v12374_v63 }
 0xa05   :  { %v12377_v7 = vpop.f32.mrf.mxu0 }
 0xa06   :  { %13646 = vmatprep.mubr.msk.f32.mxu0 %vm20933_vm6, %v12376_v42  ;;  %vm20937_vm6 = vmmov %vm20932_vm1 }
 0xa07   :  { %v12378_v21 = vpop.f32.mrf.mxu0 }
 0xa08   :  { %v12379_v1 = vadd.f32 %v12378_v21, %v12377_v7  ;;  %v13613_v21 = vpop.f32.mrf.mxu1 }
 0xa09   :  { %v12380_v28 = vpop.f32.mrf.mxu0 }
 0xa0a   :  { %13647 = vmatmul.mubr.msk.f32.gmra.mxu0 %vm20934_vm8, %v12379_v1  ;;  %vm20938_vm8 = vmmov %vm20932_vm1 }
 0xa0b   :  { %v12381_v43 = vpop.f32.mrf.mxu0 }
 0xa0c   :  { %v12382_v18 = vadd.f32 %v12381_v43, %v12380_v28 }
 0xa0d   :  { %v12383_v52 = vpop.f32.mrf.mxu0 }
 0xa0e   :  { %13649 = vmatprep.mubr.msk.f32.mxu0 %vm20935_vm14, %v12382_v18  ;;  %vm20939_vm14 = vmmov %vm20932_vm1 }
 0xa0f   :  { %v12384_v12 = vpop.f32.mrf.mxu0 }
 0xa10   :  { %v12385_v26 = vadd.f32 %v12384_v12, %v12383_v52  ;;  %v5729_v52 = vpop.f32.mrf.mxu1 }
 0xa11   :  { %v12386_v10 = vpop.f32.mrf.mxu0 }
 0xa12   :  { %13650 = vmatmul.mubr.msk.f32.gmra.mxu0 %vm20936_vm7, %v12385_v26  ;;  %vm20940_vm7 = vmmov %vm20932_vm1 }
 0xa13   :  { %v12387_v33 = vpop.f32.mrf.mxu0 }
 0xa14   :  { %v12388_v55 = vadd.f32 %v12387_v33, %v12386_v10 }
 0xa15   :  { %v12389_v58 = vpop.f32.mrf.mxu0 }
 0xa16   :  { %13652 = vmatprep.mubr.msk.f32.mxu0 %vm20932_vm1, %v12388_v55  ;;  %v13616_v55 = vpop.f32.mrf.mxu1 }
 0xa17   :  { %v12390_v44 = vpop.f32.mrf.mxu0 }
 0xa18   :  { %v12391_v59 = vadd.f32 %v12390_v44, %v12389_v58 }
 0xa19   :  { %v12392_v13 = vpop.f32.mrf.mxu0 }
 0xa1a   :  { %13653 = vmatmul.mubr.msk.f32.gmra.mxu0 %vm20937_vm6, %v12391_v59  ;;  %vm20941_vm6 = vmmov %vm20932_vm1 }
 0xa1b   :  { %v12393_v32 = vpop.f32.mrf.mxu0 }
 0xa1c   :  { %v12394_v47 = vadd.f32 %v12393_v32, %v12392_v13  ;;  %v5739_v32 = vpop.f32.mrf.mxu1 }
 0xa1d   :  { %v12395_v22 = vpop.f32.mrf.mxu0 }
 0xa1e   :  { %13655 = vmatprep.mubr.msk.f32.mxu0 %vm20938_vm8, %v12394_v47  ;;  %vm20942_vm8 = vmmov %vm20932_vm1 }
 0xa1f   :  { %v12396_v29 = vpop.f32.mrf.mxu0 }
 0xa20   :  { %v12397_v62 = vadd.f32 %v12396_v29, %v12395_v22 }
 0xa21   :  { %v12398_v39 = vpop.f32.mrf.mxu0 }
 0xa22   :  { %13656 = vmatmul.mubr.msk.f32.gmra.mxu0 %vm20939_vm14, %v12397_v62  ;;  %vm20943_vm14 = vmmov %vm20932_vm1 }
 0xa23   :  { %v12399_v3 = vpop.f32.mrf.mxu0 }
 0xa24   :  { %v12400_v38 = vadd.f32 %v12399_v3, %v12398_v39  ;;  %v13619_v39 = vpop.f32.mrf.mxu1 }
 0xa25   :  { %v12401_v30 = vpop.f32.mrf.mxu0 }
 0xa26   :  { %13658 = vmatprep.mubr.msk.f32.mxu0 %vm20940_vm7, %v12400_v38  ;;  %vm20944_vm7 = vmmov %vm20932_vm1 }
 0xa27   :  { %v12402_v23 = vpop.f32.mrf.mxu0 }
 0xa28   :  { %v12403_v25 = vadd.f32 %v12402_v23, %v12401_v30 }
 0xa29   :  { %v12404_v2 = vpop.f32.mrf.mxu0 }
 0xa2a   :  { %13659 = vmatmul.mubr.msk.f32.gmra.mxu0 %vm20932_vm1, %v12403_v25  ;;  %v5749_v25 = vpop.f32.mrf.mxu1 }
 0xa2b   :  { %v12405_v45 = vpop.f32.mrf.mxu0 }
 0xa2c   :  { %v12406_v8 = vadd.f32 %v12405_v45, %v12404_v2 }
 0xa2d   :  { %v12407_v56 = vpop.f32.mrf.mxu0 }
 0xa2e   :  { %13661 = vmatprep.mubr.msk.f32.mxu0 %vm20941_vm6, %v12406_v8  ;;  %vm20945_vm6 = vmmov %vm20932_vm1 }
 0xa2f   :  { %v12408_v48 = vpop.f32.mrf.mxu0 }
 0xa30   :  { %v12409_v27 = vadd.f32 %v12408_v48, %v12407_v56  ;;  %v13622_v48 = vpop.f32.mrf.mxu1 }
 0xa32   :  { %13662 = vmatmul.mubr.msk.f32.gmra.mxu0 %vm20942_vm8, %v12409_v27  ;;  %vm20946_vm8 = vmmov %vm20932_vm1  ;;  %v5759_v11 = vpop.f32.mrf.mxu1 }
 0xaba   :  { %v13642_v53 = vpop.f32.mrf.mxu0 }
 0xabb   :  { %v5918_v49 = vadd.f32 %v13642_v53, %v13610_v60 }
 0xabc   :  { %v5912_v63 = vpop.f32.mrf.mxu0 }
 0xabd   :  { %v5913_v15 = vadd.f32 %v5912_v63, %v5719_v61  ;;  %v5997_v42 = vadd.f32 %v18076_v54, %v5918_v49  ;;  %v13625_v63 = vpop.f32.mrf.mxu1 }
 0xabf   :  { %v5996_v7 = vadd.f32 %v18076_v54, %v5913_v15  ;;  %v6013_v28 = vmax.f32 %v5997_v42, 0.0 }
 0xac1   :  { %v6012_v1 = vmax.f32 %v5996_v7, 0.0 }
 0xac2   :  { %v13645_v43 = vpop.f32.mrf.mxu0 }
 0xac3   :  { %v5928_v18 = vadd.f32 %v13645_v43, %v13613_v21  ;;  %13672 = vmatprep.mubr.msk.f32.mxu1 %vm20943_vm14, %v6012_v1  ;;  %vm20947_vm14 = vmmov %vm20932_vm1  ;;  %v5769_v1 = vpop.f32.mrf.mxu1 }
 0xac4   :  { %v5922_v12 = vpop.f32.mrf.mxu0  ;;  %13673 = vmatmul.mubr.msk.f32.vlgmr.msra.gmra.mxu1 %vm20944_vm7, %v6013_v28  ;;  %vm20948_vm7 = vmmov %vm20932_vm1 }
 0xac5   :  { %v5923_v26 = vadd.f32 %v5922_v12, %v5729_v52  ;;  %v5999_v10 = vadd.f32 %v18076_v54, %v5928_v18  ;;  %v13628_v12 = vpop.f32.mrf.mxu1 }
 0xac7   :  { %v5998_v33 = vadd.f32 %v18076_v54, %v5923_v26  ;;  %v6015_v44 = vmax.f32 %v5999_v10, 0.0 }
 0xac9   :  { %v6014_v58 = vmax.f32 %v5998_v33, 0.0 }
 0xaca   :  { %v13648_v59 = vpop.f32.mrf.mxu0 }
 0xacb   :  { %v5938_v13 = vadd.f32 %v13648_v59, %v13616_v55  ;;  %13675 = vmatprep.mubr.msk.f32.mxu1 %vm20932_vm1, %v6014_v58  ;;  %v5779_v58 = vpop.f32.mrf.mxu1 }
 0xacc   :  { %v5932_v47 = vpop.f32.mrf.mxu0  ;;  %13676 = vmatmul.mubr.msk.f32.gmra.mxu1 %vm20945_vm6, %v6015_v44  ;;  %vm20949_vm6 = vmmov %vm20932_vm1 }
 0xacd   :  { %v5933_v22 = vadd.f32 %v5932_v47, %v5739_v32  ;;  %v6001_v29 = vadd.f32 %v18076_v54, %v5938_v13  ;;  %v13631_v47 = vpop.f32.mrf.mxu1 }
 0xacf   :  { %v6000_v62 = vadd.f32 %v18076_v54, %v5933_v22  ;;  %v6017_v38 = vmax.f32 %v6001_v29, 0.0 }
 0xad1   :  { %v6016_v3 = vmax.f32 %v6000_v62, 0.0 }
 0xad2   :  { %v13651_v30 = vpop.f32.mrf.mxu0 }
 0xad3   :  { %v5948_v23 = vadd.f32 %v13651_v30, %v13619_v39  ;;  %13678 = vmatprep.mubr.msk.f32.mxu1 %vm20946_vm8, %v6016_v3  ;;  %vm20950_vm8 = vmmov %vm20932_vm1  ;;  %v5789_v3 = vpop.f32.mrf.mxu1 }
 0xad4   :  { %v5942_v2 = vpop.f32.mrf.mxu0  ;;  %13679 = vmatmul.mubr.msk.f32.gmra.mxu1 %vm20947_vm14, %v6017_v38  ;;  %vm20951_vm14 = vmmov %vm20932_vm1 }
 0xad5   :  { %v5943_v45 = vadd.f32 %v5942_v2, %v5749_v25  ;;  %v6003_v8 = vadd.f32 %v18076_v54, %v5948_v23 }
 0xad7   :  { %v6002_v56 = vadd.f32 %v18076_v54, %v5943_v45  ;;  %v6019_v24 = vmax.f32 %v6003_v8, 0.0  ;;  %v6249_v8 = vld [vmem:[%s20328_s7 + $0x198] sm:$0xff] }
 0xad8   :  { %13696 = vmatprep.subr.mxu0 %v6249_v8 }
 0xad9   :  { %v6018_v27 = vmax.f32 %v6002_v56, 0.0  ;;  %13697 = vmatpush3.msra.mxu0 %v6249_v8  ;;  %v6248_v56 = vld [vmem:[%s20328_s7 + $0x190] sm:$0xff] }
 0xada   :  { %v13654_v37 = vpop.f32.mrf.mxu0  ;;  %13698 = vmatprep.subr.mxu0 %v6248_v56 }
 0xadb   :  { %v5958_v35 = vadd.f32 %v13654_v37, %v13622_v48  ;;  %13681 = vmatprep.mubr.msk.f32.mxu1 %vm20948_vm7, %v6018_v27  ;;  %vm20952_vm7 = vmmov %vm20932_vm1  ;;  %13699 = vmatpush3.msra.mxu0 %v6248_v56  ;;  %v6246_v48 = vld [vmem:[%s20328_s7 + $0x180] sm:$0xff] }
 0xadc   :  { %v5952_v60 = vpop.f32.mrf.mxu0  ;;  %13682 = vmatmul.mubr.msk.f32.gmra.mxu1 %vm20932_vm1, %v6019_v24  ;;  %v11538_v27 = vld [vmem:[%s20330_s8 + $0x80] ss:$0 sm:$0xff] }
 0xadd   :  { %v5953_v53 = vadd.f32 %v5952_v60, %v5759_v11  ;;  %v6005_v49 = vadd.f32 %v18076_v54, %v5958_v35 }
 0xadf   :  { %v6004_v61 = vadd.f32 %v18076_v54, %v5953_v53  ;;  %v6021_v42 = vmax.f32 %v6005_v49, 0.0 }
 0xae1   :  { %v6020_v15 = vmax.f32 %v6004_v61, 0.0 }
 0xae2   :  { %v13657_v7 = vpop.f32.mrf.mxu0 }
 0xae3   :  { %v5968_v21 = vadd.f32 %v13657_v7, %v13625_v63  ;;  %13684 = vmatprep.mubr.msk.f32.mxu1 %vm20949_vm6, %v6020_v15  ;;  %vm20953_vm6 = vmmov %vm20932_vm1 }
 0xae4   :  { %v5962_v28 = vpop.f32.mrf.mxu0  ;;  %13685 = vmatmul.mubr.msk.f32.gmra.mxu1 %vm20950_vm8, %v6021_v42  ;;  %vm20954_vm8 = vmmov %vm20932_vm1 }
 0xae5   :  { %v5963_v43 = vadd.f32 %v5962_v28, %v5769_v1  ;;  %v6007_v18 = vadd.f32 %v18076_v54, %v5968_v21 }
 0xae7   :  { %v6006_v52 = vadd.f32 %v18076_v54, %v5963_v43  ;;  %v6023_v10 = vmax.f32 %v6007_v18, 0.0 }
 0xae9   :  { %v6022_v26 = vmax.f32 %v6006_v52, 0.0 }
 0xaea   :  { %v13660_v33 = vpop.f32.mrf.mxu0 }
 0xaeb   :  { %v5978_v55 = vadd.f32 %v13660_v33, %v13628_v12  ;;  %13687 = vmatprep.mubr.msk.f32.mxu1 %vm20951_vm14, %v6022_v26  ;;  %vm20955_vm14 = vmmov %vm20932_vm1 }
 0xaec   :  { %v5972_v44 = vpop.f32.mrf.mxu0  ;;  %13688 = vmatmul.mubr.msk.f32.gmra.mxu1 %vm20952_vm7, %v6023_v10  ;;  %vm20956_vm7 = vmmov %vm20932_vm1 }
 0xaed   :  { %v5973_v59 = vadd.f32 %v5972_v44, %v5779_v58  ;;  %v6009_v13 = vadd.f32 %v18076_v54, %v5978_v55 }
 0xaef   :  { %v6008_v32 = vadd.f32 %v18076_v54, %v5973_v59  ;;  %v6025_v29 = vmax.f32 %v6009_v13, 0.0 }
 0xaf1   :  { %v6024_v22 = vmax.f32 %v6008_v32, 0.0 }
 0xaf2   :  { %v13663_v62 = vpop.f32.mrf.mxu0 }
 0xaf3   :  { %v5988_v39 = vadd.f32 %v13663_v62, %v13631_v47  ;;  %13690 = vmatprep.mubr.msk.f32.mxu1 %vm20932_vm1, %v6024_v22 }
 0xaf4   :  { %v5982_v38 = vpop.f32.mrf.mxu0  ;;  %13691 = vmatmul.mubr.msk.f32.gmra.mxu1 %vm20953_vm6, %v6025_v29  ;;  %vm20957_vm6 = vmmov %vm20932_vm1 }
 0xaf5   :  { %v5983_v30 = vadd.f32 %v5982_v38, %v5789_v3  ;;  %v6011_v23 = vadd.f32 %v18076_v54, %v5988_v39 }
 0xaf7   :  { %v6010_v25 = vadd.f32 %v18076_v54, %v5983_v30  ;;  %v6027_v45 = vmax.f32 %v6011_v23, 0.0  ;;  %v6247_v54 = vld [vmem:[%s20328_s7 + $0x188] sm:$0xff] }
 0xaf8   :  { %13700 = vmatprep.subr.mxu0 %v6247_v54 }
 0xaf9   :  { %v6026_v2 = vmax.f32 %v6010_v25, 0.0  ;;  %13701 = vmatpush3.msra.mxu0 %v6247_v54 }
 0xafa   :  { %13702 = vmatprep.subr.mxu0 %v6246_v48 }
 0xafb   :  { %13693 = vmatprep.mubr.msk.f32.mxu1 %vm20954_vm8, %v6026_v2  ;;  %13703 = vmatpush3.msra.mxu0 %v6246_v48  ;;  %vm20958_vm8 = vmmov %vm20932_vm1 }
 0xafc   :  { %13694 = vmatmul.mubr.msk.f32.gmra.mxu1 %vm20955_vm14, %v6027_v45  ;;  %vm20959_vm14 = vmmov %vm20932_vm1 }
 0xb84   :  { %v13674_v24 = vpop.f32.mrf.mxu1 }
 0xb85   :  { %v6157_v37 = vadd.f32 %v13674_v24, %v11538_v27 }
 0xb86   :  { %v6151_v35 = vpop.f32.mrf.mxu1 }
 0xb87   :  { %v6152_v11 = vadd.f32 %v11538_v27, %v6151_v35  ;;  %v6231_v53 = vmax.f32 %v6157_v37, 0.0 }
 0xb89   :  { %v6230_v60 = vmax.f32 %v6152_v11, 0.0 }
 0xb8b   :  { %13704 = vmatprep.mubr.msk.f32.mxu0 %vm20956_vm7, %v6230_v60  ;;  %vm20960_vm7 = vmmov %vm20932_vm1  ;;  %v11555_v60 = vld [vmem:[%s20330_s8 + $0x88] ss:$0 sm:$0xff] }
 0xb8c   :  { %v13677_v49 = vpop.f32.mrf.mxu1  ;;  %13705 = vmatmul.mubr.msk.f32.vlgmr.msra.gmra.mxu0 %vm20932_vm1, %v6231_v53 }
 0xb8d   :  { %v6167_v61 = vadd.f32 %v13677_v49, %v11538_v27 }
 0xb8e   :  { %v6161_v63 = vpop.f32.mrf.mxu1 }
 0xb8f   :  { %v6162_v15 = vadd.f32 %v11538_v27, %v6161_v63  ;;  %v6233_v7 = vmax.f32 %v6167_v61, 0.0 }
 0xb91   :  { %v6232_v42 = vmax.f32 %v6162_v15, 0.0 }
 0xb93   :  { %13707 = vmatprep.mubr.msk.f32.mxu0 %vm20957_vm6, %v6232_v42  ;;  %vm20961_vm6 = vmmov %vm20932_vm1 }
 0xb94   :  { %v13680_v21 = vpop.f32.mrf.mxu1  ;;  %13708 = vmatmul.mubr.msk.f32.gmra.mxu0 %vm20958_vm8, %v6233_v7  ;;  %vm20962_vm8 = vmmov %vm20932_vm1 }
 0xb95   :  { %v6177_v1 = vadd.f32 %v13680_v21, %v11538_v27 }
 0xb96   :  { %v6171_v28 = vpop.f32.mrf.mxu1 }
 0xb97   :  { %v6172_v43 = vadd.f32 %v11538_v27, %v6171_v28  ;;  %v6235_v52 = vmax.f32 %v6177_v1, 0.0 }
 0xb99   :  { %v6234_v18 = vmax.f32 %v6172_v43, 0.0 }
 0xb9b   :  { %13710 = vmatprep.mubr.msk.f32.mxu0 %vm20959_vm14, %v6234_v18  ;;  %vm20963_vm14 = vmmov %vm20932_vm1 }
 0xb9c   :  { %v13683_v12 = vpop.f32.mrf.mxu1  ;;  %13711 = vmatmul.mubr.msk.f32.gmra.mxu0 %vm20960_vm7, %v6235_v52  ;;  %vm20964_vm7 = vmmov %vm20932_vm1 }
 0xb9d   :  { %v6187_v26 = vadd.f32 %v13683_v12, %v11538_v27 }
 0xb9e   :  { %v6181_v10 = vpop.f32.mrf.mxu1 }
 0xb9f   :  { %v6182_v33 = vadd.f32 %v11538_v27, %v6181_v10  ;;  %v6237_v58 = vmax.f32 %v6187_v26, 0.0 }
 0xba1   :  { %v6236_v55 = vmax.f32 %v6182_v33, 0.0 }
 0xba3   :  { %13713 = vmatprep.mubr.msk.f32.mxu0 %vm20932_vm1, %v6236_v55 }
 0xba4   :  { %v13686_v44 = vpop.f32.mrf.mxu1  ;;  %13714 = vmatmul.mubr.msk.f32.gmra.mxu0 %vm20961_vm6, %v6237_v58  ;;  %vm20965_vm6 = vmmov %vm20932_vm1 }
 0xba5   :  { %v6197_v59 = vadd.f32 %v13686_v44, %v11538_v27 }
 0xba6   :  { %v6191_v13 = vpop.f32.mrf.mxu1 }
 0xba7   :  { %v6192_v32 = vadd.f32 %v11538_v27, %v6191_v13  ;;  %v6239_v22 = vmax.f32 %v6197_v59, 0.0 }
 0xba9   :  { %v6238_v47 = vmax.f32 %v6192_v32, 0.0 }
 0xbab   :  { %13716 = vmatprep.mubr.msk.f32.mxu0 %vm20962_vm8, %v6238_v47  ;;  %vm20966_vm8 = vmmov %vm20932_vm1 }
 0xbac   :  { %v13689_v29 = vpop.f32.mrf.mxu1  ;;  %13717 = vmatmul.mubr.msk.f32.gmra.mxu0 %vm20963_vm14, %v6239_v22  ;;  %vm20967_vm14 = vmmov %vm20932_vm1 }
 0xbad   :  { %v6207_v62 = vadd.f32 %v13689_v29, %v11538_v27 }
 0xbae   :  { %v6201_v39 = vpop.f32.mrf.mxu1 }
 0xbaf   :  { %v6202_v3 = vadd.f32 %v11538_v27, %v6201_v39  ;;  %v6241_v30 = vmax.f32 %v6207_v62, 0.0 }
 0xbb1   :  { %v6240_v38 = vmax.f32 %v6202_v3, 0.0 }
 0xbb3   :  { %13719 = vmatprep.mubr.msk.f32.mxu0 %vm20964_vm7, %v6240_v38  ;;  %vm20968_vm7 = vmmov %vm20932_vm1 }
 0xbb4   :  { %v13692_v23 = vpop.f32.mrf.mxu1  ;;  %13720 = vmatmul.mubr.msk.f32.gmra.mxu0 %vm20932_vm1, %v6241_v30 }
 0xbb5   :  { %v6217_v25 = vadd.f32 %v13692_v23, %v11538_v27 }
 0xbb6   :  { %v6211_v2 = vpop.f32.mrf.mxu1 }
 0xbb7   :  { %v6212_v45 = vadd.f32 %v11538_v27, %v6211_v2  ;;  %v6243_v56 = vmax.f32 %v6217_v25, 0.0 }
 0xbb9   :  { %v6242_v8 = vmax.f32 %v6212_v45, 0.0 }
 0xbbb   :  { %13722 = vmatprep.mubr.msk.f32.mxu0 %vm20965_vm6, %v6242_v8  ;;  %vm20969_vm6 = vmmov %vm20932_vm1 }
 0xbbc   :  { %v13695_v54 = vpop.f32.mrf.mxu1  ;;  %13723 = vmatmul.mubr.msk.f32.gmra.mxu0 %vm20966_vm8, %v6243_v56  ;;  %vm20970_vm8 = vmmov %vm20932_vm1 }
 0xbbd   :  { %v6227_v48 = vadd.f32 %v13695_v54, %v11538_v27 }
 0xbbe   :  { %v6221_v24 = vpop.f32.mrf.mxu1 }
 0xbbf   :  { %v6222_v37 = vadd.f32 %v11538_v27, %v6221_v24  ;;  %v6245_v11 = vmax.f32 %v6227_v48, 0.0 }
 0xbc1   :  { %v6244_v35 = vmax.f32 %v6222_v37, 0.0 }
 0xbc3   :  { %13725 = vmatprep.mubr.msk.f32.mxu0 %vm20967_vm14, %v6244_v35  ;;  %vm20971_vm14 = vmmov %vm20932_vm1 }
 0xbc4   :  { %13726 = vmatmul.mubr.msk.f32.gmra.mxu0 %vm20968_vm7, %v6245_v11  ;;  %vm20972_vm7 = vmmov %vm20932_vm1 }
 0xc4c   :  { %v13706_v53 = vpop.f32.mrf.mxu0 }
 0xc4d   :  { %v18144_v49 = vadd.f32 %v13706_v53, %v11555_v60 }
 0xc4e   :  { %v6369_v61 = vpop.f32.mrf.mxu0 }
 0xc4f   :  { %v18146_v63 = vadd.f32 %v11555_v60, %v6369_v61  ;;  %v6453_v15 = vsel %vm20932_vm1, %v18144_v49, 0.0 }
 0xc50   :  { %6454 = vadd.xlane.f32.xlu0 %v6453_v15 }
 0xc51   :  { %v6450_v27 = vsel %vm20969_vm6, %v18146_v63, 0.0  ;;  %vm20973_vm6 = vmmov %vm20932_vm1 }
 0xc52   :  { %6451 = vadd.xlane.f32.xlu1 %v6450_v27 }
 0xc54   :  { %v13709_v42 = vpop.f32.mrf.mxu0 }
 0xc55   :  { %v18152_v7 = vadd.f32 %v13709_v42, %v11555_v60 }
 0xc56   :  { %v6379_v21 = vpop.f32.mrf.mxu0 }
 0xc57   :  { %v18154_v1 = vadd.f32 %v11555_v60, %v6379_v21  ;;  %v6459_v28 = vsel %vm20970_vm8, %v18152_v7, 0.0  ;;  %vm20974_vm8 = vmmov %vm20932_vm1 }
 0xc58   :  { %6460 = vadd.xlane.f32.xlu0 %v6459_v28 }
 0xc59   :  { %v6456_v43 = vsel %vm20971_vm14, %v18154_v1, 0.0  ;;  %vm20975_vm14 = vmmov %vm20932_vm1 }
 0xc5a   :  { %6457 = vadd.xlane.f32.xlu1 %v6456_v43 }
 0xc5c   :  { %v13712_v18 = vpop.f32.mrf.mxu0 }
 0xc5d   :  { %v18160_v52 = vadd.f32 %v13712_v18, %v11555_v60 }
 0xc5e   :  { %v6389_v12 = vpop.f32.mrf.mxu0 }
 0xc5f   :  { %v18162_v26 = vadd.f32 %v11555_v60, %v6389_v12  ;;  %v6465_v10 = vsel %vm20972_vm7, %v18160_v52, 0.0  ;;  %vm20976_vm7 = vmmov %vm20932_vm1 }
 0xc60   :  { %6466 = vadd.xlane.f32.xlu0 %v6465_v10 }
 0xc61   :  { %v6462_v33 = vsel %vm20932_vm1, %v18162_v26, 0.0 }
 0xc62   :  { %6463 = vadd.xlane.f32.xlu1 %v6462_v33 }
 0xc64   :  { %v13715_v55 = vpop.f32.mrf.mxu0 }
 0xc65   :  { %v18168_v58 = vadd.f32 %v13715_v55, %v11555_v60 }
 0xc66   :  { %v6399_v44 = vpop.f32.mrf.mxu0 }
 0xc67   :  { %v18170_v59 = vadd.f32 %v11555_v60, %v6399_v44  ;;  %v6471_v13 = vsel %vm20973_vm6, %v18168_v58, 0.0  ;;  %vm20977_vm6 = vmmov %vm20932_vm1 }
 0xc68   :  { %6472 = vadd.xlane.f32.xlu0 %v6471_v13 }
 0xc69   :  { %v6468_v32 = vsel %vm20974_vm8, %v18170_v59, 0.0  ;;  %vm20978_vm8 = vmmov %vm20932_vm1 }
 0xc6a   :  { %6469 = vadd.xlane.f32.xlu1 %v6468_v32 }
 0xc6c   :  { %v13718_v47 = vpop.f32.mrf.mxu0 }
 0xc6d   :  { %v18176_v22 = vadd.f32 %v13718_v47, %v11555_v60 }
 0xc6e   :  { %v6409_v29 = vpop.f32.mrf.mxu0 }
 0xc6f   :  { %v18178_v62 = vadd.f32 %v11555_v60, %v6409_v29  ;;  %v6477_v39 = vsel %vm20975_vm14, %v18176_v22, 0.0  ;;  %vm20979_vm14 = vmmov %vm20932_vm1 }
 0xc70   :  { %6478 = vadd.xlane.f32.xlu0 %v6477_v39 }
 0xc71   :  { %v6474_v3 = vsel %vm20976_vm7, %v18178_v62, 0.0  ;;  %vm20980_vm7 = vmmov %vm20932_vm1 }
 0xc72   :  { %6475 = vadd.xlane.f32.xlu1 %v6474_v3 }
 0xc74   :  { %v13721_v38 = vpop.f32.mrf.mxu0 }
 0xc75   :  { %v18184_v30 = vadd.f32 %v13721_v38, %v11555_v60 }
 0xc76   :  { %v6419_v23 = vpop.f32.mrf.mxu0 }
 0xc77   :  { %v18186_v25 = vadd.f32 %v11555_v60, %v6419_v23  ;;  %v6483_v2 = vsel %vm20932_vm1, %v18184_v30, 0.0 }
 0xc78   :  { %6484 = vadd.xlane.f32.xlu0 %v6483_v2 }
 0xc79   :  { %v6480_v45 = vsel %vm20977_vm6, %v18186_v25, 0.0  ;;  %vm20981_vm6 = vmmov %vm20932_vm1 }
 0xc7a   :  { %6481 = vadd.xlane.f32.xlu1 %v6480_v45 }
 0xc7c   :  { %v13724_v8 = vpop.f32.mrf.mxu0 }
 0xc7d   :  { %v18192_v56 = vadd.f32 %v13724_v8, %v11555_v60 }
 0xc7e   :  { %v6429_v54 = vpop.f32.mrf.mxu0 }
 0xc7f   :  { %v18194_v48 = vadd.f32 %v11555_v60, %v6429_v54  ;;  %v6489_v24 = vsel %vm20978_vm8, %v18192_v56, 0.0  ;;  %vm20982_vm8 = vmmov %vm20932_vm1 }
 0xc80   :  { %6490 = vadd.xlane.f32.xlu0 %v6489_v24 }
 0xc81   :  { %v6486_v37 = vsel %vm20979_vm14, %v18194_v48, 0.0  ;;  %vm20983_vm14 = vmmov %vm20932_vm1 }
 0xc82   :  { %6487 = vadd.xlane.f32.xlu1 %v6486_v37 }
 0xc84   :  { %v13727_v35 = vpop.f32.mrf.mxu0 }
 0xc85   :  { %v18200_v11 = vadd.f32 %v13727_v35, %v11555_v60 }
 0xc86   :  { %v6439_v53 = vpop.f32.mrf.mxu0 }
 0xc87   :  { %v18202_v61 = vadd.f32 %v11555_v60, %v6439_v53  ;;  %v6495_v15 = vsel %vm20980_vm7, %v18200_v11, 0.0  ;;  %vm20984_vm7 = vmmov %vm20932_vm1 }
 0xc88   :  { %6496 = vadd.xlane.f32.xlu0 %v6495_v15 }
 0xc89   :  { %v6492_v27 = vsel %vm20932_vm1, %v18202_v61, 0.0 }
 0xc8a   :  { %6493 = vadd.xlane.f32.xlu1 %v6492_v27 }
 0xcd9   :  { %v6455_v42 = vpop.xlane.xlu0 %6454 }
 0xcda   :  { %v6499_v21 = vmul.f32 0.03125, %v6455_v42 }
 0xcdb   :  { %v6452_v28 = vpop.xlane.xlu1 %6451 }
 0xcdc   :  { %v18209_v43 = vsub.f32 %v18144_v49, %v6499_v21  ;;  %v6498_v18 = vmul.f32 0.03125, %v6452_v28 }
 0xcde   :  { %v18212_v12 = vsub.f32 %v18146_v63, %v6498_v18  ;;  %v6531_v60 = vmul.f32 %v18209_v43, %v18209_v43 }
 0xce0   :  { %v6549_v10 = vsel %vm20981_vm6, %v6531_v60, 0.0  ;;  %v6530_v33 = vmul.f32 %v18212_v12, %v18212_v12  ;;  %vm20985_vm6 = vmmov %vm20932_vm1 }
 0xce1   :  { %v6461_v55 = vpop.xlane.xlu0 %6460  ;;  %6550 = vadd.xlane.f32.xlu0 %v6549_v10 }
 0xce2   :  { %v6501_v44 = vmul.f32 0.03125, %v6461_v55  ;;  %v6546_v13 = vsel %vm20982_vm8, %v6530_v33, 0.0  ;;  %vm20986_vm8 = vmmov %vm20932_vm1 }
 0xce3   :  { %6547 = vadd.xlane.f32.xlu1 %v6546_v13  ;;  %v6458_v49 = vpop.xlane.xlu1 %6457 }
 0xce4   :  { %v18221_v32 = vsub.f32 %v18152_v7, %v6501_v44  ;;  %v6500_v63 = vmul.f32 0.03125, %v6458_v49  ;;  %v6749_v49 = vld [vmem:[%s20328_s7 + $0x1b8] sm:$0xff] }
 0xce5   :  { %13728 = vmatprep.subr.mxu1 %v6749_v49 }
 0xce6   :  { %v18224_v47 = vsub.f32 %v18154_v1, %v6500_v63  ;;  %v6533_v29 = vmul.f32 %v18221_v32, %v18221_v32  ;;  %v6946_v63 = vld [vmem:[%s20328_s7 + $0x1d8] sm:$0xff]  ;;  %13729 = vmatpush3.msra.mxu1 %v6749_v49 }
 0xce7   :  { %13760 = vmatprep.subr.mxu0 %v6946_v63 }
 0xce8   :  { %v6555_v39 = vsel %vm20983_vm14, %v6533_v29, 0.0  ;;  %v6532_v3 = vmul.f32 %v18224_v47, %v18224_v47  ;;  %vm20987_vm14 = vmmov %vm20932_vm1  ;;  %13761 = vmatpush3.msra.mxu0 %v6946_v63 }
 0xce9   :  { %v6467_v38 = vpop.xlane.xlu0 %6466  ;;  %6556 = vadd.xlane.f32.xlu0 %v6555_v39  ;;  %v6748_v39 = vld [vmem:[%s20328_s7 + $0x1b0] sm:$0xff] }
 0xcea   :  { %v6503_v23 = vmul.f32 0.03125, %v6467_v38  ;;  %v6552_v2 = vsel %vm20984_vm7, %v6532_v3, 0.0  ;;  %vm20988_vm7 = vmmov %vm20932_vm1  ;;  %v6945_v3 = vld [vmem:[%s20328_s7 + $0x1d0] sm:$0xff]  ;;  %13730 = vmatprep.subr.mxu1 %v6748_v39 }
 0xceb   :  { %6553 = vadd.xlane.f32.xlu1 %v6552_v2  ;;  %v6464_v7 = vpop.xlane.xlu1 %6463  ;;  %13762 = vmatprep.subr.mxu0 %v6945_v3 }
 0xcec   :  { %v18233_v45 = vsub.f32 %v18160_v52, %v6503_v23  ;;  %v6502_v1 = vmul.f32 0.03125, %v6464_v7  ;;  %v6747_v7 = vld [vmem:[%s20328_s7 + $0x1a8] sm:$0xff]  ;;  %13731 = vmatpush3.msra.mxu1 %v6748_v39  ;;  %13763 = vmatpush3.msra.mxu0 %v6945_v3 }
 0xced   :  { %13732 = vmatprep.subr.mxu1 %v6747_v7 }
 0xcee   :  { %v18236_v8 = vsub.f32 %v18162_v26, %v6502_v1  ;;  %v6535_v54 = vmul.f32 %v18233_v45, %v18233_v45  ;;  %v6944_v1 = vld [vmem:[%s20328_s7 + $0x1c8] sm:$0xff]  ;;  %13733 = vmatpush3.msra.mxu1 %v6747_v7 }
 0xcef   :  { %13764 = vmatprep.subr.mxu0 %v6944_v1 }
 0xcf0   :  { %v6561_v24 = vsel %vm20932_vm1, %v6535_v54, 0.0  ;;  %v6534_v37 = vmul.f32 %v18236_v8, %v18236_v8  ;;  %13765 = vmatpush3.msra.mxu0 %v6944_v1 }
 0xcf1   :  { %v6473_v35 = vpop.xlane.xlu0 %6472  ;;  %6562 = vadd.xlane.f32.xlu0 %v6561_v24 }
 0xcf2   :  { %v6505_v53 = vmul.f32 0.03125, %v6473_v35  ;;  %v6558_v15 = vsel %vm20985_vm6, %v6534_v37, 0.0  ;;  %v6746_v37 = vld [vmem:[%s20328_s7 + $0x1a0] sm:$0xff]  ;;  %vm20989_vm6 = vmmov %vm20932_vm1 }
 0xcf3   :  { %6559 = vadd.xlane.f32.xlu1 %v6558_v15  ;;  %v6470_v52 = vpop.xlane.xlu1 %6469  ;;  %v6943_v35 = vld [vmem:[%s20328_s7 + $0x1c0] sm:$0xff]  ;;  %13734 = vmatprep.subr.mxu1 %v6746_v37 }
 0xcf4   :  { %v18245_v27 = vsub.f32 %v18168_v58, %v6505_v53  ;;  %v6504_v26 = vmul.f32 0.03125, %v6470_v52  ;;  %13766 = vmatprep.subr.mxu0 %v6943_v35  ;;  %13735 = vmatpush3.msra.mxu1 %v6746_v37 }
 0xcf5   :  { %13767 = vmatpush3.msra.mxu0 %v6943_v35 }
 0xcf6   :  { %v18248_v42 = vsub.f32 %v18170_v59, %v6504_v26  ;;  %v6537_v21 = vmul.f32 %v18245_v27, %v18245_v27 }
 0xcf8   :  { %v6567_v28 = vsel %vm20986_vm8, %v6537_v21, 0.0  ;;  %v6536_v18 = vmul.f32 %v18248_v42, %v18248_v42  ;;  %vm20990_vm8 = vmmov %vm20932_vm1 }
 0xcf9   :  { %v6479_v60 = vpop.xlane.xlu0 %6478  ;;  %6568 = vadd.xlane.f32.xlu0 %v6567_v28 }
 0xcfa   :  { %v6507_v10 = vmul.f32 0.03125, %v6479_v60  ;;  %v6564_v33 = vsel %vm20987_vm14, %v6536_v18, 0.0  ;;  %vm20991_vm14 = vmmov %vm20932_vm1 }
 0xcfb   :  { %6565 = vadd.xlane.f32.xlu1 %v6564_v33  ;;  %v6476_v58 = vpop.xlane.xlu1 %6475 }
 0xcfc   :  { %v18257_v55 = vsub.f32 %v18176_v22, %v6507_v10  ;;  %v6506_v59 = vmul.f32 0.03125, %v6476_v58 }
 0xcfe   :  { %v18260_v44 = vsub.f32 %v18178_v62, %v6506_v59  ;;  %v6539_v13 = vmul.f32 %v18257_v55, %v18257_v55 }
 0xd00   :  { %v6573_v29 = vsel %vm20988_vm7, %v6539_v13, 0.0  ;;  %v6538_v22 = vmul.f32 %v18260_v44, %v18260_v44  ;;  %vm20992_vm7 = vmmov %vm20932_vm1 }
 0xd01   :  { %v6485_v62 = vpop.xlane.xlu0 %6484  ;;  %6574 = vadd.xlane.f32.xlu0 %v6573_v29 }
 0xd02   :  { %v6509_v38 = vmul.f32 0.03125, %v6485_v62  ;;  %v6570_v23 = vsel %vm20932_vm1, %v6538_v22, 0.0 }
 0xd03   :  { %6571 = vadd.xlane.f32.xlu1 %v6570_v23  ;;  %v6482_v2 = vpop.xlane.xlu1 %6481 }
 0xd04   :  { %v18287_v54 = vsub.f32 %v18184_v30, %v6509_v38  ;;  %v6508_v24 = vmul.f32 0.03125, %v6482_v2 }
 0xd06   :  { %v18296_v53 = vsub.f32 %v18186_v25, %v6508_v24  ;;  %v6541_v30 = vmul.f32 %v18287_v54, %v18287_v54 }
 0xd08   :  { %v6579_v15 = vsel %vm20989_vm6, %v6541_v30, 0.0  ;;  %v6540_v52 = vmul.f32 %v18296_v53, %v18296_v53  ;;  %vm20993_vm6 = vmmov %vm20932_vm1 }
 0xd09   :  { %v6491_v26 = vpop.xlane.xlu0 %6490  ;;  %6580 = vadd.xlane.f32.xlu0 %v6579_v15 }
 0xd0a   :  { %v6511_v21 = vmul.f32 0.03125, %v6491_v26  ;;  %v6576_v25 = vsel %vm20990_vm8, %v6540_v52, 0.0  ;;  %vm20998_vm8 = vmmov %vm20932_vm1 }
 0xd0b   :  { %6577 = vadd.xlane.f32.xlu1 %v6576_v25  ;;  %v6488_v28 = vpop.xlane.xlu1 %6487 }
 0xd0c   :  { %v18305_v18 = vsub.f32 %v18192_v56, %v6511_v21  ;;  %v6510_v60 = vmul.f32 0.03125, %v6488_v28  ;;  %v18331_v28 = vld [vmem:[%s20330_s8 + $0x90] ss:$0 sm:$0xff] }
 0xd0e   :  { %v18308_v10 = vsub.f32 %v18194_v48, %v6510_v60  ;;  %v6543_v33 = vmul.f32 %v18305_v18, %v18305_v18 }
 0xd10   :  { %v6585_v58 = vsel %vm20991_vm14, %v6543_v33, 0.0  ;;  %v6542_v59 = vmul.f32 %v18308_v10, %v18308_v10  ;;  %vm20999_vm14 = vmmov %vm20932_vm1 }
 0xd11   :  { %6586 = vadd.xlane.f32.xlu0 %v6585_v58  ;;  %v6497_v13 = vpop.xlane.xlu0 %6496 }
 0xd12   :  { %v6513_v49 = vmul.f32 0.03125, %v6497_v13  ;;  %v6582_v63 = vsel %vm20992_vm7, %v6542_v59, 0.0  ;;  %vm21000_vm7 = vmmov %vm20932_vm1 }
 0xd13   :  { %6583 = vadd.xlane.f32.xlu1 %v6582_v63  ;;  %v6494_v56 = vpop.xlane.xlu1 %6493 }
 0xd14   :  { %v18317_v29 = vsub.f32 %v18200_v11, %v6513_v49  ;;  %v6512_v48 = vmul.f32 0.03125, %v6494_v56  ;;  %v18337_v49 = vld [vmem:[%s20330_s8 + $0x98] ss:$0 sm:$0xff] }
 0xd16   :  { %v18320_v22 = vsub.f32 %v18202_v61, %v6512_v48  ;;  %v6545_v62 = vmul.f32 %v18317_v29, %v18317_v29 }
 0xd18   :  { %v6591_v39 = vsel %vm20932_vm1, %v6545_v62, 0.0  ;;  %v6544_v3 = vmul.f32 %v18320_v22, %v18320_v22 }
 0xd19   :  { %6592 = vadd.xlane.f32.xlu0 %v6591_v39 }
 0xd1a   :  { %v6588_v38 = vsel %vm20993_vm6, %v6544_v3, 0.0  ;;  %vm21005_vm6 = vmmov %vm20932_vm1 }
 0xd1b   :  { %6589 = vadd.xlane.f32.xlu1 %v6588_v38 }
 0xd6a   :  { %v6551_v23 = vpop.xlane.xlu0 %6550 }
 0xd6b   :  { %v6595_v2 = vmul.f32 0.03125, %v6551_v23 }
 0xd6c   :  { %v6548_v11 = vpop.xlane.xlu1 %6547 }
 0xd6d   :  { %v6611_v7 = vadd.f32 1e-05, %v6595_v2  ;;  %v6594_v1 = vmul.f32 0.03125, %v6548_v11 }
 0xd6f   :  { %14508 = vrsqrt.f32 %v6611_v7  ;;  %v6610_v61 = vadd.f32 1e-05, %v6594_v1 }
 0xd71   :  { %14510 = vrsqrt.f32 %v6610_v61  ;;  %v20994_v61 = vld [vmem:[#allocation2_spill] sm:$0xff] }
 0xd72   :  { %v6557_v24 = vpop.xlane.xlu0 %6556 }
 0xd73   :  { %v6597_v37 = vmul.f32 0.03125, %v6557_v24 }
 0xd74   :  { %v6554_v35 = vpop.xlane.xlu1 %6553 }
 0xd75   :  { %v6613_v30 = vadd.f32 1e-05, %v6597_v37  ;;  %v6596_v15 = vmul.f32 0.03125, %v6554_v35 }
 0xd77   :  { %14512 = vrsqrt.f32 %v6613_v30  ;;  %v6612_v52 = vadd.f32 1e-05, %v6596_v15 }
 0xd79   :  { %14514 = vrsqrt.f32 %v6612_v52 }
 0xd7a   :  { %v6563_v26 = vpop.xlane.xlu0 %6562 }
 0xd7b   :  { %v6599_v21 = vmul.f32 0.03125, %v6563_v26 }
 0xd7c   :  { %v14509_v25 = vpop.eup %14508  ;;  %v6560_v60 = vpop.xlane.xlu1 %6559 }
 0xd7d   :  { %v6643_v33 = vmul.f32 %v14509_v25, %v18209_v43  ;;  %v6615_v58 = vadd.f32 1e-05, %v6599_v21  ;;  %v6598_v59 = vmul.f32 0.03125, %v6560_v60 }
 0xd7e   :  { %v14511_v13 = vpop.eup %14510 }
 0xd7f   :  { %v6663_v63 = vmul.f32 %v18331_v28, %v6643_v33  ;;  %14516 = vrsqrt.f32 %v6615_v58  ;;  %v6614_v56 = vadd.f32 1e-05, %v6598_v59  ;;  %v6642_v48 = vmul.f32 %v14511_v13, %v18212_v12  ;;  %v20996_v12 = vld [vmem:[#allocation3_spill] sm:$0xff] }
 0xd81   :  { %14518 = vrsqrt.f32 %v6614_v56  ;;  %v6662_v62 = vmul.f32 %v18331_v28, %v6642_v48  ;;  %v6683_v39 = vadd.f32 %v18337_v49, %v6663_v63  ;;  %v21001_v63 = vld [vmem:[#allocation4_spill] sm:$0xff] }
 0xd82   :  { %v6569_v43 = vpop.xlane.xlu0 %6568 }
 0xd83   :  { %v6601_v3 = vmul.f32 0.03125, %v6569_v43  ;;  %v6682_v38 = vadd.f32 %v18337_v49, %v6662_v62  ;;  %v18349_v35 = vadd.f32 %v6683_v39, %v20996_v12  ;;  %v21003_v62 = vld [vmem:[#allocation5_spill] sm:$0xff] }
 0xd84   :  { %v14513_v23 = vpop.eup %14512  ;;  %v6566_v2 = vpop.xlane.xlu1 %6565 }
 0xd85   :  { %v6645_v11 = vmul.f32 %v14513_v23, %v18221_v32  ;;  %v6617_v7 = vadd.f32 1e-05, %v6601_v3  ;;  %v6600_v1 = vmul.f32 0.03125, %v6566_v2  ;;  %v18346_v24 = vadd.f32 %v6682_v38, %v20994_v61  ;;  %20997 = vst [vmem:[#allocation3_spill] sm:$0xff] %v18349_v35 }
 0xd86   :  { %v14515_v37 = vpop.eup %14514 }
 0xd87   :  { %20995 = vst [vmem:[#allocation2_spill] sm:$0xff] %v18346_v24  ;;  %14520 = vrsqrt.f32 %v6617_v7  ;;  %v6616_v30 = vadd.f32 1e-05, %v6600_v1  ;;  %13736 = vmatprep.mubr.msk.f32.mxu1 %vm20998_vm8, %v18346_v24  ;;  %13768 = vmatprep.mubr.msk.f32.mxu0 %vm20999_vm14, %v18346_v24  ;;  %v6644_v15 = vmul.f32 %v14515_v37, %v18224_v47  ;;  %v6665_v32 = vmul.f32 %v18331_v28, %v6645_v11  ;;  %vm21006_vm8 = vmmov %vm20932_vm1 }
 0xd88   :  { %13737 = vmatmul.mubr.msk.f32.vlgmr.msra.gmra.mxu1 %vm21000_vm7, %v18349_v35  ;;  %13769 = vmatmul.mubr.msk.f32.vlgmr.msra.gmra.mxu0 %vm20932_vm1, %v18349_v35  ;;  %vm21007_vm14 = vmmov %vm20932_vm1 }
 0xd89   :  { %14522 = vrsqrt.f32 %v6616_v30  ;;  %v6664_v52 = vmul.f32 %v18331_v28, %v6644_v15  ;;  %v6685_v21 = vadd.f32 %v18337_v49, %v6665_v32  ;;  %vm21008_vm7 = vmmov %vm20932_vm1  ;;  %v21009_v30 = vld [vmem:[#allocation6_spill] sm:$0xff] }
 0xd8a   :  { %v6575_v26 = vpop.xlane.xlu0 %6574 }
 0xd8b   :  { %v6603_v25 = vmul.f32 0.03125, %v6575_v26  ;;  %v6684_v60 = vadd.f32 %v18337_v49, %v6664_v52  ;;  %v18369_v39 = vadd.f32 %v6685_v21, %v21003_v62  ;;  %v21011_v52 = vld [vmem:[#allocation8_spill] sm:$0xff] }
 0xd8c   :  { %v14517_v33 = vpop.eup %14516  ;;  %v6572_v58 = vpop.xlane.xlu1 %6571 }
 0xd8d   :  { %v6647_v47 = vmul.f32 %v14517_v33, %v18233_v45  ;;  %v6619_v59 = vadd.f32 1e-05, %v6603_v25  ;;  %v6602_v13 = vmul.f32 0.03125, %v6572_v58  ;;  %v18366_v56 = vadd.f32 %v6684_v60, %v21001_v63  ;;  %21004 = vst [vmem:[#allocation5_spill] sm:$0xff] %v18369_v39 }
 0xd8e   :  { %v14519_v48 = vpop.eup %14518 }
 0xd8f   :  { %21002 = vst [vmem:[#allocation4_spill] sm:$0xff] %v18366_v56  ;;  %14524 = vrsqrt.f32 %v6619_v59  ;;  %v6618_v43 = vadd.f32 1e-05, %v6602_v13  ;;  %13739 = vmatprep.mubr.msk.f32.mxu1 %vm21005_vm6, %v18366_v56  ;;  %13771 = vmatprep.mubr.msk.f32.mxu0 %vm21006_vm8, %v18366_v56  ;;  %v6646_v3 = vmul.f32 %v14519_v48, %v18236_v8  ;;  %v6667_v45 = vmul.f32 %v18331_v28, %v6647_v47  ;;  %vm21013_vm6 = vmmov %vm20932_vm1 }
 0xd90   :  { %13740 = vmatmul.mubr.msk.f32.gmra.mxu1 %vm21007_vm14, %v18369_v39  ;;  %13772 = vmatmul.mubr.msk.f32.gmra.mxu0 %vm21008_vm7, %v18369_v39  ;;  %vm21014_vm8 = vmmov %vm20932_vm1 }
 0xd91   :  { %14526 = vrsqrt.f32 %v6618_v43  ;;  %v6666_v38 = vmul.f32 %v18331_v28, %v6646_v3  ;;  %v6687_v2 = vadd.f32 %v18337_v49, %v6667_v45  ;;  %vm21015_vm14 = vmmov %vm20932_vm1  ;;  %v21016_v43 = vld [vmem:[#allocation11_spill] sm:$0xff] }
 0xd92   :  { %v6581_v23 = vpop.xlane.xlu0 %6580  ;;  %vm21020_vm7 = vmmov %vm20932_vm1 }
 0xd93   :  { %v6605_v11 = vmul.f32 0.03125, %v6581_v23  ;;  %v6686_v7 = vadd.f32 %v18337_v49, %v6666_v38  ;;  %v18389_v26 = vadd.f32 %v6687_v2, %v21011_v52  ;;  %v21018_v38 = vld [vmem:[#allocation12_spill] sm:$0xff] }
 0xd94   :  { %v14521_v1 = vpop.eup %14520  ;;  %v6578_v61 = vpop.xlane.xlu1 %6577 }
 0xd95   :  { %v6649_v8 = vmul.f32 %v14521_v1, %v18245_v27  ;;  %v6621_v37 = vadd.f32 1e-05, %v6605_v11  ;;  %v6604_v12 = vmul.f32 0.03125, %v6578_v61  ;;  %v18386_v15 = vadd.f32 %v6686_v7, %v21009_v30  ;;  %21012 = vst [vmem:[#allocation8_spill] sm:$0xff] %v18389_v26 }
 0xd96   :  { %v14523_v32 = vpop.eup %14522 }
 0xd97   :  { %21010 = vst [vmem:[#allocation6_spill] sm:$0xff] %v18386_v15  ;;  %14528 = vrsqrt.f32 %v6621_v37  ;;  %v6620_v21 = vadd.f32 1e-05, %v6604_v12  ;;  %13742 = vmatprep.mubr.msk.f32.mxu1 %vm20932_vm1, %v18386_v15  ;;  %13774 = vmatprep.mubr.msk.f32.mxu0 %vm21013_vm6, %v18386_v15  ;;  %v6648_v25 = vmul.f32 %v14523_v32, %v18248_v42  ;;  %v6669_v27 = vmul.f32 %v18331_v28, %v6649_v8  ;;  %vm21021_vm6 = vmmov %vm20932_vm1 }
 0xd98   :  { %13743 = vmatmul.mubr.msk.f32.gmra.mxu1 %vm21014_vm8, %v18389_v26  ;;  %13775 = vmatmul.mubr.msk.f32.gmra.mxu0 %vm21015_vm14, %v18389_v26  ;;  %vm21022_vm8 = vmmov %vm20932_vm1 }
 0xd99   :  { %14530 = vrsqrt.f32 %v6620_v21  ;;  %v6668_v60 = vmul.f32 %v18331_v28, %v6648_v25  ;;  %v6689_v58 = vadd.f32 %v18337_v49, %v6669_v27  ;;  %v21023_v21 = vld [vmem:[#allocation15_spill] sm:$0xff]  ;;  %vm21027_vm14 = vmmov %vm20932_vm1 }
 0xd9a   :  { %v6587_v33 = vpop.xlane.xlu0 %6586 }
 0xd9b   :  { %v6607_v47 = vmul.f32 0.03125, %v6587_v33  ;;  %v6688_v59 = vadd.f32 %v18337_v49, %v6668_v60  ;;  %v18409_v23 = vadd.f32 %v6689_v58, %v21018_v38  ;;  %v21025_v60 = vld [vmem:[#allocation16_spill] sm:$0xff] }
 0xd9c   :  { %v14525_v13 = vpop.eup %14524  ;;  %v6584_v63 = vpop.xlane.xlu1 %6583 }
 0xd9d   :  { %v6651_v42 = vmul.f32 %v14525_v13, %v18257_v55  ;;  %v6623_v48 = vadd.f32 1e-05, %v6607_v47  ;;  %v6606_v62 = vmul.f32 0.03125, %v6584_v63  ;;  %v18406_v3 = vadd.f32 %v6688_v59, %v21016_v43  ;;  %21019 = vst [vmem:[#allocation12_spill] sm:$0xff] %v18409_v23 }
 0xd9e   :  { %v14527_v45 = vpop.eup %14526 }
 0xd9f   :  { %21017 = vst [vmem:[#allocation11_spill] sm:$0xff] %v18406_v3  ;;  %14532 = vrsqrt.f32 %v6623_v48  ;;  %v6622_v2 = vadd.f32 1e-05, %v6606_v62  ;;  %13745 = vmatprep.mubr.msk.f32.mxu1 %vm21020_vm7, %v18406_v3  ;;  %13777 = vmatprep.mubr.msk.f32.mxu0 %vm20932_vm1, %v18406_v3  ;;  %v6650_v11 = vmul.f32 %v14527_v45, %v18260_v44  ;;  %v6671_v55 = vmul.f32 %v18331_v28, %v6651_v42  ;;  %vm21028_vm7 = vmmov %vm20932_vm1  ;;  %v21030_v62 = vld [vmem:[#allocation19_spill] sm:$0xff]  ;;  %v21032_v45 = vld [vmem:[#allocation20_spill] sm:$0xff] }
 0xda0   :  { %13746 = vmatmul.mubr.msk.f32.gmra.mxu1 %vm21021_vm6, %v18409_v23  ;;  %13778 = vmatmul.mubr.msk.f32.gmra.mxu0 %vm21022_vm8, %v18409_v23  ;;  %vm21029_vm6 = vmmov %vm20932_vm1  ;;  %v18973_v23 = vld [vmem:[%s20330_s8 + $0xa0] ss:$0 sm:$0xff] }
 0xda1   :  { %14534 = vrsqrt.f32 %v6622_v2  ;;  %v6670_v7 = vmul.f32 %v18331_v28, %v6650_v11  ;;  %v6691_v61 = vadd.f32 %v18337_v49, %v6671_v55  ;;  %vm21034_vm8 = vmmov %vm20932_vm1 }
 0xda2   :  { %v6593_v1 = vpop.xlane.xlu0 %6592 }
 0xda3   :  { %v6609_v8 = vmul.f32 0.03125, %v6593_v1  ;;  %v6690_v37 = vadd.f32 %v18337_v49, %v6670_v7  ;;  %v18429_v33 = vadd.f32 %v6691_v61, %v21025_v60 }
 0xda4   :  { %v14529_v12 = vpop.eup %14528  ;;  %v6590_v30 = vpop.xlane.xlu1 %6589 }
 0xda5   :  { %v6653_v44 = vmul.f32 %v14529_v12, %v18287_v54  ;;  %v6625_v32 = vadd.f32 1e-05, %v6609_v8  ;;  %v6608_v52 = vmul.f32 0.03125, %v6590_v30  ;;  %v18426_v25 = vadd.f32 %v6690_v37, %v21023_v21  ;;  %21026 = vst [vmem:[#allocation16_spill] sm:$0xff] %v18429_v33  ;;  %v21037_v8 = vld [vmem:[#allocation23_spill] sm:$0xff]  ;;  %v21039_v12 = vld [vmem:[#allocation24_spill] sm:$0xff] }
 0xda6   :  { %v14531_v27 = vpop.eup %14530 }
 0xda7   :  { %21024 = vst [vmem:[#allocation15_spill] sm:$0xff] %v18426_v25  ;;  %14536 = vrsqrt.f32 %v6625_v32  ;;  %v6624_v58 = vadd.f32 1e-05, %v6608_v52  ;;  %13748 = vmatprep.mubr.msk.f32.mxu1 %vm21027_vm14, %v18426_v25  ;;  %13780 = vmatprep.mubr.msk.f32.mxu0 %vm21028_vm7, %v18426_v25  ;;  %v6652_v47 = vmul.f32 %v14531_v27, %v18296_v53  ;;  %v6673_v54 = vmul.f32 %v18331_v28, %v6653_v44  ;;  %vm21035_vm14 = vmmov %vm20932_vm1  ;;  %v21045_v27 = vld [vmem:[#allocation27_spill] sm:$0xff] }
 0xda8   :  { %13749 = vmatmul.mubr.msk.f32.gmra.mxu1 %vm20932_vm1, %v18429_v33  ;;  %13781 = vmatmul.mubr.msk.f32.gmra.mxu0 %vm21029_vm6, %v18429_v33  ;;  %vm21036_vm7 = vmmov %vm20932_vm1 }
 0xda9   :  { %14538 = vrsqrt.f32 %v6624_v58  ;;  %v6672_v59 = vmul.f32 %v18331_v28, %v6652_v47  ;;  %v6693_v13 = vadd.f32 %v18337_v49, %v6673_v54  ;;  %vm21041_vm6 = vmmov %vm20932_vm1  ;;  %v21047_v58 = vld [vmem:[#allocation28_spill] sm:$0xff] }
 0xdab   :  { %v6692_v63 = vadd.f32 %v18337_v49, %v6672_v59  ;;  %v18449_v38 = vadd.f32 %v6693_v13, %v21032_v45 }
 0xdac   :  { %v14533_v42 = vpop.eup %14532 }
 0xdad   :  { %v6655_v48 = vmul.f32 %v14533_v42, %v18305_v18  ;;  %v18446_v53 = vadd.f32 %v6692_v63, %v21030_v62  ;;  %21033 = vst [vmem:[#allocation20_spill] sm:$0xff] %v18449_v38 }
 0xdae   :  { %v14535_v43 = vpop.eup %14534 }
 0xdaf   :  { %21031 = vst [vmem:[#allocation19_spill] sm:$0xff] %v18446_v53  ;;  %13751 = vmatprep.mubr.msk.f32.mxu1 %vm21034_vm8, %v18446_v53  ;;  %13783 = vmatprep.mubr.msk.f32.mxu0 %vm21035_vm14, %v18446_v53  ;;  %v6654_v2 = vmul.f32 %v14535_v43, %v18308_v10  ;;  %v6675_v11 = vmul.f32 %v18331_v28, %v6655_v48  ;;  %vm21042_vm8 = vmmov %vm20932_vm1 }
 0xdb0   :  { %13752 = vmatmul.mubr.msk.f32.gmra.mxu1 %vm21036_vm7, %v18449_v38  ;;  %13784 = vmatmul.mubr.msk.f32.gmra.mxu0 %vm20932_vm1, %v18449_v38  ;;  %vm21043_vm14 = vmmov %vm20932_vm1 }
 0xdb1   :  { %v6674_v18 = vmul.f32 %v18331_v28, %v6654_v2  ;;  %v6695_v55 = vadd.f32 %v18337_v49, %v6675_v11  ;;  %vm21044_vm7 = vmmov %vm20932_vm1 }
 0xdb3   :  { %v6694_v7 = vadd.f32 %v18337_v49, %v6674_v18  ;;  %v18469_v30 = vadd.f32 %v6695_v55, %v21039_v12 }
 0xdb4   :  { %v14537_v1 = vpop.eup %14536 }
 0xdb5   :  { %v6657_v61 = vmul.f32 %v14537_v1, %v18317_v29  ;;  %v18466_v37 = vadd.f32 %v6694_v7, %v21037_v8  ;;  %21040 = vst [vmem:[#allocation24_spill] sm:$0xff] %v18469_v30 }
 0xdb6   :  { %v14539_v10 = vpop.eup %14538 }
 0xdb7   :  { %21038 = vst [vmem:[#allocation23_spill] sm:$0xff] %v18466_v37  ;;  %13754 = vmatprep.mubr.msk.f32.mxu1 %vm21041_vm6, %v18466_v37  ;;  %13786 = vmatprep.mubr.msk.f32.mxu0 %vm21042_vm8, %v18466_v37  ;;  %v6656_v44 = vmul.f32 %v14539_v10, %v18320_v22  ;;  %v6677_v32 = vmul.f32 %v18331_v28, %v6657_v61  ;;  %vm21049_vm6 = vmmov %vm20932_vm1  ;;  %v21052_v22 = vld [vmem:[#allocation7_spill] sm:$0xff] }
 0xdb8   :  { %13755 = vmatmul.mubr.msk.f32.gmra.mxu1 %vm21043_vm14, %v18469_v30  ;;  %13787 = vmatmul.mubr.msk.f32.gmra.mxu0 %vm21044_vm7, %v18469_v30  ;;  %vm21050_vm8 = vmmov %vm20932_vm1 }
 0xdb9   :  { %v6676_v29 = vmul.f32 %v18331_v28, %v6656_v44  ;;  %v6697_v52 = vadd.f32 %v18337_v49, %v6677_v32  ;;  %vm21051_vm14 = vmmov %vm20932_vm1  ;;  %v21053_v28 = vld [vmem:[#allocation10_spill] sm:$0xff] }
 0xdba   :  { %vm21054_vm7 = vcmp.eq.s32.totalorder %v21052_v22, %v21053_v28 }
 0xdbb   :  { %v6696_v21 = vadd.f32 %v18337_v49, %v6676_v29  ;;  %v18488_v47 = vadd.f32 %v6697_v52, %v21047_v58  ;;  %v21055_v49 = vld [vmem:[#allocation45_spill] sm:$0xff] }
 0xdbc   :  { %vm21056_vm4 = vcmp.eq.s32.totalorder %v21052_v22, %v21055_v49 }
 0xdbd   :  { %v18485_v60 = vadd.f32 %v6696_v21, %v21045_v27  ;;  %21048 = vst [vmem:[#allocation28_spill] sm:$0xff] %v18488_v47 }
 0xdbf   :  { %21046 = vst [vmem:[#allocation27_spill] sm:$0xff] %v18485_v60  ;;  %13757 = vmatprep.mubr.msk.f32.mxu1 %vm20932_vm1, %v18485_v60  ;;  %13789 = vmatprep.mubr.msk.f32.mxu0 %vm21049_vm6, %v18485_v60 }
 0xdc0   :  { %13758 = vmatmul.mubr.msk.f32.gmra.mxu1 %vm21050_vm8, %v18488_v47  ;;  %13790 = vmatmul.mubr.msk.f32.gmra.mxu0 %vm21051_vm14, %v18488_v47 }
 0xdc1   :  { %13824 = vmatprep.mubr.msk.f32.mxu1 %vm21054_vm7, %v20895_v6  ;;  %13904 = vmatprep.mubr.msk.f32.mxu0 %vm21056_vm4, %v20895_v6 }
 0xe48   :  { %v18506_v54 = vpop.f32.mrf.mxu1  ;;  %v18508_v59 = vpop.f32.mrf.mxu0 }
 0xe4a   :  { %v18510_v13 = vpop.f32.mrf.mxu1  ;;  %v18512_v63 = vpop.f32.mrf.mxu0 }
 0xe50   :  { %v18514_v42 = vpop.f32.mrf.mxu1  ;;  %v18516_v48 = vpop.f32.mrf.mxu0 }
 0xe52   :  { %v18518_v62 = vpop.f32.mrf.mxu1  ;;  %v18520_v43 = vpop.f32.mrf.mxu0 }
 0xe58   :  { %v18522_v45 = vpop.f32.mrf.mxu1  ;;  %v18524_v2 = vpop.f32.mrf.mxu0 }
 0xe5a   :  { %v18526_v11 = vpop.f32.mrf.mxu1  ;;  %v18528_v18 = vpop.f32.mrf.mxu0 }
 0xe60   :  { %v13747_v55 = vpop.f32.mrf.mxu1  ;;  %v13779_v7 = vpop.f32.mrf.mxu0 }
 0xe62   :  { %v6894_v1 = vpop.f32.mrf.mxu1  ;;  %v7043_v61 = vpop.f32.mrf.mxu0 }
 0xe68   :  { %v13750_v8 = vpop.f32.mrf.mxu1  ;;  %v13782_v10 = vpop.f32.mrf.mxu0 }
 0xe6a   :  { %v6904_v12 = vpop.f32.mrf.mxu1  ;;  %v7053_v44 = vpop.f32.mrf.mxu0 }
 0xe70   :  { %v13753_v32 = vpop.f32.mrf.mxu1  ;;  %v13785_v29 = vpop.f32.mrf.mxu0 }
 0xe72   :  { %v6914_v52 = vpop.f32.mrf.mxu1  ;;  %v7063_v21 = vpop.f32.mrf.mxu0 }
 0xe78   :  { %v13756_v27 = vpop.f32.mrf.mxu1  ;;  %v13788_v58 = vpop.f32.mrf.mxu0 }
 0xe7a   :  { %v6924_v28 = vpop.f32.mrf.mxu1  ;;  %v7073_v49 = vpop.f32.mrf.mxu0 }
 0xe80   :  { %v13759_v9 = vpop.f32.mrf.mxu1  ;;  %v13791_v50 = vpop.f32.mrf.mxu0 }
 0xe81   :  { %13792 = vmatprep.subr.mxu1 %v13791_v50  ;;  %13872 = vmatprep.subr.mxu0 %v13759_v9 }
 0xe82   :  { %v6934_v46 = vpop.f32.mrf.mxu1  ;;  %v7083_v5 = vpop.f32.mrf.mxu0  ;;  %13793 = vmatpush3.msra.mxu1 %v13791_v50  ;;  %13873 = vmatpush3.msra.mxu0 %v13759_v9  ;;  %v21059_v50 = vld [vmem:[#allocation52_spill] sm:$0xff]  ;;  %v21061_v9 = vld [vmem:[#allocation14_spill] sm:$0xff] }
 0xe83   :  { %13794 = vmatprep.subr.mxu1 %v7083_v5  ;;  %13874 = vmatprep.subr.mxu0 %v6934_v46  ;;  %vm21060_vm1 = vcmp.eq.s32.totalorder %v21052_v22, %v21059_v50  ;;  %vm21062_vm6 = vcmp.eq.s32.totalorder %v21052_v22, %v21061_v9  ;;  %v21117_v50 = vld [vmem:[#allocation40_spill] sm:$0xff] }
 0xe84   :  { %13795 = vmatpush3.msra.mxu1 %v7083_v5  ;;  %13875 = vmatpush3.msra.mxu0 %v6934_v46  ;;  %v7545_v5 = vld [vmem:[%s20328_s7 + $0x1f8] sm:$0xff]  ;;  %v21119_v9 = vld [vmem:[#allocation76_spill] sm:$0xff] }
 0xe85   :  { %13796 = vmatprep.subr.mxu1 %v13788_v58  ;;  %13876 = vmatprep.subr.mxu0 %v13756_v27  ;;  %v21057_v46 = vld [vmem:[#allocation9_spill] sm:$0xff] }
 0xe86   :  { %13797 = vmatpush3.msra.mxu1 %v13788_v58  ;;  %13877 = vmatpush3.msra.mxu0 %v13756_v27  ;;  %vm21058_vm4 = vcmp.eq.s32.totalorder %v21052_v22, %v21057_v46  ;;  %v21105_v27 = vld [vmem:[#allocation36_spill] sm:$0xff]  ;;  %v21107_v58 = vld [vmem:[#allocation73_spill] sm:$0xff]  ;;  %v21115_v46 = vld [vmem:[#allocation75_spill] sm:$0xff] }
 0xe87   :  { %13798 = vmatprep.subr.mxu1 %v7073_v49  ;;  %13878 = vmatprep.subr.mxu0 %v6924_v28 }
 0xe88   :  { %13799 = vmatpush3.msra.mxu1 %v7073_v49  ;;  %13879 = vmatpush3.msra.mxu0 %v6924_v28  ;;  %v21109_v28 = vld [vmem:[#allocation29_spill] sm:$0xff]  ;;  %v21111_v49 = vld [vmem:[#allocation74_spill] sm:$0xff] }
 0xe89   :  { %13800 = vmatprep.subr.mxu1 %v13785_v29  ;;  %13880 = vmatprep.subr.mxu0 %v13753_v32 }
 0xe8a   :  { %13801 = vmatpush3.msra.mxu1 %v13785_v29  ;;  %13881 = vmatpush3.msra.mxu0 %v13753_v32  ;;  %v21097_v32 = vld [vmem:[#allocation32_spill] sm:$0xff]  ;;  %v21099_v29 = vld [vmem:[#allocation69_spill] sm:$0xff] }
 0xe8b   :  { %13802 = vmatprep.subr.mxu1 %v7063_v21  ;;  %13882 = vmatprep.subr.mxu0 %v6914_v52 }
 0xe8c   :  { %13803 = vmatpush3.msra.mxu1 %v7063_v21  ;;  %13883 = vmatpush3.msra.mxu0 %v6914_v52  ;;  %v21101_v52 = vld [vmem:[#allocation34_spill] sm:$0xff]  ;;  %v21103_v21 = vld [vmem:[#allocation71_spill] sm:$0xff] }
 0xe8d   :  { %13804 = vmatprep.subr.mxu1 %v13782_v10  ;;  %13884 = vmatprep.subr.mxu0 %v13750_v8 }
 0xe8e   :  { %13805 = vmatpush3.msra.mxu1 %v13782_v10  ;;  %13885 = vmatpush3.msra.mxu0 %v13750_v8  ;;  %v21089_v8 = vld [vmem:[#allocation25_spill] sm:$0xff]  ;;  %v21091_v10 = vld [vmem:[#allocation64_spill] sm:$0xff] }
 0xe8f   :  { %13806 = vmatprep.subr.mxu1 %v7053_v44  ;;  %13886 = vmatprep.subr.mxu0 %v6904_v12 }
 0xe90   :  { %13807 = vmatpush3.msra.mxu1 %v7053_v44  ;;  %13887 = vmatpush3.msra.mxu0 %v6904_v12  ;;  %v21093_v12 = vld [vmem:[#allocation30_spill] sm:$0xff] }
 0xe91   :  { %13808 = vmatprep.subr.mxu1 %v13779_v7  ;;  %13888 = vmatprep.subr.mxu0 %v13747_v55  ;;  %v21095_v44 = vld [vmem:[#allocation66_spill] sm:$0xff] }
 0xe92   :  { %13809 = vmatpush3.msra.mxu1 %v13779_v7  ;;  %13889 = vmatpush3.msra.mxu0 %v13747_v55  ;;  %v21081_v55 = vld [vmem:[#allocation21_spill] sm:$0xff]  ;;  %v21083_v7 = vld [vmem:[#allocation59_spill] sm:$0xff] }
 0xe93   :  { %13810 = vmatprep.subr.mxu1 %v7043_v61  ;;  %13890 = vmatprep.subr.mxu0 %v6894_v1 }
 0xe94   :  { %13811 = vmatpush3.msra.mxu1 %v7043_v61  ;;  %13891 = vmatpush3.msra.mxu0 %v6894_v1  ;;  %v21085_v1 = vld [vmem:[#allocation26_spill] sm:$0xff]  ;;  %v21087_v61 = vld [vmem:[#allocation61_spill] sm:$0xff] }
 0xe95   :  { %13812 = vmatprep.subr.mxu1 %v18524_v2  ;;  %13892 = vmatprep.subr.mxu0 %v18522_v45 }
 0xe96   :  { %13813 = vmatpush3.msra.mxu1 %v18524_v2  ;;  %13893 = vmatpush3.msra.mxu0 %v18522_v45  ;;  %v21075_v45 = vld [vmem:[#allocation55_spill] sm:$0xff]  ;;  %v21077_v2 = vld [vmem:[#allocation22_spill] sm:$0xff] }
 0xe97   :  { %13814 = vmatprep.subr.mxu1 %v18528_v18  ;;  %13894 = vmatprep.subr.mxu0 %v18526_v11 }
 0xe98   :  { %13815 = vmatpush3.msra.mxu1 %v18528_v18  ;;  %13895 = vmatpush3.msra.mxu0 %v18526_v11  ;;  %v21079_v11 = vld [vmem:[#allocation57_spill] sm:$0xff]  ;;  %v7542_v18 = vld [vmem:[%s20328_s7 + $0x1e0] sm:$0xff] }
 0xe99   :  { %13816 = vmatprep.subr.mxu1 %v18516_v48  ;;  %13896 = vmatprep.subr.mxu0 %v18514_v42 }
 0xe9a   :  { %13817 = vmatpush3.msra.mxu1 %v18516_v48  ;;  %13897 = vmatpush3.msra.mxu0 %v18514_v42  ;;  %v21069_v42 = vld [vmem:[#allocation18_spill] sm:$0xff]  ;;  %v21071_v48 = vld [vmem:[#allocation53_spill] sm:$0xff] }
 0xe9b   :  { %13818 = vmatprep.subr.mxu1 %v18520_v43  ;;  %13898 = vmatprep.subr.mxu0 %v18518_v62 }
 0xe9c   :  { %13819 = vmatpush3.msra.mxu1 %v18520_v43  ;;  %13899 = vmatpush3.msra.mxu0 %v18518_v62  ;;  %v7543_v62 = vld [vmem:[%s20328_s7 + $0x1e8] sm:$0xff]  ;;  %v21073_v43 = vld [vmem:[#allocation17_spill] sm:$0xff] }
 0xe9d   :  { %13820 = vmatprep.subr.mxu1 %v18508_v59  ;;  %13900 = vmatprep.subr.mxu0 %v18506_v54 }
 0xe9e   :  { %13821 = vmatpush3.msra.mxu1 %v18508_v59  ;;  %13901 = vmatpush3.msra.mxu0 %v18506_v54  ;;  %v21063_v54 = vld [vmem:[#allocation54_spill] sm:$0xff]  ;;  %v7544_v59 = vld [vmem:[%s20328_s7 + $0x1f0] sm:$0xff] }
 0xe9f   :  { %13822 = vmatprep.subr.mxu1 %v18512_v63  ;;  %13902 = vmatprep.subr.mxu0 %v18510_v13  ;;  %vm21064_vm8 = vcmp.eq.s32.totalorder %v21052_v22, %v21063_v54  ;;  %v21121_v54 = vld [vmem:[#allocation42_spill] sm:$0xff] }
 0xea0   :  { %13823 = vmatpush3.msra.mxu1 %v18512_v63  ;;  %13903 = vmatpush3.msra.mxu0 %v18510_v13  ;;  %v21065_v13 = vld [vmem:[#allocation13_spill] sm:$0xff]  ;;  %v21067_v63 = vld [vmem:[#allocation56_spill] sm:$0xff] }
 0xea1   :  { %13825 = vmatmul.mubr.msk.f32.vlgmr.msra.gmra.mxu1 %vm21058_vm4, %v20895_v6  ;;  %13905 = vmatmul.mubr.msk.f32.vlgmr.msra.gmra.mxu0 %vm21060_vm1, %v20895_v6  ;;  %vm21066_vm14 = vcmp.eq.s32.totalorder %v21052_v22, %v21065_v13  ;;  %vm21068_vm7 = vcmp.eq.s32.totalorder %v21052_v22, %v21067_v63  ;;  %vm21070_vm4 = vcmp.eq.s32.totalorder %v21052_v22, %v21069_v42  ;;  %v21125_v13 = vld [vmem:[#allocation44_spill] sm:$0xff]  ;;  %v21127_v63 = vld [vmem:[#allocation58_spill] sm:$0xff]  ;;  %v21129_v42 = vld [vmem:[#allocation31_spill] sm:$0xff] }
 0xea2   :  { %13827 = vmatprep.mubr.msk.f32.mxu1 %vm21062_vm6, %v20895_v6  ;;  %13907 = vmatprep.mubr.msk.f32.mxu0 %vm21064_vm8, %v20895_v6  ;;  %vm21072_vm1 = vcmp.eq.s32.totalorder %v21052_v22, %v21071_v48  ;;  %vm21074_vm6 = vcmp.eq.s32.totalorder %v21052_v22, %v21073_v43  ;;  %vm21076_vm8 = vcmp.eq.s32.totalorder %v21052_v22, %v21075_v45  ;;  %v21131_v48 = vld [vmem:[#allocation82_spill] sm:$0xff]  ;;  %v21135_v43 = vld [vmem:[#allocation92_spill] sm:$0xff]  ;;  %v21137_v45 = vld [vmem:[#allocation33_spill] sm:$0xff] }
 0xea3   :  { %13952 = vmatprep.subr.mxu1 %v7545_v5 }
 0xea4   :  { %13953 = vmatpush3.msra.mxu1 %v7545_v5  ;;  %v21113_v5 = vld [vmem:[#allocation38_spill] sm:$0xff] }
 0xea5   :  { %13828 = vmatmul.mubr.msk.f32.gmra.mxu1 %vm21066_vm14, %v20895_v6  ;;  %13908 = vmatmul.mubr.msk.f32.gmra.mxu0 %vm21068_vm7, %v20895_v6  ;;  %vm21078_vm14 = vcmp.eq.s32.totalorder %v21052_v22, %v21077_v2  ;;  %vm21080_vm7 = vcmp.eq.s32.totalorder %v21052_v22, %v21079_v11  ;;  %v21139_v2 = vld [vmem:[#allocation93_spill] sm:$0xff]  ;;  %v21141_v11 = vld [vmem:[#allocation47_spill] sm:$0xff] }
 0xea6   :  { %13830 = vmatprep.mubr.msk.f32.mxu1 %vm21070_vm4, %v20895_v6  ;;  %13910 = vmatprep.mubr.msk.f32.mxu0 %vm21072_vm1, %v20895_v6  ;;  %vm21082_vm4 = vcmp.eq.s32.totalorder %v21052_v22, %v21081_v55  ;;  %vm21084_vm1 = vcmp.eq.s32.totalorder %v21052_v22, %v21083_v7  ;;  %v21145_v55 = vld [vmem:[#allocation35_spill] sm:$0xff]  ;;  %v21147_v7 = vld [vmem:[#allocation86_spill] sm:$0xff] }
 0xea7   :  { %13954 = vmatprep.subr.mxu1 %v7544_v59 }
 0xea8   :  { %13955 = vmatpush3.msra.mxu1 %v7544_v59  ;;  %v21123_v59 = vld [vmem:[#allocation77_spill] sm:$0xff] }
 0xea9   :  { %13831 = vmatmul.mubr.msk.f32.gmra.mxu1 %vm21074_vm6, %v20895_v6  ;;  %13911 = vmatmul.mubr.msk.f32.gmra.mxu0 %vm21076_vm8, %v20895_v6  ;;  %vm21086_vm6 = vcmp.eq.s32.totalorder %v21052_v22, %v21085_v1  ;;  %vm21088_vm8 = vcmp.eq.s32.totalorder %v21052_v22, %v21087_v61  ;;  %v21149_v1 = vld [vmem:[#allocation48_spill] sm:$0xff]  ;;  %v21151_v61 = vld [vmem:[#allocation95_spill] sm:$0xff] }
 0xeaa   :  { %13833 = vmatprep.mubr.msk.f32.mxu1 %vm21078_vm14, %v20895_v6  ;;  %13913 = vmatprep.mubr.msk.f32.mxu0 %vm21080_vm7, %v20895_v6  ;;  %vm21090_vm14 = vcmp.eq.s32.totalorder %v21052_v22, %v21089_v8  ;;  %vm21092_vm7 = vcmp.eq.s32.totalorder %v21052_v22, %v21091_v10  ;;  %v21153_v8 = vld [vmem:[#allocation37_spill] sm:$0xff]  ;;  %v21155_v10 = vld [vmem:[#allocation60_spill] sm:$0xff] }
 0xeab   :  { %13956 = vmatprep.subr.mxu1 %v7543_v62 }
 0xeac   :  { %13957 = vmatpush3.msra.mxu1 %v7543_v62  ;;  %v21133_v62 = vld [vmem:[#allocation46_spill] sm:$0xff] }
 0xead   :  { %13834 = vmatmul.mubr.msk.f32.gmra.mxu1 %vm21082_vm4, %v20895_v6  ;;  %13914 = vmatmul.mubr.msk.f32.gmra.mxu0 %vm21084_vm1, %v20895_v6  ;;  %vm21094_vm4 = vcmp.eq.s32.totalorder %v21052_v22, %v21093_v12  ;;  %vm21096_vm1 = vcmp.eq.s32.totalorder %v21052_v22, %v21095_v44  ;;  %v21157_v12 = vld [vmem:[#allocation49_spill] sm:$0xff] }
 0xeae   :  { %13836 = vmatprep.mubr.msk.f32.mxu1 %vm21086_vm6, %v20895_v6  ;;  %13916 = vmatprep.mubr.msk.f32.mxu0 %vm21088_vm8, %v20895_v6  ;;  %vm21098_vm6 = vcmp.eq.s32.totalorder %v21052_v22, %v21097_v32  ;;  %vm21100_vm8 = vcmp.eq.s32.totalorder %v21052_v22, %v21099_v29  ;;  %v21159_v44 = vld [vmem:[#allocation97_spill] sm:$0xff]  ;;  %v21161_v32 = vld [vmem:[#allocation39_spill] sm:$0xff]  ;;  %v21163_v29 = vld [vmem:[#allocation78_spill] sm:$0xff] }
 0xeaf   :  { %13958 = vmatprep.subr.mxu1 %v7542_v18 }
 0xeb0   :  { %13959 = vmatpush3.msra.mxu1 %v7542_v18  ;;  %v21143_v18 = vld [vmem:[#allocation94_spill] sm:$0xff] }
 0xeb1   :  { %13837 = vmatmul.mubr.msk.f32.gmra.mxu1 %vm21090_vm14, %v20895_v6  ;;  %13917 = vmatmul.mubr.msk.f32.gmra.mxu0 %vm21092_vm7, %v20895_v6  ;;  %vm21102_vm14 = vcmp.eq.s32.totalorder %v21052_v22, %v21101_v52  ;;  %vm21104_vm7 = vcmp.eq.s32.totalorder %v21052_v22, %v21103_v21  ;;  %v21165_v52 = vld [vmem:[#allocation50_spill] sm:$0xff]  ;;  %v21167_v21 = vld [vmem:[#allocation100_spill] sm:$0xff] }
 0xeb2   :  { %13839 = vmatprep.mubr.msk.f32.mxu1 %vm21094_vm4, %v20895_v6  ;;  %13919 = vmatprep.mubr.msk.f32.mxu0 %vm21096_vm1, %v20895_v6  ;;  %vm21106_vm4 = vcmp.eq.s32.totalorder %v21052_v22, %v21105_v27  ;;  %vm21108_vm1 = vcmp.eq.s32.totalorder %v21052_v22, %v21107_v58  ;;  %v21169_v27 = vld [vmem:[#allocation41_spill] sm:$0xff]  ;;  %v21171_v58 = vld [vmem:[#allocation63_spill] sm:$0xff] }
 0xeb5   :  { %13840 = vmatmul.mubr.msk.f32.gmra.mxu1 %vm21098_vm6, %v20895_v6  ;;  %13920 = vmatmul.mubr.msk.f32.gmra.mxu0 %vm21100_vm8, %v20895_v6  ;;  %vm21110_vm6 = vcmp.eq.s32.totalorder %v21052_v22, %v21109_v28  ;;  %vm21112_vm8 = vcmp.eq.s32.totalorder %v21052_v22, %v21111_v49  ;;  %v21173_v28 = vld [vmem:[#allocation51_spill] sm:$0xff]  ;;  %v21175_v49 = vld [vmem:[#allocation104_spill] sm:$0xff] }
 0xeb6   :  { %13842 = vmatprep.mubr.msk.f32.mxu1 %vm21102_vm14, %v20895_v6  ;;  %13922 = vmatprep.mubr.msk.f32.mxu0 %vm21104_vm7, %v20895_v6  ;;  %vm21114_vm14 = vcmp.eq.s32.totalorder %v21052_v22, %v21113_v5  ;;  %vm21116_vm7 = vcmp.eq.s32.totalorder %v21052_v22, %v21115_v46  ;;  %v21177_v5 = vld [vmem:[#allocation87_spill] sm:$0xff] }
 0xeb7   :  { %v6714_v46 = vmul.f32 2.0, %v21177_v5 }
 0xeb9   :  { %13843 = vmatmul.mubr.msk.f32.gmra.mxu1 %vm21106_vm4, %v20895_v6  ;;  %13923 = vmatmul.mubr.msk.f32.gmra.mxu0 %vm21108_vm1, %v20895_v6  ;;  %vm21118_vm4 = vcmp.eq.s32.totalorder %v21052_v22, %v21117_v50  ;;  %vm21120_vm1 = vcmp.eq.s32.totalorder %v21052_v22, %v21119_v9  ;;  %v21178_v50 = vld [vmem:[#allocation43_spill] sm:$0xff]  ;;  %v21180_v9 = vld [vmem:[#allocation102_spill] sm:$0xff] }
 0xeba   :  { %13845 = vmatprep.mubr.msk.f32.mxu1 %vm21110_vm6, %v20895_v6  ;;  %13925 = vmatprep.mubr.msk.f32.mxu0 %vm21112_vm8, %v20895_v6  ;;  %vm21122_vm6 = vcmp.eq.s32.totalorder %v21052_v22, %v21121_v54  ;;  %vm21124_vm8 = vcmp.eq.s32.totalorder %v21052_v22, %v21123_v59  ;;  %v21183_v54 = vld [vmem:[#allocation62_spill] sm:$0xff] }
 0xebb   :  { %v6715_v59 = vmul.f32 2.0, %v21183_v54 }
 0xebd   :  { %13846 = vmatmul.mubr.msk.f32.gmra.mxu1 %vm21114_vm14, %v20895_v6  ;;  %13926 = vmatmul.mubr.msk.f32.gmra.mxu0 %vm21116_vm7, %v20895_v6  ;;  %vm21126_vm14 = vcmp.eq.s32.totalorder %v21052_v22, %v21125_v13  ;;  %vm21128_vm7 = vcmp.eq.s32.totalorder %v21052_v22, %v21127_v63  ;;  %v21184_v13 = vld [vmem:[#allocation79_spill] sm:$0xff] }
 0xebe   :  { %13848 = vmatprep.mubr.msk.f32.mxu1 %vm21118_vm4, %v20895_v6  ;;  %13928 = vmatprep.mubr.msk.f32.mxu0 %vm21120_vm1, %v20895_v6  ;;  %vm21130_vm4 = vcmp.eq.s32.totalorder %v21052_v22, %v21129_v42  ;;  %vm21132_vm1 = vcmp.eq.s32.totalorder %v21052_v22, %v21131_v48  ;;  %v6716_v63 = vmul.f32 2.0, %v21184_v13  ;;  %v21187_v42 = vld [vmem:[#allocation80_spill] sm:$0xff] }
 0xebf   :  { %v6717_v48 = vmul.f32 2.0, %v21187_v42 }
 0xec1   :  { %13849 = vmatmul.mubr.msk.f32.gmra.mxu1 %vm21122_vm6, %v20895_v6  ;;  %13929 = vmatmul.mubr.msk.f32.gmra.mxu0 %vm21124_vm8, %v20895_v6  ;;  %vm21134_vm6 = vcmp.eq.s32.totalorder %v21052_v22, %v21133_v62  ;;  %vm21136_vm8 = vcmp.eq.s32.totalorder %v21052_v22, %v21135_v43  ;;  %v21188_v62 = vld [vmem:[#allocation65_spill] sm:$0xff] }
 0xec2   :  { %13851 = vmatprep.mubr.msk.f32.mxu1 %vm21126_vm14, %v20895_v6  ;;  %13931 = vmatprep.mubr.msk.f32.mxu0 %vm21128_vm7, %v20895_v6  ;;  %vm21138_vm14 = vcmp.eq.s32.totalorder %v21052_v22, %v21137_v45  ;;  %vm21140_vm7 = vcmp.eq.s32.totalorder %v21052_v22, %v21139_v2  ;;  %v6718_v43 = vmul.f32 2.0, %v21188_v62  ;;  %v21192_v2 = vld [vmem:[#allocation67_spill] sm:$0xff] }
 0xec5   :  { %13852 = vmatmul.mubr.msk.f32.gmra.mxu1 %vm21130_vm4, %v20895_v6  ;;  %13932 = vmatmul.mubr.msk.f32.gmra.mxu0 %vm21132_vm1, %v20895_v6  ;;  %vm21142_vm4 = vcmp.eq.s32.totalorder %v21052_v22, %v21141_v11  ;;  %vm21144_vm1 = vcmp.eq.s32.totalorder %v21052_v22, %v21143_v18  ;;  %v6720_v11 = vmul.f32 2.0, %v21192_v2  ;;  %v21195_v18 = vld [vmem:[#allocation88_spill] sm:$0xff] }
 0xec6   :  { %13854 = vmatprep.mubr.msk.f32.mxu1 %vm21134_vm6, %v20895_v6  ;;  %13934 = vmatprep.mubr.msk.f32.mxu0 %vm21136_vm8, %v20895_v6  ;;  %vm21146_vm6 = vcmp.eq.s32.totalorder %v21052_v22, %v21145_v55  ;;  %vm21148_vm8 = vcmp.eq.s32.totalorder %v21052_v22, %v21147_v7  ;;  %v6721_v55 = vmul.f32 2.0, %v21195_v18  ;;  %v21196_v7 = vld [vmem:[#allocation68_spill] sm:$0xff]  ;;  %v21225_v18 = vld [vmem:[#allocation106_spill] sm:$0xff] }
 0xec9   :  { %13855 = vmatmul.mubr.msk.f32.gmra.mxu1 %vm21138_vm14, %v20895_v6  ;;  %13935 = vmatmul.mubr.msk.f32.gmra.mxu0 %vm21140_vm7, %v20895_v6  ;;  %vm21150_vm14 = vcmp.eq.s32.totalorder %v21052_v22, %v21149_v1  ;;  %vm21152_vm7 = vcmp.eq.s32.totalorder %v21052_v22, %v21151_v61  ;;  %v6722_v1 = vmul.f32 2.0, %v21196_v7  ;;  %v21199_v61 = vld [vmem:[#allocation83_spill] sm:$0xff] }
 0xeca   :  { %13857 = vmatprep.mubr.msk.f32.mxu1 %vm21142_vm4, %v20895_v6  ;;  %13937 = vmatprep.mubr.msk.f32.mxu0 %vm21144_vm1, %v20895_v6  ;;  %vm21154_vm4 = vcmp.eq.s32.totalorder %v21052_v22, %v21153_v8  ;;  %vm21156_vm1 = vcmp.eq.s32.totalorder %v21052_v22, %v21155_v10  ;;  %v6723_v8 = vmul.f32 2.0, %v21199_v61  ;;  %v21200_v10 = vld [vmem:[#allocation70_spill] sm:$0xff]  ;;  %v21226_v7 = vld [vmem:[#allocation107_spill] sm:$0xff]  ;;  %v21228_v61 = vld [vmem:[#allocation108_spill] sm:$0xff] }
 0xecd   :  { %13858 = vmatmul.mubr.msk.f32.gmra.mxu1 %vm21146_vm6, %v20895_v6  ;;  %13938 = vmatmul.mubr.msk.f32.gmra.mxu0 %vm21148_vm8, %v20895_v6  ;;  %vm21158_vm6 = vcmp.eq.s32.totalorder %v21052_v22, %v21157_v12  ;;  %vm21160_vm8 = vcmp.eq.s32.totalorder %v21052_v22, %v21159_v44  ;;  %v6724_v12 = vmul.f32 2.0, %v21200_v10  ;;  %v21203_v44 = vld [vmem:[#allocation84_spill] sm:$0xff]  ;;  %v21229_v10 = vld [vmem:[#allocation109_spill] sm:$0xff] }
 0xece   :  { %13860 = vmatprep.mubr.msk.f32.mxu1 %vm21150_vm14, %v20895_v6  ;;  %13940 = vmatprep.mubr.msk.f32.mxu0 %vm21152_vm7, %v20895_v6  ;;  %vm21162_vm14 = vcmp.eq.s32.totalorder %v21052_v22, %v21161_v32  ;;  %vm21164_vm7 = vcmp.eq.s32.totalorder %v21052_v22, %v21163_v29  ;;  %v6725_v32 = vmul.f32 2.0, %v21203_v44  ;;  %v21204_v29 = vld [vmem:[#allocation72_spill] sm:$0xff]  ;;  %v21232_v44 = vld [vmem:[#allocation110_spill] sm:$0xff] }
 0xed1   :  { %13861 = vmatmul.mubr.msk.f32.gmra.mxu1 %vm21154_vm4, %v20895_v6  ;;  %13941 = vmatmul.mubr.msk.f32.gmra.mxu0 %vm21156_vm1, %v20895_v6  ;;  %vm21166_vm4 = vcmp.eq.s32.totalorder %v21052_v22, %v21165_v52  ;;  %vm21168_vm1 = vcmp.eq.s32.totalorder %v21052_v22, %v21167_v21  ;;  %v6726_v52 = vmul.f32 2.0, %v21204_v29  ;;  %v21206_v21 = vld [vmem:[#allocation85_spill] sm:$0xff]  ;;  %v21233_v29 = vld [vmem:[#allocation111_spill] sm:$0xff] }
 0xed2   :  { %13863 = vmatprep.mubr.msk.f32.mxu1 %vm21158_vm6, %v20895_v6  ;;  %13943 = vmatprep.mubr.msk.f32.mxu0 %vm21160_vm8, %v20895_v6  ;;  %vm21170_vm6 = vcmp.eq.s32.totalorder %v21052_v22, %v21169_v27  ;;  %vm21172_vm8 = vcmp.eq.s32.totalorder %v21052_v22, %v21171_v58  ;;  %v6727_v27 = vmul.f32 2.0, %v21206_v21  ;;  %v21207_v58 = vld [vmem:[#allocation89_spill] sm:$0xff]  ;;  %v21236_v21 = vld [vmem:[#allocation112_spill] sm:$0xff] }
 0xed5   :  { %13864 = vmatmul.mubr.msk.f32.gmra.mxu1 %vm21162_vm14, %v20895_v6  ;;  %13944 = vmatmul.mubr.msk.f32.gmra.mxu0 %vm21164_vm7, %v20895_v6  ;;  %vm21174_vm14 = vcmp.eq.s32.totalorder %v21052_v22, %v21173_v28  ;;  %vm21176_vm7 = vcmp.eq.s32.totalorder %v21052_v22, %v21175_v49  ;;  %v6728_v28 = vmul.f32 2.0, %v21207_v58  ;;  %v21210_v49 = vld [vmem:[#allocation90_spill] sm:$0xff]  ;;  %v21237_v58 = vld [vmem:[#allocation113_spill] sm:$0xff] }
 0xed6   :  { %13866 = vmatprep.mubr.msk.f32.mxu1 %vm21166_vm4, %v20895_v6  ;;  %13946 = vmatprep.mubr.msk.f32.mxu0 %vm21168_vm1, %v20895_v6  ;;  %vm21179_vm4 = vcmp.eq.s32.totalorder %v21052_v22, %v21178_v50  ;;  %vm21181_vm1 = vcmp.eq.s32.totalorder %v21052_v22, %v21180_v9  ;;  %v21191_v22 = vld [vmem:[#allocation81_spill] sm:$0xff]  ;;  %v6729_v5 = vmul.f32 2.0, %v21210_v49  ;;  %v21214_v9 = vld [vmem:[#allocation96_spill] sm:$0xff] }
 0xed7   :  { %v6719_v45 = vmul.f32 2.0, %v21191_v22  ;;  %v6731_v54 = vmul.f32 2.0, %v21214_v9  ;;  %v7970_v49 = vld [vmem:[%s20328_s7 + $0x210] sm:$0xff]  ;;  %v7968_v9 = vld [vmem:[%s20328_s7 + $0x200] sm:$0xff] }
 0xed9   :  { %13867 = vmatmul.mubr.msk.f32.gmra.mxu1 %vm21170_vm6, %v20895_v6  ;;  %13947 = vmatmul.mubr.msk.f32.gmra.mxu0 %vm21172_vm8, %v20895_v6  ;;  %vm21182_vm6 = vcmask 261120  }
 0xeda   :  { %13869 = vmatprep.mubr.msk.f32.mxu1 %vm21174_vm14, %v20895_v6  ;;  %13949 = vmatprep.mubr.msk.f32.mxu0 %vm21176_vm7, %v20895_v6  ;;  %vm21185_vm8 = vmmov %vm21182_vm6 }
 0xedb   :  { %vm21186_vm14 = vmmov %vm21182_vm6 }
 0xedc   :  { %vm21189_vm7 = vmmov %vm21182_vm6 }
 0xedd   :  { %13870 = vmatmul.mubr.msk.f32.gmra.mxu1 %vm21179_vm4, %v20895_v6  ;;  %13950 = vmatmul.mubr.msk.f32.gmra.mxu0 %vm21181_vm1, %v20895_v6  ;;  %vm21190_vm4 = vmmov %vm21182_vm6 }
 0xede   :  { %13960 = vmatprep.mubr.msk.f32.mxu1 %vm21182_vm6, %v6714_v46  ;;  %vm21193_vm1 = vmmov %vm21190_vm4  ;;  %v21211_v46 = vld [vmem:[#allocation91_spill] sm:$0xff] }
 0xedf   :  { %vm21194_vm6 = vmmov %vm21193_vm1  ;;  %v6730_v50 = vmul.f32 2.0, %v21211_v46 }
 0xee0   :  { %vm21305_vm5 = vmmov %vm21193_vm1 }
 0xee1   :  { %13961 = vmatmul.mubr.msk.f32.vlgmr.msra.gmra.mxu1 %vm21185_vm8, %v6715_v59  ;;  %vm21197_vm8 = vmmov %vm21193_vm1  ;;  %v21215_v59 = vld [vmem:[#allocation98_spill] sm:$0xff] }
 0xee2   :  { %13963 = vmatprep.mubr.msk.f32.mxu1 %vm21186_vm14, %v6716_v63  ;;  %vm21198_vm14 = vmmov %vm21193_vm1  ;;  %v6732_v13 = vmul.f32 2.0, %v21215_v59  ;;  %v21217_v63 = vld [vmem:[#allocation99_spill] sm:$0xff] }
 0xee3   :  { %v6733_v42 = vmul.f32 2.0, %v21217_v63  ;;  %vm21307_vm0 = vmmov %vm21193_vm1 }
 0xee5   :  { %13964 = vmatmul.mubr.msk.f32.gmra.mxu1 %vm21189_vm7, %v6717_v48  ;;  %vm21201_vm7 = vmmov %vm21193_vm1  ;;  %v21218_v48 = vld [vmem:[#allocation101_spill] sm:$0xff] }
 0xee6   :  { %13966 = vmatprep.mubr.msk.f32.mxu1 %vm21190_vm4, %v6718_v43  ;;  %vm21202_vm4 = vmmov %vm21193_vm1  ;;  %v6734_v62 = vmul.f32 2.0, %v21218_v48  ;;  %v21221_v43 = vld [vmem:[#allocation103_spill] sm:$0xff] }
 0xee7   :  { %v6735_v22 = vmul.f32 2.0, %v21221_v43  ;;  %v8333_v43 = vld [vmem:[%s20328_s7 + $0x238] sm:$0xff] }
 0xee8   :  { %14064 = vmatprep.subr.mxu1 %v8333_v43 }
 0xee9   :  { %13967 = vmatmul.mubr.msk.f32.gmra.mxu1 %vm21193_vm1, %v6719_v45  ;;  %v21222_v45 = vld [vmem:[#allocation105_spill] sm:$0xff] }
 0xeea   :  { %13969 = vmatprep.mubr.msk.f32.mxu1 %vm21194_vm6, %v6720_v11  ;;  %vm21205_vm6 = vmmov %vm21193_vm1  ;;  %v6736_v2 = vmul.f32 2.0, %v21222_v45  ;;  %v7971_v11 = vld [vmem:[%s20328_s7 + $0x218] sm:$0xff]  ;;  %14065 = vmatpush3.msra.mxu1 %v8333_v43 }
 0xeeb   :  { %14008 = vmatprep.subr.mxu0 %v7971_v11 }
 0xeec   :  { %14009 = vmatpush3.msra.mxu0 %v7971_v11 }
 0xeed   :  { %13970 = vmatmul.mubr.msk.f32.gmra.mxu1 %vm21197_vm8, %v6721_v55  ;;  %vm21208_vm8 = vmmov %vm21193_vm1  ;;  %v6737_v55 = vmul.f32 2.0, %v21225_v18  ;;  %14010 = vmatprep.subr.mxu0 %v7970_v49 }
 0xeee   :  { %13972 = vmatprep.mubr.msk.f32.mxu1 %vm21198_vm14, %v6722_v1  ;;  %vm21209_vm14 = vmmov %vm21193_vm1  ;;  %v6738_v1 = vmul.f32 2.0, %v21226_v7  ;;  %14011 = vmatpush3.msra.mxu0 %v7970_v49 }
 0xef1   :  { %13973 = vmatmul.mubr.msk.f32.gmra.mxu1 %vm21201_vm7, %v6723_v8  ;;  %vm21212_vm7 = vmmov %vm21193_vm1  ;;  %v6739_v8 = vmul.f32 2.0, %v21228_v61 }
 0xef2   :  { %13975 = vmatprep.mubr.msk.f32.mxu1 %vm21202_vm4, %v6724_v12  ;;  %vm21213_vm4 = vmmov %vm21193_vm1  ;;  %v6740_v12 = vmul.f32 2.0, %v21229_v10 }
 0xef5   :  { %13976 = vmatmul.mubr.msk.f32.gmra.mxu1 %vm21193_vm1, %v6725_v32  ;;  %v6741_v32 = vmul.f32 2.0, %v21232_v44 }
 0xef6   :  { %13978 = vmatprep.mubr.msk.f32.mxu1 %vm21205_vm6, %v6726_v52  ;;  %vm21216_vm6 = vmmov %vm21193_vm1  ;;  %v6742_v52 = vmul.f32 2.0, %v21233_v29 }
 0xef9   :  { %13979 = vmatmul.mubr.msk.f32.gmra.mxu1 %vm21208_vm8, %v6727_v27  ;;  %vm21219_vm8 = vmmov %vm21193_vm1  ;;  %v6743_v27 = vmul.f32 2.0, %v21236_v21 }
 0xefa   :  { %13981 = vmatprep.mubr.msk.f32.mxu1 %vm21209_vm14, %v6728_v28  ;;  %vm21220_vm14 = vmmov %vm21193_vm1  ;;  %v6744_v28 = vmul.f32 2.0, %v21237_v58 }
 0xefd   :  { %13982 = vmatmul.mubr.msk.f32.gmra.mxu1 %vm21212_vm7, %v6729_v5  ;;  %vm21223_vm7 = vmmov %vm21193_vm1  ;;  %v21239_v5 = vld [vmem:[#allocation114_spill] sm:$0xff] }
 0xefe   :  { %13984 = vmatprep.mubr.msk.f32.mxu1 %vm21213_vm4, %v6730_v50  ;;  %vm21224_vm4 = vmmov %vm21193_vm1  ;;  %v6745_v46 = vmul.f32 2.0, %v21239_v5  ;;  %v7969_v50 = vld [vmem:[%s20328_s7 + $0x208] sm:$0xff] }
 0xeff   :  { %14012 = vmatprep.subr.mxu0 %v7969_v50 }
 0xf00   :  { %14013 = vmatpush3.msra.mxu0 %v7969_v50 }
 0xf01   :  { %13985 = vmatmul.mubr.msk.f32.gmra.mxu1 %vm21193_vm1, %v6731_v54  ;;  %14014 = vmatprep.subr.mxu0 %v7968_v9 }
 0xf02   :  { %13987 = vmatprep.mubr.msk.f32.mxu1 %vm21216_vm6, %v6732_v13  ;;  %vm21227_vm6 = vmmov %vm21193_vm1  ;;  %14015 = vmatpush3.msra.mxu0 %v7968_v9 }
 0xf05   :  { %13988 = vmatmul.mubr.msk.f32.gmra.mxu1 %vm21219_vm8, %v6733_v42  ;;  %vm21230_vm8 = vmmov %vm21193_vm1 }
 0xf06   :  { %13990 = vmatprep.mubr.msk.f32.mxu1 %vm21220_vm14, %v6734_v62  ;;  %vm21231_vm14 = vmmov %vm21193_vm1 }
 0xf09   :  { %13991 = vmatmul.mubr.msk.f32.gmra.mxu1 %vm21223_vm7, %v6735_v22  ;;  %vm21234_vm7 = vmmov %vm21193_vm1  ;;  %v8332_v22 = vld [vmem:[%s20328_s7 + $0x230] sm:$0xff] }
 0xf0a   :  { %13993 = vmatprep.mubr.msk.f32.mxu1 %vm21224_vm4, %v6736_v2  ;;  %vm21235_vm4 = vmmov %vm21193_vm1  ;;  %14066 = vmatprep.subr.mxu1 %v8332_v22 }
 0xf0b   :  { %14067 = vmatpush3.msra.mxu1 %v8332_v22 }
 0xf0d   :  { %13994 = vmatmul.mubr.msk.f32.gmra.mxu1 %vm21193_vm1, %v6737_v55 }
 0xf0e   :  { %13996 = vmatprep.mubr.msk.f32.mxu1 %vm21227_vm6, %v6738_v1  ;;  %vm21238_vm6 = vmmov %vm21193_vm1 }
 0xf11   :  { %13997 = vmatmul.mubr.msk.f32.gmra.mxu1 %vm21230_vm8, %v6739_v8  ;;  %vm21240_vm8 = vmmov %vm21193_vm1 }
 0xf12   :  { %13999 = vmatprep.mubr.msk.f32.mxu1 %vm21231_vm14, %v6740_v12  ;;  %vm21242_vm14 = vmmov %vm21193_vm1 }
 0xf15   :  { %14000 = vmatmul.mubr.msk.f32.gmra.mxu1 %vm21234_vm7, %v6741_v32  ;;  %vm21243_vm7 = vmmov %vm21193_vm1 }
 0xf16   :  { %14002 = vmatprep.mubr.msk.f32.mxu1 %vm21235_vm4, %v6742_v52  ;;  %vm21244_vm4 = vmmov %vm21193_vm1 }
 0xf19   :  { %14003 = vmatmul.mubr.msk.f32.gmra.mxu1 %vm21193_vm1, %v6743_v27 }
 0xf1a   :  { %14005 = vmatprep.mubr.msk.f32.mxu1 %vm21238_vm6, %v6744_v28  ;;  %vm21245_vm6 = vmmov %vm21193_vm1 }
 0xf1d   :  { %14006 = vmatmul.mubr.msk.f32.gmra.mxu1 %vm21240_vm8, %v6745_v46  ;;  %vm21246_vm8 = vmmov %vm21193_vm1 }
 0xf61   :  { %v13826_v54 = vpop.f32.mrf.mxu1  ;;  %v13906_v59 = vpop.f32.mrf.mxu0 }
 0xf62   :  { %v7389_v38 = vadd.f32 %v13906_v59, %v13826_v54 }
 0xf63   :  { %v7158_v13 = vpop.f32.mrf.mxu1  ;;  %v7383_v63 = vpop.f32.mrf.mxu0 }
 0xf64   :  { %v7384_v33 = vadd.f32 %v7383_v63, %v7158_v13 }
 0xf65   :  { %v13829_v42 = vpop.f32.mrf.mxu1  ;;  %v13909_v48 = vpop.f32.mrf.mxu0 }
 0xf66   :  { %v7399_v15 = vadd.f32 %v13909_v48, %v13829_v42 }
 0xf67   :  { %v7168_v62 = vpop.f32.mrf.mxu1  ;;  %v7393_v2 = vpop.f32.mrf.mxu0 }
 0xf68   :  { %v7394_v24 = vadd.f32 %v7393_v2, %v7168_v62 }
 0xf69   :  { %v13832_v45 = vpop.f32.mrf.mxu1  ;;  %v13912_v55 = vpop.f32.mrf.mxu0 }
 0xf6b   :  { %v18896_v11 = vpop.f32.mrf.mxu1  ;;  %v7403_v61 = vpop.f32.mrf.mxu0 }
 0xf6c   :  { %v7404_v42 = vadd.f32 %v7403_v61, %v18896_v11 }
 0xf6d   :  { %v18898_v18 = vpop.f32.mrf.mxu1  ;;  %v13915_v12 = vpop.f32.mrf.mxu0 }
 0xf6f   :  { %v18900_v7 = vpop.f32.mrf.mxu1  ;;  %v18912_v29 = vpop.f32.mrf.mxu0 }
 0xf70   :  { %v7414_v62 = vadd.f32 %v18912_v29, %v18900_v7 }
 0xf71   :  { %v18902_v1 = vpop.f32.mrf.mxu1  ;;  %v18918_v27 = vpop.f32.mrf.mxu0 }
 0xf73   :  { %v18904_v8 = vpop.f32.mrf.mxu1  ;;  %v18924_v49 = vpop.f32.mrf.mxu0 }
 0xf74   :  { %v7424_v7 = vadd.f32 %v18924_v49, %v18904_v8 }
 0xf75   :  { %v18906_v10 = vpop.f32.mrf.mxu1  ;;  %v18930_v50 = vpop.f32.mrf.mxu0 }
 0xf77   :  { %v18908_v44 = vpop.f32.mrf.mxu1  ;;  %v18936_v22 = vpop.f32.mrf.mxu0 }
 0xf78   :  { %v7434_v8 = vadd.f32 %v18936_v22, %v18908_v44 }
 0xf79   :  { %v18910_v32 = vpop.f32.mrf.mxu1  ;;  %v18942_v31 = vpop.f32.mrf.mxu0 }
 0xf7b   :  { %v18914_v52 = vpop.f32.mrf.mxu1  ;;  %v18948_v41 = vpop.f32.mrf.mxu0 }
 0xf7c   :  { %v7444_v44 = vadd.f32 %v18948_v41, %v18914_v52 }
 0xf7d   :  { %v18916_v21 = vpop.f32.mrf.mxu1  ;;  %v18954_v14 = vpop.f32.mrf.mxu0 }
 0xf7f   :  { %v18920_v58 = vpop.f32.mrf.mxu1  ;;  %v18960_v40 = vpop.f32.mrf.mxu0 }
 0xf80   :  { %v7454_v41 = vadd.f32 %v18960_v40, %v18920_v58 }
 0xf81   :  { %v18922_v28 = vpop.f32.mrf.mxu1  ;;  %v18966_v30 = vpop.f32.mrf.mxu0 }
 0xf83   :  { %v18926_v5 = vpop.f32.mrf.mxu1  ;;  %v18975_v3 = vpop.f32.mrf.mxu0 }
 0xf84   :  { %v7464_v40 = vadd.f32 %v18975_v3, %v18926_v5 }
 0xf85   :  { %v18928_v46 = vpop.f32.mrf.mxu1  ;;  %v18979_v59 = vpop.f32.mrf.mxu0 }
 0xf87   :  { %v18932_v9 = vpop.f32.mrf.mxu1 }
 0xf89   :  { %v18934_v43 = vpop.f32.mrf.mxu1 }
 0xf8b   :  { %v18938_v34 = vpop.f32.mrf.mxu1 }
 0xf8d   :  { %v18940_v17 = vpop.f32.mrf.mxu1 }
 0xf8f   :  { %v18944_v20 = vpop.f32.mrf.mxu1 }
 0xf91   :  { %v18946_v36 = vpop.f32.mrf.mxu1 }
 0xf93   :  { %v18950_v57 = vpop.f32.mrf.mxu1 }
 0xf95   :  { %v18952_v0 = vpop.f32.mrf.mxu1 }
 0xf97   :  { %v18956_v4 = vpop.f32.mrf.mxu1 }
 0xf99   :  { %v18958_v51 = vpop.f32.mrf.mxu1 }
 0xf9b   :  { %v18962_v47 = vpop.f32.mrf.mxu1 }
 0xf9d   :  { %v18964_v60 = vpop.f32.mrf.mxu1 }
 0xf9f   :  { %v18968_v37 = vpop.f32.mrf.mxu1 }
 0xfa0   :  { %21241 = vst [vmem:[#allocation7_spill] sm:$0xff] %v18968_v37 }
 0xfa1   :  { %v13962_v53 = vpop.f32.mrf.mxu1 }
 0xfa2   :  { %v7868_v25 = vadd.f32 %v13962_v53, %v7389_v38  ;;  %v7409_v38 = vadd.f32 %v13912_v55, %v13832_v45 }
 0xfa3   :  { %v7708_v26 = vpop.f32.mrf.mxu1 }
 0xfa4   :  { %v7867_v39 = vadd.f32 %v7708_v26, %v7384_v33  ;;  %v7905_v56 = vadd.f32 %v18973_v23, %v7868_v25  ;;  %v18985_v33 = vpop.f32.mrf.mxu0 }
 0xfa5   :  { %v13965_v35 = vpop.f32.mrf.mxu1  ;;  %v7474_v3 = vadd.f32 %v18985_v33, %v18932_v9 }
 0xfa6   :  { %v7904_v19 = vadd.f32 %v18973_v23, %v7867_v39  ;;  %v7870_v54 = vadd.f32 %v13965_v35, %v7399_v15  ;;  %v7937_v16 = vmax.f32 %v7905_v56, 0.0  ;;  %v7419_v39 = vadd.f32 %v13915_v12, %v18898_v18  ;;  %v18994_v2 = vpop.f32.mrf.mxu0 }
 0xfa7   :  { %v7718_v53 = vpop.f32.mrf.mxu1 }
 0xfa8   :  { %v7936_v13 = vmax.f32 %v7904_v19, 0.0  ;;  %v7869_v63 = vadd.f32 %v7718_v53, %v7394_v24  ;;  %v7907_v6 = vadd.f32 %v18973_v23, %v7870_v54  ;;  %v19004_v53 = vpop.f32.mrf.mxu0 }
 0xfa9   :  { %v13968_v37 = vpop.f32.mrf.mxu1  ;;  %v7484_v9 = vadd.f32 %v19004_v53, %v18938_v34 }
 0xfaa   :  { %v7906_v26 = vadd.f32 %v18973_v23, %v7869_v63  ;;  %v7872_v25 = vadd.f32 %v13968_v37, %v7409_v38  ;;  %14016 = vmatprep.mubr.msk.f32.mxu0 %vm21242_vm14, %v7936_v13  ;;  %v7939_v56 = vmax.f32 %v7907_v6, 0.0  ;;  %vm21247_vm14 = vmmov %vm21193_vm1 }
 0xfab   :  { %v7728_v35 = vpop.f32.mrf.mxu1  ;;  %14017 = vmatmul.mubr.msk.f32.vlgmr.msra.gmra.mxu0 %vm21243_vm7, %v7937_v16  ;;  %v7429_v16 = vadd.f32 %v18918_v27, %v18902_v1  ;;  %v7439_v1 = vadd.f32 %v18930_v50, %v18906_v10  ;;  %vm21248_vm7 = vmmov %vm21193_vm1  ;;  %v7449_v10 = vadd.f32 %v18942_v31, %v18910_v32  ;;  %v7459_v31 = vadd.f32 %v18954_v14, %v18916_v21 }
 0xfac   :  { %v7938_v19 = vmax.f32 %v7906_v26, 0.0  ;;  %v7871_v24 = vadd.f32 %v7728_v35, %v7404_v42  ;;  %v7909_v15 = vadd.f32 %v18973_v23, %v7872_v25  ;;  %v19014_v35 = vpop.f32.mrf.mxu0  ;;  %v7469_v14 = vadd.f32 %v18966_v30, %v18922_v28 }
 0xfad   :  { %v13971_v48 = vpop.f32.mrf.mxu1  ;;  %v7479_v30 = vadd.f32 %v18979_v59, %v18928_v46  ;;  %v7489_v46 = vadd.f32 %v18994_v2, %v18934_v43  ;;  %v7499_v43 = vadd.f32 %v19014_v35, %v18940_v17 }
 0xfae   :  { %v7908_v37 = vadd.f32 %v18973_v23, %v7871_v24  ;;  %v7874_v45 = vadd.f32 %v13971_v48, %v7419_v39  ;;  %14019 = vmatprep.mubr.msk.f32.mxu0 %vm21244_vm4, %v7938_v19  ;;  %v7941_v55 = vmax.f32 %v7909_v15, 0.0  ;;  %vm21249_vm4 = vmmov %vm21193_vm1 }
 0xfaf   :  { %v7738_v11 = vpop.f32.mrf.mxu1  ;;  %14020 = vmatmul.mubr.msk.f32.gmra.mxu0 %vm21193_vm1, %v7939_v56 }
 0xfb0   :  { %v7940_v6 = vmax.f32 %v7908_v37, 0.0  ;;  %v7873_v18 = vadd.f32 %v7738_v11, %v7414_v62  ;;  %v7911_v61 = vadd.f32 %v18973_v23, %v7874_v45  ;;  %v7493_v62 = vpop.f32.mrf.mxu0 }
 0xfb1   :  { %v13974_v12 = vpop.f32.mrf.mxu1  ;;  %v7494_v34 = vadd.f32 %v7493_v62, %v18944_v20 }
 0xfb2   :  { %v7910_v29 = vadd.f32 %v18973_v23, %v7873_v18  ;;  %v7876_v54 = vadd.f32 %v13974_v12, %v7429_v16  ;;  %14022 = vmatprep.mubr.msk.f32.mxu0 %vm21245_vm6, %v7940_v6  ;;  %v7943_v63 = vmax.f32 %v7911_v61, 0.0  ;;  %vm21250_vm6 = vmmov %vm21193_vm1 }
 0xfb3   :  { %v7748_v38 = vpop.f32.mrf.mxu1  ;;  %14023 = vmatmul.mubr.msk.f32.gmra.mxu0 %vm21246_vm8, %v7941_v55  ;;  %v13942_v55 = vpop.f32.mrf.mxu0  ;;  %vm21251_vm8 = vmmov %vm21193_vm1 }
 0xfb4   :  { %v7942_v27 = vmax.f32 %v7910_v29, 0.0  ;;  %v7875_v13 = vadd.f32 %v7748_v38, %v7424_v7  ;;  %v7913_v42 = vadd.f32 %v18973_v23, %v7876_v54 }
 0xfb5   :  { %v13977_v26 = vpop.f32.mrf.mxu1 }
 0xfb6   :  { %v7912_v49 = vadd.f32 %v18973_v23, %v7875_v13  ;;  %v7878_v25 = vadd.f32 %v13977_v26, %v7439_v1  ;;  %14025 = vmatprep.mubr.msk.f32.mxu0 %vm21247_vm14, %v7942_v27  ;;  %v7945_v24 = vmax.f32 %v7913_v42, 0.0  ;;  %vm21252_vm14 = vmmov %vm21193_vm1  ;;  %v7503_v1 = vpop.f32.mrf.mxu0 }
 0xfb7   :  { %v7758_v39 = vpop.f32.mrf.mxu1  ;;  %14026 = vmatmul.mubr.msk.f32.gmra.mxu0 %vm21248_vm7, %v7943_v63  ;;  %vm21253_vm7 = vmmov %vm21193_vm1 }
 0xfb8   :  { %v7944_v50 = vmax.f32 %v7912_v49, 0.0  ;;  %v7877_v19 = vadd.f32 %v7758_v39, %v7434_v8  ;;  %v7915_v56 = vadd.f32 %v18973_v23, %v7878_v25  ;;  %v13945_v49 = vpop.f32.mrf.mxu0 }
 0xfb9   :  { %v13980_v15 = vpop.f32.mrf.mxu1 }
 0xfba   :  { %v7914_v22 = vadd.f32 %v18973_v23, %v7877_v19  ;;  %v7880_v48 = vadd.f32 %v13980_v15, %v7449_v10  ;;  %14028 = vmatprep.mubr.msk.f32.mxu0 %vm21249_vm4, %v7944_v50  ;;  %v7947_v11 = vmax.f32 %v7915_v56, 0.0  ;;  %vm21254_vm4 = vmmov %vm21193_vm1  ;;  %v7513_v56 = vpop.f32.mrf.mxu0 }
 0xfbb   :  { %v7768_v37 = vpop.f32.mrf.mxu1  ;;  %14029 = vmatmul.mubr.msk.f32.gmra.mxu0 %vm21193_vm1, %v7945_v24 }
 0xfbc   :  { %v7946_v32 = vmax.f32 %v7914_v22, 0.0  ;;  %v7879_v45 = vadd.f32 %v7768_v37, %v7444_v44  ;;  %v7917_v16 = vadd.f32 %v18973_v23, %v7880_v48 }
 0xfbd   :  { %v13983_v6 = vpop.f32.mrf.mxu1 }
 0xfbe   :  { %v7916_v52 = vadd.f32 %v18973_v23, %v7879_v45  ;;  %v7882_v18 = vadd.f32 %v13983_v6, %v7459_v31  ;;  %14031 = vmatprep.mubr.msk.f32.mxu0 %vm21250_vm6, %v7946_v32  ;;  %v7949_v7 = vmax.f32 %v7917_v16, 0.0  ;;  %vm21255_vm6 = vmmov %vm21193_vm1  ;;  %v13948_v32 = vpop.f32.mrf.mxu0 }
 0xfbf   :  { %v7778_v61 = vpop.f32.mrf.mxu1  ;;  %14032 = vmatmul.mubr.msk.f32.gmra.mxu0 %vm21251_vm8, %v7947_v11  ;;  %vm21256_vm8 = vmmov %vm21193_vm1  ;;  %v7509_v11 = vadd.f32 %v13942_v55, %v18946_v36 }
 0xfc0   :  { %v7948_v21 = vmax.f32 %v7916_v52, 0.0  ;;  %v7881_v12 = vadd.f32 %v7778_v61, %v7454_v41  ;;  %v7919_v29 = vadd.f32 %v18973_v23, %v7882_v18  ;;  %v7504_v52 = vadd.f32 %v7503_v1, %v18950_v57  ;;  %v7523_v18 = vpop.f32.mrf.mxu0 }
 0xfc1   :  { %v13986_v54 = vpop.f32.mrf.mxu1 }
 0xfc2   :  { %v7918_v58 = vadd.f32 %v18973_v23, %v7881_v12  ;;  %v7884_v38 = vadd.f32 %v13986_v54, %v7469_v14  ;;  %14034 = vmatprep.mubr.msk.f32.mxu0 %vm21252_vm14, %v7948_v21  ;;  %v7951_v63 = vmax.f32 %v7919_v29, 0.0  ;;  %vm21257_vm14 = vmmov %vm21193_vm1  ;;  %v7519_v14 = vadd.f32 %v13945_v49, %v18952_v0 }
 0xfc3   :  { %v7788_v27 = vpop.f32.mrf.mxu1  ;;  %14035 = vmatmul.mubr.msk.f32.gmra.mxu0 %vm21253_vm7, %v7949_v7  ;;  %vm21258_vm7 = vmmov %vm21193_vm1  ;;  %v7514_v29 = vadd.f32 %v7513_v56, %v18956_v4 }
 0xfc4   :  { %v7950_v28 = vmax.f32 %v7918_v58, 0.0  ;;  %v7883_v13 = vadd.f32 %v7788_v27, %v7464_v40  ;;  %v7921_v42 = vadd.f32 %v18973_v23, %v7884_v38  ;;  %v13951_v40 = vpop.f32.mrf.mxu0  ;;  %v7529_v38 = vadd.f32 %v13948_v32, %v18958_v51 }
 0xfc5   :  { %v13989_v26 = vpop.f32.mrf.mxu1 }
 0xfc6   :  { %v7920_v5 = vadd.f32 %v18973_v23, %v7883_v13  ;;  %v7886_v8 = vadd.f32 %v13989_v26, %v7479_v30  ;;  %14037 = vmatprep.mubr.msk.f32.mxu0 %vm21254_vm4, %v7950_v28  ;;  %v7953_v10 = vmax.f32 %v7921_v42, 0.0  ;;  %vm21259_vm4 = vmmov %vm21193_vm1  ;;  %v7524_v13 = vadd.f32 %v7523_v18, %v18962_v47  ;;  %v7533_v42 = vpop.f32.mrf.mxu0 }
 0xfc7   :  { %v7798_v25 = vpop.f32.mrf.mxu1  ;;  %14038 = vmatmul.mubr.msk.f32.gmra.mxu0 %vm21193_vm1, %v7951_v63 }
 0xfc8   :  { %v7952_v59 = vmax.f32 %v7920_v5, 0.0  ;;  %v7885_v39 = vadd.f32 %v7798_v25, %v7474_v3  ;;  %v7923_v50 = vadd.f32 %v18973_v23, %v7886_v8  ;;  %v7539_v3 = vadd.f32 %v13951_v40, %v18964_v60 }
 0xfc9   :  { %v13992_v19 = vpop.f32.mrf.mxu1 }
 0xfca   :  { %v7922_v33 = vadd.f32 %v18973_v23, %v7885_v39  ;;  %v7888_v24 = vadd.f32 %v13992_v19, %v7489_v46  ;;  %14040 = vmatprep.mubr.msk.f32.mxu0 %vm21255_vm6, %v7952_v59  ;;  %v7955_v22 = vmax.f32 %v7923_v50, 0.0  ;;  %vm21260_vm6 = vmmov %vm21193_vm1  ;;  %v21264_v46 = vld [vmem:[#allocation7_spill] sm:$0xff] }
 0xfcb   :  { %v7808_v15 = vpop.f32.mrf.mxu1  ;;  %14041 = vmatmul.mubr.msk.f32.gmra.mxu0 %vm21256_vm8, %v7953_v10  ;;  %vm21261_vm8 = vmmov %vm21193_vm1  ;;  %v7534_v59 = vadd.f32 %v7533_v42, %v21264_v46 }
 0xfcc   :  { %v7954_v2 = vmax.f32 %v7922_v33, 0.0  ;;  %v7887_v44 = vadd.f32 %v7808_v15, %v7484_v9  ;;  %v7925_v48 = vadd.f32 %v18973_v23, %v7888_v24  ;;  %v21270_v15 = vmov 1.0  }
 0xfcd   :  { %v13995_v37 = vpop.f32.mrf.mxu1 }
 0xfce   :  { %v7924_v53 = vadd.f32 %v18973_v23, %v7887_v44  ;;  %v7890_v31 = vadd.f32 %v13995_v37, %v7499_v43  ;;  %14043 = vmatprep.mubr.msk.f32.mxu0 %vm21257_vm14, %v7954_v2  ;;  %v7957_v16 = vmax.f32 %v7925_v48, 0.0  ;;  %vm21262_vm14 = vmmov %vm21193_vm1  ;;  %v21271_v43 = vld [vmem:[#allocation115_spill] sm:$0xff]  ;;  %v21272_v2 = vld [vmem:[#allocation116_spill] sm:$0xff] }
 0xfcf   :  { %v7818_v45 = vpop.f32.mrf.mxu1  ;;  %14044 = vmatmul.mubr.msk.f32.gmra.mxu0 %vm21258_vm7, %v7955_v22  ;;  %vm21263_vm7 = vmmov %vm21193_vm1  ;;  %v8331_v44 = vld [vmem:[%s20328_s7 + $0x228] sm:$0xff]  ;;  %v9302_v22 = vld [vmem:[%s20328_s7 + $0x278] sm:$0xff] }
 0xfd0   :  { %v7956_v17 = vmax.f32 %v7924_v53, 0.0  ;;  %v7889_v35 = vadd.f32 %v7818_v45, %v7494_v34  ;;  %v7927_v6 = vadd.f32 %v18973_v23, %v7890_v31  ;;  %14068 = vmatprep.subr.mxu1 %v8331_v44  ;;  %v19110_v48 = vld [vmem:[%s20330_s8 + $0xa8] ss:$0 sm:$0xff] }
 0xfd1   :  { %v13998_v41 = vpop.f32.mrf.mxu1  ;;  %14069 = vmatpush3.msra.mxu1 %v8331_v44 }
 0xfd2   :  { %v7926_v20 = vadd.f32 %v18973_v23, %v7889_v35  ;;  %v7892_v62 = vadd.f32 %v13998_v41, %v7509_v11  ;;  %14046 = vmatprep.mubr.msk.f32.mxu0 %vm21259_vm4, %v7956_v17  ;;  %v7959_v21 = vmax.f32 %v7927_v6, 0.0  ;;  %vm21265_vm4 = vmmov %vm21193_vm1  ;;  %v9301_v6 = vld [vmem:[%s20328_s7 + $0x270] sm:$0xff] }
 0xfd3   :  { %v7828_v61 = vpop.f32.mrf.mxu1  ;;  %14047 = vmatmul.mubr.msk.f32.gmra.mxu0 %vm21193_vm1, %v7957_v16 }
 0xfd4   :  { %v7958_v36 = vmax.f32 %v7926_v20, 0.0  ;;  %v7891_v55 = vadd.f32 %v7828_v61, %v7504_v52  ;;  %v7929_v12 = vadd.f32 %v18973_v23, %v7892_v62  ;;  %v9300_v20 = vld [vmem:[%s20328_s7 + $0x268] sm:$0xff] }
 0xfd5   :  { %v14001_v7 = vpop.f32.mrf.mxu1 }
 0xfd6   :  { %v7928_v57 = vadd.f32 %v18973_v23, %v7891_v55  ;;  %v7894_v54 = vadd.f32 %v14001_v7, %v7519_v14  ;;  %14049 = vmatprep.mubr.msk.f32.mxu0 %vm21260_vm6, %v7958_v36  ;;  %v7961_v27 = vmax.f32 %v7929_v12, 0.0  ;;  %vm21266_vm6 = vmmov %vm21193_vm1  ;;  %v9299_v36 = vld [vmem:[%s20328_s7 + $0x260] sm:$0xff] }
 0xfd7   :  { %v7838_v58 = vpop.f32.mrf.mxu1  ;;  %14050 = vmatmul.mubr.msk.f32.gmra.mxu0 %vm21261_vm8, %v7959_v21  ;;  %vm21267_vm8 = vmmov %vm21193_vm1 }
 0xfd8   :  { %v7960_v0 = vmax.f32 %v7928_v57, 0.0  ;;  %v7893_v1 = vadd.f32 %v7838_v58, %v7514_v29  ;;  %v7931_v30 = vadd.f32 %v18973_v23, %v7894_v54 }
 0xfd9   :  { %v14004_v28 = vpop.f32.mrf.mxu1 }
 0xfda   :  { %v7930_v4 = vadd.f32 %v18973_v23, %v7893_v1  ;;  %v7896_v63 = vadd.f32 %v14004_v28, %v7529_v38  ;;  %14052 = vmatprep.mubr.msk.f32.mxu0 %vm21262_vm14, %v7960_v0  ;;  %v7963_v8 = vmax.f32 %v7931_v30, 0.0  ;;  %vm21268_vm14 = vmmov %vm21193_vm1 }
 0xfdb   :  { %v7848_v26 = vpop.f32.mrf.mxu1  ;;  %14053 = vmatmul.mubr.msk.f32.gmra.mxu0 %vm21263_vm7, %v7961_v27  ;;  %vm21269_vm7 = vmmov %vm21193_vm1 }
 0xfdc   :  { %v7962_v51 = vmax.f32 %v7930_v4, 0.0  ;;  %v7895_v5 = vadd.f32 %v7848_v26, %v7524_v13  ;;  %v7933_v49 = vadd.f32 %v18973_v23, %v7896_v63 }
 0xfdd   :  { %v14007_v25 = vpop.f32.mrf.mxu1 }
 0xfde   :  { %v7932_v47 = vadd.f32 %v18973_v23, %v7895_v5  ;;  %v7898_v39 = vadd.f32 %v14007_v25, %v7539_v3  ;;  %14055 = vmatprep.mubr.msk.f32.mxu0 %vm21265_vm4, %v7962_v51  ;;  %v7965_v9 = vmax.f32 %v7933_v49, 0.0  ;;  %vm21273_vm4 = vcmp.eq.s32.totalorder %v21271_v43, %v21272_v2 }
 0xfdf   :  { %v7858_v10 = vpop.f32.mrf.mxu1  ;;  %14056 = vmatmul.mubr.msk.f32.gmra.mxu0 %vm21193_vm1, %v7963_v8 }
 0xfe0   :  { %v7964_v50 = vmax.f32 %v7932_v47, 0.0  ;;  %v7897_v19 = vadd.f32 %v7858_v10, %v7534_v59  ;;  %v7935_v60 = vadd.f32 %v18973_v23, %v7898_v39 }
 0xfe2   :  { %v7934_v33 = vadd.f32 %v18973_v23, %v7897_v19  ;;  %14058 = vmatprep.mubr.msk.f32.mxu0 %vm21266_vm6, %v7964_v50  ;;  %v7967_v56 = vmax.f32 %v7935_v60, 0.0  ;;  %v8330_v23 = vld [vmem:[%s20328_s7 + $0x220] sm:$0xff]  ;;  %vm21274_vm6 = vmmov %vm21193_vm1 }
 0xfe3   :  { %14059 = vmatmul.mubr.msk.f32.gmra.mxu0 %vm21267_vm8, %v7965_v9  ;;  %14070 = vmatprep.subr.mxu1 %v8330_v23  ;;  %vm21275_vm8 = vmmov %vm21193_vm1 }
 0xfe4   :  { %v7966_v24 = vmax.f32 %v7934_v33, 0.0  ;;  %14071 = vmatpush3.msra.mxu1 %v8330_v23 }
 0xfe5   :  { %14120 = vmatprep.subr.mxu1 %v9302_v22 }
 0xfe6   :  { %14061 = vmatprep.mubr.msk.f32.mxu0 %vm21268_vm14, %v7966_v24  ;;  %vm21276_vm14 = vmmov %vm21193_vm1 }
 0xfe7   :  { %14062 = vmatmul.mubr.msk.f32.gmra.mxu0 %vm21269_vm7, %v7967_v56  ;;  %vm21277_vm7 = vmmov %vm21193_vm1 }
 0xfe8   :  { %11771 = vmatprep.mubr.msk.f32.mxu0 %vm21273_vm4, %v21270_v15  ;;  %vm21278_vm4 = vmmov %vm21193_vm1 }
0x106b   :  { %v14018_v37 = vpop.f32.mrf.mxu0 }
0x106c   :  { %v8145_v34 = vadd.f32 %v14018_v37, %v19110_v48 }
0x106d   :  { %v8139_v53 = vpop.f32.mrf.mxu0 }
0x106e   :  { %v8140_v31 = vadd.f32 %v19110_v48, %v8139_v53  ;;  %v8299_v11 = vmax.f32 %v8145_v34, 0.0 }
0x106f   :  { %v14021_v32 = vpop.f32.mrf.mxu0 }
0x1070   :  { %v8298_v45 = vmax.f32 %v8140_v31, 0.0  ;;  %v8155_v17 = vadd.f32 %v14021_v32, %v19110_v48 }
0x1071   :  { %v8149_v35 = vpop.f32.mrf.mxu0 }
0x1072   :  { %v8150_v16 = vadd.f32 %v19110_v48, %v8149_v35  ;;  %14072 = vmatprep.mubr.msk.f32.mxu1 %vm21193_vm1, %v8298_v45  ;;  %v8301_v62 = vmax.f32 %v8155_v17, 0.0 }
0x1073   :  { %v14024_v41 = vpop.f32.mrf.mxu0  ;;  %14073 = vmatmul.mubr.msk.f32.vlgmr.msra.gmra.mxu1 %vm21274_vm6, %v8299_v11  ;;  %vm21279_vm6 = vmmov %vm21193_vm1 }
0x1074   :  { %v8300_v52 = vmax.f32 %v8150_v16, 0.0  ;;  %14121 = vmatpush3.msra.mxu1 %v9302_v22  ;;  %v8165_v18 = vadd.f32 %v14024_v41, %v19110_v48 }
0x1075   :  { %v8159_v61 = vpop.f32.mrf.mxu0  ;;  %14122 = vmatprep.subr.mxu1 %v9301_v6 }
0x1076   :  { %v8160_v14 = vadd.f32 %v19110_v48, %v8159_v61  ;;  %14075 = vmatprep.mubr.msk.f32.mxu1 %vm21275_vm8, %v8300_v52  ;;  %14123 = vmatpush3.msra.mxu1 %v9301_v6  ;;  %v8303_v12 = vmax.f32 %v8165_v18, 0.0  ;;  %vm21280_vm8 = vmmov %vm21193_vm1 }
0x1077   :  { %v14027_v55 = vpop.f32.mrf.mxu0  ;;  %14076 = vmatmul.mubr.msk.f32.gmra.mxu1 %vm21276_vm14, %v8301_v62  ;;  %14124 = vmatprep.subr.mxu1 %v9300_v20  ;;  %vm21281_vm14 = vmmov %vm21193_vm1 }
0x1078   :  { %v8302_v21 = vmax.f32 %v8160_v14, 0.0  ;;  %14125 = vmatpush3.msra.mxu1 %v9300_v20  ;;  %v8175_v7 = vadd.f32 %v14027_v55, %v19110_v48 }
0x1079   :  { %v8169_v29 = vpop.f32.mrf.mxu0  ;;  %14126 = vmatprep.subr.mxu1 %v9299_v36 }
0x107a   :  { %v8170_v57 = vadd.f32 %v19110_v48, %v8169_v29  ;;  %14078 = vmatprep.mubr.msk.f32.mxu1 %vm21277_vm7, %v8302_v21  ;;  %14127 = vmatpush3.msra.mxu1 %v9299_v36  ;;  %v8305_v58 = vmax.f32 %v8175_v7, 0.0  ;;  %vm21282_vm7 = vmmov %vm21193_vm1 }
0x107b   :  { %v14030_v54 = vpop.f32.mrf.mxu0  ;;  %14079 = vmatmul.mubr.msk.f32.gmra.mxu1 %vm21278_vm4, %v8303_v12  ;;  %vm21283_vm4 = vmmov %vm21193_vm1 }
0x107c   :  { %v8304_v40 = vmax.f32 %v8170_v57, 0.0  ;;  %v8185_v38 = vadd.f32 %v14030_v54, %v19110_v48 }
0x107d   :  { %v8179_v0 = vpop.f32.mrf.mxu0 }
0x107e   :  { %v8180_v1 = vadd.f32 %v19110_v48, %v8179_v0  ;;  %14081 = vmatprep.mubr.msk.f32.mxu1 %vm21193_vm1, %v8304_v40  ;;  %v8307_v28 = vmax.f32 %v8185_v38, 0.0 }
0x107f   :  { %v14033_v27 = vpop.f32.mrf.mxu0  ;;  %14082 = vmatmul.mubr.msk.f32.gmra.mxu1 %vm21279_vm6, %v8305_v58  ;;  %vm21284_vm6 = vmmov %vm21193_vm1 }
0x1080   :  { %v8306_v30 = vmax.f32 %v8180_v1, 0.0  ;;  %v8195_v13 = vadd.f32 %v14033_v27, %v19110_v48 }
0x1081   :  { %v8189_v4 = vpop.f32.mrf.mxu0 }
0x1082   :  { %v8190_v63 = vadd.f32 %v19110_v48, %v8189_v4  ;;  %14084 = vmatprep.mubr.msk.f32.mxu1 %vm21280_vm8, %v8306_v30  ;;  %v8309_v3 = vmax.f32 %v8195_v13, 0.0  ;;  %vm21285_vm8 = vmmov %vm21193_vm1 }
0x1083   :  { %v14036_v42 = vpop.f32.mrf.mxu0  ;;  %14085 = vmatmul.mubr.msk.f32.gmra.mxu1 %vm21281_vm14, %v8307_v28  ;;  %vm21286_vm14 = vmmov %vm21193_vm1 }
0x1084   :  { %v8308_v26 = vmax.f32 %v8190_v63, 0.0  ;;  %v8205_v51 = vadd.f32 %v14036_v42, %v19110_v48 }
0x1085   :  { %v8199_v5 = vpop.f32.mrf.mxu0 }
0x1086   :  { %v8200_v8 = vadd.f32 %v19110_v48, %v8199_v5  ;;  %14087 = vmatprep.mubr.msk.f32.mxu1 %vm21282_vm7, %v8308_v26  ;;  %v8311_v46 = vmax.f32 %v8205_v51, 0.0  ;;  %vm21287_vm7 = vmmov %vm21193_vm1  ;;  %v21302_v51 = vld [vmem:[#allocation3_spill] sm:$0xff]  ;;  %v21304_v5 = vld [vmem:[#allocation4_spill] sm:$0xff] }
0x1087   :  { %v14039_v49 = vpop.f32.mrf.mxu0  ;;  %14088 = vmatmul.mubr.msk.f32.gmra.mxu1 %vm21283_vm4, %v8309_v3  ;;  %vm21288_vm4 = vmmov %vm21193_vm1  ;;  %v21300_v3 = vld [vmem:[#allocation2_spill] sm:$0xff] }
0x1088   :  { %v8310_v25 = vmax.f32 %v8200_v8, 0.0  ;;  %v8215_v59 = vadd.f32 %v14039_v49, %v19110_v48  ;;  %v21308_v8 = vld [vmem:[#allocation6_spill] sm:$0xff]  ;;  %v21310_v49 = vld [vmem:[#allocation8_spill] sm:$0xff] }
0x1089   :  { %v8209_v47 = vpop.f32.mrf.mxu0 }
0x108a   :  { %v8210_v39 = vadd.f32 %v19110_v48, %v8209_v47  ;;  %14090 = vmatprep.mubr.msk.f32.mxu1 %vm21193_vm1, %v8310_v25  ;;  %v8313_v19 = vmax.f32 %v8215_v59, 0.0  ;;  %v21312_v25 = vld [vmem:[#allocation11_spill] sm:$0xff]  ;;  %v21318_v47 = vld [vmem:[#allocation16_spill] sm:$0xff] }
0x108b   :  { %v14042_v10 = vpop.f32.mrf.mxu0  ;;  %14091 = vmatmul.mubr.msk.f32.gmra.mxu1 %vm21284_vm6, %v8311_v46  ;;  %vm21289_vm6 = vmmov %vm21193_vm1  ;;  %v21314_v46 = vld [vmem:[#allocation12_spill] sm:$0xff]  ;;  %v21316_v59 = vld [vmem:[#allocation15_spill] sm:$0xff] }
0x108c   :  { %v8312_v50 = vmax.f32 %v8210_v39, 0.0  ;;  %v8225_v9 = vadd.f32 %v14042_v10, %v19110_v48  ;;  %v21320_v39 = vld [vmem:[#allocation19_spill] sm:$0xff]  ;;  %v21321_v10 = vld [vmem:[#allocation20_spill] sm:$0xff] }
0x108d   :  { %v8219_v60 = vpop.f32.mrf.mxu0 }
0x108e   :  { %v8220_v33 = vadd.f32 %v19110_v48, %v8219_v60  ;;  %14093 = vmatprep.mubr.msk.f32.mxu1 %vm21285_vm8, %v8312_v50  ;;  %v8315_v44 = vmax.f32 %v8225_v9, 0.0  ;;  %vm21290_vm8 = vmmov %vm21193_vm1  ;;  %v21323_v50 = vld [vmem:[#allocation23_spill] sm:$0xff]  ;;  %v21329_v60 = vld [vmem:[#allocation28_spill] sm:$0xff] }
0x108f   :  { %v14045_v24 = vpop.f32.mrf.mxu0  ;;  %14094 = vmatmul.mubr.msk.f32.gmra.mxu1 %vm21286_vm14, %v8313_v19  ;;  %vm21291_vm14 = vmmov %vm21193_vm1  ;;  %v21325_v19 = vld [vmem:[#allocation24_spill] sm:$0xff]  ;;  %v21327_v9 = vld [vmem:[#allocation27_spill] sm:$0xff] }
0x1090   :  { %v8314_v56 = vmax.f32 %v8220_v33, 0.0  ;;  %v8235_v23 = vadd.f32 %v14045_v24, %v19110_v48 }
0x1091   :  { %v8229_v22 = vpop.f32.mrf.mxu0 }
0x1092   :  { %v8230_v37 = vadd.f32 %v19110_v48, %v8229_v22  ;;  %14096 = vmatprep.mubr.msk.f32.mxu1 %vm21287_vm7, %v8314_v56  ;;  %v8317_v31 = vmax.f32 %v8235_v23, 0.0  ;;  %vm21292_vm7 = vmmov %vm21193_vm1 }
0x1093   :  { %v14048_v34 = vpop.f32.mrf.mxu0  ;;  %14097 = vmatmul.mubr.msk.f32.gmra.mxu1 %vm21288_vm4, %v8315_v44  ;;  %vm21293_vm4 = vmmov %vm21193_vm1 }
0x1094   :  { %v8316_v53 = vmax.f32 %v8230_v37, 0.0  ;;  %v8245_v32 = vadd.f32 %v14048_v34, %v19110_v48  ;;  %v19230_v37 = vld [vmem:[%s20330_s8 + $0xb0] ss:$0 sm:$0xff] }
0x1095   :  { %v8239_v45 = vpop.f32.mrf.mxu0 }
0x1096   :  { %v8240_v11 = vadd.f32 %v19110_v48, %v8239_v45  ;;  %14099 = vmatprep.mubr.msk.f32.mxu1 %vm21193_vm1, %v8316_v53  ;;  %v8319_v16 = vmax.f32 %v8245_v32, 0.0 }
0x1097   :  { %v14051_v17 = vpop.f32.mrf.mxu0  ;;  %14100 = vmatmul.mubr.msk.f32.gmra.mxu1 %vm21289_vm6, %v8317_v31  ;;  %vm21294_vm6 = vmmov %vm21193_vm1 }
0x1098   :  { %v8318_v35 = vmax.f32 %v8240_v11, 0.0  ;;  %v8255_v6 = vadd.f32 %v14051_v17, %v19110_v48 }
0x1099   :  { %v8249_v41 = vpop.f32.mrf.mxu0 }
0x109a   :  { %v8250_v52 = vadd.f32 %v19110_v48, %v8249_v41  ;;  %14102 = vmatprep.mubr.msk.f32.mxu1 %vm21290_vm8, %v8318_v35  ;;  %v8321_v18 = vmax.f32 %v8255_v6, 0.0  ;;  %vm21295_vm8 = vmmov %vm21193_vm1 }
0x109b   :  { %v14054_v20 = vpop.f32.mrf.mxu0  ;;  %14103 = vmatmul.mubr.msk.f32.gmra.mxu1 %vm21291_vm14, %v8319_v16  ;;  %vm21296_vm14 = vmmov %vm21193_vm1 }
0x109c   :  { %v8320_v62 = vmax.f32 %v8250_v52, 0.0  ;;  %v8265_v61 = vadd.f32 %v14054_v20, %v19110_v48 }
0x109d   :  { %v8259_v14 = vpop.f32.mrf.mxu0 }
0x109e   :  { %v8260_v36 = vadd.f32 %v19110_v48, %v8259_v14  ;;  %14105 = vmatprep.mubr.msk.f32.mxu1 %vm21292_vm7, %v8320_v62  ;;  %v8323_v12 = vmax.f32 %v8265_v61, 0.0  ;;  %vm21297_vm7 = vmmov %vm21193_vm1 }
0x109f   :  { %v14057_v55 = vpop.f32.mrf.mxu0  ;;  %14106 = vmatmul.mubr.msk.f32.gmra.mxu1 %vm21293_vm4, %v8321_v18  ;;  %vm21298_vm4 = vmmov %vm21193_vm1 }
0x10a0   :  { %v8322_v21 = vmax.f32 %v8260_v36, 0.0  ;;  %v8275_v7 = vadd.f32 %v14057_v55, %v19110_v48 }
0x10a1   :  { %v8269_v29 = vpop.f32.mrf.mxu0 }
0x10a2   :  { %v8270_v57 = vadd.f32 %v19110_v48, %v8269_v29  ;;  %14108 = vmatprep.mubr.msk.f32.mxu1 %vm21193_vm1, %v8322_v21  ;;  %v8325_v58 = vmax.f32 %v8275_v7, 0.0 }
0x10a3   :  { %v14060_v54 = vpop.f32.mrf.mxu0  ;;  %14109 = vmatmul.mubr.msk.f32.gmra.mxu1 %vm21294_vm6, %v8323_v12  ;;  %vm21299_vm6 = vmmov %vm21193_vm1 }
0x10a4   :  { %v8324_v40 = vmax.f32 %v8270_v57, 0.0  ;;  %v8285_v38 = vadd.f32 %v14060_v54, %v19110_v48 }
0x10a5   :  { %v8279_v0 = vpop.f32.mrf.mxu0 }
0x10a6   :  { %v8280_v1 = vadd.f32 %v19110_v48, %v8279_v0  ;;  %14111 = vmatprep.mubr.msk.f32.mxu1 %vm21295_vm8, %v8324_v40  ;;  %v8327_v28 = vmax.f32 %v8285_v38, 0.0  ;;  %vm21301_vm8 = vmmov %vm21193_vm1 }
0x10a7   :  { %v14063_v27 = vpop.f32.mrf.mxu0  ;;  %14112 = vmatmul.mubr.msk.f32.gmra.mxu1 %vm21296_vm14, %v8325_v58  ;;  %vm21303_vm14 = vmmov %vm21193_vm1 }
0x10a8   :  { %v8326_v30 = vmax.f32 %v8280_v1, 0.0  ;;  %v8295_v13 = vadd.f32 %v14063_v27, %v19110_v48 }
0x10a9   :  { %v8289_v4 = vpop.f32.mrf.mxu0 }
0x10aa   :  { %v8290_v63 = vadd.f32 %v19110_v48, %v8289_v4  ;;  %14114 = vmatprep.mubr.msk.f32.mxu1 %vm21297_vm7, %v8326_v30  ;;  %v8329_v26 = vmax.f32 %v8295_v13, 0.0  ;;  %v21306_v48 = vld [vmem:[#allocation5_spill] sm:$0xff]  ;;  %vm21309_vm7 = vmmov %vm21307_vm0 }
0x10ab   :  { %14115 = vmatmul.mubr.msk.f32.gmra.mxu1 %vm21298_vm4, %v8327_v28  ;;  %vm21311_vm4 = vmmov %vm21307_vm0 }
0x10ac   :  { %v8328_v42 = vmax.f32 %v8290_v63, 0.0 }
0x10ae   :  { %14117 = vmatprep.mubr.msk.f32.mxu1 %vm21193_vm1, %v8328_v42  ;;  %vm21313_vm1 = vmmov %vm21307_vm0 }
0x10af   :  { %14118 = vmatmul.mubr.msk.f32.gmra.mxu1 %vm21299_vm6, %v8329_v26  ;;  %vm21315_vm6 = vmmov %vm21307_vm0 }
0x10b0   :  { %14128 = vmatprep.mubr.msk.f32.mxu1 %vm21301_vm8, %v21300_v3  ;;  %vm21317_vm8 = vmmov %vm21307_vm0 }
0x10b3   :  { %14129 = vmatmul.mubr.msk.f32.vlgmr.msra.gmra.mxu1 %vm21303_vm14, %v21302_v51  ;;  %vm21322_vm14 = vmmov %vm21307_vm0 }
0x10b4   :  { %14131 = vmatprep.mubr.msk.f32.mxu1 %vm21305_vm5, %v21304_v5  ;;  %vm21319_vm5 = vmmov %vm21307_vm0 }
0x10b7   :  { %14132 = vmatmul.mubr.msk.f32.gmra.mxu1 %vm21307_vm0, %v21306_v48 }
0x10b8   :  { %14134 = vmatprep.mubr.msk.f32.mxu1 %vm21309_vm7, %v21308_v8  ;;  %vm21324_vm7 = vmmov %vm21307_vm0 }
0x10bb   :  { %14135 = vmatmul.mubr.msk.f32.gmra.mxu1 %vm21311_vm4, %v21310_v49  ;;  %vm21326_vm4 = vmmov %vm21307_vm0 }
0x10bc   :  { %14137 = vmatprep.mubr.msk.f32.mxu1 %vm21313_vm1, %v21312_v25  ;;  %vm21328_vm1 = vmmov %vm21307_vm0 }
0x10bf   :  { %14138 = vmatmul.mubr.msk.f32.gmra.mxu1 %vm21315_vm6, %v21314_v46  ;;  %vm21330_vm6 = vmmov %vm21307_vm0 }
0x10c0   :  { %14140 = vmatprep.mubr.msk.f32.mxu1 %vm21317_vm8, %v21316_v59  ;;  %vm21331_vm8 = vmmov %vm21307_vm0 }
0x10c3   :  { %14141 = vmatmul.mubr.msk.f32.gmra.mxu1 %vm21319_vm5, %v21318_v47  ;;  %vm21332_vm5 = vmmov %vm21307_vm0 }
0x10c4   :  { %14143 = vmatprep.mubr.msk.f32.mxu1 %vm21307_vm0, %v21320_v39 }
0x10c7   :  { %14144 = vmatmul.mubr.msk.f32.gmra.mxu1 %vm21322_vm14, %v21321_v10  ;;  %vm21333_vm14 = vmmov %vm21307_vm0 }
0x10c8   :  { %14146 = vmatprep.mubr.msk.f32.mxu1 %vm21324_vm7, %v21323_v50  ;;  %vm21334_vm7 = vmmov %vm21307_vm0 }
0x10cb   :  { %14147 = vmatmul.mubr.msk.f32.gmra.mxu1 %vm21326_vm4, %v21325_v19  ;;  %vm21335_vm4 = vmmov %vm21307_vm0 }
0x10cc   :  { %14149 = vmatprep.mubr.msk.f32.mxu1 %vm21328_vm1, %v21327_v9  ;;  %vm21336_vm1 = vmmov %vm21307_vm0 }
0x10cf   :  { %14150 = vmatmul.mubr.msk.f32.gmra.mxu1 %vm21330_vm6, %v21329_v60  ;;  %vm21337_vm6 = vmmov %vm21307_vm0 }
0x1133   :  { %v19217_v33 = vpop.f32.mrf.mxu1 }
0x1135   :  { %v19219_v24 = vpop.f32.mrf.mxu1 }
0x1137   :  { %v19221_v56 = vpop.f32.mrf.mxu1 }
0x1139   :  { %v19223_v44 = vpop.f32.mrf.mxu1 }
0x113b   :  { %v14080_v23 = vpop.f32.mrf.mxu1 }
0x113d   :  { %v19225_v22 = vpop.f32.mrf.mxu1 }
0x113f   :  { %v14083_v34 = vpop.f32.mrf.mxu1 }
0x1140   :  { %v19233_v53 = vadd.f32 %v14083_v34, %v19230_v37 }
0x1141   :  { %v8531_v31 = vpop.f32.mrf.mxu1 }
0x1142   :  { %v8683_v32 = vsel %vm21331_vm8, %v19233_v53, 0.0  ;;  %v19293_v34 = vadd.f32 %v19230_v37, %v8531_v31  ;;  %vm21338_vm8 = vmmov %vm21307_vm0 }
0x1143   :  { %8684 = vadd.xlane.f32.xlu0 %v8683_v32  ;;  %v14086_v45 = vpop.f32.mrf.mxu1 }
0x1144   :  { %v19238_v11 = vadd.f32 %v14086_v45, %v19230_v37 }
0x1145   :  { %v8541_v17 = vpop.f32.mrf.mxu1 }
0x1146   :  { %v19241_v35 = vadd.f32 %v19230_v37, %v8541_v17  ;;  %v8689_v16 = vsel %vm21332_vm5, %v19238_v11, 0.0  ;;  %vm21339_vm5 = vmmov %vm21307_vm0 }
0x1147   :  { %8690 = vadd.xlane.f32.xlu0 %v8689_v16  ;;  %v14089_v6 = vpop.f32.mrf.mxu1 }
0x1148   :  { %v19246_v52 = vadd.f32 %v14089_v6, %v19230_v37  ;;  %v8686_v20 = vsel %vm21307_vm0, %v19241_v35, 0.0 }
0x1149   :  { %v8551_v41 = vpop.f32.mrf.mxu1 }
0x114a   :  { %v19251_v61 = vadd.f32 %v19230_v37, %v8551_v41  ;;  %v8695_v14 = vsel %vm21333_vm14, %v19246_v52, 0.0  ;;  %v19303_v41 = vadd.f32 %v14080_v23, %v19230_v37  ;;  %vm21340_vm14 = vmmov %vm21307_vm0 }
0x114b   :  { %v14092_v62 = vpop.f32.mrf.mxu1  ;;  %8687 = vadd.xlane.f32.xlu0 %v8686_v20 }
0x114c   :  { %v19256_v21 = vadd.f32 %v14092_v62, %v19230_v37  ;;  %v8692_v12 = vsel %vm21334_vm7, %v19251_v61, 0.0  ;;  %v8680_v62 = vsel %vm21340_vm14, %v19293_v34, 0.0  ;;  %vm21341_vm7 = vmmov %vm21307_vm0 }
0x114d   :  { %v8561_v18 = vpop.f32.mrf.mxu1  ;;  %vm21347_vm14 = vmmov %vm21307_vm0 }
0x114e   :  { %v19264_v54 = vadd.f32 %v19230_v37, %v8561_v18  ;;  %v8701_v58 = vsel %vm21335_vm4, %v19256_v21, 0.0  ;;  %vm21342_vm4 = vmmov %vm21307_vm0 }
0x114f   :  { %v14095_v36 = vpop.f32.mrf.mxu1  ;;  %8696 = vadd.xlane.f32.xlu0 %v8695_v14  ;;  %v19314_v14 = vadd.f32 %v19230_v37, %v19225_v22 }
0x1150   :  { %v19276_v1 = vadd.f32 %v14095_v36, %v19230_v37  ;;  %v8698_v27 = vsel %vm21336_vm1, %v19264_v54, 0.0  ;;  %vm21343_vm1 = vmmov %vm21307_vm0 }
0x1151   :  { %v8571_v55 = vpop.f32.mrf.mxu1 }
0x1152   :  { %v19285_v13 = vadd.f32 %v19230_v37, %v8571_v55  ;;  %v8707_v4 = vsel %vm21337_vm6, %v19276_v1, 0.0  ;;  %v8677_v55 = vsel %vm21342_vm4, %v19303_v41, 0.0  ;;  %vm21344_vm6 = vmmov %vm21307_vm0 }
0x1153   :  { %v14098_v7 = vpop.f32.mrf.mxu1  ;;  %8693 = vadd.xlane.f32.xlu0 %v8692_v12  ;;  %vm21349_vm4 = vmmov %vm21307_vm0 }
0x1154   :  { %v19261_v29 = vadd.f32 %v14098_v7, %v19230_v37  ;;  %v8704_v45 = vsel %vm21339_vm5, %v19285_v13, 0.0  ;;  %v19325_v7 = vadd.f32 %v19221_v56, %v19230_v37  ;;  %vm21346_vm5 = vmmov %vm21307_vm0 }
0x1155   :  { %v8581_v57 = vpop.f32.mrf.mxu1 }
0x1156   :  { %v19267_v40 = vadd.f32 %v19230_v37, %v8581_v57 }
0x1157   :  { %v19271_v38 = vpop.f32.mrf.mxu1  ;;  %8702 = vadd.xlane.f32.xlu0 %v8701_v58  ;;  %v8674_v58 = vsel %vm21344_vm6, %v19314_v14, 0.0  ;;  %vm21351_vm6 = vmmov %vm21307_vm0 }
0x1159   :  { %v19273_v0 = vpop.f32.mrf.mxu1 }
0x115b   :  { %v19280_v30 = vpop.f32.mrf.mxu1  ;;  %8699 = vadd.xlane.f32.xlu0 %v8698_v27 }
0x115d   :  { %v19282_v28 = vpop.f32.mrf.mxu1 }
0x115f   :  { %v14107_v63 = vpop.f32.mrf.mxu1  ;;  %8708 = vadd.xlane.f32.xlu0 %v8707_v4  ;;  %v19336_v4 = vadd.f32 %v19230_v37, %v19223_v44 }
0x1160   :  { %v19290_v42 = vadd.f32 %v14107_v63, %v19230_v37 }
0x1161   :  { %v8611_v26 = vpop.f32.mrf.mxu1 }
0x1162   :  { %v8731_v32 = vsel %vm21338_vm8, %v19290_v42, 0.0  ;;  %vm21345_vm8 = vmmov %vm21307_vm0 }
0x1163   :  { %8732 = vadd.xlane.f32.xlu1 %v8731_v32  ;;  %v14110_v17 = vpop.f32.mrf.mxu1  ;;  %8705 = vadd.xlane.f32.xlu0 %v8704_v45  ;;  %v8671_v32 = vsel %vm21346_vm5, %v19325_v7, 0.0  ;;  %vm21353_vm5 = vmmov %vm21307_vm0 }
0x1164   :  { %v19300_v16 = vadd.f32 %v14110_v17, %v19230_v37  ;;  %v19347_v17 = vadd.f32 %v19217_v33, %v19230_v37 }
0x1165   :  { %v8621_v6 = vpop.f32.mrf.mxu1 }
0x1166   :  { %v19306_v20 = vadd.f32 %v19230_v37, %v8621_v6  ;;  %v8737_v31 = vsel %vm21307_vm0, %v19300_v16, 0.0 }
0x1167   :  { %8738 = vadd.xlane.f32.xlu1 %v8737_v31  ;;  %v14113_v18 = vpop.f32.mrf.mxu1  ;;  %8681 = vadd.xlane.f32.xlu0 %v8680_v62  ;;  %v8668_v31 = vsel %vm21347_vm14, %v19336_v4, 0.0  ;;  %vm21354_vm14 = vmmov %vm21307_vm0 }
0x1168   :  { %v19317_v36 = vadd.f32 %v14113_v18, %v19230_v37  ;;  %v8734_v23 = vsel %vm21341_vm7, %v19306_v20, 0.0  ;;  %v19358_v18 = vadd.f32 %v19230_v37, %v19219_v24  ;;  %vm21348_vm7 = vmmov %vm21307_vm0 }
0x1169   :  { %v8631_v12 = vpop.f32.mrf.mxu1 }
0x116a   :  { %v19328_v57 = vadd.f32 %v19230_v37, %v8631_v12  ;;  %v8743_v22 = vsel %vm21343_vm1, %v19317_v36, 0.0  ;;  %vm21350_vm1 = vmmov %vm21307_vm0 }
0x116b   :  { %8735 = vadd.xlane.f32.xlu1 %v8734_v23  ;;  %8678 = vadd.xlane.f32.xlu0 %v8677_v55  ;;  %v14116_v27 = vpop.f32.mrf.mxu1  ;;  %v8665_v55 = vsel %vm21349_vm4, %v19347_v17, 0.0  ;;  %vm21356_vm4 = vmmov %vm21307_vm0 }
0x116c   :  { %v19339_v63 = vadd.f32 %v14116_v27, %v19230_v37  ;;  %v8740_v56 = vsel %vm21345_vm8, %v19328_v57, 0.0  ;;  %v19375_v27 = vadd.f32 %v19230_v37, %v8611_v26  ;;  %vm21352_vm8 = vmmov %vm21307_vm0 }
0x116d   :  { %v8641_v45 = vpop.f32.mrf.mxu1 }
0x116e   :  { %v19350_v6 = vadd.f32 %v19230_v37, %v8641_v45  ;;  %v8749_v44 = vsel %vm21307_vm0, %v19339_v63, 0.0  ;;  %v8728_v45 = vsel %vm21353_vm5, %v19375_v27, 0.0  ;;  %vm21360_vm5 = vmmov %vm21307_vm0 }
0x116f   :  { %8744 = vadd.xlane.f32.xlu1 %v8743_v22  ;;  %8675 = vadd.xlane.f32.xlu0 %v8674_v58  ;;  %v14119_v62 = vpop.f32.mrf.mxu1  ;;  %v8662_v58 = vsel %vm21350_vm1, %v19358_v18, 0.0  ;;  %vm21357_vm1 = vmmov %vm21307_vm0 }
0x1170   :  { %v19361_v23 = vadd.f32 %v14119_v62, %v19230_v37  ;;  %v8746_v33 = vsel %vm21348_vm7, %v19350_v6, 0.0  ;;  %v19399_v62 = vadd.f32 %v19230_v37, %v19273_v0  ;;  %vm21355_vm7 = vmmov %vm21307_vm0 }
0x1171   :  { %v8651_v12 = vpop.f32.mrf.mxu1 }
0x1172   :  { %v19368_v22 = vadd.f32 %v19230_v37, %v8651_v12  ;;  %v8755_v24 = vsel %vm21351_vm6, %v19361_v23, 0.0  ;;  %vm21358_vm6 = vmmov %vm21307_vm0 }
0x1173   :  { %8741 = vadd.xlane.f32.xlu1 %v8740_v56  ;;  %8672 = vadd.xlane.f32.xlu0 %v8671_v32  ;;  %v19381_v32 = vadd.f32 %v19280_v30, %v19230_v37 }
0x1174   :  { %v8752_v56 = vsel %vm21352_vm8, %v19368_v22, 0.0  ;;  %vm21359_vm8 = vmmov %vm21307_vm0 }
0x1175   :  { %v8725_v26 = vsel %vm21307_vm0, %v19381_v32, 0.0 }
0x1177   :  { %8750 = vadd.xlane.f32.xlu1 %v8749_v44  ;;  %8669 = vadd.xlane.f32.xlu0 %v8668_v31  ;;  %v19387_v44 = vadd.f32 %v19230_v37, %v19282_v28  ;;  %v19393_v31 = vadd.f32 %v19271_v38, %v19230_v37  ;;  %v8713_v38 = vsel %vm21357_vm1, %v19261_v29, 0.0  ;;  %vm21364_vm1 = vmmov %vm21307_vm0 }
0x1179   :  { %v8722_v30 = vsel %vm21354_vm14, %v19387_v44, 0.0  ;;  %v8719_v28 = vsel %vm21355_vm7, %v19393_v31, 0.0  ;;  %vm21361_vm14 = vmmov %vm21307_vm0 }
0x117a   :  { %vm21362_vm7 = vmmov %vm21307_vm0 }
0x117b   :  { %8747 = vadd.xlane.f32.xlu1 %v8746_v33  ;;  %8666 = vadd.xlane.f32.xlu0 %v8665_v55  ;;  %v8716_v33 = vsel %vm21356_vm4, %v19399_v62, 0.0  ;;  %v8710_v55 = vsel %vm21358_vm6, %v19267_v40, 0.0  ;;  %vm21363_vm4 = vmmov %vm21307_vm0 }
0x117c   :  { %vm21365_vm6 = vmmov %vm21307_vm0 }
0x117f   :  { %8663 = vadd.xlane.f32.xlu0 %v8662_v58  ;;  %8756 = vadd.xlane.f32.xlu1 %v8755_v24 }
0x1183   :  { %8753 = vadd.xlane.f32.xlu1 %v8752_v56 }
0x1187   :  { %8729 = vadd.xlane.f32.xlu1 %v8728_v45 }
0x118b   :  { %8726 = vadd.xlane.f32.xlu1 %v8725_v26 }
0x118f   :  { %8723 = vadd.xlane.f32.xlu1 %v8722_v30 }
0x1193   :  { %8720 = vadd.xlane.f32.xlu1 %v8719_v28 }
0x1197   :  { %8717 = vadd.xlane.f32.xlu1 %v8716_v33 }
0x119b   :  { %8714 = vadd.xlane.f32.xlu1 %v8713_v38 }
0x119f   :  { %8711 = vadd.xlane.f32.xlu1 %v8710_v55 }
0x11cc   :  { %v8685_v12 = vpop.xlane.xlu0 %8684 }
0x11cd   :  { %v8765_v58 = vmul.f32 0.03125, %v8685_v12 }
0x11cf   :  { %v19410_v37 = vsub.f32 %v19233_v53, %v8765_v58 }
0x11d0   :  { %v8691_v0 = vpop.xlane.xlu0 %8690 }
0x11d1   :  { %v8767_v24 = vmul.f32 0.03125, %v8691_v0  ;;  %v8829_v56 = vmul.f32 %v19410_v37, %v19410_v37 }
0x11d3   :  { %v19415_v45 = vsub.f32 %v19238_v11, %v8767_v24  ;;  %v8875_v26 = vsel %vm21359_vm8, %v8829_v56, 0.0  ;;  %vm21366_vm8 = vmmov %vm21307_vm0 }
0x11d4   :  { %v8688_v30 = vpop.xlane.xlu0 %8687  ;;  %8876 = vadd.xlane.f32.xlu0 %v8875_v26 }
0x11d5   :  { %v8766_v28 = vmul.f32 0.03125, %v8688_v30  ;;  %v8831_v33 = vmul.f32 %v19415_v45, %v19415_v45 }
0x11d7   :  { %v19421_v38 = vsub.f32 %v19241_v35, %v8766_v28  ;;  %v8881_v53 = vsel %vm21360_vm5, %v8831_v33, 0.0  ;;  %vm21367_vm5 = vmmov %vm21307_vm0 }
0x11d8   :  { %v8697_v55 = vpop.xlane.xlu0 %8696  ;;  %8882 = vadd.xlane.f32.xlu0 %v8881_v53 }
0x11d9   :  { %v8769_v12 = vmul.f32 0.03125, %v8697_v55  ;;  %v8830_v11 = vmul.f32 %v19421_v38, %v19421_v38 }
0x11db   :  { %v19427_v58 = vsub.f32 %v19246_v52, %v8769_v12  ;;  %v8878_v0 = vsel %vm21307_vm0, %v8830_v11, 0.0 }
0x11dc   :  { %v8694_v24 = vpop.xlane.xlu0 %8693  ;;  %8879 = vadd.xlane.f32.xlu0 %v8878_v0 }
0x11dd   :  { %v8768_v56 = vmul.f32 0.03125, %v8694_v24  ;;  %v8833_v35 = vmul.f32 %v19427_v58, %v19427_v58 }
0x11df   :  { %v19433_v26 = vsub.f32 %v19251_v61, %v8768_v56  ;;  %v8887_v30 = vsel %vm21361_vm14, %v8833_v35, 0.0  ;;  %vm21368_vm14 = vmmov %vm21307_vm0 }
0x11e0   :  { %v8703_v28 = vpop.xlane.xlu0 %8702  ;;  %8888 = vadd.xlane.f32.xlu0 %v8887_v30 }
0x11e1   :  { %v8771_v33 = vmul.f32 0.03125, %v8703_v28  ;;  %v8832_v52 = vmul.f32 %v19433_v26, %v19433_v26 }
0x11e3   :  { %v19439_v53 = vsub.f32 %v19256_v21, %v8771_v33  ;;  %v8884_v55 = vsel %vm21362_vm7, %v8832_v52, 0.0  ;;  %vm21369_vm7 = vmmov %vm21307_vm0 }
0x11e4   :  { %v8700_v12 = vpop.xlane.xlu0 %8699  ;;  %8885 = vadd.xlane.f32.xlu0 %v8884_v55 }
0x11e5   :  { %v8770_v11 = vmul.f32 0.03125, %v8700_v12  ;;  %v8835_v61 = vmul.f32 %v19439_v53, %v19439_v53 }
0x11e7   :  { %v19445_v0 = vsub.f32 %v19264_v54, %v8770_v11  ;;  %v8893_v24 = vsel %vm21363_vm4, %v8835_v61, 0.0  ;;  %vm21370_vm4 = vmmov %vm21307_vm0 }
0x11e8   :  { %v8709_v56 = vpop.xlane.xlu0 %8708  ;;  %8894 = vadd.xlane.f32.xlu0 %v8893_v24 }
0x11e9   :  { %v8773_v35 = vmul.f32 0.03125, %v8709_v56  ;;  %v8834_v21 = vmul.f32 %v19445_v0, %v19445_v0 }
0x11eb   :  { %v19451_v30 = vsub.f32 %v19276_v1, %v8773_v35  ;;  %v8890_v28 = vsel %vm21364_vm1, %v8834_v21, 0.0  ;;  %vm21371_vm1 = vmmov %vm21307_vm0 }
0x11ec   :  { %v8733_v33 = vpop.xlane.xlu1 %8732  ;;  %v8706_v52 = vpop.xlane.xlu0 %8705  ;;  %8891 = vadd.xlane.f32.xlu0 %v8890_v28 }
0x11ed   :  { %v8781_v55 = vmul.f32 0.03125, %v8733_v33  ;;  %v8772_v12 = vmul.f32 0.03125, %v8706_v52  ;;  %v8837_v54 = vmul.f32 %v19451_v30, %v19451_v30 }
0x11ef   :  { %v19457_v11 = vsub.f32 %v19290_v42, %v8781_v55  ;;  %v19460_v61 = vsub.f32 %v19285_v13, %v8772_v12  ;;  %v8899_v24 = vsel %vm21365_vm6, %v8837_v54, 0.0  ;;  %vm21372_vm6 = vmmov %vm21307_vm0 }
0x11f0   :  { %v8739_v1 = vpop.xlane.xlu1 %8738  ;;  %v8682_v56 = vpop.xlane.xlu0 %8681  ;;  %8900 = vadd.xlane.f32.xlu0 %v8899_v24 }
0x11f1   :  { %v8783_v35 = vmul.f32 0.03125, %v8739_v1  ;;  %v8764_v21 = vmul.f32 0.03125, %v8682_v56  ;;  %v8836_v28 = vmul.f32 %v19460_v61, %v19460_v61  ;;  %v8845_v33 = vmul.f32 %v19457_v11, %v19457_v11 }
0x11f3   :  { %v19468_v52 = vsub.f32 %v19300_v16, %v8783_v35  ;;  %v19471_v42 = vsub.f32 %v19293_v34, %v8764_v21  ;;  %v8896_v13 = vsel %vm21366_vm8, %v8836_v28, 0.0  ;;  %v8923_v55 = vsel %vm21367_vm5, %v8845_v33, 0.0  ;;  %vm21373_vm8 = vmmov %vm21307_vm0 }
0x11f4   :  { %v8736_v12 = vpop.xlane.xlu1 %8735  ;;  %v8679_v54 = vpop.xlane.xlu0 %8678  ;;  %8897 = vadd.xlane.f32.xlu0 %v8896_v13  ;;  %8924 = vadd.xlane.f32.xlu1 %v8923_v55  ;;  %vm21374_vm5 = vmmov %vm21307_vm0 }
0x11f5   :  { %v8782_v24 = vmul.f32 0.03125, %v8736_v12  ;;  %v8763_v1 = vmul.f32 0.03125, %v8679_v54  ;;  %v8828_v56 = vmul.f32 %v19471_v42, %v19471_v42  ;;  %v8847_v16 = vmul.f32 %v19468_v52, %v19468_v52 }
0x11f7   :  { %v19480_v35 = vsub.f32 %v19306_v20, %v8782_v24  ;;  %v19483_v34 = vsub.f32 %v19303_v41, %v8763_v1  ;;  %v8872_v21 = vsel %vm21307_vm0, %v8828_v56, 0.0  ;;  %v8929_v28 = vsel %vm21368_vm14, %v8847_v16, 0.0  ;;  %vm21375_vm14 = vmmov %vm21307_vm0 }
0x11f8   :  { %v8745_v33 = vpop.xlane.xlu1 %8744  ;;  %v8676_v13 = vpop.xlane.xlu0 %8675  ;;  %8873 = vadd.xlane.f32.xlu0 %v8872_v21  ;;  %8930 = vadd.xlane.f32.xlu1 %v8929_v28 }
0x11f9   :  { %v8785_v55 = vmul.f32 0.03125, %v8745_v33  ;;  %v8762_v12 = vmul.f32 0.03125, %v8676_v13  ;;  %v8827_v54 = vmul.f32 %v19483_v34, %v19483_v34  ;;  %v8846_v20 = vmul.f32 %v19480_v35, %v19480_v35 }
0x11fb   :  { %v19492_v24 = vsub.f32 %v19317_v36, %v8785_v55  ;;  %v19495_v41 = vsub.f32 %v19314_v14, %v8762_v12  ;;  %v8869_v1 = vsel %vm21369_vm7, %v8827_v54, 0.0  ;;  %v8926_v56 = vsel %vm21370_vm4, %v8846_v20, 0.0  ;;  %vm21377_vm7 = vmmov %vm21307_vm0 }
0x11fc   :  { %v8742_v16 = vpop.xlane.xlu1 %8741  ;;  %v8673_v21 = vpop.xlane.xlu0 %8672  ;;  %8870 = vadd.xlane.f32.xlu0 %v8869_v1  ;;  %8927 = vadd.xlane.f32.xlu1 %v8926_v56  ;;  %vm21378_vm4 = vmmov %vm21307_vm0 }
0x11fd   :  { %v8784_v28 = vmul.f32 0.03125, %v8742_v16  ;;  %v8761_v33 = vmul.f32 0.03125, %v8673_v21  ;;  %v8826_v13 = vmul.f32 %v19495_v41, %v19495_v41  ;;  %v8849_v36 = vmul.f32 %v19492_v24, %v19492_v24 }
0x11ff   :  { %v19504_v55 = vsub.f32 %v19328_v57, %v8784_v28  ;;  %v19507_v14 = vsub.f32 %v19325_v7, %v8761_v33  ;;  %v8866_v12 = vsel %vm21371_vm1, %v8826_v13, 0.0  ;;  %v8935_v54 = vsel %vm21372_vm6, %v8849_v36, 0.0  ;;  %vm21379_vm1 = vmmov %vm21307_vm0 }
0x1200   :  { %v8751_v20 = vpop.xlane.xlu1 %8750  ;;  %v8670_v1 = vpop.xlane.xlu0 %8669  ;;  %8867 = vadd.xlane.f32.xlu0 %v8866_v12  ;;  %8936 = vadd.xlane.f32.xlu1 %v8935_v54  ;;  %vm21380_vm6 = vmmov %vm21307_vm0 }
0x1201   :  { %v8787_v56 = vmul.f32 0.03125, %v8751_v20  ;;  %v8760_v16 = vmul.f32 0.03125, %v8670_v1  ;;  %v8825_v21 = vmul.f32 %v19507_v14, %v19507_v14  ;;  %v8848_v57 = vmul.f32 %v19504_v55, %v19504_v55 }
0x1203   :  { %v19516_v28 = vsub.f32 %v19339_v63, %v8787_v56  ;;  %v19519_v7 = vsub.f32 %v19336_v4, %v8760_v16  ;;  %v8863_v33 = vsel %vm21373_vm8, %v8825_v21, 0.0  ;;  %v8932_v13 = vsel %vm21374_vm5, %v8848_v57, 0.0  ;;  %vm21381_vm8 = vmmov %vm21307_vm0 }
0x1204   :  { %v8748_v36 = vpop.xlane.xlu1 %8747  ;;  %v8667_v12 = vpop.xlane.xlu0 %8666  ;;  %8864 = vadd.xlane.f32.xlu0 %v8863_v33  ;;  %8933 = vadd.xlane.f32.xlu1 %v8932_v13  ;;  %vm21382_vm5 = vmmov %vm21307_vm0 }
0x1205   :  { %v8786_v54 = vmul.f32 0.03125, %v8748_v36  ;;  %v8759_v20 = vmul.f32 0.03125, %v8667_v12  ;;  %v8824_v1 = vmul.f32 %v19519_v7, %v19519_v7  ;;  %v8851_v63 = vmul.f32 %v19516_v28, %v19516_v28 }
0x1207   :  { %v19528_v56 = vsub.f32 %v19350_v6, %v8786_v54  ;;  %v19531_v4 = vsub.f32 %v19347_v17, %v8759_v20  ;;  %v8860_v16 = vsel %vm21307_vm0, %v8824_v1, 0.0  ;;  %v8941_v21 = vsel %vm21375_vm14, %v8851_v63, 0.0  ;;  %vm21383_vm14 = vmmov %vm21307_vm0 }
0x1208   :  { %8861 = vadd.xlane.f32.xlu0 %v8860_v16  ;;  %v8664_v57 = vpop.xlane.xlu0 %8663  ;;  %v8757_v33 = vpop.xlane.xlu1 %8756  ;;  %8942 = vadd.xlane.f32.xlu1 %v8941_v21 }
0x1209   :  { %v8758_v13 = vmul.f32 0.03125, %v8664_v57  ;;  %v8789_v36 = vmul.f32 0.03125, %v8757_v33  ;;  %v8823_v12 = vmul.f32 %v19531_v4, %v19531_v4  ;;  %v8850_v6 = vmul.f32 %v19528_v56, %v19528_v56 }
0x120b   :  { %v19540_v54 = vsub.f32 %v19358_v18, %v8758_v13  ;;  %v19543_v17 = vsub.f32 %v19361_v23, %v8789_v36  ;;  %v8857_v20 = vsel %vm21377_vm7, %v8823_v12, 0.0  ;;  %v8938_v1 = vsel %vm21378_vm4, %v8850_v6, 0.0  ;;  %vm21384_vm7 = vmmov %vm21307_vm0 }
0x120c   :  { %8858 = vadd.xlane.f32.xlu0 %v8857_v20  ;;  %8939 = vadd.xlane.f32.xlu1 %v8938_v1  ;;  %v8754_v63 = vpop.xlane.xlu1 %8753  ;;  %vm21385_vm4 = vmmov %vm21307_vm0 }
0x120d   :  { %21376 = vst [vmem:[#allocation10_spill] sm:$0xff] %v19540_v54  ;;  %v8788_v16 = vmul.f32 0.03125, %v8754_v63  ;;  %v8822_v21 = vmul.f32 %v19540_v54, %v19540_v54  ;;  %v8853_v57 = vmul.f32 %v19543_v17, %v19543_v17 }
0x120f   :  { %v19552_v18 = vsub.f32 %v19368_v22, %v8788_v16  ;;  %v8854_v23 = vsel %vm21379_vm1, %v8822_v21, 0.0  ;;  %v8947_v33 = vsel %vm21380_vm6, %v8853_v57, 0.0  ;;  %vm21387_vm1 = vmmov %vm21307_vm0 }
0x1210   :  { %8855 = vadd.xlane.f32.xlu0 %v8854_v23  ;;  %8948 = vadd.xlane.f32.xlu1 %v8947_v33  ;;  %v8730_v13 = vpop.xlane.xlu1 %8729  ;;  %vm21388_vm6 = vmmov %vm21307_vm0 }
0x1211   :  { %v8780_v36 = vmul.f32 0.03125, %v8730_v13  ;;  %v8852_v12 = vmul.f32 %v19552_v18, %v19552_v18 }
0x1213   :  { %v19559_v6 = vsub.f32 %v19375_v27, %v8780_v36  ;;  %v8944_v20 = vsel %vm21381_vm8, %v8852_v12, 0.0 }
0x1214   :  { %8945 = vadd.xlane.f32.xlu1 %v8944_v20  ;;  %v8727_v1 = vpop.xlane.xlu1 %8726 }
0x1215   :  { %v8779_v22 = vmul.f32 0.03125, %v8727_v1  ;;  %v8844_v63 = vmul.f32 %v19559_v6, %v19559_v6 }
0x1217   :  { %v19565_v16 = vsub.f32 %v19381_v32, %v8779_v22  ;;  %v8920_v21 = vsel %vm21382_vm5, %v8844_v63, 0.0 }
0x1218   :  { %8921 = vadd.xlane.f32.xlu1 %v8920_v21  ;;  %v8724_v57 = vpop.xlane.xlu1 %8723 }
0x1219   :  { %v8778_v23 = vmul.f32 0.03125, %v8724_v57  ;;  %v8843_v27 = vmul.f32 %v19565_v16, %v19565_v16 }
0x121b   :  { %v19571_v33 = vsub.f32 %v19387_v44, %v8778_v23  ;;  %v8917_v13 = vsel %vm21307_vm0, %v8843_v27, 0.0 }
0x121c   :  { %8918 = vadd.xlane.f32.xlu1 %v8917_v13  ;;  %v8721_v36 = vpop.xlane.xlu1 %8720 }
0x121d   :  { %v8777_v12 = vmul.f32 0.03125, %v8721_v36  ;;  %v8842_v32 = vmul.f32 %v19571_v33, %v19571_v33 }
0x121f   :  { %v19577_v20 = vsub.f32 %v19393_v31, %v8777_v12  ;;  %v8914_v1 = vsel %vm21383_vm14, %v8842_v32, 0.0 }
0x1220   :  { %8915 = vadd.xlane.f32.xlu1 %v8914_v1  ;;  %v8718_v22 = vpop.xlane.xlu1 %8717 }
0x1221   :  { %v8776_v63 = vmul.f32 0.03125, %v8718_v22  ;;  %v8841_v44 = vmul.f32 %v19577_v20, %v19577_v20 }
0x1223   :  { %v19583_v21 = vsub.f32 %v19399_v62, %v8776_v63  ;;  %v8911_v57 = vsel %vm21384_vm7, %v8841_v44, 0.0 }
0x1224   :  { %8912 = vadd.xlane.f32.xlu1 %v8911_v57  ;;  %v8715_v23 = vpop.xlane.xlu1 %8714 }
0x1225   :  { %v8775_v27 = vmul.f32 0.03125, %v8715_v23  ;;  %v8840_v31 = vmul.f32 %v19583_v21, %v19583_v21 }
0x1227   :  { %v19589_v13 = vsub.f32 %v19261_v29, %v8775_v27  ;;  %v8908_v36 = vsel %vm21385_vm4, %v8840_v31, 0.0 }
0x1228   :  { %8909 = vadd.xlane.f32.xlu1 %v8908_v36  ;;  %v8712_v12 = vpop.xlane.xlu1 %8711 }
0x1229   :  { %v8774_v32 = vmul.f32 0.03125, %v8712_v12  ;;  %v8839_v62 = vmul.f32 %v19589_v13, %v19589_v13 }
0x122b   :  { %v19595_v1 = vsub.f32 %v19267_v40, %v8774_v32  ;;  %v8905_v22 = vsel %vm21387_vm1, %v8839_v62, 0.0 }
0x122c   :  { %8906 = vadd.xlane.f32.xlu1 %v8905_v22 }
0x122d   :  { %21386 = vst [vmem:[#allocation45_spill] sm:$0xff] %v19595_v1  ;;  %v8838_v63 = vmul.f32 %v19595_v1, %v19595_v1 }
0x122f   :  { %v8902_v29 = vsel %vm21388_vm6, %v8838_v63, 0.0 }
0x1230   :  { %8903 = vadd.xlane.f32.xlu1 %v8902_v29 }
0x125d   :  { %v8877_v44 = vpop.xlane.xlu0 %8876 }
0x1261   :  { %v8883_v57 = vpop.xlane.xlu0 %8882 }
0x1262   :  { %v8959_v39 = vmul.f32 0.03125, %v8883_v57 }
0x1264   :  { %v8991_v49 = vadd.f32 1e-05, %v8959_v39 }
0x1265   :  { %v8880_v23 = vpop.xlane.xlu0 %8879 }
0x1269   :  { %v8889_v27 = vpop.xlane.xlu0 %8888 }
0x126a   :  { %v8961_v63 = vmul.f32 0.03125, %v8889_v27 }
0x126c   :  { %v8993_v48 = vadd.f32 1e-05, %v8961_v63 }
0x126d   :  { %v8886_v31 = vpop.xlane.xlu0 %8885 }
0x126e   :  { %v8960_v59 = vmul.f32 0.03125, %v8886_v31 }
0x1270   :  { %v8992_v3 = vadd.f32 1e-05, %v8960_v59 }
0x1271   :  { %v8895_v36 = vpop.xlane.xlu0 %8894 }
0x1272   :  { %v8963_v8 = vmul.f32 0.03125, %v8895_v36 }
0x1274   :  { %v8995_v1 = vadd.f32 1e-05, %v8963_v8 }
0x1275   :  { %v8892_v12 = vpop.xlane.xlu0 %8891 }
0x1276   :  { %v8962_v5 = vmul.f32 0.03125, %v8892_v12 }
0x1278   :  { %v8994_v57 = vadd.f32 1e-05, %v8962_v5 }
0x1279   :  { %v8901_v9 = vpop.xlane.xlu0 %8900 }
0x127a   :  { %v8965_v10 = vmul.f32 0.03125, %v8901_v9 }
0x127c   :  { %v8997_v46 = vadd.f32 1e-05, %v8965_v10 }
0x127d   :  { %v8925_v60 = vpop.xlane.xlu1 %8924  ;;  %v8898_v32 = vpop.xlane.xlu0 %8897 }
0x127e   :  { %v8964_v25 = vmul.f32 0.03125, %v8898_v32  ;;  %14540 = vrsqrt.f32 %v8997_v46 }
0x127f   :  { %14542 = vrsqrt.f32 %v8991_v49  ;;  %v8957_v49 = vmul.f32 0.03125, %v8877_v44 }
0x1280   :  { %v8996_v15 = vadd.f32 1e-05, %v8964_v25  ;;  %14544 = vrsqrt.f32 %v8993_v48  ;;  %v8958_v48 = vmul.f32 0.03125, %v8880_v23 }
0x1281   :  { %v8931_v40 = vpop.xlane.xlu1 %8930  ;;  %v8874_v22 = vpop.xlane.xlu0 %8873  ;;  %14546 = vrsqrt.f32 %v8992_v3  ;;  %v8973_v3 = vmul.f32 0.03125, %v8925_v60 }
0x1282   :  { %14548 = vrsqrt.f32 %v8996_v15  ;;  %v8975_v32 = vmul.f32 0.03125, %v8931_v40  ;;  %v8990_v40 = vadd.f32 1e-05, %v8958_v48 }
0x1283   :  { %14550 = vrsqrt.f32 %v8995_v1  ;;  %v8956_v1 = vmul.f32 0.03125, %v8874_v22 }
0x1284   :  { %14552 = vrsqrt.f32 %v8994_v57  ;;  %v9007_v15 = vadd.f32 1e-05, %v8975_v32  ;;  %v9005_v57 = vadd.f32 1e-05, %v8973_v3 }
0x1285   :  { %v8928_v19 = vpop.xlane.xlu1 %8927  ;;  %v8871_v47 = vpop.xlane.xlu0 %8870  ;;  %v8988_v60 = vadd.f32 1e-05, %v8956_v1 }
0x1286   :  { %v8974_v5 = vmul.f32 0.03125, %v8928_v19  ;;  %v8955_v63 = vmul.f32 0.03125, %v8871_v47 }
0x1288   :  { %v9006_v44 = vadd.f32 1e-05, %v8974_v5  ;;  %v8987_v22 = vadd.f32 1e-05, %v8955_v63 }
0x1289   :  { %v8937_v62 = vpop.xlane.xlu1 %8936  ;;  %v8868_v2 = vpop.xlane.xlu0 %8867 }
0x128a   :  { %v8977_v27 = vmul.f32 0.03125, %v8937_v62  ;;  %v8954_v19 = vmul.f32 0.03125, %v8868_v2 }
0x128c   :  { %v9009_v46 = vadd.f32 1e-05, %v8977_v27 }
0x128d   :  { %v8934_v50 = vpop.xlane.xlu1 %8933  ;;  %v8865_v39 = vpop.xlane.xlu0 %8864 }
0x128e   :  { %v8976_v36 = vmul.f32 0.03125, %v8934_v50  ;;  %v8989_v50 = vadd.f32 1e-05, %v8957_v49  ;;  %v8953_v48 = vmul.f32 0.03125, %v8865_v39 }
0x1290   :  { %v9008_v8 = vadd.f32 1e-05, %v8976_v36 }
0x1291   :  { %v8943_v29 = vpop.xlane.xlu1 %8942  ;;  %v8862_v62 = vpop.xlane.xlu0 %8861 }
0x1292   :  { %v8979_v43 = vmul.f32 0.03125, %v8943_v29  ;;  %v14541_v29 = vpop.eup %14540  ;;  %v8952_v63 = vmul.f32 0.03125, %v8862_v62 }
0x1293   :  { %v14543_v23 = vpop.eup %14542 }
0x1294   :  { %v9011_v10 = vadd.f32 1e-05, %v8979_v43  ;;  %v19603_v2 = vmul.f32 %v14543_v23, %v19415_v45  ;;  %v8985_v23 = vadd.f32 1e-05, %v8953_v48 }
0x1295   :  { %v8940_v51 = vpop.xlane.xlu1 %8939  ;;  %v8859_v47 = vpop.xlane.xlu0 %8858 }
0x1296   :  { %v8978_v9 = vmul.f32 0.03125, %v8940_v51  ;;  %14554 = vrsqrt.f32 %v9011_v10  ;;  %v14545_v10 = vpop.eup %14544 }
0x1297   :  { %v14547_v36 = vpop.eup %14546 }
0x1298   :  { %v9010_v12 = vadd.f32 1e-05, %v8978_v9  ;;  %v19617_v1 = vmul.f32 %v14547_v36, %v19433_v26 }
0x1299   :  { %v8949_v54 = vpop.xlane.xlu1 %8948 }
0x129a   :  { %v8981_v31 = vmul.f32 0.03125, %v8949_v54 }
0x129c   :  { %v9013_v59 = vadd.f32 1e-05, %v8981_v31 }
0x129d   :  { %v8946_v25 = vpop.xlane.xlu1 %8945 }
0x129e   :  { %v8980_v51 = vmul.f32 0.03125, %v8946_v25  ;;  %14556 = vrsqrt.f32 %v9013_v59  ;;  %v14549_v59 = vpop.eup %14548  ;;  %v8986_v25 = vadd.f32 1e-05, %v8954_v19 }
0x129f   :  { %14558 = vrsqrt.f32 %v9010_v12  ;;  %v9061_v12 = vmul.f32 %v14541_v29, %v19451_v30  ;;  %v19608_v30 = vld [vmem:[%s20330_s8 + $0xb8] ss:$0 sm:$0xff] }
0x12a0   :  { %v9012_v43 = vadd.f32 1e-05, %v8980_v51  ;;  %14560 = vrsqrt.f32 %v9009_v46  ;;  %v14551_v46 = vpop.eup %14550 }
0x12a1   :  { %v8922_v54 = vpop.xlane.xlu1 %8921  ;;  %v14553_v51 = vpop.eup %14552  ;;  %v9097_v3 = vmul.f32 %v19608_v30, %v9061_v12  ;;  %v9059_v39 = vmul.f32 %v14551_v46, %v19439_v53  ;;  %v19624_v53 = vld [vmem:[%s20330_s8 + $0xc0] ss:$0 sm:$0xff] }
0x12a2   :  { %14562 = vrsqrt.f32 %v9012_v43  ;;  %v8972_v9 = vmul.f32 0.03125, %v8922_v54  ;;  %v19613_v54 = vmul.f32 %v14545_v10, %v19427_v58  ;;  %v8856_v58 = vpop.xlane.xlu0 %8855 }
0x12a3   :  { %14564 = vrsqrt.f32 %v9008_v8  ;;  %v14555_v43 = vpop.eup %14554  ;;  %v8950_v12 = vmul.f32 0.03125, %v8856_v58 }
0x12a4   :  { %14566 = vrsqrt.f32 %v9007_v15  ;;  %v9004_v32 = vadd.f32 1e-05, %v8972_v9  ;;  %v9060_v15 = vmul.f32 %v14549_v59, %v19460_v61  ;;  %v9058_v9 = vmul.f32 %v14553_v51, %v19445_v0 }
0x12a5   :  { %v8919_v27 = vpop.xlane.xlu1 %8918  ;;  %14568 = vrsqrt.f32 %v8989_v50  ;;  %v9075_v26 = vmul.f32 %v14555_v43, %v19516_v28 }
0x12a6   :  { %v8971_v31 = vmul.f32 0.03125, %v8919_v27  ;;  %14570 = vrsqrt.f32 %v8990_v40  ;;  %v8951_v27 = vmul.f32 0.03125, %v8859_v47  ;;  %v9096_v0 = vmul.f32 %v19608_v30, %v9060_v15 }
0x12a7   :  { %14572 = vrsqrt.f32 %v9006_v44  ;;  %v9094_v48 = vmul.f32 %v19608_v30, %v9058_v9 }
0x12a8   :  { %14574 = vrsqrt.f32 %v9005_v57  ;;  %v9003_v5 = vadd.f32 1e-05, %v8971_v31 }
0x12a9   :  { %v8916_v49 = vpop.xlane.xlu1 %8915  ;;  %14576 = vrsqrt.f32 %v8988_v60 }
0x12aa   :  { %v8970_v8 = vmul.f32 0.03125, %v8916_v49  ;;  %14578 = vrsqrt.f32 %v8987_v22  ;;  %v8984_v22 = vadd.f32 1e-05, %v8952_v63  ;;  %v9111_v49 = vmul.f32 %v19608_v30, %v9075_v26 }
0x12ab   :  { %v14557_v45 = vpop.eup %14556  ;;  %14580 = vrsqrt.f32 %v9004_v32 }
0x12ac   :  { %v9002_v50 = vadd.f32 1e-05, %v8970_v8  ;;  %v14559_v40 = vpop.eup %14558  ;;  %14582 = vrsqrt.f32 %v8986_v25  ;;  %v9077_v44 = vmul.f32 %v14557_v45, %v19543_v17  ;;  %v9133_v17 = vadd.f32 %v19624_v53, %v9097_v3 }
0x12ad   :  { %v8913_v29 = vpop.xlane.xlu1 %8912  ;;  %v14561_v61 = vpop.eup %14560  ;;  %14584 = vrsqrt.f32 %v9003_v5  ;;  %v9074_v31 = vmul.f32 %v14559_v40, %v19528_v56  ;;  %v9095_v56 = vmul.f32 %v19608_v30, %v9059_v39  ;;  %v8982_v45 = vadd.f32 1e-05, %v8950_v12 }
0x12ae   :  { %v8969_v57 = vmul.f32 0.03125, %v8913_v29  ;;  %v9113_v62 = vmul.f32 %v19608_v30, %v9077_v44  ;;  %14586 = vrsqrt.f32 %v9002_v50  ;;  %v9073_v47 = vmul.f32 %v14561_v61, %v19492_v24 }
0x12af   :  { %v14563_v19 = vpop.eup %14562  ;;  %v9110_v43 = vmul.f32 %v19608_v30, %v9074_v31  ;;  %v9132_v40 = vadd.f32 %v19624_v53, %v9096_v0  ;;  %v9147_v44 = vadd.f32 %v19624_v53, %v9111_v49  ;;  %v9130_v0 = vadd.f32 %v19624_v53, %v9094_v48 }
0x12b0   :  { %v9001_v10 = vadd.f32 1e-05, %v8969_v57  ;;  %v9076_v60 = vmul.f32 %v14563_v19, %v19552_v18  ;;  %v14565_v36 = vpop.eup %14564  ;;  %v9149_v28 = vadd.f32 %v19624_v53, %v9113_v62  ;;  %v8983_v18 = vadd.f32 1e-05, %v8951_v27 }
0x12b1   :  { %v8910_v59 = vpop.xlane.xlu1 %8909  ;;  %v14567_v32 = vpop.eup %14566  ;;  %v9072_v3 = vmul.f32 %v14565_v36, %v19504_v55  ;;  %v9109_v9 = vmul.f32 %v19608_v30, %v9073_v47  ;;  %v9131_v55 = vadd.f32 %v19624_v53, %v9095_v56  ;;  %v9146_v26 = vadd.f32 %v19624_v53, %v9110_v43 }
0x12b2   :  { %14588 = vrsqrt.f32 %v9001_v10  ;;  %v8968_v46 = vmul.f32 0.03125, %v8910_v59  ;;  %v9112_v25 = vmul.f32 %v19608_v30, %v9076_v60  ;;  %v14569_v51 = vpop.eup %14568  ;;  %12734 = vmatprep.subr.mxu0 %v9149_v28  ;;  %v9071_v63 = vmul.f32 %v14567_v32, %v19468_v52 }
0x12b3   :  { %14590 = vrsqrt.f32 %v8985_v23  ;;  %v14571_v5 = vpop.eup %14570  ;;  %12735 = vmatpush3.msra.mxu0 %v9133_v17  ;;  %v9093_v23 = vmul.f32 %v19608_v30, %v19613_v54  ;;  %v9108_v19 = vmul.f32 %v19608_v30, %v9072_v3  ;;  %v9092_v54 = vmul.f32 %v19608_v30, %v19617_v1 }
0x12b4   :  { %v9000_v8 = vadd.f32 1e-05, %v8968_v46  ;;  %v9148_v24 = vadd.f32 %v19624_v53, %v9112_v25  ;;  %v14573_v15 = vpop.eup %14572  ;;  %14592 = vrsqrt.f32 %v8984_v22  ;;  %v9054_v58 = vmul.f32 %v14571_v5, %v19421_v38 }
0x12b5   :  { %v8907_v50 = vpop.xlane.xlu1 %8906  ;;  %v14575_v39 = vpop.eup %14574  ;;  %v9070_v27 = vmul.f32 %v14573_v15, %v19480_v35  ;;  %v9145_v31 = vadd.f32 %v19624_v53, %v9109_v9  ;;  %v9107_v36 = vmul.f32 %v19608_v30, %v9071_v63  ;;  %v9129_v22 = vadd.f32 %v19624_v53, %v9093_v23 }
0x12b6   :  { %14594 = vrsqrt.f32 %v9000_v8  ;;  %v8967_v29 = vmul.f32 0.03125, %v8907_v50  ;;  %12736 = vmatprep.subr.mxu0 %v9148_v24  ;;  %v14577_v61 = vpop.eup %14576  ;;  %v9069_v38 = vmul.f32 %v14575_v39, %v19457_v11  ;;  %v9091_v12 = vmul.f32 %v19608_v30, %v19603_v2 }
0x12b7   :  { %14596 = vrsqrt.f32 %v8983_v18  ;;  %12737 = vmatpush3.msra.mxu0 %v9132_v40  ;;  %v14579_v57 = vpop.eup %14578  ;;  %v9053_v59 = vmul.f32 %v14569_v51, %v19410_v37  ;;  %v9144_v11 = vadd.f32 %v19624_v53, %v9108_v19  ;;  %v9106_v28 = vmul.f32 %v19608_v30, %v9070_v27 }
0x12b8   :  { %v8999_v52 = vadd.f32 1e-05, %v8967_v29  ;;  %12738 = vmatprep.subr.mxu0 %v9147_v44  ;;  %v14581_v62 = vpop.eup %14580  ;;  %14598 = vrsqrt.f32 %v8982_v45  ;;  %v9128_v46 = vadd.f32 %v19624_v53, %v9092_v54  ;;  %v9090_v25 = vmul.f32 %v19608_v30, %v9054_v58 }
0x12b9   :  { %12739 = vmatpush3.msra.mxu0 %v9131_v55  ;;  %v8904_v17 = vpop.xlane.xlu1 %8903  ;;  %v14583_v10 = vpop.eup %14582  ;;  %v9068_v47 = vmul.f32 %v14581_v62, %v19559_v6  ;;  %v9052_v49 = vmul.f32 %v14577_v61, %v19471_v42  ;;  %v9143_v37 = vadd.f32 %v19624_v53, %v9107_v36  ;;  %v9105_v2 = vmul.f32 %v19608_v30, %v9069_v38  ;;  %v21390_v36 = vld [vmem:[#allocation45_spill] sm:$0xff] }
0x12ba   :  { %14600 = vrsqrt.f32 %v8999_v52  ;;  %v8966_v60 = vmul.f32 0.03125, %v8904_v17  ;;  %12740 = vmatprep.subr.mxu0 %v9146_v26  ;;  %v14585_v35 = vpop.eup %14584  ;;  %v9127_v6 = vadd.f32 %v19624_v53, %v9091_v12  ;;  %v9089_v56 = vmul.f32 %v19608_v30, %v9053_v59 }
0x12bb   :  { %12741 = vmatpush3.msra.mxu0 %v9130_v0  ;;  %v14587_v32 = vpop.eup %14586  ;;  %v9067_v51 = vmul.f32 %v14585_v35, %v19565_v16  ;;  %v9051_v48 = vmul.f32 %v14579_v57, %v19483_v34  ;;  %v9142_v42 = vadd.f32 %v19624_v53, %v9106_v28  ;;  %v9104_v8 = vmul.f32 %v19608_v30, %v9068_v47  ;;  %v21389_v0 = vld [vmem:[#allocation10_spill] sm:$0xff] }
0x12bc   :  { %v8998_v1 = vadd.f32 1e-05, %v8966_v60  ;;  %12742 = vmatprep.subr.mxu0 %v9145_v31  ;;  %v9066_v24 = vmul.f32 %v14587_v32, %v19571_v33  ;;  %v9126_v43 = vadd.f32 %v19624_v53, %v9090_v25  ;;  %v9088_v16 = vmul.f32 %v19608_v30, %v9052_v49  ;;  %v21393_v25 = vld [vmem:[#allocation117_spill] sm:$0xff] }
0x12bd   :  { %12743 = vmatpush3.msra.mxu0 %v9129_v22  ;;  %v9050_v3 = vmul.f32 %v14583_v10, %v19495_v41  ;;  %v9141_v45 = vadd.f32 %v19624_v53, %v9105_v2  ;;  %v9103_v34 = vmul.f32 %v19608_v30, %v9067_v51  ;;  %v9125_v63 = vadd.f32 %v19624_v53, %v9089_v56  ;;  %v21398_v2 = vld [vmem:[#allocation121_spill] sm:$0xff]  ;;  %v21401_v51 = vld [vmem:[#allocation122_spill] sm:$0xff] }
0x12be   :  { %14602 = vrsqrt.f32 %v8998_v1  ;;  %12744 = vmatprep.subr.mxu0 %v9144_v11  ;;  %v9087_v33 = vmul.f32 %v19608_v30, %v9051_v48  ;;  %v9140_v41 = vadd.f32 %v19624_v53, %v9104_v8  ;;  %v9102_v44 = vmul.f32 %v19608_v30, %v9066_v24  ;;  %v21410_v56 = vld [vmem:[#allocation125_spill] sm:$0xff]  ;;  %v21413_v48 = vld [vmem:[#allocation126_spill] sm:$0xff] }
0x12bf   :  { %v14589_v18 = vpop.eup %14588  ;;  %12745 = vmatpush3.msra.mxu0 %v9128_v46  ;;  %v9124_v61 = vadd.f32 %v19624_v53, %v9088_v16  ;;  %v9139_v58 = vadd.f32 %v19624_v53, %v9103_v34  ;;  %v21391_v32 = vmov 1.0   ;;  %vm21412_vm0 = vcmp.eq.s32.totalorder %v21410_v56, %v21393_v25  ;;  %v21422_v8 = vld [vmem:[#allocation129_spill] sm:$0xff]  ;;  %v21425_v24 = vld [vmem:[#allocation130_spill] sm:$0xff]  ;;  %v21430_v16 = vld [vmem:[#allocation132_spill] sm:$0xff] }
0x12c0   :  { %v14591_v5 = vpop.eup %14590  ;;  %12746 = vmatprep.subr.mxu0 %v9143_v37  ;;  %v9065_v50 = vmul.f32 %v14589_v18, %v19577_v20  ;;  %v9086_v20 = vmul.f32 %v19608_v30, %v9050_v3  ;;  %v9123_v52 = vadd.f32 %v19624_v53, %v9087_v33  ;;  %v9138_v19 = vadd.f32 %v19624_v53, %v9102_v44  ;;  %v21395_v37 = vld [vmem:[#allocation116_spill] sm:$0xff]  ;;  %v21404_v18 = vld [vmem:[#allocation123_spill] sm:$0xff]  ;;  %v9298_v3 = vld [vmem:[%s20328_s7 + $0x258] sm:$0xff] }
0x12c1   :  { %12747 = vmatpush3.msra.mxu0 %v9127_v6  ;;  %v14593_v15 = vpop.eup %14592  ;;  %v9049_v39 = vmul.f32 %v14591_v5, %v19507_v14  ;;  %v21407_v6 = vld [vmem:[#allocation124_spill] sm:$0xff]  ;;  %vm21411_vm5 = vcmp.eq.s32.totalorder %v21410_v56, %v21395_v37  ;;  %vm21414_vm14 = vcmp.eq.s32.totalorder %v21413_v48, %v21395_v37  ;;  %vm21415_vm7 = vcmp.eq.s32.totalorder %v21413_v48, %v21393_v25  ;;  %v21416_v5 = vld [vmem:[#allocation127_spill] sm:$0xff]  ;;  %v9295_v34 = vld [vmem:[%s20328_s7 + $0x240] sm:$0xff]  ;;  %v14130_v56 = vpop.f32.mrf.mxu1 }
0x12c2   :  { %12748 = vmatprep.subr.mxu0 %v9142_v42  ;;  %v9048_v55 = vmul.f32 %v14593_v15, %v19519_v7  ;;  %v9101_v14 = vmul.f32 %v19608_v30, %v9065_v50  ;;  %v9122_v62 = vadd.f32 %v19624_v53, %v9086_v20  ;;  %vm21409_vm8 = vcmp.eq.s32.totalorder %v21407_v6, %v21393_v25  ;;  %v21419_v42 = vld [vmem:[#allocation128_spill] sm:$0xff] }
0x12c3   :  { %v14595_v40 = vpop.eup %14594  ;;  %12749 = vmatpush3.msra.mxu0 %v9126_v43  ;;  %v9085_v26 = vmul.f32 %v19608_v30, %v9049_v39  ;;  %vm21417_vm4 = vcmp.eq.s32.totalorder %v21416_v5, %v21395_v37  ;;  %vm21418_vm1 = vcmp.eq.s32.totalorder %v21416_v5, %v21393_v25  ;;  %vm21420_vm6 = vcmp.eq.s32.totalorder %v21419_v42, %v21395_v37  ;;  %v21428_v43 = vld [vmem:[#allocation131_spill] sm:$0xff]  ;;  %v9297_v15 = vld [vmem:[%s20328_s7 + $0x250] sm:$0xff] }
0x12c4   :  { %v14597_v29 = vpop.eup %14596  ;;  %12750 = vmatprep.subr.mxu0 %v9141_v45  ;;  %v9064_v9 = vmul.f32 %v14595_v40, %v19583_v21  ;;  %v9084_v17 = vmul.f32 %v19608_v30, %v9048_v55  ;;  %v9137_v38 = vadd.f32 %v19624_v53, %v9101_v14  ;;  %v9296_v45 = vld [vmem:[%s20328_s7 + $0x248] sm:$0xff] }
0x12c5   :  { %12751 = vmatpush3.msra.mxu0 %v9125_v63  ;;  %v14599_v23 = vpop.eup %14598  ;;  %v9047_v21 = vmul.f32 %v14597_v29, %v19531_v4  ;;  %v9121_v60 = vadd.f32 %v19624_v53, %v9085_v26 }
0x12c6   :  { %12752 = vmatprep.subr.mxu0 %v9140_v41  ;;  %v9100_v27 = vmul.f32 %v19608_v30, %v9064_v9  ;;  %v9046_v54 = vmul.f32 %v14599_v23, %v21389_v0  ;;  %v9120_v22 = vadd.f32 %v19624_v53, %v9084_v17 }
0x12c7   :  { %v14601_v57 = vpop.eup %14600  ;;  %12753 = vmatpush3.msra.mxu0 %v9124_v61  ;;  %v9083_v31 = vmul.f32 %v19608_v30, %v9047_v21 }
0x12c8   :  { %12754 = vmatprep.subr.mxu0 %v9139_v58  ;;  %v9063_v7 = vmul.f32 %v14601_v57, %v19589_v13  ;;  %v9136_v13 = vadd.f32 %v19624_v53, %v9100_v27  ;;  %v9082_v12 = vmul.f32 %v19608_v30, %v9046_v54 }
0x12c9   :  { %12755 = vmatpush3.msra.mxu0 %v9123_v52  ;;  %v9119_v11 = vadd.f32 %v19624_v53, %v9083_v31 }
0x12ca   :  { %12756 = vmatprep.subr.mxu0 %v9138_v19  ;;  %v9099_v10 = vmul.f32 %v19608_v30, %v9063_v7  ;;  %v9118_v47 = vadd.f32 %v19624_v53, %v9082_v12 }
0x12cb   :  { %v14603_v4 = vpop.eup %14602  ;;  %12757 = vmatpush3.msra.mxu0 %v9122_v62 }
0x12cc   :  { %12758 = vmatprep.subr.mxu0 %v9137_v38  ;;  %v9062_v35 = vmul.f32 %v14603_v4, %v21390_v36  ;;  %v9135_v59 = vadd.f32 %v19624_v53, %v9099_v10 }
0x12cd   :  { %12759 = vmatpush3.msra.mxu0 %v9121_v60 }
0x12ce   :  { %12760 = vmatprep.subr.mxu0 %v9136_v13  ;;  %v9098_v1 = vmul.f32 %v19608_v30, %v9062_v35 }
0x12cf   :  { %12761 = vmatpush3.msra.mxu0 %v9120_v22 }
0x12d0   :  { %12762 = vmatprep.subr.mxu0 %v9135_v59  ;;  %v9134_v28 = vadd.f32 %v19624_v53, %v9098_v1 }
0x12d1   :  { %12763 = vmatpush3.msra.mxu0 %v9119_v11 }
0x12d2   :  { %12764 = vmatprep.subr.mxu0 %v9134_v28 }
0x12d3   :  { %12765 = vmatpush3.msra.mxu0 %v9118_v47 }
0x12d4   :  { %11772 = vmatmul.mubr.msk.f32.vlgmr.msra.gmra.mxu0 %vm3000_vm10, %v21391_v32  ;;  %vm21399_vm10 = vcmp.eq.s32.totalorder %v21398_v2, %v21395_v37  ;;  %14152 = vmatprep.subr.mxu0 %v9298_v3 }
0x12d5   :  { %11773 = vmatprep.mubr.msk.f32.mxu0 %vm3003_vm13, %v21391_v32  ;;  %vm21405_vm13 = vcmp.eq.s32.totalorder %v21404_v18, %v21395_v37  ;;  %14153 = vmatpush3.msra.mxu0 %v9298_v3 }
0x12d6   :  { %14154 = vmatprep.subr.mxu0 %v9297_v15 }
0x12d7   :  { %14155 = vmatpush3.msra.mxu0 %v9297_v15 }
0x12d8   :  { %11774 = vmatmul.mubr.msk.f32.gmra.mxu0 %vm3002_vm12, %v21391_v32  ;;  %vm21400_vm12 = vcmp.eq.s32.totalorder %v21398_v2, %v21393_v25  ;;  %14156 = vmatprep.subr.mxu0 %v9296_v45  ;;  %v9681_v2 = vld [vmem:[%s20328_s7 + $0x298] sm:$0xff] }
0x12d9   :  { %11775 = vmatprep.mubr.msk.f32.mxu0 %vm3005_vm3, %v21391_v32  ;;  %vm21408_vm3 = vcmp.eq.s32.totalorder %v21407_v6, %v21395_v37  ;;  %14157 = vmatpush3.msra.mxu0 %v9296_v45  ;;  %v9678_v6 = vld [vmem:[%s20328_s7 + $0x280] sm:$0xff] }
0x12da   :  { %14158 = vmatprep.subr.mxu0 %v9295_v34  ;;  %14184 = vmatprep.subr.mxu1 %v9681_v2 }
0x12db   :  { %14159 = vmatpush3.msra.mxu0 %v9295_v34  ;;  %14185 = vmatpush3.msra.mxu1 %v9681_v2 }
0x12dc   :  { %11776 = vmatmul.mubr.msk.f32.gmra.mxu0 %vm3004_vm11, %v21391_v32  ;;  %vm21402_vm11 = vcmp.eq.s32.totalorder %v21401_v51, %v21395_v37 }
0x12dd   :  { %11777 = vmatprep.mubr.msk.f32.mxu0 %vm3007_vm9, %v21391_v32  ;;  %vm21403_vm9 = vcmp.eq.s32.totalorder %v21401_v51, %v21393_v25  ;;  %v9680_v51 = vld [vmem:[%s20328_s7 + $0x290] sm:$0xff] }
0x12de   :  { %14186 = vmatprep.subr.mxu1 %v9680_v51 }
0x12df   :  { %14187 = vmatpush3.msra.mxu1 %v9680_v51 }
0x12e0   :  { %11778 = vmatmul.mubr.msk.f32.gmra.mxu0 %vm3006_vm15, %v21391_v32  ;;  %vm21406_vm15 = vcmp.eq.s32.totalorder %v21404_v18, %v21393_v25  ;;  %v9679_v18 = vld [vmem:[%s20328_s7 + $0x288] sm:$0xff] }
0x12e1   :  { %11779 = vmatprep.mubr.msk.f32.mxu0 %vm21399_vm10, %v21391_v32  ;;  %vm21421_vm10 = vcmp.eq.s32.totalorder %v21419_v42, %v21393_v25  ;;  %14188 = vmatprep.subr.mxu1 %v9679_v18  ;;  %v19883_v42 = vld [vmem:[%s20330_s8 + $0xc8] ss:$0 sm:$0xff] }
0x12e2   :  { %14189 = vmatpush3.msra.mxu1 %v9679_v18 }
0x12e3   :  { %14190 = vmatprep.subr.mxu1 %v9678_v6 }
0x12e4   :  { %11780 = vmatmul.mubr.msk.f32.gmra.mxu0 %vm21400_vm12, %v21391_v32  ;;  %vm21423_vm12 = vcmp.eq.s32.totalorder %v21422_v8, %v21395_v37  ;;  %14191 = vmatpush3.msra.mxu1 %v9678_v6 }
0x12e5   :  { %11781 = vmatprep.mubr.msk.f32.mxu0 %vm21402_vm11, %v21391_v32  ;;  %vm21424_vm11 = vcmp.eq.s32.totalorder %v21422_v8, %v21393_v25  ;;  %v9369_v8 = vpop.f32.mrf.mxu1 }
0x12e7   :  { %v14133_v15 = vpop.f32.mrf.mxu1 }
0x12e8   :  { %11782 = vmatmul.mubr.msk.f32.gmra.mxu0 %vm21403_vm9, %v21391_v32  ;;  %vm21426_vm9 = vcmp.eq.s32.totalorder %v21425_v24, %v21395_v37 }
0x12e9   :  { %11783 = vmatprep.mubr.msk.f32.mxu0 %vm21405_vm13, %v21391_v32  ;;  %vm21427_vm13 = vcmp.eq.s32.totalorder %v21425_v24, %v21393_v25 }
0x12ec   :  { %11784 = vmatmul.mubr.msk.f32.gmra.mxu0 %vm21406_vm15, %v21391_v32  ;;  %vm21429_vm15 = vcmp.eq.s32.totalorder %v21428_v43, %v21393_v25 }
0x12ed   :  { %11785 = vmatprep.mubr.msk.f32.mxu0 %vm21408_vm3, %v21391_v32  ;;  %vm21431_vm3 = vcmp.eq.s32.totalorder %v21430_v16, %v21395_v37 }
0x12f0   :  { %11786 = vmatmul.mubr.msk.f32.gmra.mxu0 %vm21409_vm8, %v21391_v32  ;;  %vm21432_vm8 = vcmp.eq.s32.totalorder %v21430_v16, %v21393_v25 }
0x12f1   :  { %11787 = vmatprep.mubr.msk.f32.mxu0 %vm21411_vm5, %v21391_v32 }
0x12f4   :  { %11788 = vmatmul.mubr.msk.f32.gmra.mxu0 %vm21412_vm0, %v21391_v32 }
0x12f5   :  { %11789 = vmatprep.mubr.msk.f32.mxu0 %vm21414_vm14, %v21391_v32 }
0x12f8   :  { %11790 = vmatmul.mubr.msk.f32.gmra.mxu0 %vm21415_vm7, %v21391_v32 }
0x12f9   :  { %11791 = vmatprep.mubr.msk.f32.mxu0 %vm21417_vm4, %v21391_v32 }
0x12fc   :  { %11792 = vmatmul.mubr.msk.f32.gmra.mxu0 %vm21418_vm1, %v21391_v32 }
0x12fd   :  { %11793 = vmatprep.mubr.msk.f32.mxu0 %vm21420_vm6, %v21391_v32 }
0x1300   :  { %11794 = vmatmul.mubr.msk.f32.gmra.mxu0 %vm21421_vm10, %v21391_v32 }
0x1301   :  { %11795 = vmatprep.mubr.msk.f32.mxu0 %vm21423_vm12, %v21391_v32 }
0x1304   :  { %11796 = vmatmul.mubr.msk.f32.gmra.mxu0 %vm21424_vm11, %v21391_v32 }
0x1305   :  { %11797 = vmatprep.mubr.msk.f32.mxu0 %vm21426_vm9, %v21391_v32 }
0x1308   :  { %11798 = vmatmul.mubr.msk.f32.gmra.mxu0 %vm21427_vm13, %v21391_v32 }
0x1309   :  { %11799 = vmatprep.mubr.msk.f32.mxu0 %vm3029_vm2, %v21391_v32  ;;  %vm21433_vm2 = vcmask 261120  }
0x130a   :  { %vm21434_vm5 = vmmov %vm21433_vm2 }
0x130b   :  { %vm21435_vm0 = vmmov %vm21433_vm2 }
0x130c   :  { %11800 = vmatmul.mubr.msk.f32.gmra.mxu0 %vm21429_vm15, %v21391_v32  ;;  %vm21436_vm14 = vmmov %vm21435_vm0 }
0x130d   :  { %11801 = vmatprep.mubr.msk.f32.mxu0 %vm21431_vm3, %v21391_v32  ;;  %vm21437_vm7 = vmmov %vm21435_vm0 }
0x130e   :  { %vm21438_vm4 = vmmov %vm21435_vm0 }
0x130f   :  { %vm21439_vm1 = vmmov %vm21435_vm0 }
0x1310   :  { %11802 = vmatmul.mubr.msk.f32.gmra.mxu0 %vm21432_vm8, %v21391_v32  ;;  %vm21440_vm6 = vmmov %vm21435_vm0 }
0x1311   :  { %vm21441_vm10 = vmmov %vm21435_vm0 }
0x1312   :  { %vm21442_vm12 = vmmov %vm21435_vm0 }
0x1313   :  { %vm21443_vm11 = vmmov %vm21435_vm0 }
0x1314   :  { %vm21444_vm9 = vmmov %vm21435_vm0 }
0x1315   :  { %vm21445_vm13 = vmmov %vm21435_vm0 }
0x1316   :  { %vm21446_vm15 = vmmov %vm21435_vm0 }
0x1317   :  { %vm21447_vm3 = vmmov %vm21435_vm0 }
0x1318   :  { %vm21448_vm8 = vmmov %vm21435_vm0 }
0x1394   :  { %v12766_v50 = vpop.f32.mrf.mxu0 }
0x1396   :  { %v12767_v40 = vpop.f32.mrf.mxu0 }
0x1397   :  { %v12768_v63 = vadd.f32 %v12767_v40, %v12766_v50 }
0x1398   :  { %v12769_v33 = vpop.f32.mrf.mxu0 }
0x1399   :  { %14160 = vmatprep.mubr.msk.f32.mxu0 %vm21433_vm2, %v12768_v63  ;;  %vm21449_vm2 = vmmov %vm21435_vm0  ;;  %v9379_v63 = vpop.f32.mrf.mxu1 }
0x139a   :  { %v12770_v39 = vpop.f32.mrf.mxu0 }
0x139b   :  { %v12771_v29 = vadd.f32 %v12770_v39, %v12769_v33 }
0x139c   :  { %v12772_v41 = vpop.f32.mrf.mxu0 }
0x139d   :  { %14161 = vmatmul.mubr.msk.f32.vlgmr.msra.gmra.mxu0 %vm21434_vm5, %v12771_v29  ;;  %vm21450_vm5 = vmmov %vm21435_vm0 }
0x139e   :  { %v12773_v44 = vpop.f32.mrf.mxu0 }
0x139f   :  { %v12774_v9 = vadd.f32 %v12773_v44, %v12772_v41  ;;  %v14136_v44 = vpop.f32.mrf.mxu1 }
0x13a0   :  { %v12775_v61 = vpop.f32.mrf.mxu0 }
0x13a1   :  { %14163 = vmatprep.mubr.msk.f32.mxu0 %vm21435_vm0, %v12774_v9 }
0x13a2   :  { %v12776_v20 = vpop.f32.mrf.mxu0 }
0x13a3   :  { %v12777_v55 = vadd.f32 %v12776_v20, %v12775_v61 }
0x13a4   :  { %v12778_v23 = vpop.f32.mrf.mxu0 }
0x13a5   :  { %14164 = vmatmul.mubr.msk.f32.gmra.mxu0 %vm21436_vm14, %v12777_v55  ;;  %vm21451_vm14 = vmmov %vm21435_vm0 }
0x13a6   :  { %v12779_v58 = vpop.f32.mrf.mxu0 }
0x13a7   :  { %v12780_v14 = vadd.f32 %v12779_v58, %v12778_v23  ;;  %v9389_v23 = vpop.f32.mrf.mxu1 }
0x13a8   :  { %v12781_v57 = vpop.f32.mrf.mxu0 }
0x13a9   :  { %14166 = vmatprep.mubr.msk.f32.mxu0 %vm21437_vm7, %v12780_v14  ;;  %vm21452_vm7 = vmmov %vm21435_vm0 }
0x13aa   :  { %v12782_v52 = vpop.f32.mrf.mxu0 }
0x13ab   :  { %v12783_v26 = vadd.f32 %v12782_v52, %v12781_v57 }
0x13ac   :  { %v12784_v21 = vpop.f32.mrf.mxu0 }
0x13ad   :  { %14167 = vmatmul.mubr.msk.f32.gmra.mxu0 %vm21438_vm4, %v12783_v26  ;;  %v14139_v26 = vpop.f32.mrf.mxu1  ;;  %vm21453_vm4 = vmmov %vm21435_vm0 }
0x13ae   :  { %v12785_v19 = vpop.f32.mrf.mxu0 }
0x13af   :  { %v12786_v27 = vadd.f32 %v12785_v19, %v12784_v21 }
0x13b0   :  { %v12787_v7 = vpop.f32.mrf.mxu0 }
0x13b1   :  { %14169 = vmatprep.mubr.msk.f32.mxu0 %vm21439_vm1, %v12786_v27  ;;  %vm21454_vm1 = vmmov %vm21435_vm0 }
0x13b2   :  { %v12788_v62 = vpop.f32.mrf.mxu0 }
0x13b3   :  { %v12789_v17 = vadd.f32 %v12788_v62, %v12787_v7  ;;  %v9399_v62 = vpop.f32.mrf.mxu1 }
0x13b4   :  { %v12790_v0 = vpop.f32.mrf.mxu0 }
0x13b5   :  { %14170 = vmatmul.mubr.msk.f32.gmra.mxu0 %vm21440_vm6, %v12789_v17  ;;  %vm21455_vm6 = vmmov %vm21435_vm0 }
0x13b6   :  { %v12791_v54 = vpop.f32.mrf.mxu0 }
0x13b7   :  { %v12792_v38 = vadd.f32 %v12791_v54, %v12790_v0 }
0x13b8   :  { %v12793_v10 = vpop.f32.mrf.mxu0 }
0x13b9   :  { %14172 = vmatprep.mubr.msk.f32.mxu0 %vm21441_vm10, %v12792_v38  ;;  %vm21456_vm10 = vmmov %vm21435_vm0 }
0x13ba   :  { %v12794_v4 = vpop.f32.mrf.mxu0 }
0x13bb   :  { %v12795_v60 = vadd.f32 %v12794_v4, %v12793_v10  ;;  %v14142_v10 = vpop.f32.mrf.mxu1 }
0x13bc   :  { %v12796_v31 = vpop.f32.mrf.mxu0 }
0x13bd   :  { %14173 = vmatmul.mubr.msk.f32.gmra.mxu0 %vm21442_vm12, %v12795_v60  ;;  %vm21457_vm12 = vmmov %vm21435_vm0 }
0x13be   :  { %v12797_v13 = vpop.f32.mrf.mxu0 }
0x13bf   :  { %v12798_v36 = vadd.f32 %v12797_v13, %v12796_v31 }
0x13c0   :  { %v12799_v35 = vpop.f32.mrf.mxu0 }
0x13c1   :  { %14175 = vmatprep.mubr.msk.f32.mxu0 %vm21443_vm11, %v12798_v36  ;;  %v9409_v36 = vpop.f32.mrf.mxu1  ;;  %vm21458_vm11 = vmmov %vm21435_vm0 }
0x13c2   :  { %v12800_v22 = vpop.f32.mrf.mxu0 }
0x13c3   :  { %v12801_v12 = vadd.f32 %v12800_v22, %v12799_v35 }
0x13c4   :  { %v12802_v59 = vpop.f32.mrf.mxu0 }
0x13c5   :  { %14176 = vmatmul.mubr.msk.f32.gmra.mxu0 %vm21444_vm9, %v12801_v12  ;;  %vm21459_vm9 = vmmov %vm21435_vm0 }
0x13c6   :  { %v12803_v1 = vpop.f32.mrf.mxu0 }
0x13c7   :  { %v12804_v11 = vadd.f32 %v12803_v1, %v12802_v59  ;;  %v14145_v1 = vpop.f32.mrf.mxu1 }
0x13c8   :  { %v12805_v28 = vpop.f32.mrf.mxu0 }
0x13c9   :  { %14178 = vmatprep.mubr.msk.f32.mxu0 %vm21445_vm13, %v12804_v11  ;;  %vm21460_vm13 = vmmov %vm21435_vm0 }
0x13ca   :  { %v12806_v47 = vpop.f32.mrf.mxu0 }
0x13cb   :  { %v12807_v32 = vadd.f32 %v12806_v47, %v12805_v28 }
0x13cc   :  { %v12808_v46 = vpop.f32.mrf.mxu0 }
0x13cd   :  { %14179 = vmatmul.mubr.msk.f32.gmra.mxu0 %vm21446_vm15, %v12807_v32  ;;  %vm21461_vm15 = vmmov %vm21435_vm0 }
0x13ce   :  { %v12809_v25 = vpop.f32.mrf.mxu0 }
0x13cf   :  { %v12810_v49 = vadd.f32 %v12809_v25, %v12808_v46  ;;  %v9419_v46 = vpop.f32.mrf.mxu1 }
0x13d0   :  { %v12811_v37 = vpop.f32.mrf.mxu0 }
0x13d1   :  { %14181 = vmatprep.mubr.msk.f32.mxu0 %vm21447_vm3, %v12810_v49  ;;  %vm21462_vm3 = vmmov %vm21435_vm0 }
0x13d2   :  { %v12812_v30 = vpop.f32.mrf.mxu0 }
0x13d3   :  { %v12813_v53 = vadd.f32 %v12812_v30, %v12811_v37 }
0x13d5   :  { %14182 = vmatmul.mubr.msk.f32.gmra.mxu0 %vm21448_vm8, %v12813_v53  ;;  %v14148_v53 = vpop.f32.mrf.mxu1  ;;  %vm21463_vm8 = vmmov %vm21435_vm0 }
0x145d   :  { %v14162_v48 = vpop.f32.mrf.mxu0 }
0x145e   :  { %v9568_v5 = vadd.f32 %v14162_v48, %v14130_v56  ;;  %v9429_v56 = vpop.f32.mrf.mxu1 }
0x145f   :  { %v9562_v24 = vpop.f32.mrf.mxu0 }
0x1460   :  { %v9563_v43 = vadd.f32 %v9562_v24, %v9369_v8  ;;  %v9647_v16 = vadd.f32 %v19883_v42, %v9568_v5 }
0x1462   :  { %v9646_v3 = vadd.f32 %v19883_v42, %v9563_v43  ;;  %v9663_v34 = vmax.f32 %v9647_v16, 0.0  ;;  %v14151_v43 = vpop.f32.mrf.mxu1 }
0x1464   :  { %v9662_v45 = vmax.f32 %v9646_v3, 0.0 }
0x1465   :  { %v14165_v50 = vpop.f32.mrf.mxu0 }
0x1466   :  { %v9578_v40 = vadd.f32 %v14165_v50, %v14133_v15  ;;  %14192 = vmatprep.mubr.msk.f32.mxu1 %vm21449_vm2, %v9662_v45  ;;  %vm21464_vm2 = vmmov %vm21435_vm0 }
0x1467   :  { %v9572_v33 = vpop.f32.mrf.mxu0  ;;  %14193 = vmatmul.mubr.msk.f32.vlgmr.msra.gmra.mxu1 %vm21450_vm5, %v9663_v34  ;;  %v9439_v34 = vpop.f32.mrf.mxu1  ;;  %vm21465_vm5 = vmmov %vm21435_vm0 }
0x1468   :  { %v9573_v39 = vadd.f32 %v9572_v33, %v9379_v63  ;;  %v9649_v29 = vadd.f32 %v19883_v42, %v9578_v40 }
0x146a   :  { %v9648_v41 = vadd.f32 %v19883_v42, %v9573_v39  ;;  %v9665_v61 = vmax.f32 %v9649_v29, 0.0 }
0x146c   :  { %v9664_v9 = vmax.f32 %v9648_v41, 0.0  ;;  %v9899_v41 = vld [vmem:[%s20328_s7 + $0x2b8] sm:$0xff] }
0x146d   :  { %v14168_v20 = vpop.f32.mrf.mxu0  ;;  %14216 = vmatprep.subr.mxu0 %v9899_v41 }
0x146e   :  { %v9588_v55 = vadd.f32 %v14168_v20, %v14136_v44  ;;  %14195 = vmatprep.mubr.msk.f32.mxu1 %vm21435_vm0, %v9664_v9  ;;  %14217 = vmatpush3.msra.mxu0 %v9899_v41  ;;  %v9898_v44 = vld [vmem:[%s20328_s7 + $0x2b0] sm:$0xff]  ;;  %v9896_v9 = vld [vmem:[%s20328_s7 + $0x2a0] sm:$0xff] }
0x146f   :  { %v9582_v58 = vpop.f32.mrf.mxu0  ;;  %14196 = vmatmul.mubr.msk.f32.gmra.mxu1 %vm21451_vm14, %v9665_v61  ;;  %14218 = vmatprep.subr.mxu0 %v9898_v44  ;;  %v11836_v61 = vld [vmem:[%s20330_s8 + $0xd0] ss:$0 sm:$0xff]  ;;  %vm21466_vm14 = vmmov %vm21435_vm0 }
0x1470   :  { %v9583_v14 = vadd.f32 %v9582_v58, %v9389_v23  ;;  %v9651_v57 = vadd.f32 %v19883_v42, %v9588_v55  ;;  %14219 = vmatpush3.msra.mxu0 %v9898_v44 }
0x1472   :  { %v9650_v52 = vadd.f32 %v19883_v42, %v9583_v14  ;;  %v9667_v19 = vmax.f32 %v9651_v57, 0.0 }
0x1474   :  { %v9666_v21 = vmax.f32 %v9650_v52, 0.0 }
0x1475   :  { %v14171_v27 = vpop.f32.mrf.mxu0 }
0x1476   :  { %v9598_v7 = vadd.f32 %v14171_v27, %v14139_v26  ;;  %14198 = vmatprep.mubr.msk.f32.mxu1 %vm21452_vm7, %v9666_v21  ;;  %vm21467_vm7 = vmmov %vm21435_vm0 }
0x1477   :  { %v9592_v17 = vpop.f32.mrf.mxu0  ;;  %14199 = vmatmul.mubr.msk.f32.gmra.mxu1 %vm21453_vm4, %v9667_v19  ;;  %vm21468_vm4 = vmmov %vm21435_vm0 }
0x1478   :  { %v9593_v0 = vadd.f32 %v9592_v17, %v9399_v62  ;;  %v9653_v54 = vadd.f32 %v19883_v42, %v9598_v7 }
0x147a   :  { %v9652_v38 = vadd.f32 %v19883_v42, %v9593_v0  ;;  %v9669_v60 = vmax.f32 %v9653_v54, 0.0 }
0x147c   :  { %v9668_v4 = vmax.f32 %v9652_v38, 0.0 }
0x147d   :  { %v14174_v31 = vpop.f32.mrf.mxu0 }
0x147e   :  { %v9608_v13 = vadd.f32 %v14174_v31, %v14142_v10  ;;  %14201 = vmatprep.mubr.msk.f32.mxu1 %vm21454_vm1, %v9668_v4  ;;  %vm21469_vm1 = vmmov %vm21435_vm0 }
0x147f   :  { %v9602_v35 = vpop.f32.mrf.mxu0  ;;  %14202 = vmatmul.mubr.msk.f32.gmra.mxu1 %vm21455_vm6, %v9669_v60  ;;  %vm21470_vm6 = vmmov %vm21435_vm0 }
0x1480   :  { %v9603_v22 = vadd.f32 %v9602_v35, %v9409_v36  ;;  %v9655_v12 = vadd.f32 %v19883_v42, %v9608_v13 }
0x1482   :  { %v9654_v59 = vadd.f32 %v19883_v42, %v9603_v22  ;;  %v9671_v28 = vmax.f32 %v9655_v12, 0.0 }
0x1484   :  { %v9670_v11 = vmax.f32 %v9654_v59, 0.0 }
0x1485   :  { %v14177_v47 = vpop.f32.mrf.mxu0 }
0x1486   :  { %v9618_v32 = vadd.f32 %v14177_v47, %v14145_v1  ;;  %14204 = vmatprep.mubr.msk.f32.mxu1 %vm21456_vm10, %v9670_v11  ;;  %vm21471_vm10 = vmmov %vm21435_vm0 }
0x1487   :  { %v9612_v25 = vpop.f32.mrf.mxu0  ;;  %14205 = vmatmul.mubr.msk.f32.gmra.mxu1 %vm21457_vm12, %v9671_v28  ;;  %vm21472_vm12 = vmmov %vm21435_vm0 }
0x1488   :  { %v9613_v49 = vadd.f32 %v9612_v25, %v9419_v46  ;;  %v9657_v37 = vadd.f32 %v19883_v42, %v9618_v32 }
0x148a   :  { %v9656_v30 = vadd.f32 %v19883_v42, %v9613_v49  ;;  %v9673_v51 = vmax.f32 %v9657_v37, 0.0 }
0x148c   :  { %v9672_v2 = vmax.f32 %v9656_v30, 0.0 }
0x148d   :  { %v14180_v18 = vpop.f32.mrf.mxu0 }
0x148e   :  { %v9628_v6 = vadd.f32 %v14180_v18, %v14148_v53  ;;  %14207 = vmatprep.mubr.msk.f32.mxu1 %vm21458_vm11, %v9672_v2  ;;  %vm21473_vm11 = vmmov %vm21435_vm0 }
0x148f   :  { %v9622_v48 = vpop.f32.mrf.mxu0  ;;  %14208 = vmatmul.mubr.msk.f32.gmra.mxu1 %vm21459_vm9, %v9673_v51  ;;  %vm21474_vm9 = vmmov %vm21435_vm0 }
0x1490   :  { %v9623_v5 = vadd.f32 %v9622_v48, %v9429_v56  ;;  %v9659_v8 = vadd.f32 %v19883_v42, %v9628_v6 }
0x1492   :  { %v9658_v24 = vadd.f32 %v19883_v42, %v9623_v5  ;;  %v9675_v3 = vmax.f32 %v9659_v8, 0.0 }
0x1494   :  { %v9674_v16 = vmax.f32 %v9658_v24, 0.0 }
0x1495   :  { %v14183_v15 = vpop.f32.mrf.mxu0 }
0x1496   :  { %v9638_v45 = vadd.f32 %v14183_v15, %v14151_v43  ;;  %14210 = vmatprep.mubr.msk.f32.mxu1 %vm21460_vm13, %v9674_v16  ;;  %vm21475_vm13 = vmmov %vm21435_vm0  ;;  %v11853_v16 = vld [vmem:[%s20330_s8 + $0xd8] ss:$0 sm:$0xff] }
0x1497   :  { %v9632_v50 = vpop.f32.mrf.mxu0  ;;  %14211 = vmatmul.mubr.msk.f32.gmra.mxu1 %vm21461_vm15, %v9675_v3  ;;  %vm21476_vm15 = vmmov %vm21435_vm0 }
0x1498   :  { %v9633_v40 = vadd.f32 %v9632_v50, %v9439_v34  ;;  %v9661_v63 = vadd.f32 %v19883_v42, %v9638_v45 }
0x149a   :  { %v9660_v33 = vadd.f32 %v19883_v42, %v9633_v40  ;;  %v9677_v29 = vmax.f32 %v9661_v63, 0.0  ;;  %v9897_v42 = vld [vmem:[%s20328_s7 + $0x2a8] sm:$0xff] }
0x149b   :  { %14220 = vmatprep.subr.mxu0 %v9897_v42 }
0x149c   :  { %v9676_v39 = vmax.f32 %v9660_v33, 0.0  ;;  %14221 = vmatpush3.msra.mxu0 %v9897_v42 }
0x149d   :  { %14222 = vmatprep.subr.mxu0 %v9896_v9 }
0x149e   :  { %14213 = vmatprep.mubr.msk.f32.mxu1 %vm21462_vm3, %v9676_v39  ;;  %14223 = vmatpush3.msra.mxu0 %v9896_v9  ;;  %vm21477_vm3 = vmmov %vm21435_vm0 }
0x149f   :  { %14214 = vmatmul.mubr.msk.f32.gmra.mxu1 %vm21463_vm8, %v9677_v29  ;;  %vm21478_vm8 = vmmov %vm21435_vm0 }
0x1527   :  { %v14194_v20 = vpop.f32.mrf.mxu1 }
0x1528   :  { %v9807_v55 = vadd.f32 %v14194_v20, %v11836_v61 }
0x1529   :  { %v9801_v23 = vpop.f32.mrf.mxu1 }
0x152a   :  { %v9802_v58 = vadd.f32 %v11836_v61, %v9801_v23  ;;  %v9881_v57 = vmax.f32 %v9807_v55, 0.0 }
0x152c   :  { %v9880_v14 = vmax.f32 %v9802_v58, 0.0 }
0x152e   :  { %14224 = vmatprep.mubr.msk.f32.mxu0 %vm21464_vm2, %v9880_v14  ;;  %vm21479_vm2 = vmmov %vm21435_vm0 }
0x152f   :  { %v14197_v52 = vpop.f32.mrf.mxu1  ;;  %14225 = vmatmul.mubr.msk.f32.vlgmr.msra.gmra.mxu0 %vm21465_vm5, %v9881_v57  ;;  %vm21480_vm5 = vmmov %vm21435_vm0 }
0x1530   :  { %v9817_v26 = vadd.f32 %v14197_v52, %v11836_v61 }
0x1531   :  { %v9811_v21 = vpop.f32.mrf.mxu1 }
0x1532   :  { %v9812_v19 = vadd.f32 %v11836_v61, %v9811_v21  ;;  %v9883_v7 = vmax.f32 %v9817_v26, 0.0 }
0x1534   :  { %v9882_v27 = vmax.f32 %v9812_v19, 0.0 }
0x1536   :  { %14227 = vmatprep.mubr.msk.f32.mxu0 %vm21435_vm0, %v9882_v27 }
0x1537   :  { %v14200_v62 = vpop.f32.mrf.mxu1  ;;  %14228 = vmatmul.mubr.msk.f32.gmra.mxu0 %vm21466_vm14, %v9883_v7  ;;  %vm21481_vm14 = vmmov %vm21435_vm0 }
0x1538   :  { %v9827_v17 = vadd.f32 %v14200_v62, %v11836_v61 }
0x1539   :  { %v9821_v0 = vpop.f32.mrf.mxu1 }
0x153a   :  { %v9822_v54 = vadd.f32 %v11836_v61, %v9821_v0  ;;  %v9885_v10 = vmax.f32 %v9827_v17, 0.0 }
0x153c   :  { %v9884_v38 = vmax.f32 %v9822_v54, 0.0 }
0x153e   :  { %14230 = vmatprep.mubr.msk.f32.mxu0 %vm21467_vm7, %v9884_v38  ;;  %vm21482_vm7 = vmmov %vm21435_vm0 }
0x153f   :  { %v14203_v4 = vpop.f32.mrf.mxu1  ;;  %14231 = vmatmul.mubr.msk.f32.gmra.mxu0 %vm21468_vm4, %v9885_v10  ;;  %vm21483_vm4 = vmmov %vm21435_vm0 }
0x1540   :  { %v9837_v60 = vadd.f32 %v14203_v4, %v11836_v61 }
0x1541   :  { %v9831_v31 = vpop.f32.mrf.mxu1 }
0x1542   :  { %v9832_v13 = vadd.f32 %v11836_v61, %v9831_v31  ;;  %v9887_v35 = vmax.f32 %v9837_v60, 0.0 }
0x1544   :  { %v9886_v36 = vmax.f32 %v9832_v13, 0.0 }
0x1546   :  { %14233 = vmatprep.mubr.msk.f32.mxu0 %vm21469_vm1, %v9886_v36  ;;  %vm21484_vm1 = vmmov %vm21435_vm0 }
0x1547   :  { %v14206_v22 = vpop.f32.mrf.mxu1  ;;  %14234 = vmatmul.mubr.msk.f32.gmra.mxu0 %vm21470_vm6, %v9887_v35  ;;  %vm21485_vm6 = vmmov %vm21435_vm0 }
0x1548   :  { %v9847_v12 = vadd.f32 %v14206_v22, %v11836_v61 }
0x1549   :  { %v9841_v59 = vpop.f32.mrf.mxu1 }
0x154a   :  { %v9842_v1 = vadd.f32 %v11836_v61, %v9841_v59  ;;  %v9889_v28 = vmax.f32 %v9847_v12, 0.0 }
0x154c   :  { %v9888_v11 = vmax.f32 %v9842_v1, 0.0 }
0x154e   :  { %14236 = vmatprep.mubr.msk.f32.mxu0 %vm21471_vm10, %v9888_v11  ;;  %vm21486_vm10 = vmmov %vm21435_vm0 }
0x154f   :  { %v14209_v47 = vpop.f32.mrf.mxu1  ;;  %14237 = vmatmul.mubr.msk.f32.gmra.mxu0 %vm21472_vm12, %v9889_v28  ;;  %vm21487_vm12 = vmmov %vm21435_vm0 }
0x1550   :  { %v9857_v32 = vadd.f32 %v14209_v47, %v11836_v61 }
0x1551   :  { %v9851_v46 = vpop.f32.mrf.mxu1 }
0x1552   :  { %v9852_v25 = vadd.f32 %v11836_v61, %v9851_v46  ;;  %v9891_v37 = vmax.f32 %v9857_v32, 0.0 }
0x1554   :  { %v9890_v49 = vmax.f32 %v9852_v25, 0.0 }
0x1556   :  { %14239 = vmatprep.mubr.msk.f32.mxu0 %vm21473_vm11, %v9890_v49  ;;  %vm21488_vm11 = vmmov %vm21435_vm0 }
0x1557   :  { %v14212_v30 = vpop.f32.mrf.mxu1  ;;  %14240 = vmatmul.mubr.msk.f32.gmra.mxu0 %vm21474_vm9, %v9891_v37  ;;  %vm21489_vm9 = vmmov %vm21435_vm0 }
0x1558   :  { %v9867_v53 = vadd.f32 %v14212_v30, %v11836_v61 }
0x1559   :  { %v9861_v2 = vpop.f32.mrf.mxu1 }
0x155a   :  { %v9862_v51 = vadd.f32 %v11836_v61, %v9861_v2  ;;  %v9893_v6 = vmax.f32 %v9867_v53, 0.0 }
0x155c   :  { %v9892_v18 = vmax.f32 %v9862_v51, 0.0 }
0x155e   :  { %14242 = vmatprep.mubr.msk.f32.mxu0 %vm21475_vm13, %v9892_v18  ;;  %vm21490_vm13 = vmmov %vm21435_vm0 }
0x155f   :  { %v14215_v56 = vpop.f32.mrf.mxu1  ;;  %14243 = vmatmul.mubr.msk.f32.gmra.mxu0 %vm21476_vm15, %v9893_v6  ;;  %vm21491_vm15 = vmmov %vm21435_vm0 }
0x1560   :  { %v9877_v48 = vadd.f32 %v14215_v56, %v11836_v61 }
0x1561   :  { %v9871_v5 = vpop.f32.mrf.mxu1 }
0x1562   :  { %v9872_v8 = vadd.f32 %v11836_v61, %v9871_v5  ;;  %v9895_v43 = vmax.f32 %v9877_v48, 0.0 }
0x1564   :  { %v9894_v24 = vmax.f32 %v9872_v8, 0.0 }
0x1566   :  { %14245 = vmatprep.mubr.msk.f32.mxu0 %vm21477_vm3, %v9894_v24  ;;  %vm21492_vm3 = vmmov %vm21435_vm0 }
0x1567   :  { %14246 = vmatmul.mubr.msk.f32.gmra.mxu0 %vm21478_vm8, %v9895_v43  ;;  %vm21493_vm8 = vmmov %vm21435_vm0 }
0x15ef   :  { %v14226_v3 = vpop.f32.mrf.mxu0 }
0x15f0   :  { %v19951_v15 = vadd.f32 %v14226_v3, %v11853_v16 }
0x15f1   :  { %v10019_v45 = vpop.f32.mrf.mxu0 }
0x15f2   :  { %v19953_v34 = vadd.f32 %v11853_v16, %v10019_v45  ;;  %v10103_v50 = vsel %vm21479_vm2, %v19951_v15, 0.0  ;;  %vm21494_vm2 = vmmov %vm21435_vm0 }
0x15f3   :  { %10104 = vadd.xlane.f32.xlu0 %v10103_v50 }
0x15f4   :  { %v10100_v40 = vsel %vm21480_vm5, %v19953_v34, 0.0  ;;  %vm21495_vm5 = vmmov %vm21435_vm0 }
0x15f5   :  { %10101 = vadd.xlane.f32.xlu1 %v10100_v40 }
0x15f7   :  { %v14229_v63 = vpop.f32.mrf.mxu0 }
0x15f8   :  { %v19959_v33 = vadd.f32 %v14229_v63, %v11853_v16 }
0x15f9   :  { %v10029_v39 = vpop.f32.mrf.mxu0 }
0x15fa   :  { %v19961_v29 = vadd.f32 %v11853_v16, %v10029_v39  ;;  %v10109_v41 = vsel %vm21435_vm0, %v19959_v33, 0.0 }
0x15fb   :  { %10110 = vadd.xlane.f32.xlu0 %v10109_v41 }
0x15fc   :  { %v10106_v44 = vsel %vm21481_vm14, %v19961_v29, 0.0  ;;  %vm21496_vm14 = vmmov %vm21435_vm0 }
0x15fd   :  { %10107 = vadd.xlane.f32.xlu1 %v10106_v44 }
0x15ff   :  { %v14232_v42 = vpop.f32.mrf.mxu0 }
0x1600   :  { %v19967_v9 = vadd.f32 %v14232_v42, %v11853_v16 }
0x1601   :  { %v10039_v61 = vpop.f32.mrf.mxu0 }
0x1602   :  { %v19969_v20 = vadd.f32 %v11853_v16, %v10039_v61  ;;  %v10115_v55 = vsel %vm21482_vm7, %v19967_v9, 0.0  ;;  %vm21497_vm7 = vmmov %vm21435_vm0 }
0x1603   :  { %10116 = vadd.xlane.f32.xlu0 %v10115_v55 }
0x1604   :  { %v10112_v23 = vsel %vm21483_vm4, %v19969_v20, 0.0  ;;  %vm21498_vm4 = vmmov %vm21435_vm0 }
0x1605   :  { %10113 = vadd.xlane.f32.xlu1 %v10112_v23 }
0x1607   :  { %v14235_v58 = vpop.f32.mrf.mxu0 }
0x1608   :  { %v19975_v14 = vadd.f32 %v14235_v58, %v11853_v16 }
0x1609   :  { %v10049_v57 = vpop.f32.mrf.mxu0 }
0x160a   :  { %v19977_v52 = vadd.f32 %v11853_v16, %v10049_v57  ;;  %v10121_v26 = vsel %vm21484_vm1, %v19975_v14, 0.0  ;;  %vm21499_vm1 = vmmov %vm21435_vm0 }
0x160b   :  { %10122 = vadd.xlane.f32.xlu0 %v10121_v26 }
0x160c   :  { %v10118_v21 = vsel %vm21485_vm6, %v19977_v52, 0.0  ;;  %vm21500_vm6 = vmmov %vm21435_vm0 }
0x160d   :  { %10119 = vadd.xlane.f32.xlu1 %v10118_v21 }
0x160f   :  { %v14238_v19 = vpop.f32.mrf.mxu0 }
0x1610   :  { %v19983_v27 = vadd.f32 %v14238_v19, %v11853_v16 }
0x1611   :  { %v10059_v7 = vpop.f32.mrf.mxu0 }
0x1612   :  { %v19985_v62 = vadd.f32 %v11853_v16, %v10059_v7  ;;  %v10127_v17 = vsel %vm21486_vm10, %v19983_v27, 0.0  ;;  %vm21501_vm10 = vmmov %vm21435_vm0 }
0x1613   :  { %10128 = vadd.xlane.f32.xlu0 %v10127_v17 }
0x1614   :  { %v10124_v0 = vsel %vm21487_vm12, %v19985_v62, 0.0  ;;  %vm21502_vm12 = vmmov %vm21435_vm0 }
0x1615   :  { %10125 = vadd.xlane.f32.xlu1 %v10124_v0 }
0x1617   :  { %v14241_v54 = vpop.f32.mrf.mxu0 }
0x1618   :  { %v19991_v38 = vadd.f32 %v14241_v54, %v11853_v16 }
0x1619   :  { %v10069_v10 = vpop.f32.mrf.mxu0 }
0x161a   :  { %v19993_v4 = vadd.f32 %v11853_v16, %v10069_v10  ;;  %v10133_v60 = vsel %vm21488_vm11, %v19991_v38, 0.0  ;;  %vm21503_vm11 = vmmov %vm21435_vm0 }
0x161b   :  { %10134 = vadd.xlane.f32.xlu0 %v10133_v60 }
0x161c   :  { %v10130_v31 = vsel %vm21489_vm9, %v19993_v4, 0.0  ;;  %vm21504_vm9 = vmmov %vm21435_vm0 }
0x161d   :  { %10131 = vadd.xlane.f32.xlu1 %v10130_v31 }
0x161f   :  { %v14244_v13 = vpop.f32.mrf.mxu0 }
0x1620   :  { %v19999_v36 = vadd.f32 %v14244_v13, %v11853_v16 }
0x1621   :  { %v10079_v35 = vpop.f32.mrf.mxu0 }
0x1622   :  { %v20001_v22 = vadd.f32 %v11853_v16, %v10079_v35  ;;  %v10139_v12 = vsel %vm21490_vm13, %v19999_v36, 0.0  ;;  %v10367_v35 = vld [vmem:[%s20328_s7 + $0x2d8] sm:$0xff]  ;;  %vm21505_vm13 = vmmov %vm21435_vm0 }
0x1623   :  { %10140 = vadd.xlane.f32.xlu0 %v10139_v12  ;;  %14248 = vmatprep.subr.mxu1 %v10367_v35 }
0x1624   :  { %v10136_v59 = vsel %vm21491_vm15, %v20001_v22, 0.0  ;;  %14249 = vmatpush3.msra.mxu1 %v10367_v35  ;;  %vm21506_vm15 = vmmov %vm21435_vm0 }
0x1625   :  { %10137 = vadd.xlane.f32.xlu1 %v10136_v59 }
0x1627   :  { %v14247_v1 = vpop.f32.mrf.mxu0 }
0x1628   :  { %v20007_v11 = vadd.f32 %v14247_v1, %v11853_v16 }
0x1629   :  { %v10089_v28 = vpop.f32.mrf.mxu0 }
0x162a   :  { %v20009_v47 = vadd.f32 %v11853_v16, %v10089_v28  ;;  %v10145_v32 = vsel %vm21492_vm3, %v20007_v11, 0.0  ;;  %vm21507_vm3 = vmmov %vm21435_vm0 }
0x162b   :  { %10146 = vadd.xlane.f32.xlu0 %v10145_v32 }
0x162c   :  { %v10142_v46 = vsel %vm21493_vm8, %v20009_v47, 0.0  ;;  %vm21508_vm8 = vmmov %vm21435_vm0 }
0x162d   :  { %10143 = vadd.xlane.f32.xlu1 %v10142_v46  ;;  %v10365_v46 = vld [vmem:[%s20328_s7 + $0x2c8] sm:$0xff] }
0x167c   :  { %v10105_v25 = vpop.xlane.xlu0 %10104 }
0x167d   :  { %v10149_v49 = vmul.f32 0.03125, %v10105_v25 }
0x167e   :  { %v10102_v37 = vpop.xlane.xlu1 %10101 }
0x167f   :  { %v20016_v30 = vsub.f32 %v19951_v15, %v10149_v49  ;;  %v10148_v53 = vmul.f32 0.03125, %v10102_v37  ;;  %v10364_v37 = vld [vmem:[%s20328_s7 + $0x2c0] sm:$0xff] }
0x1681   :  { %v20019_v2 = vsub.f32 %v19953_v34, %v10148_v53  ;;  %v10181_v51 = vmul.f32 %v20016_v30, %v20016_v30 }
0x1683   :  { %v10199_v18 = vsel %vm21494_vm2, %v10181_v51, 0.0  ;;  %v10180_v6 = vmul.f32 %v20019_v2, %v20019_v2  ;;  %vm21511_vm2 = vmmov %vm21435_vm0 }
0x1684   :  { %v10111_v56 = vpop.xlane.xlu0 %10110  ;;  %10200 = vadd.xlane.f32.xlu0 %v10199_v18 }
0x1685   :  { %v10151_v48 = vmul.f32 0.03125, %v10111_v56  ;;  %v10196_v5 = vsel %vm21495_vm5, %v10180_v6, 0.0  ;;  %vm21512_vm5 = vmmov %vm21435_vm0 }
0x1686   :  { %10197 = vadd.xlane.f32.xlu1 %v10196_v5  ;;  %v10108_v8 = vpop.xlane.xlu1 %10107 }
0x1687   :  { %v20028_v24 = vsub.f32 %v19959_v33, %v10151_v48  ;;  %v10150_v43 = vmul.f32 0.03125, %v10108_v8 }
0x1689   :  { %v20031_v16 = vsub.f32 %v19961_v29, %v10150_v43  ;;  %v10183_v3 = vmul.f32 %v20028_v24, %v20028_v24 }
0x168b   :  { %v10205_v15 = vsel %vm21435_vm0, %v10183_v3, 0.0  ;;  %v10182_v45 = vmul.f32 %v20031_v16, %v20031_v16 }
0x168c   :  { %v10117_v34 = vpop.xlane.xlu0 %10116  ;;  %10206 = vadd.xlane.f32.xlu0 %v10205_v15 }
0x168d   :  { %v10153_v50 = vmul.f32 0.03125, %v10117_v34  ;;  %v10202_v40 = vsel %vm21496_vm14, %v10182_v45, 0.0  ;;  %vm21515_vm14 = vmmov %vm21435_vm0 }
0x168e   :  { %10203 = vadd.xlane.f32.xlu1 %v10202_v40  ;;  %v10114_v63 = vpop.xlane.xlu1 %10113 }
0x168f   :  { %v20040_v33 = vsub.f32 %v19967_v9, %v10153_v50  ;;  %v10152_v39 = vmul.f32 0.03125, %v10114_v63 }
0x1691   :  { %v20043_v29 = vsub.f32 %v19969_v20, %v10152_v39  ;;  %v10185_v41 = vmul.f32 %v20040_v33, %v20040_v33 }
0x1693   :  { %v10211_v44 = vsel %vm21497_vm7, %v10185_v41, 0.0  ;;  %v10184_v42 = vmul.f32 %v20043_v29, %v20043_v29  ;;  %vm21518_vm7 = vmmov %vm21435_vm0 }
0x1694   :  { %v10123_v61 = vpop.xlane.xlu0 %10122  ;;  %10212 = vadd.xlane.f32.xlu0 %v10211_v44 }
0x1695   :  { %v10155_v55 = vmul.f32 0.03125, %v10123_v61  ;;  %v10208_v23 = vsel %vm21498_vm4, %v10184_v42, 0.0  ;;  %vm21519_vm4 = vmmov %vm21435_vm0 }
0x1696   :  { %10209 = vadd.xlane.f32.xlu1 %v10208_v23  ;;  %v10120_v9 = vpop.xlane.xlu1 %10119 }
0x1697   :  { %v20052_v58 = vsub.f32 %v19975_v14, %v10155_v55  ;;  %v10154_v20 = vmul.f32 0.03125, %v10120_v9 }
0x1699   :  { %v20055_v57 = vsub.f32 %v19977_v52, %v10154_v20  ;;  %v10187_v26 = vmul.f32 %v20052_v58, %v20052_v58 }
0x169b   :  { %v10217_v21 = vsel %vm21499_vm1, %v10187_v26, 0.0  ;;  %v10186_v19 = vmul.f32 %v20055_v57, %v20055_v57  ;;  %vm21522_vm1 = vmmov %vm21435_vm0 }
0x169c   :  { %v10129_v7 = vpop.xlane.xlu0 %10128  ;;  %10218 = vadd.xlane.f32.xlu0 %v10217_v21 }
0x169d   :  { %v10157_v17 = vmul.f32 0.03125, %v10129_v7  ;;  %v10214_v0 = vsel %vm21500_vm6, %v10186_v19, 0.0  ;;  %vm21523_vm6 = vmmov %vm21435_vm0 }
0x169e   :  { %10215 = vadd.xlane.f32.xlu1 %v10214_v0  ;;  %v10126_v14 = vpop.xlane.xlu1 %10125 }
0x169f   :  { %v20064_v54 = vsub.f32 %v19983_v27, %v10157_v17  ;;  %v10156_v52 = vmul.f32 0.03125, %v10126_v14 }
0x16a1   :  { %v20067_v10 = vsub.f32 %v19985_v62, %v10156_v52  ;;  %v10189_v60 = vmul.f32 %v20064_v54, %v20064_v54  ;;  %v10366_v62 = vld [vmem:[%s20328_s7 + $0x2d0] sm:$0xff]  ;;  %v20126_v52 = vld [vmem:[%s20330_s8 + $0xe0] ss:$0 sm:$0xff] }
0x16a2   :  { %14250 = vmatprep.subr.mxu1 %v10366_v62 }
0x16a3   :  { %v10223_v31 = vsel %vm21501_vm10, %v10189_v60, 0.0  ;;  %v10188_v13 = vmul.f32 %v20067_v10, %v20067_v10  ;;  %14251 = vmatpush3.msra.mxu1 %v10366_v62  ;;  %vm21526_vm10 = vmmov %vm21435_vm0 }
0x16a4   :  { %v10135_v12 = vpop.xlane.xlu0 %10134  ;;  %10224 = vadd.xlane.f32.xlu0 %v10223_v31  ;;  %14252 = vmatprep.subr.mxu1 %v10365_v46 }
0x16a5   :  { %v10159_v27 = vmul.f32 0.03125, %v10135_v12  ;;  %v10220_v59 = vsel %vm21502_vm12, %v10188_v13, 0.0  ;;  %14253 = vmatpush3.msra.mxu1 %v10365_v46  ;;  %vm21527_vm12 = vmmov %vm21435_vm0 }
0x16a6   :  { %10221 = vadd.xlane.f32.xlu1 %v10220_v59  ;;  %v10132_v1 = vpop.xlane.xlu1 %10131  ;;  %14254 = vmatprep.subr.mxu1 %v10364_v37 }
0x16a7   :  { %v20082_v28 = vsub.f32 %v19991_v38, %v10159_v27  ;;  %v10158_v32 = vmul.f32 0.03125, %v10132_v1  ;;  %14255 = vmatpush3.msra.mxu1 %v10364_v37  ;;  %v20132_v27 = vld [vmem:[%s20330_s8 + $0xe8] ss:$0 sm:$0xff] }
0x16a9   :  { %v20088_v25 = vsub.f32 %v19993_v4, %v10158_v32  ;;  %v10191_v49 = vmul.f32 %v20082_v28, %v20082_v28 }
0x16ab   :  { %v10229_v38 = vsel %vm21503_vm11, %v10191_v49, 0.0  ;;  %v10190_v53 = vmul.f32 %v20088_v25, %v20088_v25  ;;  %vm21530_vm11 = vmmov %vm21435_vm0 }
0x16ac   :  { %v10141_v51 = vpop.xlane.xlu0 %10140  ;;  %10230 = vadd.xlane.f32.xlu0 %v10229_v38 }
0x16ad   :  { %v10161_v18 = vmul.f32 0.03125, %v10141_v51  ;;  %v10226_v4 = vsel %vm21504_vm9, %v10190_v53, 0.0  ;;  %vm21531_vm9 = vmmov %vm21435_vm0 }
0x16ae   :  { %10227 = vadd.xlane.f32.xlu1 %v10226_v4  ;;  %v10138_v6 = vpop.xlane.xlu1 %10137 }
0x16af   :  { %v20100_v56 = vsub.f32 %v19999_v36, %v10161_v18  ;;  %v10160_v48 = vmul.f32 0.03125, %v10138_v6  ;;  %v21509_v6 = vld [vmem:[#allocation2_spill] sm:$0xff] }
0x16b1   :  { %v20103_v5 = vsub.f32 %v20001_v22, %v10160_v48  ;;  %v10193_v8 = vmul.f32 %v20100_v56, %v20100_v56 }
0x16b3   :  { %v10235_v43 = vsel %vm21505_vm13, %v10193_v8, 0.0  ;;  %v10192_v3 = vmul.f32 %v20103_v5, %v20103_v5  ;;  %vm21534_vm13 = vmmov %vm21435_vm0 }
0x16b4   :  { %10236 = vadd.xlane.f32.xlu0 %v10235_v43  ;;  %v10147_v15 = vpop.xlane.xlu0 %10146  ;;  %v21510_v43 = vld [vmem:[#allocation3_spill] sm:$0xff] }
0x16b5   :  { %v10163_v45 = vmul.f32 0.03125, %v10147_v15  ;;  %v10232_v34 = vsel %vm21506_vm15, %v10192_v3, 0.0  ;;  %vm21535_vm15 = vmmov %vm21435_vm0 }
0x16b6   :  { %10233 = vadd.xlane.f32.xlu1 %v10232_v34  ;;  %v10144_v36 = vpop.xlane.xlu1 %10143 }
0x16b7   :  { %v20112_v50 = vsub.f32 %v20007_v11, %v10163_v45  ;;  %v10162_v22 = vmul.f32 0.03125, %v10144_v36 }
0x16b9   :  { %v20115_v40 = vsub.f32 %v20009_v47, %v10162_v22  ;;  %v10195_v63 = vmul.f32 %v20112_v50, %v20112_v50 }
0x16bb   :  { %v10241_v39 = vsel %vm21507_vm3, %v10195_v63, 0.0  ;;  %v10194_v41 = vmul.f32 %v20115_v40, %v20115_v40  ;;  %vm21538_vm3 = vmmov %vm21435_vm0 }
0x16bc   :  { %10242 = vadd.xlane.f32.xlu0 %v10241_v39 }
0x16bd   :  { %v10238_v44 = vsel %vm21508_vm8, %v10194_v41, 0.0  ;;  %vm21539_vm8 = vmmov %vm21435_vm0 }
0x16be   :  { %10239 = vadd.xlane.f32.xlu1 %v10238_v44 }
0x170d   :  { %v10201_v42 = vpop.xlane.xlu0 %10200 }
0x170e   :  { %v10245_v61 = vmul.f32 0.03125, %v10201_v42 }
0x170f   :  { %v10198_v11 = vpop.xlane.xlu1 %10197 }
0x1710   :  { %v10261_v55 = vadd.f32 1e-05, %v10245_v61  ;;  %v10244_v23 = vmul.f32 0.03125, %v10198_v11 }
0x1712   :  { %14604 = vrsqrt.f32 %v10261_v55  ;;  %v10260_v47 = vadd.f32 1e-05, %v10244_v23  ;;  %v21514_v23 = vld [vmem:[#allocation5_spill] sm:$0xff] }
0x1714   :  { %14606 = vrsqrt.f32 %v10260_v47 }
0x1715   :  { %v10207_v9 = vpop.xlane.xlu0 %10206 }
0x1716   :  { %v10247_v20 = vmul.f32 0.03125, %v10207_v9 }
0x1717   :  { %v10204_v26 = vpop.xlane.xlu1 %10203 }
0x1718   :  { %v10263_v21 = vadd.f32 1e-05, %v10247_v20  ;;  %v10246_v19 = vmul.f32 0.03125, %v10204_v26 }
0x171a   :  { %14608 = vrsqrt.f32 %v10263_v21  ;;  %v10262_v7 = vadd.f32 1e-05, %v10246_v19 }
0x171c   :  { %14610 = vrsqrt.f32 %v10262_v7 }
0x171d   :  { %v10213_v17 = vpop.xlane.xlu0 %10212 }
0x171e   :  { %v10249_v0 = vmul.f32 0.03125, %v10213_v17 }
0x171f   :  { %v14605_v14 = vpop.eup %14604  ;;  %v10210_v60 = vpop.xlane.xlu1 %10209 }
0x1720   :  { %v10293_v31 = vmul.f32 %v14605_v14, %v20016_v30  ;;  %v10265_v13 = vadd.f32 1e-05, %v10249_v0  ;;  %v10248_v35 = vmul.f32 0.03125, %v10210_v60 }
0x1721   :  { %v14607_v12 = vpop.eup %14606 }
0x1722   :  { %v10313_v59 = vmul.f32 %v20126_v52, %v10293_v31  ;;  %14612 = vrsqrt.f32 %v10265_v13  ;;  %v10264_v62 = vadd.f32 1e-05, %v10248_v35  ;;  %v10292_v1 = vmul.f32 %v14607_v12, %v20019_v2 }
0x1724   :  { %14614 = vrsqrt.f32 %v10264_v62  ;;  %v10312_v32 = vmul.f32 %v20126_v52, %v10292_v1  ;;  %v10333_v46 = vadd.f32 %v20132_v27, %v10313_v59  ;;  %v21517_v59 = vld [vmem:[#allocation8_spill] sm:$0xff] }
0x1725   :  { %v10219_v30 = vpop.xlane.xlu0 %10218 }
0x1726   :  { %v10251_v49 = vmul.f32 0.03125, %v10219_v30  ;;  %v10332_v37 = vadd.f32 %v20132_v27, %v10312_v32  ;;  %v10349_v2 = vadd.f32 %v10333_v46, %v21510_v43  ;;  %v21521_v43 = vld [vmem:[#allocation12_spill] sm:$0xff] }
0x1727   :  { %v14609_v38 = vpop.eup %14608  ;;  %v10216_v53 = vpop.xlane.xlu1 %10215 }
0x1728   :  { %v10295_v51 = vmul.f32 %v14609_v38, %v20028_v24  ;;  %v10267_v18 = vadd.f32 1e-05, %v10251_v49  ;;  %v10250_v4 = vmul.f32 0.03125, %v10216_v53  ;;  %v10348_v48 = vadd.f32 %v10332_v37, %v21509_v6 }
0x1729   :  { %v14611_v8 = vpop.eup %14610 }
0x172a   :  { %14616 = vrsqrt.f32 %v10267_v18  ;;  %v10266_v3 = vadd.f32 1e-05, %v10250_v4  ;;  %14256 = vmatprep.mubr.msk.f32.mxu1 %vm21511_vm2, %v10348_v48  ;;  %v10294_v15 = vmul.f32 %v14611_v8, %v20031_v16  ;;  %v10315_v45 = vmul.f32 %v20126_v52, %v10295_v51  ;;  %v21513_v16 = vld [vmem:[#allocation4_spill] sm:$0xff]  ;;  %vm21540_vm2 = vmmov %vm21435_vm0 }
0x172b   :  { %14257 = vmatmul.mubr.msk.f32.vlgmr.msra.gmra.mxu1 %vm21512_vm5, %v10349_v2  ;;  %vm21541_vm5 = vmmov %vm21435_vm0 }
0x172c   :  { %14618 = vrsqrt.f32 %v10266_v3  ;;  %v10314_v24 = vmul.f32 %v20126_v52, %v10294_v15  ;;  %v10335_v36 = vadd.f32 %v20132_v27, %v10315_v45 }
0x172d   :  { %v10225_v34 = vpop.xlane.xlu0 %10224 }
0x172e   :  { %v10253_v22 = vmul.f32 0.03125, %v10225_v34  ;;  %v10334_v63 = vadd.f32 %v20132_v27, %v10314_v24  ;;  %v10351_v47 = vadd.f32 %v10335_v36, %v21514_v23 }
0x172f   :  { %v14613_v39 = vpop.eup %14612  ;;  %v10222_v41 = vpop.xlane.xlu1 %10221 }
0x1730   :  { %v10297_v44 = vmul.f32 %v14613_v39, %v20040_v33  ;;  %v10269_v42 = vadd.f32 1e-05, %v10253_v22  ;;  %v10252_v61 = vmul.f32 0.03125, %v10222_v41  ;;  %v10350_v11 = vadd.f32 %v10334_v63, %v21513_v16 }
0x1731   :  { %v14615_v55 = vpop.eup %14614 }
0x1732   :  { %14620 = vrsqrt.f32 %v10269_v42  ;;  %v10268_v9 = vadd.f32 1e-05, %v10252_v61  ;;  %14259 = vmatprep.mubr.msk.f32.mxu1 %vm21435_vm0, %v10350_v11  ;;  %v10296_v20 = vmul.f32 %v14615_v55, %v20043_v29  ;;  %v10317_v26 = vmul.f32 %v20126_v52, %v10297_v44  ;;  %v21516_v29 = vld [vmem:[#allocation6_spill] sm:$0xff]  ;;  %v21525_v11 = vld [vmem:[#allocation16_spill] sm:$0xff] }
0x1733   :  { %14260 = vmatmul.mubr.msk.f32.gmra.mxu1 %vm21515_vm14, %v10351_v47  ;;  %vm21542_vm14 = vmmov %vm21435_vm0 }
0x1734   :  { %14622 = vrsqrt.f32 %v10268_v9  ;;  %v10316_v33 = vmul.f32 %v20126_v52, %v10296_v20  ;;  %v10337_v19 = vadd.f32 %v20132_v27, %v10317_v26 }
0x1735   :  { %v10231_v21 = vpop.xlane.xlu0 %10230 }
0x1736   :  { %v10255_v7 = vmul.f32 0.03125, %v10231_v21  ;;  %v10336_v17 = vadd.f32 %v20132_v27, %v10316_v33  ;;  %v10353_v62 = vadd.f32 %v10337_v19, %v21517_v59  ;;  %v21528_v19 = vld [vmem:[#allocation19_spill] sm:$0xff] }
0x1737   :  { %v14617_v0 = vpop.eup %14616  ;;  %v10228_v14 = vpop.xlane.xlu1 %10227 }
0x1738   :  { %v10299_v60 = vmul.f32 %v14617_v0, %v20052_v58  ;;  %v10271_v31 = vadd.f32 1e-05, %v10255_v7  ;;  %v10254_v13 = vmul.f32 0.03125, %v10228_v14  ;;  %v10352_v35 = vadd.f32 %v10336_v17, %v21516_v29  ;;  %v21529_v0 = vld [vmem:[#allocation20_spill] sm:$0xff] }
0x1739   :  { %v14619_v12 = vpop.eup %14618 }
0x173a   :  { %14624 = vrsqrt.f32 %v10271_v31  ;;  %v10270_v1 = vadd.f32 1e-05, %v10254_v13  ;;  %14262 = vmatprep.mubr.msk.f32.mxu1 %vm21518_vm7, %v10352_v35  ;;  %v10298_v32 = vmul.f32 %v14619_v12, %v20055_v57  ;;  %v10319_v46 = vmul.f32 %v20126_v52, %v10299_v60  ;;  %v21520_v57 = vld [vmem:[#allocation11_spill] sm:$0xff]  ;;  %vm21543_vm7 = vmmov %vm21435_vm0 }
0x173b   :  { %14263 = vmatmul.mubr.msk.f32.gmra.mxu1 %vm21519_vm4, %v10353_v62  ;;  %v21532_v12 = vld [vmem:[#allocation23_spill] sm:$0xff]  ;;  %vm21544_vm4 = vmmov %vm21435_vm0 }
0x173c   :  { %14626 = vrsqrt.f32 %v10270_v1  ;;  %v10318_v58 = vmul.f32 %v20126_v52, %v10298_v32  ;;  %v10339_v49 = vadd.f32 %v20132_v27, %v10319_v46  ;;  %v21533_v1 = vld [vmem:[#allocation24_spill] sm:$0xff] }
0x173d   :  { %v10237_v30 = vpop.xlane.xlu0 %10236 }
0x173e   :  { %v10257_v37 = vmul.f32 0.03125, %v10237_v30  ;;  %v10338_v38 = vadd.f32 %v20132_v27, %v10318_v58  ;;  %v10355_v2 = vadd.f32 %v10339_v49, %v21521_v43 }
0x173f   :  { %v14621_v53 = vpop.eup %14620  ;;  %v10234_v51 = vpop.xlane.xlu1 %10233 }
0x1740   :  { %v10301_v18 = vmul.f32 %v14621_v53, %v20064_v54  ;;  %v10273_v4 = vadd.f32 1e-05, %v10257_v37  ;;  %v10256_v6 = vmul.f32 0.03125, %v10234_v51  ;;  %v10354_v48 = vadd.f32 %v10338_v38, %v21520_v57  ;;  %v21537_v38 = vld [vmem:[#allocation28_spill] sm:$0xff]  ;;  %v10368_v51 = vld [vmem:[%s20328_s7 + $0x2e0] sm:$0xff] }
0x1741   :  { %v14623_v8 = vpop.eup %14622 }
0x1742   :  { %14628 = vrsqrt.f32 %v10273_v4  ;;  %v10272_v3 = vadd.f32 1e-05, %v10256_v6  ;;  %14265 = vmatprep.mubr.msk.f32.mxu1 %vm21522_vm1, %v10354_v48  ;;  %v10300_v15 = vmul.f32 %v14623_v8, %v20067_v10  ;;  %v10321_v45 = vmul.f32 %v20126_v52, %v10301_v18  ;;  %v21524_v10 = vld [vmem:[#allocation15_spill] sm:$0xff]  ;;  %v11872_v18 = vld [vmem:[%s20330_s8 + $0xf0] ss:$0 sm:$0xff]  ;;  %vm21545_vm1 = vmmov %vm21435_vm0 }
0x1743   :  { %14266 = vmatmul.mubr.msk.f32.gmra.mxu1 %vm21523_vm6, %v10355_v2  ;;  %vm21546_vm6 = vmmov %vm21435_vm0 }
0x1744   :  { %14630 = vrsqrt.f32 %v10272_v3  ;;  %v10320_v54 = vmul.f32 %v20126_v52, %v10300_v15  ;;  %v10341_v34 = vadd.f32 %v20132_v27, %v10321_v45 }
0x1745   :  { %v10243_v24 = vpop.xlane.xlu0 %10242 }
0x1746   :  { %v10259_v36 = vmul.f32 0.03125, %v10243_v24  ;;  %v10340_v22 = vadd.f32 %v20132_v27, %v10320_v54  ;;  %v10357_v55 = vadd.f32 %v10341_v34, %v21525_v11 }
0x1747   :  { %v14625_v63 = vpop.eup %14624  ;;  %v10240_v39 = vpop.xlane.xlu1 %10239 }
0x1748   :  { %v10303_v41 = vmul.f32 %v14625_v63, %v20082_v28  ;;  %v10275_v44 = vadd.f32 1e-05, %v10259_v36  ;;  %v10258_v42 = vmul.f32 0.03125, %v10240_v39  ;;  %v10356_v61 = vadd.f32 %v10340_v22, %v21524_v10 }
0x1749   :  { %v14627_v16 = vpop.eup %14626 }
0x174a   :  { %14632 = vrsqrt.f32 %v10275_v44  ;;  %v10274_v23 = vadd.f32 1e-05, %v10258_v42  ;;  %14268 = vmatprep.mubr.msk.f32.mxu1 %vm21526_vm10, %v10356_v61  ;;  %v10302_v47 = vmul.f32 %v14627_v16, %v20088_v25  ;;  %v10323_v9 = vmul.f32 %v20126_v52, %v10303_v41  ;;  %vm21547_vm10 = vmmov %vm21435_vm0 }
0x174b   :  { %14269 = vmatmul.mubr.msk.f32.gmra.mxu1 %vm21527_vm12, %v10357_v55  ;;  %vm21548_vm12 = vmmov %vm21435_vm0 }
0x174c   :  { %14634 = vrsqrt.f32 %v10274_v23  ;;  %v10322_v28 = vmul.f32 %v20126_v52, %v10302_v47  ;;  %v10343_v20 = vadd.f32 %v20132_v27, %v10323_v9 }
0x174e   :  { %v10342_v26 = vadd.f32 %v20132_v27, %v10322_v28  ;;  %v10359_v14 = vadd.f32 %v10343_v20, %v21529_v0 }
0x174f   :  { %v14629_v33 = vpop.eup %14628 }
0x1750   :  { %v10305_v21 = vmul.f32 %v14629_v33, %v20100_v56  ;;  %v10358_v7 = vadd.f32 %v10342_v26, %v21528_v19 }
0x1751   :  { %v14631_v17 = vpop.eup %14630 }
0x1752   :  { %14271 = vmatprep.mubr.msk.f32.mxu1 %vm21530_vm11, %v10358_v7  ;;  %v10304_v25 = vmul.f32 %v14631_v17, %v20103_v5  ;;  %v10325_v60 = vmul.f32 %v20126_v52, %v10305_v21  ;;  %vm21549_vm11 = vmmov %vm21435_vm0 }
0x1753   :  { %14272 = vmatmul.mubr.msk.f32.gmra.mxu1 %vm21531_vm9, %v10359_v14  ;;  %vm21550_vm9 = vmmov %vm21435_vm0 }
0x1754   :  { %v10324_v31 = vmul.f32 %v20126_v52, %v10304_v25  ;;  %v10345_v13 = vadd.f32 %v20132_v27, %v10325_v60 }
0x1756   :  { %v10344_v29 = vadd.f32 %v20132_v27, %v10324_v31  ;;  %v10361_v32 = vadd.f32 %v10345_v13, %v21533_v1  ;;  %v10803_v1 = vld [vmem:[%s20335_s9 + $0x18] sm:$0xff] }
0x1757   :  { %v14633_v56 = vpop.eup %14632  ;;  %14312 = vmatprep.subr.mxu1 %v10803_v1 }
0x1758   :  { %v10307_v35 = vmul.f32 %v14633_v56, %v20112_v50  ;;  %v10360_v59 = vadd.f32 %v10344_v29, %v21532_v12  ;;  %v21536_v50 = vld [vmem:[#allocation27_spill] sm:$0xff]  ;;  %14313 = vmatpush3.msra.mxu1 %v10803_v1 }
0x1759   :  { %v14635_v62 = vpop.eup %14634 }
0x175a   :  { %14274 = vmatprep.mubr.msk.f32.mxu1 %vm21534_vm13, %v10360_v59  ;;  %v10306_v5 = vmul.f32 %v14635_v62, %v20115_v40  ;;  %v10327_v46 = vmul.f32 %v20126_v52, %v10307_v35  ;;  %v10371_v40 = vld [vmem:[%s20328_s7 + $0x2f8] sm:$0xff]  ;;  %vm21551_vm13 = vmmov %vm21435_vm0 }
0x175b   :  { %14275 = vmatmul.mubr.msk.f32.gmra.mxu1 %vm21535_vm15, %v10361_v32  ;;  %14280 = vmatprep.subr.mxu0 %v10371_v40  ;;  %vm21552_vm15 = vmmov %vm21435_vm0  ;;  %v10802_v32 = vld [vmem:[%s20335_s9 + $0x10] sm:$0xff] }
0x175c   :  { %v10326_v58 = vmul.f32 %v20126_v52, %v10306_v5  ;;  %v10347_v30 = vadd.f32 %v20132_v27, %v10327_v46  ;;  %14281 = vmatpush3.msra.mxu0 %v10371_v40  ;;  %v10370_v52 = vld [vmem:[%s20328_s7 + $0x2f0] sm:$0xff]  ;;  %14314 = vmatprep.subr.mxu1 %v10802_v32  ;;  %v10801_v5 = vld [vmem:[%s20335_s9 + $0x8] sm:$0xff]  ;;  %v10800_v46 = vld [vmem:[%s20335_s9] sm:$0xff] }
0x175d   :  { %14282 = vmatprep.subr.mxu0 %v10370_v52  ;;  %14315 = vmatpush3.msra.mxu1 %v10802_v32 }
0x175e   :  { %v10346_v49 = vadd.f32 %v20132_v27, %v10326_v58  ;;  %v10363_v53 = vadd.f32 %v10347_v30, %v21537_v38  ;;  %14283 = vmatpush3.msra.mxu0 %v10370_v52  ;;  %v10369_v27 = vld [vmem:[%s20328_s7 + $0x2e8] sm:$0xff]  ;;  %14316 = vmatprep.subr.mxu1 %v10801_v5  ;;  %v11889_v58 = vld [vmem:[%s20330_s8 + $0xf8] ss:$0 sm:$0xff] }
0x175f   :  { %14284 = vmatprep.subr.mxu0 %v10369_v27  ;;  %14317 = vmatpush3.msra.mxu1 %v10801_v5 }
0x1760   :  { %v10362_v37 = vadd.f32 %v10346_v49, %v21536_v50  ;;  %14285 = vmatpush3.msra.mxu0 %v10369_v27  ;;  %14318 = vmatprep.subr.mxu1 %v10800_v46 }
0x1761   :  { %14286 = vmatprep.subr.mxu0 %v10368_v51  ;;  %14319 = vmatpush3.msra.mxu1 %v10800_v46 }
0x1762   :  { %14277 = vmatprep.mubr.msk.f32.mxu1 %vm21538_vm3, %v10362_v37  ;;  %14287 = vmatpush3.msra.mxu0 %v10368_v51  ;;  %vm21553_vm3 = vmmov %vm21435_vm0 }
0x1763   :  { %14278 = vmatmul.mubr.msk.f32.gmra.mxu1 %vm21539_vm8, %v10363_v53  ;;  %vm21554_vm8 = vmmov %vm21435_vm0 }
0x17eb   :  { %v14258_v4 = vpop.f32.mrf.mxu1 }
0x17ec   :  { %v10498_v6 = vadd.f32 %v14258_v4, %v11872_v18 }
0x17ed   :  { %v10492_v57 = vpop.f32.mrf.mxu1 }
0x17ee   :  { %v10493_v48 = vadd.f32 %v11872_v18, %v10492_v57  ;;  %v10572_v43 = vmax.f32 %v10498_v6, 0.0 }
0x17f0   :  { %v10571_v8 = vmax.f32 %v10493_v48, 0.0 }
0x17f2   :  { %14288 = vmatprep.mubr.msk.f32.mxu0 %vm21540_vm2, %v10571_v8  ;;  %vm21555_vm2 = vmmov %vm21435_vm0 }
0x17f3   :  { %v14261_v2 = vpop.f32.mrf.mxu1  ;;  %14289 = vmatmul.mubr.msk.f32.vlgmr.msra.gmra.mxu0 %vm21541_vm5, %v10572_v43  ;;  %vm21556_vm5 = vmmov %vm21435_vm0 }
0x17f4   :  { %v10508_v3 = vadd.f32 %v14261_v2, %v11872_v18 }
0x17f5   :  { %v10502_v15 = vpop.f32.mrf.mxu1 }
0x17f6   :  { %v10503_v45 = vadd.f32 %v11872_v18, %v10502_v15  ;;  %v10574_v24 = vmax.f32 %v10508_v3, 0.0 }
0x17f8   :  { %v10573_v54 = vmax.f32 %v10503_v45, 0.0 }
0x17fa   :  { %14291 = vmatprep.mubr.msk.f32.mxu0 %vm21435_vm0, %v10573_v54 }
0x17fb   :  { %v14264_v34 = vpop.f32.mrf.mxu1  ;;  %14292 = vmatmul.mubr.msk.f32.gmra.mxu0 %vm21542_vm14, %v10574_v24  ;;  %vm21557_vm14 = vmmov %vm21435_vm0 }
0x17fc   :  { %v10518_v36 = vadd.f32 %v14264_v34, %v11872_v18 }
0x17fd   :  { %v10512_v22 = vpop.f32.mrf.mxu1 }
0x17fe   :  { %v10513_v63 = vadd.f32 %v11872_v18, %v10512_v22  ;;  %v10576_v41 = vmax.f32 %v10518_v36, 0.0 }
0x1800   :  { %v10575_v39 = vmax.f32 %v10513_v63, 0.0 }
0x1802   :  { %14294 = vmatprep.mubr.msk.f32.mxu0 %vm21543_vm7, %v10575_v39  ;;  %vm21558_vm7 = vmmov %vm21435_vm0 }
0x1803   :  { %v14267_v44 = vpop.f32.mrf.mxu1  ;;  %14295 = vmatmul.mubr.msk.f32.gmra.mxu0 %vm21544_vm4, %v10576_v41  ;;  %vm21559_vm4 = vmmov %vm21435_vm0 }
0x1804   :  { %v10528_v42 = vadd.f32 %v14267_v44, %v11872_v18 }
0x1805   :  { %v10522_v10 = vpop.f32.mrf.mxu1 }
0x1806   :  { %v10523_v61 = vadd.f32 %v11872_v18, %v10522_v10  ;;  %v10578_v11 = vmax.f32 %v10528_v42, 0.0 }
0x1808   :  { %v10577_v16 = vmax.f32 %v10523_v61, 0.0 }
0x180a   :  { %14297 = vmatprep.mubr.msk.f32.mxu0 %vm21545_vm1, %v10577_v16  ;;  %vm21560_vm1 = vmmov %vm21435_vm0 }
0x180b   :  { %v14270_v55 = vpop.f32.mrf.mxu1  ;;  %14298 = vmatmul.mubr.msk.f32.gmra.mxu0 %vm21546_vm6, %v10578_v11  ;;  %vm21561_vm6 = vmmov %vm21435_vm0 }
0x180c   :  { %v10538_v23 = vadd.f32 %v14270_v55, %v11872_v18 }
0x180d   :  { %v10532_v47 = vpop.f32.mrf.mxu1 }
0x180e   :  { %v10533_v9 = vadd.f32 %v11872_v18, %v10532_v47  ;;  %v10580_v20 = vmax.f32 %v10538_v23, 0.0 }
0x1810   :  { %v10579_v28 = vmax.f32 %v10533_v9, 0.0 }
0x1812   :  { %14300 = vmatprep.mubr.msk.f32.mxu0 %vm21547_vm10, %v10579_v28  ;;  %vm21562_vm10 = vmmov %vm21435_vm0 }
0x1813   :  { %v14273_v26 = vpop.f32.mrf.mxu1  ;;  %14301 = vmatmul.mubr.msk.f32.gmra.mxu0 %vm21548_vm12, %v10580_v20  ;;  %vm21563_vm12 = vmmov %vm21435_vm0 }
0x1814   :  { %v10548_v33 = vadd.f32 %v14273_v26, %v11872_v18 }
0x1815   :  { %v10542_v21 = vpop.f32.mrf.mxu1 }
0x1816   :  { %v10543_v19 = vadd.f32 %v11872_v18, %v10542_v21  ;;  %v10582_v17 = vmax.f32 %v10548_v33, 0.0 }
0x1818   :  { %v10581_v7 = vmax.f32 %v10543_v19, 0.0 }
0x181a   :  { %14303 = vmatprep.mubr.msk.f32.mxu0 %vm21549_vm11, %v10581_v7  ;;  %vm21564_vm11 = vmmov %vm21435_vm0 }
0x181b   :  { %v14276_v0 = vpop.f32.mrf.mxu1  ;;  %14304 = vmatmul.mubr.msk.f32.gmra.mxu0 %vm21550_vm9, %v10582_v17  ;;  %vm21565_vm9 = vmmov %vm21435_vm0 }
0x181c   :  { %v10558_v14 = vadd.f32 %v14276_v0, %v11872_v18 }
0x181d   :  { %v10552_v25 = vpop.f32.mrf.mxu1 }
0x181e   :  { %v10553_v60 = vadd.f32 %v11872_v18, %v10552_v25  ;;  %v10584_v13 = vmax.f32 %v10558_v14, 0.0  ;;  %v11906_v14 = vld [vmem:[%s20336_s10] ss:$0 sm:$0xff] }
0x1820   :  { %v10583_v31 = vmax.f32 %v10553_v60, 0.0 }
0x1822   :  { %14306 = vmatprep.mubr.msk.f32.mxu0 %vm21551_vm13, %v10583_v31  ;;  %vm21566_vm13 = vmmov %vm21435_vm0 }
0x1823   :  { %v14279_v29 = vpop.f32.mrf.mxu1  ;;  %14307 = vmatmul.mubr.msk.f32.gmra.mxu0 %vm21552_vm15, %v10584_v13  ;;  %vm21567_vm15 = vmmov %vm21435_vm0 }
0x1824   :  { %v10568_v56 = vadd.f32 %v14279_v29, %v11872_v18 }
0x1825   :  { %v10562_v35 = vpop.f32.mrf.mxu1 }
0x1826   :  { %v10563_v12 = vadd.f32 %v11872_v18, %v10562_v35  ;;  %v10586_v62 = vmax.f32 %v10568_v56, 0.0 }
0x1828   :  { %v10585_v59 = vmax.f32 %v10563_v12, 0.0 }
0x182a   :  { %14309 = vmatprep.mubr.msk.f32.mxu0 %vm21553_vm3, %v10585_v59  ;;  %vm21568_vm3 = vmmov %vm21435_vm0 }
0x182b   :  { %14310 = vmatmul.mubr.msk.f32.gmra.mxu0 %vm21554_vm8, %v10586_v62  ;;  %vm21569_vm8 = vmmov %vm21435_vm0 }
0x18b3   :  { %v14290_v30 = vpop.f32.mrf.mxu0 }
0x18b4   :  { %v10711_v49 = vadd.f32 %v14290_v30, %v11889_v58 }
0x18b5   :  { %v10705_v50 = vpop.f32.mrf.mxu0 }
0x18b6   :  { %v10706_v37 = vadd.f32 %v11889_v58, %v10705_v50  ;;  %v10785_v53 = vmax.f32 %v10711_v49, 0.0 }
0x18b8   :  { %v10784_v38 = vmax.f32 %v10706_v37, 0.0 }
0x18ba   :  { %14320 = vmatprep.mubr.msk.f32.mxu1 %vm21555_vm2, %v10784_v38 }
0x18bb   :  { %v14293_v40 = vpop.f32.mrf.mxu0  ;;  %14321 = vmatmul.mubr.msk.f32.vlgmr.msra.gmra.mxu1 %vm21556_vm5, %v10785_v53 }
0x18bc   :  { %v10721_v52 = vadd.f32 %v14293_v40, %v11889_v58 }
0x18bd   :  { %v10715_v27 = vpop.f32.mrf.mxu0 }
0x18be   :  { %v10716_v51 = vadd.f32 %v11889_v58, %v10715_v27  ;;  %v10787_v4 = vmax.f32 %v10721_v52, 0.0 }
0x18c0   :  { %v10786_v18 = vmax.f32 %v10716_v51, 0.0 }
0x18c2   :  { %14323 = vmatprep.mubr.msk.f32.mxu1 %vm21435_vm0, %v10786_v18 }
0x18c3   :  { %v14296_v6 = vpop.f32.mrf.mxu0  ;;  %14324 = vmatmul.mubr.msk.f32.gmra.mxu1 %vm21557_vm14, %v10787_v4 }
0x18c4   :  { %v10731_v57 = vadd.f32 %v14296_v6, %v11889_v58 }
0x18c5   :  { %v10725_v48 = vpop.f32.mrf.mxu0 }
0x18c6   :  { %v10726_v8 = vadd.f32 %v11889_v58, %v10725_v48  ;;  %v10789_v2 = vmax.f32 %v10731_v57, 0.0 }
0x18c8   :  { %v10788_v43 = vmax.f32 %v10726_v8, 0.0 }
0x18ca   :  { %14326 = vmatprep.mubr.msk.f32.mxu1 %vm21558_vm7, %v10788_v43 }
0x18cb   :  { %v14299_v3 = vpop.f32.mrf.mxu0  ;;  %14327 = vmatmul.mubr.msk.f32.gmra.mxu1 %vm21559_vm4, %v10789_v2 }
0x18cc   :  { %v10741_v15 = vadd.f32 %v14299_v3, %v11889_v58 }
0x18cd   :  { %v10735_v45 = vpop.f32.mrf.mxu0 }
0x18ce   :  { %v10736_v54 = vadd.f32 %v11889_v58, %v10735_v45  ;;  %v10791_v34 = vmax.f32 %v10741_v15, 0.0 }
0x18d0   :  { %v10790_v24 = vmax.f32 %v10736_v54, 0.0 }
0x18d2   :  { %14329 = vmatprep.mubr.msk.f32.mxu1 %vm21560_vm1, %v10790_v24 }
0x18d3   :  { %v14302_v36 = vpop.f32.mrf.mxu0  ;;  %14330 = vmatmul.mubr.msk.f32.gmra.mxu1 %vm21561_vm6, %v10791_v34 }
0x18d4   :  { %v10751_v22 = vadd.f32 %v14302_v36, %v11889_v58 }
0x18d5   :  { %v10745_v63 = vpop.f32.mrf.mxu0 }
0x18d6   :  { %v10746_v39 = vadd.f32 %v11889_v58, %v10745_v63  ;;  %v10793_v44 = vmax.f32 %v10751_v22, 0.0 }
0x18d8   :  { %v10792_v41 = vmax.f32 %v10746_v39, 0.0 }
0x18da   :  { %14332 = vmatprep.mubr.msk.f32.mxu1 %vm21562_vm10, %v10792_v41 }
0x18db   :  { %v14305_v42 = vpop.f32.mrf.mxu0  ;;  %14333 = vmatmul.mubr.msk.f32.gmra.mxu1 %vm21563_vm12, %v10793_v44 }
0x18dc   :  { %v10761_v10 = vadd.f32 %v14305_v42, %v11889_v58 }
0x18dd   :  { %v10755_v61 = vpop.f32.mrf.mxu0 }
0x18de   :  { %v10756_v16 = vadd.f32 %v11889_v58, %v10755_v61  ;;  %v10795_v55 = vmax.f32 %v10761_v10, 0.0 }
0x18e0   :  { %v10794_v11 = vmax.f32 %v10756_v16, 0.0 }
0x18e2   :  { %14335 = vmatprep.mubr.msk.f32.mxu1 %vm21564_vm11, %v10794_v11 }
0x18e3   :  { %v14308_v23 = vpop.f32.mrf.mxu0  ;;  %14336 = vmatmul.mubr.msk.f32.gmra.mxu1 %vm21565_vm9, %v10795_v55 }
0x18e4   :  { %v10771_v47 = vadd.f32 %v14308_v23, %v11889_v58 }
0x18e5   :  { %v10765_v9 = vpop.f32.mrf.mxu0 }
0x18e6   :  { %v10766_v28 = vadd.f32 %v11889_v58, %v10765_v9  ;;  %v10797_v26 = vmax.f32 %v10771_v47, 0.0 }
0x18e8   :  { %v10796_v20 = vmax.f32 %v10766_v28, 0.0 }
0x18ea   :  { %14338 = vmatprep.mubr.msk.f32.mxu1 %vm21566_vm13, %v10796_v20 }
0x18eb   :  { %v14311_v33 = vpop.f32.mrf.mxu0  ;;  %14339 = vmatmul.mubr.msk.f32.gmra.mxu1 %vm21567_vm15, %v10797_v26 }
0x18ec   :  { %v10781_v21 = vadd.f32 %v14311_v33, %v11889_v58 }
0x18ed   :  { %v10775_v19 = vpop.f32.mrf.mxu0 }
0x18ee   :  { %v10776_v7 = vadd.f32 %v11889_v58, %v10775_v19  ;;  %v10799_v0 = vmax.f32 %v10781_v21, 0.0 }
0x18f0   :  { %v10798_v17 = vmax.f32 %v10776_v7, 0.0 }
0x18f2   :  { %14341 = vmatprep.mubr.msk.f32.mxu1 %vm21568_vm3, %v10798_v17 }
0x18f3   :  { %14342 = vmatmul.mubr.msk.f32.gmra.mxu1 %vm21569_vm8, %v10799_v0 }
0x197b   :  { %v14322_v25 = vpop.f32.mrf.mxu1 }
0x197c   :  { %v10931_v60 = vadd.f32 %v14322_v25, %v11906_v14 }
0x197d   :  { %v10925_v31 = vpop.f32.mrf.mxu1 }
0x197e   :  { %11005 = vst [vmem:[%s20337_s11 + $0x8] sm:$0xff] %v10931_v60  ;;  %v10926_v13 = vadd.f32 %v11906_v14, %v10925_v31 }
0x1980   :  { %11004 = vst [vmem:[%s20337_s11] sm:$0xff] %v10926_v13 }
0x1983   :  { %v14325_v29 = vpop.f32.mrf.mxu1 }
0x1984   :  { %v10941_v56 = vadd.f32 %v14325_v29, %v11906_v14 }
0x1985   :  { %v10935_v35 = vpop.f32.mrf.mxu1 }
0x1986   :  { %11007 = vst [vmem:[%s20337_s11 + $0x18] sm:$0xff] %v10941_v56  ;;  %v10936_v12 = vadd.f32 %v11906_v14, %v10935_v35 }
0x1988   :  { %11006 = vst [vmem:[%s20337_s11 + $0x10] sm:$0xff] %v10936_v12 }
0x198b   :  { %v14328_v59 = vpop.f32.mrf.mxu1 }
0x198c   :  { %v10951_v62 = vadd.f32 %v14328_v59, %v11906_v14 }
0x198d   :  { %v10945_v1 = vpop.f32.mrf.mxu1 }
0x198e   :  { %11009 = vst [vmem:[%s20337_s11 + $0x28] sm:$0xff] %v10951_v62  ;;  %v10946_v32 = vadd.f32 %v11906_v14, %v10945_v1 }
0x1990   :  { %11008 = vst [vmem:[%s20337_s11 + $0x20] sm:$0xff] %v10946_v32 }
0x1993   :  { %v14331_v5 = vpop.f32.mrf.mxu1 }
0x1994   :  { %v10961_v46 = vadd.f32 %v14331_v5, %v11906_v14 }
0x1995   :  { %v10955_v58 = vpop.f32.mrf.mxu1 }
0x1996   :  { %11011 = vst [vmem:[%s20337_s11 + $0x38] sm:$0xff] %v10961_v46  ;;  %v10956_v30 = vadd.f32 %v11906_v14, %v10955_v58 }
0x1998   :  { %11010 = vst [vmem:[%s20337_s11 + $0x30] sm:$0xff] %v10956_v30 }
0x199b   :  { %v14334_v49 = vpop.f32.mrf.mxu1 }
0x199c   :  { %v10971_v50 = vadd.f32 %v14334_v49, %v11906_v14 }
0x199d   :  { %v10965_v37 = vpop.f32.mrf.mxu1 }
0x199e   :  { %11013 = vst [vmem:[%s20337_s11 + $0x48] sm:$0xff] %v10971_v50  ;;  %v10966_v38 = vadd.f32 %v11906_v14, %v10965_v37 }
0x19a0   :  { %11012 = vst [vmem:[%s20337_s11 + $0x40] sm:$0xff] %v10966_v38 }
0x19a3   :  { %v14337_v53 = vpop.f32.mrf.mxu1 }
0x19a4   :  { %v10981_v40 = vadd.f32 %v14337_v53, %v11906_v14 }
0x19a5   :  { %v10975_v52 = vpop.f32.mrf.mxu1 }
0x19a6   :  { %11015 = vst [vmem:[%s20337_s11 + $0x58] sm:$0xff] %v10981_v40  ;;  %v10976_v27 = vadd.f32 %v11906_v14, %v10975_v52 }
0x19a8   :  { %11014 = vst [vmem:[%s20337_s11 + $0x50] sm:$0xff] %v10976_v27 }
0x19ab   :  { %v14340_v51 = vpop.f32.mrf.mxu1 }
0x19ac   :  { %v10991_v18 = vadd.f32 %v14340_v51, %v11906_v14 }
0x19ad   :  { %v10985_v4 = vpop.f32.mrf.mxu1 }
0x19ae   :  { %11017 = vst [vmem:[%s20337_s11 + $0x68] sm:$0xff] %v10991_v18  ;;  %v10986_v6 = vadd.f32 %v11906_v14, %v10985_v4 }
0x19b0   :  { %11016 = vst [vmem:[%s20337_s11 + $0x60] sm:$0xff] %v10986_v6 }
0x19b3   :  { %v14343_v57 = vpop.f32.mrf.mxu1 }
0x19b4   :  { %v11001_v48 = vadd.f32 %v14343_v57, %v11906_v14 }
0x19b5   :  { %v10995_v8 = vpop.f32.mrf.mxu1 }
0x19b6   :  { %11019 = vst [vmem:[%s20337_s11 + $0x78] sm:$0xff] %v11001_v48  ;;  %v10996_v43 = vadd.f32 %v11906_v14, %v10995_v8 }
0x19b8   :  { %11018 = vst [vmem:[%s20337_s11 + $0x70] sm:$0xff] %v10996_v43 }

</bundles_post_ra>
